<compile_context>
chip_gen: v6e
topology: v6e:2x2x1
jax: 0.10.0
libtpu: 0.0.40
codegen_flags: <defaults>
</compile_context>

<pallas_src>
import functools

import jax
import jax.numpy as jnp
from jax.experimental import pallas as pl
from jax.experimental.pallas import tpu as pltpu


_BN_EPS = 1e-5
_VMEM_LIMIT = 40 * 1024 * 1024  # headroom under v7x's 64 MiB physical VMEM


def _round_up(x, m):
    return ((x + m - 1) // m) * m


def _pick_tm(m, cap=512):
    """Row tile: multiple of 8, <= cap; prefers an exact divisor of m (no row
    padding / output slice) and >= 2 grid steps (v7x has 2 TensorCores)."""
    target = min(cap, max(8, _round_up((m + 1) // 2, 8)))
    best = 0
    d = 8
    while d <= min(cap, m):
        if m % d == 0 and d <= target:
            best = d
        d += 8
    if best:
        return best
    return min(cap, max(16, _round_up((m + 1) // 2, 16)))


# ---------------------------------------------------------------------------
# Pallas kernels
# ---------------------------------------------------------------------------

def _mm_kernel(a_ref, b_ref, s_ref, c_ref, o_ref, *, relu):
    """o = act((a @ b) * s + c); s, c broadcast over rows; bf16 store."""
    acc = jnp.dot(a_ref[...], b_ref[...], preferred_element_type=jnp.float32)
    y = acc * s_ref[...] + c_ref[...]
    if relu:
        y = jnp.maximum(y, 0.0)
    o_ref[...] = y.astype(o_ref.dtype)


def _mm_res_kernel(a_ref, b_ref, s_ref, c_ref, r_ref, o_ref, *, relu):
    """o = act((a @ b) * s + c + residual) — residual add fused in epilogue."""
    acc = jnp.dot(a_ref[...], b_ref[...], preferred_element_type=jnp.float32)
    y = acc * s_ref[...] + c_ref[...] + r_ref[...].astype(jnp.float32)
    if relu:
        y = jnp.maximum(y, 0.0)
    o_ref[...] = y.astype(o_ref.dtype)


def _mm_dual_kernel(a_ref, b1_ref, s1_ref, c1_ref, bd_ref, sd_ref, cd_ref,
                    o1_ref, od_ref, *, center_lo, center_hi):
    """conv1 (3x3, BN, ReLU) and the 1x1 downsample (BN) from one A tile.

    The 1x1 stride-s input is exactly the centre-tap column slice of conv1's
    3x3 im2col A, so A is read from HBM once and two outputs are produced.
    """
    a = a_ref[...]
    acc1 = jnp.dot(a, b1_ref[...], preferred_element_type=jnp.float32)
    y1 = jnp.maximum(acc1 * s1_ref[...] + c1_ref[...], 0.0)
    o1_ref[...] = y1.astype(o1_ref.dtype)
    accd = jnp.dot(a[:, center_lo:center_hi], bd_ref[...],
                   preferred_element_type=jnp.float32)
    od_ref[...] = (accd * sd_ref[...] + cd_ref[...]).astype(od_ref.dtype)


def _max3_kernel(a_ref, b_ref, c_ref, o_ref):
    o_ref[...] = jnp.maximum(jnp.maximum(a_ref[...], b_ref[...]), c_ref[...])


def _gap_mlp_kernel(x_ref, w1_ref, s1_ref, c1_ref, w2_ref, c2_ref, o_ref, *,
                    inv_hw):
    """Global-average-pool over HW + Linear -> BN(folded) -> ReLU -> Linear."""
    feat = jnp.sum(x_ref[...].astype(jnp.float32), axis=1) * inv_hw
    h = jnp.dot(feat.astype(jnp.bfloat16), w1_ref[...],
                preferred_element_type=jnp.float32)
    h = jnp.maximum(h * s1_ref[...] + c1_ref[...], 0.0)
    o_ref[...] = jnp.dot(h.astype(jnp.bfloat16), w2_ref[...],
                         preferred_element_type=jnp.float32) + c2_ref[...]


# ---------------------------------------------------------------------------
# Pallas wrappers
# ---------------------------------------------------------------------------

def matmul_scale_bias(a, b, scale, bias, relu, residual=None):
    """relu_opt((a @ b) * scale + bias [+ residual]) with bf16 output.

    `b`, `scale`, `bias` (and `residual`) already have 128-aligned columns;
    K is zero-padded to a multiple of 128 here for lane-dense loads.
    """
    m, k = a.shape
    _, n = b.shape                      # n is already a multiple of 128
    kp = _round_up(k, 128)
    tm = _pick_tm(m, cap=512)
    mp = _round_up(m, tm)

    a_p = a.astype(jnp.bfloat16)
    if (mp, kp) != (m, k):
        a_p = jnp.pad(a_p, ((0, mp - m), (0, kp - k)))
    b_p = b if kp == k else jnp.pad(b, ((0, kp - k), (0, 0)))
    s_p = scale.reshape(1, n).astype(jnp.float32)
    c_p = bias.reshape(1, n).astype(jnp.float32)

    ins = [a_p, b_p, s_p, c_p]
    in_specs = [
        pl.BlockSpec((tm, kp), lambda i: (i, 0)),
        pl.BlockSpec((kp, n), lambda i: (0, 0)),
        pl.BlockSpec((1, n), lambda i: (0, 0)),
        pl.BlockSpec((1, n), lambda i: (0, 0)),
    ]
    if residual is None:
        kernel = functools.partial(_mm_kernel, relu=relu)
    else:
        r_p = residual.astype(jnp.bfloat16)
        if mp != m:
            r_p = jnp.pad(r_p, ((0, mp - m), (0, 0)))
        ins.append(r_p)
        in_specs.append(pl.BlockSpec((tm, n), lambda i: (i, 0)))
        kernel = functools.partial(_mm_res_kernel, relu=relu)

    out = pl.pallas_call(
        kernel,
        out_shape=jax.ShapeDtypeStruct((mp, n), jnp.bfloat16),
        grid=(mp // tm,),
        in_specs=in_specs,
        out_specs=pl.BlockSpec((tm, n), lambda i: (i, 0)),
        compiler_params=pltpu.CompilerParams(
            dimension_semantics=("parallel",),
            vmem_limit_bytes=_VMEM_LIMIT),
    )(*ins)
    return out if mp == m else out[:m]


def _max3(a, b, c):
    """Elementwise max of three (M, C) bf16 arrays, lane-dense, tiled rows."""
    m, ch = a.shape
    tm = _pick_tm(m, cap=1024)
    mp = _round_up(m, tm)
    if mp != m:
        pads = ((0, mp - m), (0, 0))
        a, b, c = jnp.pad(a, pads), jnp.pad(b, pads), jnp.pad(c, pads)
    out = pl.pallas_call(
        _max3_kernel,
        out_shape=jax.ShapeDtypeStruct((mp, ch), a.dtype),
        grid=(mp // tm,),
        in_specs=[pl.BlockSpec((tm, ch), lambda i: (i, 0))] * 3,
        out_specs=pl.BlockSpec((tm, ch), lambda i: (i, 0)),
        compiler_params=pltpu.CompilerParams(
            dimension_semantics=("parallel",),
            vmem_limit_bytes=_VMEM_LIMIT),
    )(a, b, c)
    return out if mp == m else out[:m]


def maxpool_3x3_s2_p1(x):
    # x: (N, H, W, Cpad) bf16 NHWC.  Separable max: 3-tap over W, then over H.
    n, h, w, c = x.shape
    xp = jnp.pad(x, ((0, 0), (1, 1), (1, 1), (0, 0)),
                 constant_values=-jnp.inf)
    oh = (h + 2 - 3) // 2 + 1
    ow = (w + 2 - 3) // 2 + 1
    # W pass
    taps = [xp[:, :, j:j + 2 * ow:2, :].reshape(n * (h + 2) * ow, c)
            for j in range(3)]
    m1 = _max3(*taps).reshape(n, h + 2, ow, c)
    # H pass
    taps = [m1[:, i:i + 2 * oh:2, :, :].reshape(n * oh * ow, c)
            for i in range(3)]
    return _max3(*taps).reshape(n, oh, ow, c)


# ---------------------------------------------------------------------------
# Model glue (im2col conv, BN folding, ResNet blocks, fused GAP + MLP head)
# ---------------------------------------------------------------------------

def _fold_bn(bn, n_pad):
    s = bn["gamma"] / jnp.sqrt(bn["var"] + _BN_EPS)
    b = bn["beta"] - bn["mean"] * s
    c = s.shape[0]
    if n_pad > c:
        s = jnp.pad(s, (0, n_pad - c))
        b = jnp.pad(b, (0, n_pad - c))
    return s.astype(jnp.float32), b.astype(jnp.float32)


def _weight_matrix(w, c_store, cout_pad):
    # w: PyTorch layout (Cout, Cin, KH, KW) -> (KH*KW*c_store, cout_pad) bf16;
    # zero rows for padded input channels, zero columns for padded outputs.
    cout, cin, kh, kw = w.shape
    wm = jnp.transpose(w, (2, 3, 1, 0))                 # (kh, kw, cin, cout)
    wm = jnp.pad(wm, ((0, 0), (0, 0), (0, c_store - cin), (0, cout_pad - cout)))
    return wm.reshape(kh * kw * c_store, cout_pad).astype(jnp.bfloat16)


def _im2col(x, kh, kw, stride, pad):
    # x: (N, H, W, C) -> patches (N*OH*OW, KH*KW*C), patch order (kh, kw, c)
    if pad:
        x = jnp.pad(x, ((0, 0), (pad, pad), (pad, pad), (0, 0)))
    n, h, w, c = x.shape
    oh = (h - kh) // stride + 1
    ow = (w - kw) // stride + 1
    taps = [x[:, i:i + stride * oh:stride, j:j + stride * ow:stride, :]
            for i in range(kh) for j in range(kw)]
    p = jnp.concatenate(taps, axis=-1)                  # (N, OH, OW, KH*KW*C)
    return p.reshape(n * oh * ow, kh * kw * c), (n, oh, ow)


def conv_bn(x, w, bn, stride, pad, relu, residual=None):
    # x: bf16 NHWC (channels possibly already 128-padded); w: (Cout,Cin,KH,KW)
    cout = w.shape[0]
    cout_pad = _round_up(cout, 128)
    c_store = x.shape[-1]
    kh, kw = w.shape[2], w.shape[3]
    patches, (n, oh, ow) = _im2col(x, kh, kw, stride, pad)
    wm = _weight_matrix(w, c_store, cout_pad)
    s, b = _fold_bn(bn, cout_pad)
    r2 = None
    if residual is not None:
        r2 = residual.reshape(n * oh * ow, cout_pad)
    y = matmul_scale_bias(patches, wm, s, b, relu, residual=r2)
    return y.reshape(n, oh, ow, cout_pad)


def conv_bn_dual(x, w1, bn1, wd, bnd, stride):
    """conv1 (3x3, BN, ReLU) and fused 1x1-stride-s downsample (BN) outputs."""
    cout = w1.shape[0]
    cout_pad = _round_up(cout, 128)
    c_store = x.shape[-1]                 # multiple of 128 for block inputs
    patches, (n, oh, ow) = _im2col(x, 3, 3, stride, 1)
    m, k = patches.shape                  # k = 9 * c_store (already 128-aligned)

    b1 = _weight_matrix(w1, c_store, cout_pad)
    bd = _weight_matrix(wd, c_store, cout_pad)          # (c_store, cout_pad)
    s1, c1 = _fold_bn(bn1, cout_pad)
    sd, cd = _fold_bn(bnd, cout_pad)

    tm = _pick_tm(m, cap=512)
    mp = _round_up(m, tm)
    a_p = patches if mp == m else jnp.pad(patches, ((0, mp - m), (0, 0)))

    center_lo = 4 * c_store               # 3x3 centre tap (i=1, j=1)
    kernel = functools.partial(_mm_dual_kernel,
                               center_lo=center_lo,
                               center_hi=center_lo + c_store)

    out1, outd = pl.pallas_call(
        kernel,
        out_shape=(jax.ShapeDtypeStruct((mp, cout_pad), jnp.bfloat16),
                   jax.ShapeDtypeStruct((mp, cout_pad), jnp.bfloat16)),
        grid=(mp // tm,),
        in_specs=[pl.BlockSpec((tm, k), lambda i: (i, 0)),
                  pl.BlockSpec((k, cout_pad), lambda i: (0, 0)),
                  pl.BlockSpec((1, cout_pad), lambda i: (0, 0)),
                  pl.BlockSpec((1, cout_pad), lambda i: (0, 0)),
                  pl.BlockSpec((c_store, cout_pad), lambda i: (0, 0)),
                  pl.BlockSpec((1, cout_pad), lambda i: (0, 0)),
                  pl.BlockSpec((1, cout_pad), lambda i: (0, 0))],
        out_specs=(pl.BlockSpec((tm, cout_pad), lambda i: (i, 0)),
                   pl.BlockSpec((tm, cout_pad), lambda i: (i, 0))),
        compiler_params=pltpu.CompilerParams(
            dimension_semantics=("parallel",),
            vmem_limit_bytes=_VMEM_LIMIT),
    )(a_p, b1, s1.reshape(1, -1), c1.reshape(1, -1),
      bd, sd.reshape(1, -1), cd.reshape(1, -1))
    if mp != m:
        out1, outd = out1[:m], outd[:m]
    return (out1.reshape(n, oh, ow, cout_pad),
            outd.reshape(n, oh, ow, cout_pad))


def basic_block(x, p, stride):
    if "down_w" in p:
        out, identity = conv_bn_dual(x, p["conv1_w"], p["bn1"],
                                     p["down_w"], p["down_bn"], stride)
    else:
        identity = x
        out = conv_bn(x, p["conv1_w"], p["bn1"], stride, 1, relu=True)
    # residual add + ReLU fused into conv2's matmul epilogue
    return conv_bn(out, p["conv2_w"], p["bn2"], 1, 1, relu=True,
                   residual=identity)


def mlphead_with_gap(x, fc):
    """GAP over HW + Linear -> BatchNorm1d(folded) -> ReLU -> Linear, fused."""
    n, oh, ow, cpad = x.shape
    hw = oh * ow
    hwp = _round_up(hw, 8)
    np_ = _round_up(n, 8)
    x3 = x.reshape(n, hw, cpad)
    if (np_, hwp) != (n, hw):
        x3 = jnp.pad(x3, ((0, np_ - n), (0, hwp - hw), (0, 0)))

    hidden, cf = fc["w1"].shape
    proj = fc["w2"].shape[0]
    hp = _round_up(hidden, 128)
    pp = _round_up(proj, 128)

    s, b = _fold_bn(fc["bn"], hidden)
    bias1 = fc["b1"] * s + b
    w1 = jnp.pad(fc["w1"].T.astype(jnp.bfloat16),
                 ((0, cpad - cf), (0, hp - hidden)))
    s1 = jnp.pad(s.reshape(1, hidden), ((0, 0), (0, hp - hidden)))
    c1 = jnp.pad(bias1.reshape(1, hidden), ((0, 0), (0, hp - hidden)))
    w2 = jnp.pad(fc["w2"].T.astype(jnp.bfloat16),
                 ((0, hp - hidden), (0, pp - proj)))
    c2 = jnp.pad(fc["b2"].reshape(1, proj).astype(jnp.float32),
                 ((0, 0), (0, pp - proj)))

    out = pl.pallas_call(
        functools.partial(_gap_mlp_kernel, inv_hw=1.0 / hw),
        out_shape=jax.ShapeDtypeStruct((np_, pp), jnp.float32),
        grid=(1,),
        in_specs=[pl.BlockSpec((np_, hwp, cpad), lambda i: (0, 0, 0)),
                  pl.BlockSpec((cpad, hp), lambda i: (0, 0)),
                  pl.BlockSpec((1, hp), lambda i: (0, 0)),
                  pl.BlockSpec((1, hp), lambda i: (0, 0)),
                  pl.BlockSpec((hp, pp), lambda i: (0, 0)),
                  pl.BlockSpec((1, pp), lambda i: (0, 0))],
        out_specs=pl.BlockSpec((np_, pp), lambda i: (0, 0)),
        compiler_params=pltpu.CompilerParams(vmem_limit_bytes=_VMEM_LIMIT),
    )(x3, w1, s1, c1, w2, c2)
    return out[:n, :proj]


def byol_forward(params, x_nchw):
    # layout: input is NCHW (PyTorch convention) -> bf16 NHWC inside kernels.
    x = jnp.transpose(x_nchw, (0, 2, 3, 1)).astype(jnp.bfloat16)
    x = conv_bn(x, params["conv1_w"], params["bn1"], stride=2, pad=3, relu=True)
    x = maxpool_3x3_s2_p1(x)
    for li in range(4):
        stage_stride = 1 if li == 0 else 2
        for bi, bp in enumerate(params[f"layer{li + 1}"]):
            x = basic_block(x, bp, stage_stride if bi == 0 else 1)
    return mlphead_with_gap(x, params["fc"])    # (N, projection_size), f32


# ---------------------------------------------------------------------------
# Deterministic parameter init (synthetic weights; shapes per the module)
# ---------------------------------------------------------------------------

def _bn_params(c):
    # PyTorch BatchNorm defaults: gamma=1, beta=0, running_mean=0, running_var=1
    return {"gamma": jnp.ones((c,), jnp.float32),
            "beta": jnp.zeros((c,), jnp.float32),
            "mean": jnp.zeros((c,), jnp.float32),
            "var": jnp.ones((c,), jnp.float32)}


def init_params(key, in_ch=3, widths=(8, 16, 32, 64), blocks=(2, 2, 2, 2),
                hidden=32, proj=16):
    keys = iter(jax.random.split(key, 64))

    def rnd(shape):
        return 0.05 * jax.random.normal(next(keys), shape, jnp.float32)

    p = {"conv1_w": rnd((widths[0], in_ch, 7, 7)), "bn1": _bn_params(widths[0])}
    prev = widths[0]
    for li, (w, nb) in enumerate(zip(widths, blocks)):
        stage = []
        for b in range(nb):
            stride = (1 if li == 0 else 2) if b == 0 else 1
            bp = {"conv1_w": rnd((w, prev, 3, 3)), "bn1": _bn_params(w),
                  "conv2_w": rnd((w, w, 3, 3)), "bn2": _bn_params(w)}
            if stride != 1 or prev != w:
                bp["down_w"] = rnd((w, prev, 1, 1))
                bp["down_bn"] = _bn_params(w)
            stage.append(bp)
            prev = w
        p[f"layer{li + 1}"] = stage
    # args.in_channels = model.fc.in_features == prev
    p["fc"] = {"w1": rnd((hidden, prev)), "b1": jnp.zeros((hidden,), jnp.float32),
               "bn": _bn_params(hidden),
               "w2": rnd((proj, hidden)), "b2": jnp.zeros((proj,), jnp.float32)}
    return p


# ---------------------------------------------------------------------------

if __name__ == "__main__":
    key = jax.random.PRNGKey(0)
    pkey, xkey = jax.random.split(key)
    params = init_params(pkey)
    x = jax.random.normal(xkey, (2, 3, 32, 32), jnp.float32)  # NCHW, like PyTorch

    fwd = jax.jit(byol_forward)
    out = fwd(params, x)
    out = jax.block_until_ready(out)

    assert out.shape == (2, 16), out.shape
    assert out.dtype == jnp.float32
    assert bool(jnp.all(jnp.isfinite(out)))
    print("KERNEL_OK")
</pallas_src>

<mosaic_0001>
module attributes {stable_mosaic.version = 11 : i64} {
  func.func @_mm_kernel(%arg0: i32, %arg1: memref<256x256xbf16, #tpu.memory_space<vmem>>, %arg2: memref<256x128xbf16, #tpu.memory_space<vmem>>, %arg3: memref<1x128xf32, #tpu.memory_space<vmem>>, %arg4: memref<1x128xf32, #tpu.memory_space<vmem>>, %arg5: memref<256x128xbf16, #tpu.memory_space<vmem>>) attributes {dimension_semantics = [#tpu.dimension_semantics<parallel>], iteration_bounds = array<i64: 2>, scalar_prefetch = 0 : i64, scratch_operands = 0 : i64, tpu.core_type = #tpu.core_type<tc>, window_params = [{transform_indices = @transform_0, window_bounds = array<i64: 256, 256>}, {pipeline_mode = #tpu.pipeline_mode<synchronous>, transform_indices = @transform_1, window_bounds = array<i64: 256, 128>}, {pipeline_mode = #tpu.pipeline_mode<synchronous>, transform_indices = @transform_2, window_bounds = array<i64: 1, 128>}, {pipeline_mode = #tpu.pipeline_mode<synchronous>, transform_indices = @transform_3, window_bounds = array<i64: 1, 128>}, {transform_indices = @transform_4, window_bounds = array<i64: 256, 128>}]} {
    %c0 = arith.constant 0 : index
    %c0_0 = arith.constant 0 : index
    %0 = vector.load %arg1[%c0, %c0_0] : memref<256x256xbf16, #tpu.memory_space<vmem>>, vector<256x256xbf16>
    %c0_1 = arith.constant 0 : index
    %c0_2 = arith.constant 0 : index
    %1 = vector.load %arg2[%c0_1, %c0_2] : memref<256x128xbf16, #tpu.memory_space<vmem>>, vector<256x128xbf16>
    %cst = arith.constant dense<0.000000e+00> : vector<256x128xf32>
    %2 = tpu.matmul %0, %1, %cst {dimension_numbers = #tpu.dot_dimension_numbers<[1], [0], [0], [1], [0, 0, 1, 1], [], []>} : vector<256x256xbf16>, vector<256x128xbf16>, vector<256x128xf32> -> vector<256x128xf32>
    %c0_3 = arith.constant 0 : index
    %c0_4 = arith.constant 0 : index
    %3 = vector.load %arg3[%c0_3, %c0_4] : memref<1x128xf32, #tpu.memory_space<vmem>>, vector<1x128xf32>
    %4 = vector.broadcast %3 : vector<1x128xf32> to vector<256x128xf32>
    %5 = arith.mulf %2, %4 : vector<256x128xf32>
    %c0_5 = arith.constant 0 : index
    %c0_6 = arith.constant 0 : index
    %6 = vector.load %arg4[%c0_5, %c0_6] : memref<1x128xf32, #tpu.memory_space<vmem>>, vector<1x128xf32>
    %7 = vector.broadcast %6 : vector<1x128xf32> to vector<256x128xf32>
    %8 = arith.addf %5, %7 : vector<256x128xf32>
    %cst_7 = arith.constant 0.000000e+00 : f32
    %9 = vector.broadcast %cst_7 : f32 to vector<256x128xf32>
    %10 = arith.maximumf %8, %9 : vector<256x128xf32>
    %11 = arith.truncf %10 : vector<256x128xf32> to vector<256x128xbf16>
    %c0_8 = arith.constant 0 : index
    %c0_9 = arith.constant 0 : index
    %12 = vector.load %arg5[%c0_8, %c0_9] : memref<256x128xbf16, #tpu.memory_space<vmem>>, vector<256x128xbf16>
    tpu.vector_store %arg5[%c0_8, %c0_9], %11 {strides = array<i32>} : memref<256x128xbf16, #tpu.memory_space<vmem>>, vector<256x128xbf16>,
    return
  }
  func.func @transform_0(%arg0: i32) -> (i32, i32) {
    %c0_i32 = arith.constant 0 : i32
    %c0_i32_0 = arith.constant 0 : i32
    return %arg0, %c0_i32 : i32, i32
  }
  func.func @transform_1(%arg0: i32) -> (i32, i32) {
    %c0_i32 = arith.constant 0 : i32
    %c0_i32_0 = arith.constant 0 : i32
    %c0_i32_1 = arith.constant 0 : i32
    return %c0_i32, %c0_i32_0 : i32, i32
  }
  func.func @transform_2(%arg0: i32) -> (i32, i32) {
    %c0_i32 = arith.constant 0 : i32
    %c0_i32_0 = arith.constant 0 : i32
    %c0_i32_1 = arith.constant 0 : i32
    return %c0_i32, %c0_i32_0 : i32, i32
  }
  func.func @transform_3(%arg0: i32) -> (i32, i32) {
    %c0_i32 = arith.constant 0 : i32
    %c0_i32_0 = arith.constant 0 : i32
    %c0_i32_1 = arith.constant 0 : i32
    return %c0_i32, %c0_i32_0 : i32, i32
  }
  func.func @transform_4(%arg0: i32) -> (i32, i32) {
    %c0_i32 = arith.constant 0 : i32
    %c0_i32_0 = arith.constant 0 : i32
    return %arg0, %c0_i32 : i32, i32
  }
}

module attributes {stable_mosaic.version = 11 : i64} {
  func.func @_max3_kernel(%arg0: i32, %arg1: memref<144x128xbf16, #tpu.memory_space<vmem>>, %arg2: memref<144x128xbf16, #tpu.memory_space<vmem>>, %arg3: memref<144x128xbf16, #tpu.memory_space<vmem>>, %arg4: memref<144x128xbf16, #tpu.memory_space<vmem>>) attributes {dimension_semantics = [#tpu.dimension_semantics<parallel>], iteration_bounds = array<i64: 2>, scalar_prefetch = 0 : i64, scratch_operands = 0 : i64, tpu.core_type = #tpu.core_type<tc>, window_params = [{transform_indices = @transform_0, window_bounds = array<i64: 144, 128>}, {transform_indices = @transform_1, window_bounds = array<i64: 144, 128>}, {transform_indices = @transform_2, window_bounds = array<i64: 144, 128>}, {transform_indices = @transform_3, window_bounds = array<i64: 144, 128>}]} {
    %c0 = arith.constant 0 : index
    %c0_0 = arith.constant 0 : index
    %0 = vector.load %arg1[%c0, %c0_0] : memref<144x128xbf16, #tpu.memory_space<vmem>>, vector<144x128xbf16>
    %c0_1 = arith.constant 0 : index
    %c0_2 = arith.constant 0 : index
    %1 = vector.load %arg2[%c0_1, %c0_2] : memref<144x128xbf16, #tpu.memory_space<vmem>>, vector<144x128xbf16>
    %2 = arith.maximumf %0, %1 : vector<144x128xbf16>
    %c0_3 = arith.constant 0 : index
    %c0_4 = arith.constant 0 : index
    %3 = vector.load %arg3[%c0_3, %c0_4] : memref<144x128xbf16, #tpu.memory_space<vmem>>, vector<144x128xbf16>
    %4 = arith.maximumf %2, %3 : vector<144x128xbf16>
    %c0_5 = arith.constant 0 : index
    %c0_6 = arith.constant 0 : index
    %5 = vector.load %arg4[%c0_5, %c0_6] : memref<144x128xbf16, #tpu.memory_space<vmem>>, vector<144x128xbf16>
    tpu.vector_store %arg4[%c0_5, %c0_6], %4 {strides = array<i32>} : memref<144x128xbf16, #tpu.memory_space<vmem>>, vector<144x128xbf16>,
    return
  }
  func.func @transform_0(%arg0: i32) -> (i32, i32) {
    %c0_i32 = arith.constant 0 : i32
    %c0_i32_0 = arith.constant 0 : i32
    return %arg0, %c0_i32 : i32, i32
  }
  func.func @transform_1(%arg0: i32) -> (i32, i32) {
    %c0_i32 = arith.constant 0 : i32
    %c0_i32_0 = arith.constant 0 : i32
    return %arg0, %c0_i32 : i32, i32
  }
  func.func @transform_2(%arg0: i32) -> (i32, i32) {
    %c0_i32 = arith.constant 0 : i32
    %c0_i32_0 = arith.constant 0 : i32
    return %arg0, %c0_i32 : i32, i32
  }
  func.func @transform_3(%arg0: i32) -> (i32, i32) {
    %c0_i32 = arith.constant 0 : i32
    %c0_i32_0 = arith.constant 0 : i32
    return %arg0, %c0_i32 : i32, i32
  }
}

module attributes {stable_mosaic.version = 11 : i64} {
  func.func @_max3_kernel(%arg0: i32, %arg1: memref<64x128xbf16, #tpu.memory_space<vmem>>, %arg2: memref<64x128xbf16, #tpu.memory_space<vmem>>, %arg3: memref<64x128xbf16, #tpu.memory_space<vmem>>, %arg4: memref<64x128xbf16, #tpu.memory_space<vmem>>) attributes {dimension_semantics = [#tpu.dimension_semantics<parallel>], iteration_bounds = array<i64: 2>, scalar_prefetch = 0 : i64, scratch_operands = 0 : i64, tpu.core_type = #tpu.core_type<tc>, window_params = [{transform_indices = @transform_0, window_bounds = array<i64: 64, 128>}, {transform_indices = @transform_1, window_bounds = array<i64: 64, 128>}, {transform_indices = @transform_2, window_bounds = array<i64: 64, 128>}, {transform_indices = @transform_3, window_bounds = array<i64: 64, 128>}]} {
    %c0 = arith.constant 0 : index
    %c0_0 = arith.constant 0 : index
    %0 = vector.load %arg1[%c0, %c0_0] : memref<64x128xbf16, #tpu.memory_space<vmem>>, vector<64x128xbf16>
    %c0_1 = arith.constant 0 : index
    %c0_2 = arith.constant 0 : index
    %1 = vector.load %arg2[%c0_1, %c0_2] : memref<64x128xbf16, #tpu.memory_space<vmem>>, vector<64x128xbf16>
    %2 = arith.maximumf %0, %1 : vector<64x128xbf16>
    %c0_3 = arith.constant 0 : index
    %c0_4 = arith.constant 0 : index
    %3 = vector.load %arg3[%c0_3, %c0_4] : memref<64x128xbf16, #tpu.memory_space<vmem>>, vector<64x128xbf16>
    %4 = arith.maximumf %2, %3 : vector<64x128xbf16>
    %c0_5 = arith.constant 0 : index
    %c0_6 = arith.constant 0 : index
    %5 = vector.load %arg4[%c0_5, %c0_6] : memref<64x128xbf16, #tpu.memory_space<vmem>>, vector<64x128xbf16>
    tpu.vector_store %arg4[%c0_5, %c0_6], %4 {strides = array<i32>} : memref<64x128xbf16, #tpu.memory_space<vmem>>, vector<64x128xbf16>,
    return
  }
  func.func @transform_0(%arg0: i32) -> (i32, i32) {
    %c0_i32 = arith.constant 0 : i32
    %c0_i32_0 = arith.constant 0 : i32
    return %arg0, %c0_i32 : i32, i32
  }
  func.func @transform_1(%arg0: i32) -> (i32, i32) {
    %c0_i32 = arith.constant 0 : i32
    %c0_i32_0 = arith.constant 0 : i32
    return %arg0, %c0_i32 : i32, i32
  }
  func.func @transform_2(%arg0: i32) -> (i32, i32) {
    %c0_i32 = arith.constant 0 : i32
    %c0_i32_0 = arith.constant 0 : i32
    return %arg0, %c0_i32 : i32, i32
  }
  func.func @transform_3(%arg0: i32) -> (i32, i32) {
    %c0_i32 = arith.constant 0 : i32
    %c0_i32_0 = arith.constant 0 : i32
    return %arg0, %c0_i32 : i32, i32
  }
}

module attributes {stable_mosaic.version = 11 : i64} {
  func.func @_mm_kernel(%arg0: i32, %arg1: memref<64x1152xbf16, #tpu.memory_space<vmem>>, %arg2: memref<1152x128xbf16, #tpu.memory_space<vmem>>, %arg3: memref<1x128xf32, #tpu.memory_space<vmem>>, %arg4: memref<1x128xf32, #tpu.memory_space<vmem>>, %arg5: memref<64x128xbf16, #tpu.memory_space<vmem>>) attributes {dimension_semantics = [#tpu.dimension_semantics<parallel>], iteration_bounds = array<i64: 2>, scalar_prefetch = 0 : i64, scratch_operands = 0 : i64, tpu.core_type = #tpu.core_type<tc>, window_params = [{transform_indices = @transform_0, window_bounds = array<i64: 64, 1152>}, {pipeline_mode = #tpu.pipeline_mode<synchronous>, transform_indices = @transform_1, window_bounds = array<i64: 1152, 128>}, {pipeline_mode = #tpu.pipeline_mode<synchronous>, transform_indices = @transform_2, window_bounds = array<i64: 1, 128>}, {pipeline_mode = #tpu.pipeline_mode<synchronous>, transform_indices = @transform_3, window_bounds = array<i64: 1, 128>}, {transform_indices = @transform_4, window_bounds = array<i64: 64, 128>}]} {
    %c0 = arith.constant 0 : index
    %c0_0 = arith.constant 0 : index
    %0 = vector.load %arg1[%c0, %c0_0] : memref<64x1152xbf16, #tpu.memory_space<vmem>>, vector<64x1152xbf16>
    %c0_1 = arith.constant 0 : index
    %c0_2 = arith.constant 0 : index
    %1 = vector.load %arg2[%c0_1, %c0_2] : memref<1152x128xbf16, #tpu.memory_space<vmem>>, vector<1152x128xbf16>
    %cst = arith.constant dense<0.000000e+00> : vector<64x128xf32>
    %2 = tpu.matmul %0, %1, %cst {dimension_numbers = #tpu.dot_dimension_numbers<[1], [0], [0], [1], [0, 0, 1, 1], [], []>} : vector<64x1152xbf16>, vector<1152x128xbf16>, vector<64x128xf32> -> vector<64x128xf32>
    %c0_3 = arith.constant 0 : index
    %c0_4 = arith.constant 0 : index
    %3 = vector.load %arg3[%c0_3, %c0_4] : memref<1x128xf32, #tpu.memory_space<vmem>>, vector<1x128xf32>
    %4 = vector.broadcast %3 : vector<1x128xf32> to vector<64x128xf32>
    %5 = arith.mulf %2, %4 : vector<64x128xf32>
    %c0_5 = arith.constant 0 : index
    %c0_6 = arith.constant 0 : index
    %6 = vector.load %arg4[%c0_5, %c0_6] : memref<1x128xf32, #tpu.memory_space<vmem>>, vector<1x128xf32>
    %7 = vector.broadcast %6 : vector<1x128xf32> to vector<64x128xf32>
    %8 = arith.addf %5, %7 : vector<64x128xf32>
    %cst_7 = arith.constant 0.000000e+00 : f32
    %9 = vector.broadcast %cst_7 : f32 to vector<64x128xf32>
    %10 = arith.maximumf %8, %9 : vector<64x128xf32>
    %11 = arith.truncf %10 : vector<64x128xf32> to vector<64x128xbf16>
    %c0_8 = arith.constant 0 : index
    %c0_9 = arith.constant 0 : index
    %12 = vector.load %arg5[%c0_8, %c0_9] : memref<64x128xbf16, #tpu.memory_space<vmem>>, vector<64x128xbf16>
    tpu.vector_store %arg5[%c0_8, %c0_9], %11 {strides = array<i32>} : memref<64x128xbf16, #tpu.memory_space<vmem>>, vector<64x128xbf16>,
    return
  }
  func.func @transform_0(%arg0: i32) -> (i32, i32) {
    %c0_i32 = arith.constant 0 : i32
    %c0_i32_0 = arith.constant 0 : i32
    return %arg0, %c0_i32 : i32, i32
  }
  func.func @transform_1(%arg0: i32) -> (i32, i32) {
    %c0_i32 = arith.constant 0 : i32
    %c0_i32_0 = arith.constant 0 : i32
    %c0_i32_1 = arith.constant 0 : i32
    return %c0_i32, %c0_i32_0 : i32, i32
  }
  func.func @transform_2(%arg0: i32) -> (i32, i32) {
    %c0_i32 = arith.constant 0 : i32
    %c0_i32_0 = arith.constant 0 : i32
    %c0_i32_1 = arith.constant 0 : i32
    return %c0_i32, %c0_i32_0 : i32, i32
  }
  func.func @transform_3(%arg0: i32) -> (i32, i32) {
    %c0_i32 = arith.constant 0 : i32
    %c0_i32_0 = arith.constant 0 : i32
    %c0_i32_1 = arith.constant 0 : i32
    return %c0_i32, %c0_i32_0 : i32, i32
  }
  func.func @transform_4(%arg0: i32) -> (i32, i32) {
    %c0_i32 = arith.constant 0 : i32
    %c0_i32_0 = arith.constant 0 : i32
    return %arg0, %c0_i32 : i32, i32
  }
}

module attributes {stable_mosaic.version = 11 : i64} {
  func.func @_mm_res_kernel(%arg0: i32, %arg1: memref<64x1152xbf16, #tpu.memory_space<vmem>>, %arg2: memref<1152x128xbf16, #tpu.memory_space<vmem>>, %arg3: memref<1x128xf32, #tpu.memory_space<vmem>>, %arg4: memref<1x128xf32, #tpu.memory_space<vmem>>, %arg5: memref<64x128xbf16, #tpu.memory_space<vmem>>, %arg6: memref<64x128xbf16, #tpu.memory_space<vmem>>) attributes {dimension_semantics = [#tpu.dimension_semantics<parallel>], iteration_bounds = array<i64: 2>, scalar_prefetch = 0 : i64, scratch_operands = 0 : i64, tpu.core_type = #tpu.core_type<tc>, window_params = [{transform_indices = @transform_0, window_bounds = array<i64: 64, 1152>}, {pipeline_mode = #tpu.pipeline_mode<synchronous>, transform_indices = @transform_1, window_bounds = array<i64: 1152, 128>}, {pipeline_mode = #tpu.pipeline_mode<synchronous>, transform_indices = @transform_2, window_bounds = array<i64: 1, 128>}, {pipeline_mode = #tpu.pipeline_mode<synchronous>, transform_indices = @transform_3, window_bounds = array<i64: 1, 128>}, {transform_indices = @transform_4, window_bounds = array<i64: 64, 128>}, {transform_indices = @transform_5, window_bounds = array<i64: 64, 128>}]} {
    %c0 = arith.constant 0 : index
    %c0_0 = arith.constant 0 : index
    %0 = vector.load %arg1[%c0, %c0_0] : memref<64x1152xbf16, #tpu.memory_space<vmem>>, vector<64x1152xbf16>
    %c0_1 = arith.constant 0 : index
    %c0_2 = arith.constant 0 : index
    %1 = vector.load %arg2[%c0_1, %c0_2] : memref<1152x128xbf16, #tpu.memory_space<vmem>>, vector<1152x128xbf16>
    %cst = arith.constant dense<0.000000e+00> : vector<64x128xf32>
    %2 = tpu.matmul %0, %1, %cst {dimension_numbers = #tpu.dot_dimension_numbers<[1], [0], [0], [1], [0, 0, 1, 1], [], []>} : vector<64x1152xbf16>, vector<1152x128xbf16>, vector<64x128xf32> -> vector<64x128xf32>
    %c0_3 = arith.constant 0 : index
    %c0_4 = arith.constant 0 : index
    %3 = vector.load %arg3[%c0_3, %c0_4] : memref<1x128xf32, #tpu.memory_space<vmem>>, vector<1x128xf32>
    %4 = vector.broadcast %3 : vector<1x128xf32> to vector<64x128xf32>
    %5 = arith.mulf %2, %4 : vector<64x128xf32>
    %c0_5 = arith.constant 0 : index
    %c0_6 = arith.constant 0 : index
    %6 = vector.load %arg4[%c0_5, %c0_6] : memref<1x128xf32, #tpu.memory_space<vmem>>, vector<1x128xf32>
    %7 = vector.broadcast %6 : vector<1x128xf32> to vector<64x128xf32>
    %8 = arith.addf %5, %7 : vector<64x128xf32>
    %c0_7 = arith.constant 0 : index
    %c0_8 = arith.constant 0 : index
    %9 = vector.load %arg5[%c0_7, %c0_8] : memref<64x128xbf16, #tpu.memory_space<vmem>>, vector<64x128xbf16>
    %10 = arith.extf %9 : vector<64x128xbf16> to vector<64x128xf32>
    %11 = arith.addf %8, %10 : vector<64x128xf32>
    %cst_9 = arith.constant 0.000000e+00 : f32
    %12 = vector.broadcast %cst_9 : f32 to vector<64x128xf32>
    %13 = arith.maximumf %11, %12 : vector<64x128xf32>
    %14 = arith.truncf %13 : vector<64x128xf32> to vector<64x128xbf16>
    %c0_10 = arith.constant 0 : index
    %c0_11 = arith.constant 0 : index
    %15 = vector.load %arg6[%c0_10, %c0_11] : memref<64x128xbf16, #tpu.memory_space<vmem>>, vector<64x128xbf16>
    tpu.vector_store %arg6[%c0_10, %c0_11], %14 {strides = array<i32>} : memref<64x128xbf16, #tpu.memory_space<vmem>>, vector<64x128xbf16>,
    return
  }
  func.func @transform_0(%arg0: i32) -> (i32, i32) {
    %c0_i32 = arith.constant 0 : i32
    %c0_i32_0 = arith.constant 0 : i32
    return %arg0, %c0_i32 : i32, i32
  }
  func.func @transform_1(%arg0: i32) -> (i32, i32) {
    %c0_i32 = arith.constant 0 : i32
    %c0_i32_0 = arith.constant 0 : i32
    %c0_i32_1 = arith.constant 0 : i32
    return %c0_i32, %c0_i32_0 : i32, i32
  }
  func.func @transform_2(%arg0: i32) -> (i32, i32) {
    %c0_i32 = arith.constant 0 : i32
    %c0_i32_0 = arith.constant 0 : i32
    %c0_i32_1 = arith.constant 0 : i32
    return %c0_i32, %c0_i32_0 : i32, i32
  }
  func.func @transform_3(%arg0: i32) -> (i32, i32) {
    %c0_i32 = arith.constant 0 : i32
    %c0_i32_0 = arith.constant 0 : i32
    %c0_i32_1 = arith.constant 0 : i32
    return %c0_i32, %c0_i32_0 : i32, i32
  }
  func.func @transform_4(%arg0: i32) -> (i32, i32) {
    %c0_i32 = arith.constant 0 : i32
    %c0_i32_0 = arith.constant 0 : i32
    return %arg0, %c0_i32 : i32, i32
  }
  func.func @transform_5(%arg0: i32) -> (i32, i32) {
    %c0_i32 = arith.constant 0 : i32
    %c0_i32_0 = arith.constant 0 : i32
    return %arg0, %c0_i32 : i32, i32
  }
}

module attributes {stable_mosaic.version = 11 : i64} {
  func.func @_mm_dual_kernel(%arg0: i32, %arg1: memref<16x1152xbf16, #tpu.memory_space<vmem>>, %arg2: memref<1152x128xbf16, #tpu.memory_space<vmem>>, %arg3: memref<1x128xf32, #tpu.memory_space<vmem>>, %arg4: memref<1x128xf32, #tpu.memory_space<vmem>>, %arg5: memref<128x128xbf16, #tpu.memory_space<vmem>>, %arg6: memref<1x128xf32, #tpu.memory_space<vmem>>, %arg7: memref<1x128xf32, #tpu.memory_space<vmem>>, %arg8: memref<16x128xbf16, #tpu.memory_space<vmem>>, %arg9: memref<16x128xbf16, #tpu.memory_space<vmem>>) attributes {dimension_semantics = [#tpu.dimension_semantics<parallel>], iteration_bounds = array<i64: 2>, scalar_prefetch = 0 : i64, scratch_operands = 0 : i64, tpu.core_type = #tpu.core_type<tc>, window_params = [{transform_indices = @transform_0, window_bounds = array<i64: 16, 1152>}, {pipeline_mode = #tpu.pipeline_mode<synchronous>, transform_indices = @transform_1, window_bounds = array<i64: 1152, 128>}, {pipeline_mode = #tpu.pipeline_mode<synchronous>, transform_indices = @transform_2, window_bounds = array<i64: 1, 128>}, {pipeline_mode = #tpu.pipeline_mode<synchronous>, transform_indices = @transform_3, window_bounds = array<i64: 1, 128>}, {pipeline_mode = #tpu.pipeline_mode<synchronous>, transform_indices = @transform_4, window_bounds = array<i64: 128, 128>}, {pipeline_mode = #tpu.pipeline_mode<synchronous>, transform_indices = @transform_5, window_bounds = array<i64: 1, 128>}, {pipeline_mode = #tpu.pipeline_mode<synchronous>, transform_indices = @transform_6, window_bounds = array<i64: 1, 128>}, {transform_indices = @transform_7, window_bounds = array<i64: 16, 128>}, {transform_indices = @transform_8, window_bounds = array<i64: 16, 128>}]} {
    %c0 = arith.constant 0 : index
    %c0_0 = arith.constant 0 : index
    %0 = vector.load %arg1[%c0, %c0_0] : memref<16x1152xbf16, #tpu.memory_space<vmem>>, vector<16x1152xbf16>
    %c0_1 = arith.constant 0 : index
    %c0_2 = arith.constant 0 : index
    %1 = vector.load %arg2[%c0_1, %c0_2] : memref<1152x128xbf16, #tpu.memory_space<vmem>>, vector<1152x128xbf16>
    %cst = arith.constant dense<0.000000e+00> : vector<16x128xf32>
    %2 = tpu.matmul %0, %1, %cst {dimension_numbers = #tpu.dot_dimension_numbers<[1], [0], [0], [1], [0, 0, 1, 1], [], []>} : vector<16x1152xbf16>, vector<1152x128xbf16>, vector<16x128xf32> -> vector<16x128xf32>
    %c0_3 = arith.constant 0 : index
    %c0_4 = arith.constant 0 : index
    %3 = vector.load %arg3[%c0_3, %c0_4] : memref<1x128xf32, #tpu.memory_space<vmem>>, vector<1x128xf32>
    %4 = vector.broadcast %3 : vector<1x128xf32> to vector<16x128xf32>
    %5 = arith.mulf %2, %4 : vector<16x128xf32>
    %c0_5 = arith.constant 0 : index
    %c0_6 = arith.constant 0 : index
    %6 = vector.load %arg4[%c0_5, %c0_6] : memref<1x128xf32, #tpu.memory_space<vmem>>, vector<1x128xf32>
    %7 = vector.broadcast %6 : vector<1x128xf32> to vector<16x128xf32>
    %8 = arith.addf %5, %7 : vector<16x128xf32>
    %cst_7 = arith.constant 0.000000e+00 : f32
    %9 = vector.broadcast %cst_7 : f32 to vector<16x128xf32>
    %10 = arith.maximumf %8, %9 : vector<16x128xf32>
    %11 = arith.truncf %10 : vector<16x128xf32> to vector<16x128xbf16>
    %c0_8 = arith.constant 0 : index
    %c0_9 = arith.constant 0 : index
    %12 = vector.load %arg8[%c0_8, %c0_9] : memref<16x128xbf16, #tpu.memory_space<vmem>>, vector<16x128xbf16>
    tpu.vector_store %arg8[%c0_8, %c0_9], %11 {strides = array<i32>} : memref<16x128xbf16, #tpu.memory_space<vmem>>, vector<16x128xbf16>,
    %13 = vector.extract_strided_slice %0 {offsets = [0, 512], sizes = [16, 128], strides = [1, 1]} : vector<16x1152xbf16> to vector<16x128xbf16>
    %c0_10 = arith.constant 0 : index
    %c0_11 = arith.constant 0 : index
    %14 = vector.load %arg5[%c0_10, %c0_11] : memref<128x128xbf16, #tpu.memory_space<vmem>>, vector<128x128xbf16>
    %cst_12 = arith.constant dense<0.000000e+00> : vector<16x128xf32>
    %15 = tpu.matmul %13, %14, %cst_12 {dimension_numbers = #tpu.dot_dimension_numbers<[1], [0], [0], [1], [0, 0, 1, 1], [], []>} : vector<16x128xbf16>, vector<128x128xbf16>, vector<16x128xf32> -> vector<16x128xf32>
    %c0_13 = arith.constant 0 : index
    %c0_14 = arith.constant 0 : index
    %16 = vector.load %arg6[%c0_13, %c0_14] : memref<1x128xf32, #tpu.memory_space<vmem>>, vector<1x128xf32>
    %17 = vector.broadcast %16 : vector<1x128xf32> to vector<16x128xf32>
    %18 = arith.mulf %15, %17 : vector<16x128xf32>
    %c0_15 = arith.constant 0 : index
    %c0_16 = arith.constant 0 : index
    %19 = vector.load %arg7[%c0_15, %c0_16] : memref<1x128xf32, #tpu.memory_space<vmem>>, vector<1x128xf32>
    %20 = vector.broadcast %19 : vector<1x128xf32> to vector<16x128xf32>
    %21 = arith.addf %18, %20 : vector<16x128xf32>
    %22 = arith.truncf %21 : vector<16x128xf32> to vector<16x128xbf16>
    %c0_17 = arith.constant 0 : index
    %c0_18 = arith.constant 0 : index
    %23 = vector.load %arg9[%c0_17, %c0_18] : memref<16x128xbf16, #tpu.memory_space<vmem>>, vector<16x128xbf16>
    tpu.vector_store %arg9[%c0_17, %c0_18], %22 {strides = array<i32>} : memref<16x128xbf16, #tpu.memory_space<vmem>>, vector<16x128xbf16>,
    return
  }
  func.func @transform_0(%arg0: i32) -> (i32, i32) {
    %c0_i32 = arith.constant 0 : i32
    %c0_i32_0 = arith.constant 0 : i32
    return %arg0, %c0_i32 : i32, i32
  }
  func.func @transform_1(%arg0: i32) -> (i32, i32) {
    %c0_i32 = arith.constant 0 : i32
    %c0_i32_0 = arith.constant 0 : i32
    %c0_i32_1 = arith.constant 0 : i32
    return %c0_i32, %c0_i32_0 : i32, i32
  }
  func.func @transform_2(%arg0: i32) -> (i32, i32) {
    %c0_i32 = arith.constant 0 : i32
    %c0_i32_0 = arith.constant 0 : i32
    %c0_i32_1 = arith.constant 0 : i32
    return %c0_i32, %c0_i32_0 : i32, i32
  }
  func.func @transform_3(%arg0: i32) -> (i32, i32) {
    %c0_i32 = arith.constant 0 : i32
    %c0_i32_0 = arith.constant 0 : i32
    %c0_i32_1 = arith.constant 0 : i32
    return %c0_i32, %c0_i32_0 : i32, i32
  }
  func.func @transform_4(%arg0: i32) -> (i32, i32) {
    %c0_i32 = arith.constant 0 : i32
    %c0_i32_0 = arith.constant 0 : i32
    %c0_i32_1 = arith.constant 0 : i32
    return %c0_i32, %c0_i32_0 : i32, i32
  }
  func.func @transform_5(%arg0: i32) -> (i32, i32) {
    %c0_i32 = arith.constant 0 : i32
    %c0_i32_0 = arith.constant 0 : i32
    %c0_i32_1 = arith.constant 0 : i32
    return %c0_i32, %c0_i32_0 : i32, i32
  }
  func.func @transform_6(%arg0: i32) -> (i32, i32) {
    %c0_i32 = arith.constant 0 : i32
    %c0_i32_0 = arith.constant 0 : i32
    %c0_i32_1 = arith.constant 0 : i32
    return %c0_i32, %c0_i32_0 : i32, i32
  }
  func.func @transform_7(%arg0: i32) -> (i32, i32) {
    %c0_i32 = arith.constant 0 : i32
    %c0_i32_0 = arith.constant 0 : i32
    return %arg0, %c0_i32 : i32, i32
  }
  func.func @transform_8(%arg0: i32) -> (i32, i32) {
    %c0_i32 = arith.constant 0 : i32
    %c0_i32_0 = arith.constant 0 : i32
    return %arg0, %c0_i32 : i32, i32
  }
}

module attributes {stable_mosaic.version = 11 : i64} {
  func.func @_mm_res_kernel(%arg0: i32, %arg1: memref<16x1152xbf16, #tpu.memory_space<vmem>>, %arg2: memref<1152x128xbf16, #tpu.memory_space<vmem>>, %arg3: memref<1x128xf32, #tpu.memory_space<vmem>>, %arg4: memref<1x128xf32, #tpu.memory_space<vmem>>, %arg5: memref<16x128xbf16, #tpu.memory_space<vmem>>, %arg6: memref<16x128xbf16, #tpu.memory_space<vmem>>) attributes {dimension_semantics = [#tpu.dimension_semantics<parallel>], iteration_bounds = array<i64: 2>, scalar_prefetch = 0 : i64, scratch_operands = 0 : i64, tpu.core_type = #tpu.core_type<tc>, window_params = [{transform_indices = @transform_0, window_bounds = array<i64: 16, 1152>}, {pipeline_mode = #tpu.pipeline_mode<synchronous>, transform_indices = @transform_1, window_bounds = array<i64: 1152, 128>}, {pipeline_mode = #tpu.pipeline_mode<synchronous>, transform_indices = @transform_2, window_bounds = array<i64: 1, 128>}, {pipeline_mode = #tpu.pipeline_mode<synchronous>, transform_indices = @transform_3, window_bounds = array<i64: 1, 128>}, {transform_indices = @transform_4, window_bounds = array<i64: 16, 128>}, {transform_indices = @transform_5, window_bounds = array<i64: 16, 128>}]} {
    %c0 = arith.constant 0 : index
    %c0_0 = arith.constant 0 : index
    %0 = vector.load %arg1[%c0, %c0_0] : memref<16x1152xbf16, #tpu.memory_space<vmem>>, vector<16x1152xbf16>
    %c0_1 = arith.constant 0 : index
    %c0_2 = arith.constant 0 : index
    %1 = vector.load %arg2[%c0_1, %c0_2] : memref<1152x128xbf16, #tpu.memory_space<vmem>>, vector<1152x128xbf16>
    %cst = arith.constant dense<0.000000e+00> : vector<16x128xf32>
    %2 = tpu.matmul %0, %1, %cst {dimension_numbers = #tpu.dot_dimension_numbers<[1], [0], [0], [1], [0, 0, 1, 1], [], []>} : vector<16x1152xbf16>, vector<1152x128xbf16>, vector<16x128xf32> -> vector<16x128xf32>
    %c0_3 = arith.constant 0 : index
    %c0_4 = arith.constant 0 : index
    %3 = vector.load %arg3[%c0_3, %c0_4] : memref<1x128xf32, #tpu.memory_space<vmem>>, vector<1x128xf32>
    %4 = vector.broadcast %3 : vector<1x128xf32> to vector<16x128xf32>
    %5 = arith.mulf %2, %4 : vector<16x128xf32>
    %c0_5 = arith.constant 0 : index
    %c0_6 = arith.constant 0 : index
    %6 = vector.load %arg4[%c0_5, %c0_6] : memref<1x128xf32, #tpu.memory_space<vmem>>, vector<1x128xf32>
    %7 = vector.broadcast %6 : vector<1x128xf32> to vector<16x128xf32>
    %8 = arith.addf %5, %7 : vector<16x128xf32>
    %c0_7 = arith.constant 0 : index
    %c0_8 = arith.constant 0 : index
    %9 = vector.load %arg5[%c0_7, %c0_8] : memref<16x128xbf16, #tpu.memory_space<vmem>>, vector<16x128xbf16>
    %10 = arith.extf %9 : vector<16x128xbf16> to vector<16x128xf32>
    %11 = arith.addf %8, %10 : vector<16x128xf32>
    %cst_9 = arith.constant 0.000000e+00 : f32
    %12 = vector.broadcast %cst_9 : f32 to vector<16x128xf32>
    %13 = arith.maximumf %11, %12 : vector<16x128xf32>
    %14 = arith.truncf %13 : vector<16x128xf32> to vector<16x128xbf16>
    %c0_10 = arith.constant 0 : index
    %c0_11 = arith.constant 0 : index
    %15 = vector.load %arg6[%c0_10, %c0_11] : memref<16x128xbf16, #tpu.memory_space<vmem>>, vector<16x128xbf16>
    tpu.vector_store %arg6[%c0_10, %c0_11], %14 {strides = array<i32>} : memref<16x128xbf16, #tpu.memory_space<vmem>>, vector<16x128xbf16>,
    return
  }
  func.func @transform_0(%arg0: i32) -> (i32, i32) {
    %c0_i32 = arith.constant 0 : i32
    %c0_i32_0 = arith.constant 0 : i32
    return %arg0, %c0_i32 : i32, i32
  }
  func.func @transform_1(%arg0: i32) -> (i32, i32) {
    %c0_i32 = arith.constant 0 : i32
    %c0_i32_0 = arith.constant 0 : i32
    %c0_i32_1 = arith.constant 0 : i32
    return %c0_i32, %c0_i32_0 : i32, i32
  }
  func.func @transform_2(%arg0: i32) -> (i32, i32) {
    %c0_i32 = arith.constant 0 : i32
    %c0_i32_0 = arith.constant 0 : i32
    %c0_i32_1 = arith.constant 0 : i32
    return %c0_i32, %c0_i32_0 : i32, i32
  }
  func.func @transform_3(%arg0: i32) -> (i32, i32) {
    %c0_i32 = arith.constant 0 : i32
    %c0_i32_0 = arith.constant 0 : i32
    %c0_i32_1 = arith.constant 0 : i32
    return %c0_i32, %c0_i32_0 : i32, i32
  }
  func.func @transform_4(%arg0: i32) -> (i32, i32) {
    %c0_i32 = arith.constant 0 : i32
    %c0_i32_0 = arith.constant 0 : i32
    return %arg0, %c0_i32 : i32, i32
  }
  func.func @transform_5(%arg0: i32) -> (i32, i32) {
    %c0_i32 = arith.constant 0 : i32
    %c0_i32_0 = arith.constant 0 : i32
    return %arg0, %c0_i32 : i32, i32
  }
}

module attributes {stable_mosaic.version = 11 : i64} {
  func.func @_mm_kernel(%arg0: i32, %arg1: memref<16x1152xbf16, #tpu.memory_space<vmem>>, %arg2: memref<1152x128xbf16, #tpu.memory_space<vmem>>, %arg3: memref<1x128xf32, #tpu.memory_space<vmem>>, %arg4: memref<1x128xf32, #tpu.memory_space<vmem>>, %arg5: memref<16x128xbf16, #tpu.memory_space<vmem>>) attributes {dimension_semantics = [#tpu.dimension_semantics<parallel>], iteration_bounds = array<i64: 2>, scalar_prefetch = 0 : i64, scratch_operands = 0 : i64, tpu.core_type = #tpu.core_type<tc>, window_params = [{transform_indices = @transform_0, window_bounds = array<i64: 16, 1152>}, {pipeline_mode = #tpu.pipeline_mode<synchronous>, transform_indices = @transform_1, window_bounds = array<i64: 1152, 128>}, {pipeline_mode = #tpu.pipeline_mode<synchronous>, transform_indices = @transform_2, window_bounds = array<i64: 1, 128>}, {pipeline_mode = #tpu.pipeline_mode<synchronous>, transform_indices = @transform_3, window_bounds = array<i64: 1, 128>}, {transform_indices = @transform_4, window_bounds = array<i64: 16, 128>}]} {
    %c0 = arith.constant 0 : index
    %c0_0 = arith.constant 0 : index
    %0 = vector.load %arg1[%c0, %c0_0] : memref<16x1152xbf16, #tpu.memory_space<vmem>>, vector<16x1152xbf16>
    %c0_1 = arith.constant 0 : index
    %c0_2 = arith.constant 0 : index
    %1 = vector.load %arg2[%c0_1, %c0_2] : memref<1152x128xbf16, #tpu.memory_space<vmem>>, vector<1152x128xbf16>
    %cst = arith.constant dense<0.000000e+00> : vector<16x128xf32>
    %2 = tpu.matmul %0, %1, %cst {dimension_numbers = #tpu.dot_dimension_numbers<[1], [0], [0], [1], [0, 0, 1, 1], [], []>} : vector<16x1152xbf16>, vector<1152x128xbf16>, vector<16x128xf32> -> vector<16x128xf32>
    %c0_3 = arith.constant 0 : index
    %c0_4 = arith.constant 0 : index
    %3 = vector.load %arg3[%c0_3, %c0_4] : memref<1x128xf32, #tpu.memory_space<vmem>>, vector<1x128xf32>
    %4 = vector.broadcast %3 : vector<1x128xf32> to vector<16x128xf32>
    %5 = arith.mulf %2, %4 : vector<16x128xf32>
    %c0_5 = arith.constant 0 : index
    %c0_6 = arith.constant 0 : index
    %6 = vector.load %arg4[%c0_5, %c0_6] : memref<1x128xf32, #tpu.memory_space<vmem>>, vector<1x128xf32>
    %7 = vector.broadcast %6 : vector<1x128xf32> to vector<16x128xf32>
    %8 = arith.addf %5, %7 : vector<16x128xf32>
    %cst_7 = arith.constant 0.000000e+00 : f32
    %9 = vector.broadcast %cst_7 : f32 to vector<16x128xf32>
    %10 = arith.maximumf %8, %9 : vector<16x128xf32>
    %11 = arith.truncf %10 : vector<16x128xf32> to vector<16x128xbf16>
    %c0_8 = arith.constant 0 : index
    %c0_9 = arith.constant 0 : index
    %12 = vector.load %arg5[%c0_8, %c0_9] : memref<16x128xbf16, #tpu.memory_space<vmem>>, vector<16x128xbf16>
    tpu.vector_store %arg5[%c0_8, %c0_9], %11 {strides = array<i32>} : memref<16x128xbf16, #tpu.memory_space<vmem>>, vector<16x128xbf16>,
    return
  }
  func.func @transform_0(%arg0: i32) -> (i32, i32) {
    %c0_i32 = arith.constant 0 : i32
    %c0_i32_0 = arith.constant 0 : i32
    return %arg0, %c0_i32 : i32, i32
  }
  func.func @transform_1(%arg0: i32) -> (i32, i32) {
    %c0_i32 = arith.constant 0 : i32
    %c0_i32_0 = arith.constant 0 : i32
    %c0_i32_1 = arith.constant 0 : i32
    return %c0_i32, %c0_i32_0 : i32, i32
  }
  func.func @transform_2(%arg0: i32) -> (i32, i32) {
    %c0_i32 = arith.constant 0 : i32
    %c0_i32_0 = arith.constant 0 : i32
    %c0_i32_1 = arith.constant 0 : i32
    return %c0_i32, %c0_i32_0 : i32, i32
  }
  func.func @transform_3(%arg0: i32) -> (i32, i32) {
    %c0_i32 = arith.constant 0 : i32
    %c0_i32_0 = arith.constant 0 : i32
    %c0_i32_1 = arith.constant 0 : i32
    return %c0_i32, %c0_i32_0 : i32, i32
  }
  func.func @transform_4(%arg0: i32) -> (i32, i32) {
    %c0_i32 = arith.constant 0 : i32
    %c0_i32_0 = arith.constant 0 : i32
    return %arg0, %c0_i32 : i32, i32
  }
}

module attributes {stable_mosaic.version = 11 : i64} {
  func.func @_mm_dual_kernel(%arg0: i32, %arg1: memref<8x1152xbf16, #tpu.memory_space<vmem>>, %arg2: memref<1152x128xbf16, #tpu.memory_space<vmem>>, %arg3: memref<1x128xf32, #tpu.memory_space<vmem>>, %arg4: memref<1x128xf32, #tpu.memory_space<vmem>>, %arg5: memref<128x128xbf16, #tpu.memory_space<vmem>>, %arg6: memref<1x128xf32, #tpu.memory_space<vmem>>, %arg7: memref<1x128xf32, #tpu.memory_space<vmem>>, %arg8: memref<8x128xbf16, #tpu.memory_space<vmem>>, %arg9: memref<8x128xbf16, #tpu.memory_space<vmem>>) attributes {dimension_semantics = [#tpu.dimension_semantics<parallel>], iteration_bounds = array<i64: 1>, scalar_prefetch = 0 : i64, scratch_operands = 0 : i64, tpu.core_type = #tpu.core_type<tc>, window_params = [{transform_indices = @transform_0, window_bounds = array<i64: 8, 1152>}, {pipeline_mode = #tpu.pipeline_mode<synchronous>, transform_indices = @transform_1, window_bounds = array<i64: 1152, 128>}, {pipeline_mode = #tpu.pipeline_mode<synchronous>, transform_indices = @transform_2, window_bounds = array<i64: 1, 128>}, {pipeline_mode = #tpu.pipeline_mode<synchronous>, transform_indices = @transform_3, window_bounds = array<i64: 1, 128>}, {pipeline_mode = #tpu.pipeline_mode<synchronous>, transform_indices = @transform_4, window_bounds = array<i64: 128, 128>}, {pipeline_mode = #tpu.pipeline_mode<synchronous>, transform_indices = @transform_5, window_bounds = array<i64: 1, 128>}, {pipeline_mode = #tpu.pipeline_mode<synchronous>, transform_indices = @transform_6, window_bounds = array<i64: 1, 128>}, {transform_indices = @transform_7, window_bounds = array<i64: 8, 128>}, {transform_indices = @transform_8, window_bounds = array<i64: 8, 128>}]} {
    %c0 = arith.constant 0 : index
    %c0_0 = arith.constant 0 : index
    %0 = vector.load %arg1[%c0, %c0_0] : memref<8x1152xbf16, #tpu.memory_space<vmem>>, vector<8x1152xbf16>
    %c0_1 = arith.constant 0 : index
    %c0_2 = arith.constant 0 : index
    %1 = vector.load %arg2[%c0_1, %c0_2] : memref<1152x128xbf16, #tpu.memory_space<vmem>>, vector<1152x128xbf16>
    %cst = arith.constant dense<0.000000e+00> : vector<8x128xf32>
    %2 = tpu.matmul %0, %1, %cst {dimension_numbers = #tpu.dot_dimension_numbers<[1], [0], [0], [1], [0, 0, 1, 1], [], []>} : vector<8x1152xbf16>, vector<1152x128xbf16>, vector<8x128xf32> -> vector<8x128xf32>
    %c0_3 = arith.constant 0 : index
    %c0_4 = arith.constant 0 : index
    %3 = vector.load %arg3[%c0_3, %c0_4] : memref<1x128xf32, #tpu.memory_space<vmem>>, vector<1x128xf32>
    %4 = vector.broadcast %3 : vector<1x128xf32> to vector<8x128xf32>
    %5 = arith.mulf %2, %4 : vector<8x128xf32>
    %c0_5 = arith.constant 0 : index
    %c0_6 = arith.constant 0 : index
    %6 = vector.load %arg4[%c0_5, %c0_6] : memref<1x128xf32, #tpu.memory_space<vmem>>, vector<1x128xf32>
    %7 = vector.broadcast %6 : vector<1x128xf32> to vector<8x128xf32>
    %8 = arith.addf %5, %7 : vector<8x128xf32>
    %cst_7 = arith.constant 0.000000e+00 : f32
    %9 = vector.broadcast %cst_7 : f32 to vector<8x128xf32>
    %10 = arith.maximumf %8, %9 : vector<8x128xf32>
    %11 = arith.truncf %10 : vector<8x128xf32> to vector<8x128xbf16>
    %c0_8 = arith.constant 0 : index
    %c0_9 = arith.constant 0 : index
    %12 = vector.load %arg8[%c0_8, %c0_9] : memref<8x128xbf16, #tpu.memory_space<vmem>>, vector<8x128xbf16>
    tpu.vector_store %arg8[%c0_8, %c0_9], %11 {strides = array<i32>} : memref<8x128xbf16, #tpu.memory_space<vmem>>, vector<8x128xbf16>,
    %13 = vector.extract_strided_slice %0 {offsets = [0, 512], sizes = [8, 128], strides = [1, 1]} : vector<8x1152xbf16> to vector<8x128xbf16>
    %c0_10 = arith.constant 0 : index
    %c0_11 = arith.constant 0 : index
    %14 = vector.load %arg5[%c0_10, %c0_11] : memref<128x128xbf16, #tpu.memory_space<vmem>>, vector<128x128xbf16>
    %cst_12 = arith.constant dense<0.000000e+00> : vector<8x128xf32>
    %15 = tpu.matmul %13, %14, %cst_12 {dimension_numbers = #tpu.dot_dimension_numbers<[1], [0], [0], [1], [0, 0, 1, 1], [], []>} : vector<8x128xbf16>, vector<128x128xbf16>, vector<8x128xf32> -> vector<8x128xf32>
    %c0_13 = arith.constant 0 : index
    %c0_14 = arith.constant 0 : index
    %16 = vector.load %arg6[%c0_13, %c0_14] : memref<1x128xf32, #tpu.memory_space<vmem>>, vector<1x128xf32>
    %17 = vector.broadcast %16 : vector<1x128xf32> to vector<8x128xf32>
    %18 = arith.mulf %15, %17 : vector<8x128xf32>
    %c0_15 = arith.constant 0 : index
    %c0_16 = arith.constant 0 : index
    %19 = vector.load %arg7[%c0_15, %c0_16] : memref<1x128xf32, #tpu.memory_space<vmem>>, vector<1x128xf32>
    %20 = vector.broadcast %19 : vector<1x128xf32> to vector<8x128xf32>
    %21 = arith.addf %18, %20 : vector<8x128xf32>
    %22 = arith.truncf %21 : vector<8x128xf32> to vector<8x128xbf16>
    %c0_17 = arith.constant 0 : index
    %c0_18 = arith.constant 0 : index
    %23 = vector.load %arg9[%c0_17, %c0_18] : memref<8x128xbf16, #tpu.memory_space<vmem>>, vector<8x128xbf16>
    tpu.vector_store %arg9[%c0_17, %c0_18], %22 {strides = array<i32>} : memref<8x128xbf16, #tpu.memory_space<vmem>>, vector<8x128xbf16>,
    return
  }
  func.func @transform_0(%arg0: i32) -> (i32, i32) {
    %c0_i32 = arith.constant 0 : i32
    %c0_i32_0 = arith.constant 0 : i32
    return %arg0, %c0_i32 : i32, i32
  }
  func.func @transform_1(%arg0: i32) -> (i32, i32) {
    %c0_i32 = arith.constant 0 : i32
    %c0_i32_0 = arith.constant 0 : i32
    %c0_i32_1 = arith.constant 0 : i32
    return %c0_i32, %c0_i32_0 : i32, i32
  }
  func.func @transform_2(%arg0: i32) -> (i32, i32) {
    %c0_i32 = arith.constant 0 : i32
    %c0_i32_0 = arith.constant 0 : i32
    %c0_i32_1 = arith.constant 0 : i32
    return %c0_i32, %c0_i32_0 : i32, i32
  }
  func.func @transform_3(%arg0: i32) -> (i32, i32) {
    %c0_i32 = arith.constant 0 : i32
    %c0_i32_0 = arith.constant 0 : i32
    %c0_i32_1 = arith.constant 0 : i32
    return %c0_i32, %c0_i32_0 : i32, i32
  }
  func.func @transform_4(%arg0: i32) -> (i32, i32) {
    %c0_i32 = arith.constant 0 : i32
    %c0_i32_0 = arith.constant 0 : i32
    %c0_i32_1 = arith.constant 0 : i32
    return %c0_i32, %c0_i32_0 : i32, i32
  }
  func.func @transform_5(%arg0: i32) -> (i32, i32) {
    %c0_i32 = arith.constant 0 : i32
    %c0_i32_0 = arith.constant 0 : i32
    %c0_i32_1 = arith.constant 0 : i32
    return %c0_i32, %c0_i32_0 : i32, i32
  }
  func.func @transform_6(%arg0: i32) -> (i32, i32) {
    %c0_i32 = arith.constant 0 : i32
    %c0_i32_0 = arith.constant 0 : i32
    %c0_i32_1 = arith.constant 0 : i32
    return %c0_i32, %c0_i32_0 : i32, i32
  }
  func.func @transform_7(%arg0: i32) -> (i32, i32) {
    %c0_i32 = arith.constant 0 : i32
    %c0_i32_0 = arith.constant 0 : i32
    return %arg0, %c0_i32 : i32, i32
  }
  func.func @transform_8(%arg0: i32) -> (i32, i32) {
    %c0_i32 = arith.constant 0 : i32
    %c0_i32_0 = arith.constant 0 : i32
    return %arg0, %c0_i32 : i32, i32
  }
}

module attributes {stable_mosaic.version = 11 : i64} {
  func.func @_mm_kernel(%arg0: i32, %arg1: memref<8x1152xbf16, #tpu.memory_space<vmem>>, %arg2: memref<1152x128xbf16, #tpu.memory_space<vmem>>, %arg3: memref<1x128xf32, #tpu.memory_space<vmem>>, %arg4: memref<1x128xf32, #tpu.memory_space<vmem>>, %arg5: memref<8x128xbf16, #tpu.memory_space<vmem>>) attributes {dimension_semantics = [#tpu.dimension_semantics<parallel>], iteration_bounds = array<i64: 1>, scalar_prefetch = 0 : i64, scratch_operands = 0 : i64, tpu.core_type = #tpu.core_type<tc>, window_params = [{transform_indices = @transform_0, window_bounds = array<i64: 8, 1152>}, {pipeline_mode = #tpu.pipeline_mode<synchronous>, transform_indices = @transform_1, window_bounds = array<i64: 1152, 128>}, {pipeline_mode = #tpu.pipeline_mode<synchronous>, transform_indices = @transform_2, window_bounds = array<i64: 1, 128>}, {pipeline_mode = #tpu.pipeline_mode<synchronous>, transform_indices = @transform_3, window_bounds = array<i64: 1, 128>}, {transform_indices = @transform_4, window_bounds = array<i64: 8, 128>}]} {
    %c0 = arith.constant 0 : index
    %c0_0 = arith.constant 0 : index
    %0 = vector.load %arg1[%c0, %c0_0] : memref<8x1152xbf16, #tpu.memory_space<vmem>>, vector<8x1152xbf16>
    %c0_1 = arith.constant 0 : index
    %c0_2 = arith.constant 0 : index
    %1 = vector.load %arg2[%c0_1, %c0_2] : memref<1152x128xbf16, #tpu.memory_space<vmem>>, vector<1152x128xbf16>
    %cst = arith.constant dense<0.000000e+00> : vector<8x128xf32>
    %2 = tpu.matmul %0, %1, %cst {dimension_numbers = #tpu.dot_dimension_numbers<[1], [0], [0], [1], [0, 0, 1, 1], [], []>} : vector<8x1152xbf16>, vector<1152x128xbf16>, vector<8x128xf32> -> vector<8x128xf32>
    %c0_3 = arith.constant 0 : index
    %c0_4 = arith.constant 0 : index
    %3 = vector.load %arg3[%c0_3, %c0_4] : memref<1x128xf32, #tpu.memory_space<vmem>>, vector<1x128xf32>
    %4 = vector.broadcast %3 : vector<1x128xf32> to vector<8x128xf32>
    %5 = arith.mulf %2, %4 : vector<8x128xf32>
    %c0_5 = arith.constant 0 : index
    %c0_6 = arith.constant 0 : index
    %6 = vector.load %arg4[%c0_5, %c0_6] : memref<1x128xf32, #tpu.memory_space<vmem>>, vector<1x128xf32>
    %7 = vector.broadcast %6 : vector<1x128xf32> to vector<8x128xf32>
    %8 = arith.addf %5, %7 : vector<8x128xf32>
    %cst_7 = arith.constant 0.000000e+00 : f32
    %9 = vector.broadcast %cst_7 : f32 to vector<8x128xf32>
    %10 = arith.maximumf %8, %9 : vector<8x128xf32>
    %11 = arith.truncf %10 : vector<8x128xf32> to vector<8x128xbf16>
    %c0_8 = arith.constant 0 : index
    %c0_9 = arith.constant 0 : index
    %12 = vector.load %arg5[%c0_8, %c0_9] : memref<8x128xbf16, #tpu.memory_space<vmem>>, vector<8x128xbf16>
    tpu.vector_store %arg5[%c0_8, %c0_9], %11 {strides = array<i32>} : memref<8x128xbf16, #tpu.memory_space<vmem>>, vector<8x128xbf16>,
    return
  }
  func.func @transform_0(%arg0: i32) -> (i32, i32) {
    %c0_i32 = arith.constant 0 : i32
    %c0_i32_0 = arith.constant 0 : i32
    return %arg0, %c0_i32 : i32, i32
  }
  func.func @transform_1(%arg0: i32) -> (i32, i32) {
    %c0_i32 = arith.constant 0 : i32
    %c0_i32_0 = arith.constant 0 : i32
    %c0_i32_1 = arith.constant 0 : i32
    return %c0_i32, %c0_i32_0 : i32, i32
  }
  func.func @transform_2(%arg0: i32) -> (i32, i32) {
    %c0_i32 = arith.constant 0 : i32
    %c0_i32_0 = arith.constant 0 : i32
    %c0_i32_1 = arith.constant 0 : i32
    return %c0_i32, %c0_i32_0 : i32, i32
  }
  func.func @transform_3(%arg0: i32) -> (i32, i32) {
    %c0_i32 = arith.constant 0 : i32
    %c0_i32_0 = arith.constant 0 : i32
    %c0_i32_1 = arith.constant 0 : i32
    return %c0_i32, %c0_i32_0 : i32, i32
  }
  func.func @transform_4(%arg0: i32) -> (i32, i32) {
    %c0_i32 = arith.constant 0 : i32
    %c0_i32_0 = arith.constant 0 : i32
    return %arg0, %c0_i32 : i32, i32
  }
}

module attributes {stable_mosaic.version = 11 : i64} {
  func.func @_mm_res_kernel(%arg0: i32, %arg1: memref<8x1152xbf16, #tpu.memory_space<vmem>>, %arg2: memref<1152x128xbf16, #tpu.memory_space<vmem>>, %arg3: memref<1x128xf32, #tpu.memory_space<vmem>>, %arg4: memref<1x128xf32, #tpu.memory_space<vmem>>, %arg5: memref<8x128xbf16, #tpu.memory_space<vmem>>, %arg6: memref<8x128xbf16, #tpu.memory_space<vmem>>) attributes {dimension_semantics = [#tpu.dimension_semantics<parallel>], iteration_bounds = array<i64: 1>, scalar_prefetch = 0 : i64, scratch_operands = 0 : i64, tpu.core_type = #tpu.core_type<tc>, window_params = [{transform_indices = @transform_0, window_bounds = array<i64: 8, 1152>}, {pipeline_mode = #tpu.pipeline_mode<synchronous>, transform_indices = @transform_1, window_bounds = array<i64: 1152, 128>}, {pipeline_mode = #tpu.pipeline_mode<synchronous>, transform_indices = @transform_2, window_bounds = array<i64: 1, 128>}, {pipeline_mode = #tpu.pipeline_mode<synchronous>, transform_indices = @transform_3, window_bounds = array<i64: 1, 128>}, {transform_indices = @transform_4, window_bounds = array<i64: 8, 128>}, {transform_indices = @transform_5, window_bounds = array<i64: 8, 128>}]} {
    %c0 = arith.constant 0 : index
    %c0_0 = arith.constant 0 : index
    %0 = vector.load %arg1[%c0, %c0_0] : memref<8x1152xbf16, #tpu.memory_space<vmem>>, vector<8x1152xbf16>
    %c0_1 = arith.constant 0 : index
    %c0_2 = arith.constant 0 : index
    %1 = vector.load %arg2[%c0_1, %c0_2] : memref<1152x128xbf16, #tpu.memory_space<vmem>>, vector<1152x128xbf16>
    %cst = arith.constant dense<0.000000e+00> : vector<8x128xf32>
    %2 = tpu.matmul %0, %1, %cst {dimension_numbers = #tpu.dot_dimension_numbers<[1], [0], [0], [1], [0, 0, 1, 1], [], []>} : vector<8x1152xbf16>, vector<1152x128xbf16>, vector<8x128xf32> -> vector<8x128xf32>
    %c0_3 = arith.constant 0 : index
    %c0_4 = arith.constant 0 : index
    %3 = vector.load %arg3[%c0_3, %c0_4] : memref<1x128xf32, #tpu.memory_space<vmem>>, vector<1x128xf32>
    %4 = vector.broadcast %3 : vector<1x128xf32> to vector<8x128xf32>
    %5 = arith.mulf %2, %4 : vector<8x128xf32>
    %c0_5 = arith.constant 0 : index
    %c0_6 = arith.constant 0 : index
    %6 = vector.load %arg4[%c0_5, %c0_6] : memref<1x128xf32, #tpu.memory_space<vmem>>, vector<1x128xf32>
    %7 = vector.broadcast %6 : vector<1x128xf32> to vector<8x128xf32>
    %8 = arith.addf %5, %7 : vector<8x128xf32>
    %c0_7 = arith.constant 0 : index
    %c0_8 = arith.constant 0 : index
    %9 = vector.load %arg5[%c0_7, %c0_8] : memref<8x128xbf16, #tpu.memory_space<vmem>>, vector<8x128xbf16>
    %10 = arith.extf %9 : vector<8x128xbf16> to vector<8x128xf32>
    %11 = arith.addf %8, %10 : vector<8x128xf32>
    %cst_9 = arith.constant 0.000000e+00 : f32
    %12 = vector.broadcast %cst_9 : f32 to vector<8x128xf32>
    %13 = arith.maximumf %11, %12 : vector<8x128xf32>
    %14 = arith.truncf %13 : vector<8x128xf32> to vector<8x128xbf16>
    %c0_10 = arith.constant 0 : index
    %c0_11 = arith.constant 0 : index
    %15 = vector.load %arg6[%c0_10, %c0_11] : memref<8x128xbf16, #tpu.memory_space<vmem>>, vector<8x128xbf16>
    tpu.vector_store %arg6[%c0_10, %c0_11], %14 {strides = array<i32>} : memref<8x128xbf16, #tpu.memory_space<vmem>>, vector<8x128xbf16>,
    return
  }
  func.func @transform_0(%arg0: i32) -> (i32, i32) {
    %c0_i32 = arith.constant 0 : i32
    %c0_i32_0 = arith.constant 0 : i32
    return %arg0, %c0_i32 : i32, i32
  }
  func.func @transform_1(%arg0: i32) -> (i32, i32) {
    %c0_i32 = arith.constant 0 : i32
    %c0_i32_0 = arith.constant 0 : i32
    %c0_i32_1 = arith.constant 0 : i32
    return %c0_i32, %c0_i32_0 : i32, i32
  }
  func.func @transform_2(%arg0: i32) -> (i32, i32) {
    %c0_i32 = arith.constant 0 : i32
    %c0_i32_0 = arith.constant 0 : i32
    %c0_i32_1 = arith.constant 0 : i32
    return %c0_i32, %c0_i32_0 : i32, i32
  }
  func.func @transform_3(%arg0: i32) -> (i32, i32) {
    %c0_i32 = arith.constant 0 : i32
    %c0_i32_0 = arith.constant 0 : i32
    %c0_i32_1 = arith.constant 0 : i32
    return %c0_i32, %c0_i32_0 : i32, i32
  }
  func.func @transform_4(%arg0: i32) -> (i32, i32) {
    %c0_i32 = arith.constant 0 : i32
    %c0_i32_0 = arith.constant 0 : i32
    return %arg0, %c0_i32 : i32, i32
  }
  func.func @transform_5(%arg0: i32) -> (i32, i32) {
    %c0_i32 = arith.constant 0 : i32
    %c0_i32_0 = arith.constant 0 : i32
    return %arg0, %c0_i32 : i32, i32
  }
}

module attributes {stable_mosaic.version = 11 : i64} {
  func.func @_mm_dual_kernel(%arg0: i32, %arg1: memref<16x1152xbf16, #tpu.memory_space<vmem>>, %arg2: memref<1152x128xbf16, #tpu.memory_space<vmem>>, %arg3: memref<1x128xf32, #tpu.memory_space<vmem>>, %arg4: memref<1x128xf32, #tpu.memory_space<vmem>>, %arg5: memref<128x128xbf16, #tpu.memory_space<vmem>>, %arg6: memref<1x128xf32, #tpu.memory_space<vmem>>, %arg7: memref<1x128xf32, #tpu.memory_space<vmem>>, %arg8: memref<16x128xbf16, #tpu.memory_space<vmem>>, %arg9: memref<16x128xbf16, #tpu.memory_space<vmem>>) attributes {dimension_semantics = [#tpu.dimension_semantics<parallel>], iteration_bounds = array<i64: 1>, scalar_prefetch = 0 : i64, scratch_operands = 0 : i64, tpu.core_type = #tpu.core_type<tc>, window_params = [{transform_indices = @transform_0, window_bounds = array<i64: 16, 1152>}, {pipeline_mode = #tpu.pipeline_mode<synchronous>, transform_indices = @transform_1, window_bounds = array<i64: 1152, 128>}, {pipeline_mode = #tpu.pipeline_mode<synchronous>, transform_indices = @transform_2, window_bounds = array<i64: 1, 128>}, {pipeline_mode = #tpu.pipeline_mode<synchronous>, transform_indices = @transform_3, window_bounds = array<i64: 1, 128>}, {pipeline_mode = #tpu.pipeline_mode<synchronous>, transform_indices = @transform_4, window_bounds = array<i64: 128, 128>}, {pipeline_mode = #tpu.pipeline_mode<synchronous>, transform_indices = @transform_5, window_bounds = array<i64: 1, 128>}, {pipeline_mode = #tpu.pipeline_mode<synchronous>, transform_indices = @transform_6, window_bounds = array<i64: 1, 128>}, {transform_indices = @transform_7, window_bounds = array<i64: 16, 128>}, {transform_indices = @transform_8, window_bounds = array<i64: 16, 128>}]} {
    %c0 = arith.constant 0 : index
    %c0_0 = arith.constant 0 : index
    %0 = vector.load %arg1[%c0, %c0_0] : memref<16x1152xbf16, #tpu.memory_space<vmem>>, vector<16x1152xbf16>
    %c0_1 = arith.constant 0 : index
    %c0_2 = arith.constant 0 : index
    %1 = vector.load %arg2[%c0_1, %c0_2] : memref<1152x128xbf16, #tpu.memory_space<vmem>>, vector<1152x128xbf16>
    %cst = arith.constant dense<0.000000e+00> : vector<16x128xf32>
    %2 = tpu.matmul %0, %1, %cst {dimension_numbers = #tpu.dot_dimension_numbers<[1], [0], [0], [1], [0, 0, 1, 1], [], []>} : vector<16x1152xbf16>, vector<1152x128xbf16>, vector<16x128xf32> -> vector<16x128xf32>
    %c0_3 = arith.constant 0 : index
    %c0_4 = arith.constant 0 : index
    %3 = vector.load %arg3[%c0_3, %c0_4] : memref<1x128xf32, #tpu.memory_space<vmem>>, vector<1x128xf32>
    %4 = vector.broadcast %3 : vector<1x128xf32> to vector<16x128xf32>
    %5 = arith.mulf %2, %4 : vector<16x128xf32>
    %c0_5 = arith.constant 0 : index
    %c0_6 = arith.constant 0 : index
    %6 = vector.load %arg4[%c0_5, %c0_6] : memref<1x128xf32, #tpu.memory_space<vmem>>, vector<1x128xf32>
    %7 = vector.broadcast %6 : vector<1x128xf32> to vector<16x128xf32>
    %8 = arith.addf %5, %7 : vector<16x128xf32>
    %cst_7 = arith.constant 0.000000e+00 : f32
    %9 = vector.broadcast %cst_7 : f32 to vector<16x128xf32>
    %10 = arith.maximumf %8, %9 : vector<16x128xf32>
    %11 = arith.truncf %10 : vector<16x128xf32> to vector<16x128xbf16>
    %c0_8 = arith.constant 0 : index
    %c0_9 = arith.constant 0 : index
    %12 = vector.load %arg8[%c0_8, %c0_9] : memref<16x128xbf16, #tpu.memory_space<vmem>>, vector<16x128xbf16>
    tpu.vector_store %arg8[%c0_8, %c0_9], %11 {strides = array<i32>} : memref<16x128xbf16, #tpu.memory_space<vmem>>, vector<16x128xbf16>,
    %13 = vector.extract_strided_slice %0 {offsets = [0, 512], sizes = [16, 128], strides = [1, 1]} : vector<16x1152xbf16> to vector<16x128xbf16>
    %c0_10 = arith.constant 0 : index
    %c0_11 = arith.constant 0 : index
    %14 = vector.load %arg5[%c0_10, %c0_11] : memref<128x128xbf16, #tpu.memory_space<vmem>>, vector<128x128xbf16>
    %cst_12 = arith.constant dense<0.000000e+00> : vector<16x128xf32>
    %15 = tpu.matmul %13, %14, %cst_12 {dimension_numbers = #tpu.dot_dimension_numbers<[1], [0], [0], [1], [0, 0, 1, 1], [], []>} : vector<16x128xbf16>, vector<128x128xbf16>, vector<16x128xf32> -> vector<16x128xf32>
    %c0_13 = arith.constant 0 : index
    %c0_14 = arith.constant 0 : index
    %16 = vector.load %arg6[%c0_13, %c0_14] : memref<1x128xf32, #tpu.memory_space<vmem>>, vector<1x128xf32>
    %17 = vector.broadcast %16 : vector<1x128xf32> to vector<16x128xf32>
    %18 = arith.mulf %15, %17 : vector<16x128xf32>
    %c0_15 = arith.constant 0 : index
    %c0_16 = arith.constant 0 : index
    %19 = vector.load %arg7[%c0_15, %c0_16] : memref<1x128xf32, #tpu.memory_space<vmem>>, vector<1x128xf32>
    %20 = vector.broadcast %19 : vector<1x128xf32> to vector<16x128xf32>
    %21 = arith.addf %18, %20 : vector<16x128xf32>
    %22 = arith.truncf %21 : vector<16x128xf32> to vector<16x128xbf16>
    %c0_17 = arith.constant 0 : index
    %c0_18 = arith.constant 0 : index
    %23 = vector.load %arg9[%c0_17, %c0_18] : memref<16x128xbf16, #tpu.memory_space<vmem>>, vector<16x128xbf16>
    tpu.vector_store %arg9[%c0_17, %c0_18], %22 {strides = array<i32>} : memref<16x128xbf16, #tpu.memory_space<vmem>>, vector<16x128xbf16>,
    return
  }
  func.func @transform_0(%arg0: i32) -> (i32, i32) {
    %c0_i32 = arith.constant 0 : i32
    %c0_i32_0 = arith.constant 0 : i32
    return %arg0, %c0_i32 : i32, i32
  }
  func.func @transform_1(%arg0: i32) -> (i32, i32) {
    %c0_i32 = arith.constant 0 : i32
    %c0_i32_0 = arith.constant 0 : i32
    %c0_i32_1 = arith.constant 0 : i32
    return %c0_i32, %c0_i32_0 : i32, i32
  }
  func.func @transform_2(%arg0: i32) -> (i32, i32) {
    %c0_i32 = arith.constant 0 : i32
    %c0_i32_0 = arith.constant 0 : i32
    %c0_i32_1 = arith.constant 0 : i32
    return %c0_i32, %c0_i32_0 : i32, i32
  }
  func.func @transform_3(%arg0: i32) -> (i32, i32) {
    %c0_i32 = arith.constant 0 : i32
    %c0_i32_0 = arith.constant 0 : i32
    %c0_i32_1 = arith.constant 0 : i32
    return %c0_i32, %c0_i32_0 : i32, i32
  }
  func.func @transform_4(%arg0: i32) -> (i32, i32) {
    %c0_i32 = arith.constant 0 : i32
    %c0_i32_0 = arith.constant 0 : i32
    %c0_i32_1 = arith.constant 0 : i32
    return %c0_i32, %c0_i32_0 : i32, i32
  }
  func.func @transform_5(%arg0: i32) -> (i32, i32) {
    %c0_i32 = arith.constant 0 : i32
    %c0_i32_0 = arith.constant 0 : i32
    %c0_i32_1 = arith.constant 0 : i32
    return %c0_i32, %c0_i32_0 : i32, i32
  }
  func.func @transform_6(%arg0: i32) -> (i32, i32) {
    %c0_i32 = arith.constant 0 : i32
    %c0_i32_0 = arith.constant 0 : i32
    %c0_i32_1 = arith.constant 0 : i32
    return %c0_i32, %c0_i32_0 : i32, i32
  }
  func.func @transform_7(%arg0: i32) -> (i32, i32) {
    %c0_i32 = arith.constant 0 : i32
    %c0_i32_0 = arith.constant 0 : i32
    return %arg0, %c0_i32 : i32, i32
  }
  func.func @transform_8(%arg0: i32) -> (i32, i32) {
    %c0_i32 = arith.constant 0 : i32
    %c0_i32_0 = arith.constant 0 : i32
    return %arg0, %c0_i32 : i32, i32
  }
}

module attributes {stable_mosaic.version = 11 : i64} {
  func.func @_mm_res_kernel(%arg0: i32, %arg1: memref<16x1152xbf16, #tpu.memory_space<vmem>>, %arg2: memref<1152x128xbf16, #tpu.memory_space<vmem>>, %arg3: memref<1x128xf32, #tpu.memory_space<vmem>>, %arg4: memref<1x128xf32, #tpu.memory_space<vmem>>, %arg5: memref<16x128xbf16, #tpu.memory_space<vmem>>, %arg6: memref<16x128xbf16, #tpu.memory_space<vmem>>) attributes {dimension_semantics = [#tpu.dimension_semantics<parallel>], iteration_bounds = array<i64: 1>, scalar_prefetch = 0 : i64, scratch_operands = 0 : i64, tpu.core_type = #tpu.core_type<tc>, window_params = [{transform_indices = @transform_0, window_bounds = array<i64: 16, 1152>}, {pipeline_mode = #tpu.pipeline_mode<synchronous>, transform_indices = @transform_1, window_bounds = array<i64: 1152, 128>}, {pipeline_mode = #tpu.pipeline_mode<synchronous>, transform_indices = @transform_2, window_bounds = array<i64: 1, 128>}, {pipeline_mode = #tpu.pipeline_mode<synchronous>, transform_indices = @transform_3, window_bounds = array<i64: 1, 128>}, {transform_indices = @transform_4, window_bounds = array<i64: 16, 128>}, {transform_indices = @transform_5, window_bounds = array<i64: 16, 128>}]} {
    %c0 = arith.constant 0 : index
    %c0_0 = arith.constant 0 : index
    %0 = vector.load %arg1[%c0, %c0_0] : memref<16x1152xbf16, #tpu.memory_space<vmem>>, vector<16x1152xbf16>
    %c0_1 = arith.constant 0 : index
    %c0_2 = arith.constant 0 : index
    %1 = vector.load %arg2[%c0_1, %c0_2] : memref<1152x128xbf16, #tpu.memory_space<vmem>>, vector<1152x128xbf16>
    %cst = arith.constant dense<0.000000e+00> : vector<16x128xf32>
    %2 = tpu.matmul %0, %1, %cst {dimension_numbers = #tpu.dot_dimension_numbers<[1], [0], [0], [1], [0, 0, 1, 1], [], []>} : vector<16x1152xbf16>, vector<1152x128xbf16>, vector<16x128xf32> -> vector<16x128xf32>
    %c0_3 = arith.constant 0 : index
    %c0_4 = arith.constant 0 : index
    %3 = vector.load %arg3[%c0_3, %c0_4] : memref<1x128xf32, #tpu.memory_space<vmem>>, vector<1x128xf32>
    %4 = vector.broadcast %3 : vector<1x128xf32> to vector<16x128xf32>
    %5 = arith.mulf %2, %4 : vector<16x128xf32>
    %c0_5 = arith.constant 0 : index
    %c0_6 = arith.constant 0 : index
    %6 = vector.load %arg4[%c0_5, %c0_6] : memref<1x128xf32, #tpu.memory_space<vmem>>, vector<1x128xf32>
    %7 = vector.broadcast %6 : vector<1x128xf32> to vector<16x128xf32>
    %8 = arith.addf %5, %7 : vector<16x128xf32>
    %c0_7 = arith.constant 0 : index
    %c0_8 = arith.constant 0 : index
    %9 = vector.load %arg5[%c0_7, %c0_8] : memref<16x128xbf16, #tpu.memory_space<vmem>>, vector<16x128xbf16>
    %10 = arith.extf %9 : vector<16x128xbf16> to vector<16x128xf32>
    %11 = arith.addf %8, %10 : vector<16x128xf32>
    %cst_9 = arith.constant 0.000000e+00 : f32
    %12 = vector.broadcast %cst_9 : f32 to vector<16x128xf32>
    %13 = arith.maximumf %11, %12 : vector<16x128xf32>
    %14 = arith.truncf %13 : vector<16x128xf32> to vector<16x128xbf16>
    %c0_10 = arith.constant 0 : index
    %c0_11 = arith.constant 0 : index
    %15 = vector.load %arg6[%c0_10, %c0_11] : memref<16x128xbf16, #tpu.memory_space<vmem>>, vector<16x128xbf16>
    tpu.vector_store %arg6[%c0_10, %c0_11], %14 {strides = array<i32>} : memref<16x128xbf16, #tpu.memory_space<vmem>>, vector<16x128xbf16>,
    return
  }
  func.func @transform_0(%arg0: i32) -> (i32, i32) {
    %c0_i32 = arith.constant 0 : i32
    %c0_i32_0 = arith.constant 0 : i32
    return %arg0, %c0_i32 : i32, i32
  }
  func.func @transform_1(%arg0: i32) -> (i32, i32) {
    %c0_i32 = arith.constant 0 : i32
    %c0_i32_0 = arith.constant 0 : i32
    %c0_i32_1 = arith.constant 0 : i32
    return %c0_i32, %c0_i32_0 : i32, i32
  }
  func.func @transform_2(%arg0: i32) -> (i32, i32) {
    %c0_i32 = arith.constant 0 : i32
    %c0_i32_0 = arith.constant 0 : i32
    %c0_i32_1 = arith.constant 0 : i32
    return %c0_i32, %c0_i32_0 : i32, i32
  }
  func.func @transform_3(%arg0: i32) -> (i32, i32) {
    %c0_i32 = arith.constant 0 : i32
    %c0_i32_0 = arith.constant 0 : i32
    %c0_i32_1 = arith.constant 0 : i32
    return %c0_i32, %c0_i32_0 : i32, i32
  }
  func.func @transform_4(%arg0: i32) -> (i32, i32) {
    %c0_i32 = arith.constant 0 : i32
    %c0_i32_0 = arith.constant 0 : i32
    return %arg0, %c0_i32 : i32, i32
  }
  func.func @transform_5(%arg0: i32) -> (i32, i32) {
    %c0_i32 = arith.constant 0 : i32
    %c0_i32_0 = arith.constant 0 : i32
    return %arg0, %c0_i32 : i32, i32
  }
}

module attributes {stable_mosaic.version = 11 : i64} {
  func.func @_mm_kernel(%arg0: i32, %arg1: memref<16x1152xbf16, #tpu.memory_space<vmem>>, %arg2: memref<1152x128xbf16, #tpu.memory_space<vmem>>, %arg3: memref<1x128xf32, #tpu.memory_space<vmem>>, %arg4: memref<1x128xf32, #tpu.memory_space<vmem>>, %arg5: memref<16x128xbf16, #tpu.memory_space<vmem>>) attributes {dimension_semantics = [#tpu.dimension_semantics<parallel>], iteration_bounds = array<i64: 1>, scalar_prefetch = 0 : i64, scratch_operands = 0 : i64, tpu.core_type = #tpu.core_type<tc>, window_params = [{transform_indices = @transform_0, window_bounds = array<i64: 16, 1152>}, {pipeline_mode = #tpu.pipeline_mode<synchronous>, transform_indices = @transform_1, window_bounds = array<i64: 1152, 128>}, {pipeline_mode = #tpu.pipeline_mode<synchronous>, transform_indices = @transform_2, window_bounds = array<i64: 1, 128>}, {pipeline_mode = #tpu.pipeline_mode<synchronous>, transform_indices = @transform_3, window_bounds = array<i64: 1, 128>}, {transform_indices = @transform_4, window_bounds = array<i64: 16, 128>}]} {
    %c0 = arith.constant 0 : index
    %c0_0 = arith.constant 0 : index
    %0 = vector.load %arg1[%c0, %c0_0] : memref<16x1152xbf16, #tpu.memory_space<vmem>>, vector<16x1152xbf16>
    %c0_1 = arith.constant 0 : index
    %c0_2 = arith.constant 0 : index
    %1 = vector.load %arg2[%c0_1, %c0_2] : memref<1152x128xbf16, #tpu.memory_space<vmem>>, vector<1152x128xbf16>
    %cst = arith.constant dense<0.000000e+00> : vector<16x128xf32>
    %2 = tpu.matmul %0, %1, %cst {dimension_numbers = #tpu.dot_dimension_numbers<[1], [0], [0], [1], [0, 0, 1, 1], [], []>} : vector<16x1152xbf16>, vector<1152x128xbf16>, vector<16x128xf32> -> vector<16x128xf32>
    %c0_3 = arith.constant 0 : index
    %c0_4 = arith.constant 0 : index
    %3 = vector.load %arg3[%c0_3, %c0_4] : memref<1x128xf32, #tpu.memory_space<vmem>>, vector<1x128xf32>
    %4 = vector.broadcast %3 : vector<1x128xf32> to vector<16x128xf32>
    %5 = arith.mulf %2, %4 : vector<16x128xf32>
    %c0_5 = arith.constant 0 : index
    %c0_6 = arith.constant 0 : index
    %6 = vector.load %arg4[%c0_5, %c0_6] : memref<1x128xf32, #tpu.memory_space<vmem>>, vector<1x128xf32>
    %7 = vector.broadcast %6 : vector<1x128xf32> to vector<16x128xf32>
    %8 = arith.addf %5, %7 : vector<16x128xf32>
    %cst_7 = arith.constant 0.000000e+00 : f32
    %9 = vector.broadcast %cst_7 : f32 to vector<16x128xf32>
    %10 = arith.maximumf %8, %9 : vector<16x128xf32>
    %11 = arith.truncf %10 : vector<16x128xf32> to vector<16x128xbf16>
    %c0_8 = arith.constant 0 : index
    %c0_9 = arith.constant 0 : index
    %12 = vector.load %arg5[%c0_8, %c0_9] : memref<16x128xbf16, #tpu.memory_space<vmem>>, vector<16x128xbf16>
    tpu.vector_store %arg5[%c0_8, %c0_9], %11 {strides = array<i32>} : memref<16x128xbf16, #tpu.memory_space<vmem>>, vector<16x128xbf16>,
    return
  }
  func.func @transform_0(%arg0: i32) -> (i32, i32) {
    %c0_i32 = arith.constant 0 : i32
    %c0_i32_0 = arith.constant 0 : i32
    return %arg0, %c0_i32 : i32, i32
  }
  func.func @transform_1(%arg0: i32) -> (i32, i32) {
    %c0_i32 = arith.constant 0 : i32
    %c0_i32_0 = arith.constant 0 : i32
    %c0_i32_1 = arith.constant 0 : i32
    return %c0_i32, %c0_i32_0 : i32, i32
  }
  func.func @transform_2(%arg0: i32) -> (i32, i32) {
    %c0_i32 = arith.constant 0 : i32
    %c0_i32_0 = arith.constant 0 : i32
    %c0_i32_1 = arith.constant 0 : i32
    return %c0_i32, %c0_i32_0 : i32, i32
  }
  func.func @transform_3(%arg0: i32) -> (i32, i32) {
    %c0_i32 = arith.constant 0 : i32
    %c0_i32_0 = arith.constant 0 : i32
    %c0_i32_1 = arith.constant 0 : i32
    return %c0_i32, %c0_i32_0 : i32, i32
  }
  func.func @transform_4(%arg0: i32) -> (i32, i32) {
    %c0_i32 = arith.constant 0 : i32
    %c0_i32_0 = arith.constant 0 : i32
    return %arg0, %c0_i32 : i32, i32
  }
}

module attributes {stable_mosaic.version = 11 : i64} {
  func.func @_gap_mlp_kernel(%arg0: i32, %arg1: memref<8x8x128xbf16, #tpu.memory_space<vmem>>, %arg2: memref<128x128xbf16, #tpu.memory_space<vmem>>, %arg3: memref<1x128xf32, #tpu.memory_space<vmem>>, %arg4: memref<1x128xf32, #tpu.memory_space<vmem>>, %arg5: memref<128x128xbf16, #tpu.memory_space<vmem>>, %arg6: memref<1x128xf32, #tpu.memory_space<vmem>>, %arg7: memref<8x128xf32, #tpu.memory_space<vmem>>) attributes {dimension_semantics = [#tpu.dimension_semantics<arbitrary>], iteration_bounds = array<i64: 1>, scalar_prefetch = 0 : i64, scratch_operands = 0 : i64, tpu.core_type = #tpu.core_type<tc>, window_params = [{pipeline_mode = #tpu.pipeline_mode<synchronous>, transform_indices = @transform_0, window_bounds = array<i64: 8, 8, 128>}, {pipeline_mode = #tpu.pipeline_mode<synchronous>, transform_indices = @transform_1, window_bounds = array<i64: 128, 128>}, {pipeline_mode = #tpu.pipeline_mode<synchronous>, transform_indices = @transform_2, window_bounds = array<i64: 1, 128>}, {pipeline_mode = #tpu.pipeline_mode<synchronous>, transform_indices = @transform_3, window_bounds = array<i64: 1, 128>}, {pipeline_mode = #tpu.pipeline_mode<synchronous>, transform_indices = @transform_4, window_bounds = array<i64: 128, 128>}, {pipeline_mode = #tpu.pipeline_mode<synchronous>, transform_indices = @transform_5, window_bounds = array<i64: 1, 128>}, {pipeline_mode = #tpu.pipeline_mode<synchronous>, transform_indices = @transform_6, window_bounds = array<i64: 8, 128>}]} {
    %c0 = arith.constant 0 : index
    %c0_0 = arith.constant 0 : index
    %c0_1 = arith.constant 0 : index
    %0 = vector.load %arg1[%c0, %c0_0, %c0_1] : memref<8x8x128xbf16, #tpu.memory_space<vmem>>, vector<8x8x128xbf16>
    %1 = arith.extf %0 : vector<8x8x128xbf16> to vector<8x8x128xf32>
    %cst = arith.constant dense<0.000000e+00> : vector<8x128xf32>
    %2 = vector.multi_reduction <add>, %1, %cst [1] : vector<8x8x128xf32> to vector<8x128xf32>
    %cst_2 = arith.constant 1.000000e+00 : f32
    %3 = vector.broadcast %cst_2 : f32 to vector<8x128xf32>
    %4 = arith.mulf %2, %3 : vector<8x128xf32>
    %5 = arith.truncf %4 : vector<8x128xf32> to vector<8x128xbf16>
    %c0_3 = arith.constant 0 : index
    %c0_4 = arith.constant 0 : index
    %6 = vector.load %arg2[%c0_3, %c0_4] : memref<128x128xbf16, #tpu.memory_space<vmem>>, vector<128x128xbf16>
    %cst_5 = arith.constant dense<0.000000e+00> : vector<8x128xf32>
    %7 = tpu.matmul %5, %6, %cst_5 {dimension_numbers = #tpu.dot_dimension_numbers<[1], [0], [0], [1], [0, 0, 1, 1], [], []>} : vector<8x128xbf16>, vector<128x128xbf16>, vector<8x128xf32> -> vector<8x128xf32>
    %c0_6 = arith.constant 0 : index
    %c0_7 = arith.constant 0 : index
    %8 = vector.load %arg3[%c0_6, %c0_7] : memref<1x128xf32, #tpu.memory_space<vmem>>, vector<1x128xf32>
    %9 = vector.broadcast %8 : vector<1x128xf32> to vector<8x128xf32>
    %10 = arith.mulf %7, %9 : vector<8x128xf32>
    %c0_8 = arith.constant 0 : index
    %c0_9 = arith.constant 0 : index
    %11 = vector.load %arg4[%c0_8, %c0_9] : memref<1x128xf32, #tpu.memory_space<vmem>>, vector<1x128xf32>
    %12 = vector.broadcast %11 : vector<1x128xf32> to vector<8x128xf32>
    %13 = arith.addf %10, %12 : vector<8x128xf32>
    %cst_10 = arith.constant 0.000000e+00 : f32
    %14 = vector.broadcast %cst_10 : f32 to vector<8x128xf32>
    %15 = arith.maximumf %13, %14 : vector<8x128xf32>
    %16 = arith.truncf %15 : vector<8x128xf32> to vector<8x128xbf16>
    %c0_11 = arith.constant 0 : index
    %c0_12 = arith.constant 0 : index
    %17 = vector.load %arg5[%c0_11, %c0_12] : memref<128x128xbf16, #tpu.memory_space<vmem>>, vector<128x128xbf16>
    %cst_13 = arith.constant dense<0.000000e+00> : vector<8x128xf32>
    %18 = tpu.matmul %16, %17, %cst_13 {dimension_numbers = #tpu.dot_dimension_numbers<[1], [0], [0], [1], [0, 0, 1, 1], [], []>} : vector<8x128xbf16>, vector<128x128xbf16>, vector<8x128xf32> -> vector<8x128xf32>
    %c0_14 = arith.constant 0 : index
    %c0_15 = arith.constant 0 : index
    %19 = vector.load %arg6[%c0_14, %c0_15] : memref<1x128xf32, #tpu.memory_space<vmem>>, vector<1x128xf32>
    %20 = vector.broadcast %19 : vector<1x128xf32> to vector<8x128xf32>
    %21 = arith.addf %18, %20 : vector<8x128xf32>
    %c0_16 = arith.constant 0 : index
    %c0_17 = arith.constant 0 : index
    %22 = vector.load %arg7[%c0_16, %c0_17] : memref<8x128xf32, #tpu.memory_space<vmem>>, vector<8x128xf32>
    tpu.vector_store %arg7[%c0_16, %c0_17], %21 {strides = array<i32>} : memref<8x128xf32, #tpu.memory_space<vmem>>, vector<8x128xf32>,
    return
  }
  func.func @transform_0(%arg0: i32) -> (i32, i32, i32) {
    %c0_i32 = arith.constant 0 : i32
    %c0_i32_0 = arith.constant 0 : i32
    %c0_i32_1 = arith.constant 0 : i32
    %c0_i32_2 = arith.constant 0 : i32
    return %c0_i32, %c0_i32_0, %c0_i32_1 : i32, i32, i32
  }
  func.func @transform_1(%arg0: i32) -> (i32, i32) {
    %c0_i32 = arith.constant 0 : i32
    %c0_i32_0 = arith.constant 0 : i32
    %c0_i32_1 = arith.constant 0 : i32
    return %c0_i32, %c0_i32_0 : i32, i32
  }
  func.func @transform_2(%arg0: i32) -> (i32, i32) {
    %c0_i32 = arith.constant 0 : i32
    %c0_i32_0 = arith.constant 0 : i32
    %c0_i32_1 = arith.constant 0 : i32
    return %c0_i32, %c0_i32_0 : i32, i32
  }
  func.func @transform_3(%arg0: i32) -> (i32, i32) {
    %c0_i32 = arith.constant 0 : i32
    %c0_i32_0 = arith.constant 0 : i32
    %c0_i32_1 = arith.constant 0 : i32
    return %c0_i32, %c0_i32_0 : i32, i32
  }
  func.func @transform_4(%arg0: i32) -> (i32, i32) {
    %c0_i32 = arith.constant 0 : i32
    %c0_i32_0 = arith.constant 0 : i32
    %c0_i32_1 = arith.constant 0 : i32
    return %c0_i32, %c0_i32_0 : i32, i32
  }
  func.func @transform_5(%arg0: i32) -> (i32, i32) {
    %c0_i32 = arith.constant 0 : i32
    %c0_i32_0 = arith.constant 0 : i32
    %c0_i32_1 = arith.constant 0 : i32
    return %c0_i32, %c0_i32_0 : i32, i32
  }
  func.func @transform_6(%arg0: i32) -> (i32, i32) {
    %c0_i32 = arith.constant 0 : i32
    %c0_i32_0 = arith.constant 0 : i32
    %c0_i32_1 = arith.constant 0 : i32
    return %c0_i32, %c0_i32_0 : i32, i32
  }
}

</mosaic_0001>

<bundles_post_ra>
// kernel: byol_forward.22
= control target key start
LH: loop header
LB: loop body
LE: loop exit
PB: predicated region body
PF: predicated region fallthrough
CT: control target
= control target key end

     0   :  { %s424_s12 = smov 0   ;;  %s477_s0 = inlined_call_operand.vmem [shape: bf16[128,128], index: 0, kind: input, shape index: {}]   ;;  %s478_s1 = inlined_call_operand.vmem [shape: bf16[128,128], index: 1, kind: input, shape index: {}]   ;;  %s479_s2 = inlined_call_operand.vmem [shape: bf16[128,128], index: 2, kind: input, shape index: {}]   ;;  %s480_s3 = inlined_call_operand.vmem [shape: bf16[128,128], index: 3, kind: output, shape index: {}]  }
   0x1 LB: > { %s346_s13 = sadd.s32 4294967295, %s402_s12   ;;  %p350_p0 = scmp.ge.s32.totalorder %s402_s12, 1  ;;  %s402_s12 = sphi %s424_s12, %s13_s12  }
   0x2   : > { %p160_p1 = scmp.lt.s32.totalorder %s402_s12, 3 }
   0x4   : > { %p161_p2 = pnand %p350_p0, %p160_p1 }
   0x5   : > { %s351_s14 = sshll.u32 (!%p161_p2), %s346_s13, 3 }
   0x6   : > { %164 = sbr.rel (%p161_p2) target bundleno = 29 (0x1d), region = 32  ;;  %p195_p3 = scmp.lt.s32.totalorder (!%p161_p2), %s351_s14, 15 }
   0xb   : > { %s482_s14 = smov (!%p195_p3, %s351_s14), 15 }
   0xc   : > { %s352_s15 = sshll.u32 %s482_s14, 2 }
   0xd   : > { %s435_s18 = scalar_lea.vmem %s477_s0, %s352_s15  ;;  %s440_s21 = scalar_lea.vmem %s478_s1, %s352_s15 }
   0xe   : > { %s445_s24 = scalar_lea.vmem %s479_s2, %s352_s15  ;;  %v218_v0 = vld [vmem:[%s435_s18] sm:$0xf]  ;;  %v219_v1 = vld [vmem:[%s435_s18 + $0x4] sm:$0xf]  ;;  %v220_v8 = vld [vmem:[%s435_s18 + $0x8] sm:$0xf]  ;;  %s216_s27 = scalar_lea.vmem %s480_s3, %s352_s15 }
   0xf   : > { %v226_v2 = vld [vmem:[%s440_s21] sm:$0xf]  ;;  %v227_v3 = vld [vmem:[%s440_s21 + $0x4] sm:$0xf]  ;;  %v221_v9 = vld [vmem:[%s435_s18 + $0xc] sm:$0xf] }
  0x10   : > { %v234_v4 = vmax.bf16 %v226_v2, %v218_v0  ;;  %v242_v5 = vld [vmem:[%s445_s24] sm:$0xf]  ;;  %v243_v6 = vld [vmem:[%s445_s24 + $0x4] sm:$0xf]  ;;  %v235_v7 = vmax.bf16 %v227_v3, %v219_v1  ;;  %v228_v10 = vld [vmem:[%s440_s21 + $0x8] sm:$0xf] }
  0x11   : > { %v229_v12 = vld [vmem:[%s440_s21 + $0xc] sm:$0xf]  ;;  %v236_v13 = vmax.bf16 %v228_v10, %v220_v8  ;;  %v244_v14 = vld [vmem:[%s445_s24 + $0x8] sm:$0xf]  ;;  %v222_v18 = vld [vmem:[%s435_s18 + $0x10] sm:$0xf] }
  0x12   : > { %v250_v11 = vmax.bf16 %v242_v5, %v234_v4  ;;  %v245_v15 = vld [vmem:[%s445_s24 + $0xc] sm:$0xf]  ;;  %v251_v16 = vmax.bf16 %v243_v6, %v235_v7  ;;  %v237_v17 = vmax.bf16 %v229_v12, %v221_v9  ;;  %v223_v19 = vld [vmem:[%s435_s18 + $0x14] sm:$0xf]  ;;  %v230_v20 = vld [vmem:[%s440_s21 + $0x10] sm:$0xf] }
  0x13   : > { %v252_v21 = vmax.bf16 %v244_v14, %v236_v13  ;;  %v231_v22 = vld [vmem:[%s440_s21 + $0x14] sm:$0xf]  ;;  %v238_v23 = vmax.bf16 %v230_v20, %v222_v18  ;;  %v246_v24 = vld [vmem:[%s445_s24 + $0x10] sm:$0xf]  ;;  %v224_v29 = vld [vmem:[%s435_s18 + $0x18] sm:$0xf] }
  0x14   : > { %v247_v25 = vld [vmem:[%s445_s24 + $0x14] sm:$0xf]  ;;  %v381_v26 = vcombine.low %v250_v11, %v251_v16  ;;  %v253_v27 = vmax.bf16 %v245_v15, %v237_v17  ;;  %v239_v28 = vmax.bf16 %v231_v22, %v223_v19  ;;  %v225_v30 = vld [vmem:[%s435_s18 + $0x1c] sm:$0xf]  ;;  %v232_v31 = vld [vmem:[%s440_s21 + $0x18] sm:$0xf] }
  0x15   : > { %v254_v32 = vmax.bf16 %v246_v24, %v238_v23  ;;  %v233_v33 = vld [vmem:[%s440_s21 + $0x1c] sm:$0xf]  ;;  %v240_v34 = vmax.bf16 %v232_v31, %v224_v29  ;;  %v248_v35 = vld [vmem:[%s445_s24 + $0x18] sm:$0xf] }
  0x16   : > { %v249_v36 = vld [vmem:[%s445_s24 + $0x1c] sm:$0xf]  ;;  %365 = vst [vmem:[%s216_s27] sm:$0xff] %v381_v26   ;;  %v382_v37 = vcombine.low %v252_v21, %v253_v27  ;;  %v255_v38 = vmax.bf16 %v247_v25, %v239_v28  ;;  %v241_v39 = vmax.bf16 %v233_v33, %v225_v30 }
  0x17   : > { %v256_v40 = vmax.bf16 %v248_v35, %v240_v34 }
  0x18   : > { %383 = vst [vmem:[%s216_s27 + $0x8] sm:$0xff] %v382_v37   ;;  %v384_v41 = vcombine.low %v254_v32, %v255_v38  ;;  %v257_v42 = vmax.bf16 %v249_v36, %v241_v39 }
  0x1a   : > { %385 = vst [vmem:[%s216_s27 + $0x10] sm:$0xff] %v384_v41   ;;  %v386_v43 = vcombine.low %v256_v40, %v257_v42 }
  0x1c   : > { %387 = vst [vmem:[%s216_s27 + $0x18] sm:$0xff] %v386_v43  }
  0x1d PF: > { %s13_s12 = sadd.s32 1, %s402_s12  }
  0x1e   : > { %p10_p4 = scmp.ge.s32.totalorder %s13_s12, 4  }
  0x20   :  { %12 = sbr.rel (!%p10_p4) target bundleno = 1 (0x1), region = 68 }

// kernel: byol_forward.21
= control target key start
LH: loop header
LB: loop body
LE: loop exit
PB: predicated region body
PF: predicated region fallthrough
CT: control target
= control target key end

     0   :  { %s515_s12 = smov 0   ;;  %s609_s0 = inlined_call_operand.vmem [shape: bf16[288,128], index: 0, kind: input, shape index: {}]   ;;  %s610_s1 = inlined_call_operand.vmem [shape: bf16[288,128], index: 1, kind: input, shape index: {}]   ;;  %s611_s2 = inlined_call_operand.vmem [shape: bf16[288,128], index: 2, kind: input, shape index: {}]   ;;  %s612_s3 = inlined_call_operand.vmem [shape: bf16[288,128], index: 3, kind: output, shape index: {}]  }
   0x1 LB: > { %s406_s13 = sadd.s32 4294967295, %s493_s12   ;;  %p410_p0 = scmp.ge.s32.totalorder %s493_s12, 1  ;;  %s493_s12 = sphi %s515_s12, %s13_s12  }
   0x2   : > { %p160_p1 = scmp.lt.s32.totalorder %s493_s12, 3 }
   0x4   : > { %p161_p2 = pnand %p410_p0, %p160_p1 }
   0x5   : > { %s194_s14 = smul.u32 (!%p161_p2), 18, %s406_s13 }
   0x6   : > { %164 = sbr.rel (%p161_p2) target bundleno = 40 (0x28), region = 32 }
   0x7   : > { %p195_p3 = scmp.lt.s32.totalorder (!%p161_p2), %s194_s14, 35 }
   0xb   : > { %s614_s14 = smov (!%p195_p3, %s194_s14), 35 }
   0xc   : > { %s411_s15 = sshll.u32 %s614_s14, 2 }
   0xd   : > { %s526_s18 = scalar_lea.vmem %s609_s0, %s411_s15  ;;  %s531_s21 = scalar_lea.vmem %s610_s1, %s411_s15 }
   0xe   : > { %s536_s24 = scalar_lea.vmem %s611_s2, %s411_s15  ;;  %v218_v0 = vld [vmem:[%s526_s18] sm:$0xf]  ;;  %v219_v1 = vld [vmem:[%s526_s18 + $0x4] sm:$0xf]  ;;  %v220_v8 = vld [vmem:[%s526_s18 + $0x8] sm:$0xf]  ;;  %s556_s27 = scalar_lea.vmem %s612_s3, %s411_s15 }
   0xf   : > { %v236_v2 = vld [vmem:[%s531_s21] sm:$0xf]  ;;  %v237_v3 = vld [vmem:[%s531_s21 + $0x4] sm:$0xf]  ;;  %v221_v9 = vld [vmem:[%s526_s18 + $0xc] sm:$0xf] }
  0x10   : > { %v254_v4 = vmax.bf16 %v236_v2, %v218_v0  ;;  %v272_v5 = vld [vmem:[%s536_s24] sm:$0xf]  ;;  %v273_v6 = vld [vmem:[%s536_s24 + $0x4] sm:$0xf]  ;;  %v255_v7 = vmax.bf16 %v237_v3, %v219_v1  ;;  %v238_v10 = vld [vmem:[%s531_s21 + $0x8] sm:$0xf] }
  0x11   : > { %v239_v12 = vld [vmem:[%s531_s21 + $0xc] sm:$0xf]  ;;  %v256_v13 = vmax.bf16 %v238_v10, %v220_v8  ;;  %v274_v14 = vld [vmem:[%s536_s24 + $0x8] sm:$0xf]  ;;  %v222_v18 = vld [vmem:[%s526_s18 + $0x10] sm:$0xf] }
  0x12   : > { %v290_v11 = vmax.bf16 %v272_v5, %v254_v4  ;;  %v275_v15 = vld [vmem:[%s536_s24 + $0xc] sm:$0xf]  ;;  %v291_v16 = vmax.bf16 %v273_v6, %v255_v7  ;;  %v257_v17 = vmax.bf16 %v239_v12, %v221_v9  ;;  %v223_v19 = vld [vmem:[%s526_s18 + $0x14] sm:$0xf]  ;;  %v240_v20 = vld [vmem:[%s531_s21 + $0x10] sm:$0xf] }
  0x13   : > { %v292_v21 = vmax.bf16 %v274_v14, %v256_v13  ;;  %v241_v22 = vld [vmem:[%s531_s21 + $0x14] sm:$0xf]  ;;  %v258_v23 = vmax.bf16 %v240_v20, %v222_v18  ;;  %v276_v24 = vld [vmem:[%s536_s24 + $0x10] sm:$0xf]  ;;  %v224_v29 = vld [vmem:[%s526_s18 + $0x18] sm:$0xf] }
  0x14   : > { %v277_v25 = vld [vmem:[%s536_s24 + $0x14] sm:$0xf]  ;;  %v462_v26 = vcombine.low %v290_v11, %v291_v16  ;;  %v293_v27 = vmax.bf16 %v275_v15, %v257_v17  ;;  %v259_v28 = vmax.bf16 %v241_v22, %v223_v19  ;;  %v225_v30 = vld [vmem:[%s526_s18 + $0x1c] sm:$0xf]  ;;  %v242_v31 = vld [vmem:[%s531_s21 + $0x18] sm:$0xf] }
  0x15   : > { %v294_v32 = vmax.bf16 %v276_v24, %v258_v23  ;;  %v243_v33 = vld [vmem:[%s531_s21 + $0x1c] sm:$0xf]  ;;  %v260_v34 = vmax.bf16 %v242_v31, %v224_v29  ;;  %v278_v35 = vld [vmem:[%s536_s24 + $0x18] sm:$0xf]  ;;  %v226_v40 = vld [vmem:[%s526_s18 + $0x20] sm:$0xf] }
  0x16   : > { %v279_v36 = vld [vmem:[%s536_s24 + $0x1c] sm:$0xf]  ;;  %421 = vst [vmem:[%s556_s27] sm:$0xff] %v462_v26   ;;  %v463_v37 = vcombine.low %v292_v21, %v293_v27  ;;  %v295_v38 = vmax.bf16 %v277_v25, %v259_v28  ;;  %v261_v39 = vmax.bf16 %v243_v33, %v225_v30  ;;  %v227_v41 = vld [vmem:[%s526_s18 + $0x24] sm:$0xf]  ;;  %v244_v42 = vld [vmem:[%s531_s21 + $0x20] sm:$0xf] }
  0x17   : > { %v296_v43 = vmax.bf16 %v278_v35, %v260_v34  ;;  %v245_v44 = vld [vmem:[%s531_s21 + $0x24] sm:$0xf]  ;;  %v262_v45 = vmax.bf16 %v244_v42, %v226_v40  ;;  %v280_v46 = vld [vmem:[%s536_s24 + $0x20] sm:$0xf]  ;;  %v228_v51 = vld [vmem:[%s526_s18 + $0x28] sm:$0xf] }
  0x18   : > { %v281_v47 = vld [vmem:[%s536_s24 + $0x24] sm:$0xf]  ;;  %464 = vst [vmem:[%s556_s27 + $0x8] sm:$0xff] %v463_v37   ;;  %v465_v48 = vcombine.low %v294_v32, %v295_v38  ;;  %v297_v49 = vmax.bf16 %v279_v36, %v261_v39  ;;  %v263_v50 = vmax.bf16 %v245_v44, %v227_v41  ;;  %v229_v52 = vld [vmem:[%s526_s18 + $0x2c] sm:$0xf] }
  0x19   : > { %v246_v53 = vld [vmem:[%s531_s21 + $0x28] sm:$0xf]  ;;  %v298_v54 = vmax.bf16 %v280_v46, %v262_v45  ;;  %v247_v55 = vld [vmem:[%s531_s21 + $0x2c] sm:$0xf]  ;;  %v230_v62 = vld [vmem:[%s526_s18 + $0x30] sm:$0xf] }
  0x1a   : > { %v264_v56 = vmax.bf16 %v246_v53, %v228_v51  ;;  %v282_v57 = vld [vmem:[%s536_s24 + $0x28] sm:$0xf]  ;;  %v283_v58 = vld [vmem:[%s536_s24 + $0x2c] sm:$0xf]  ;;  %466 = vst [vmem:[%s556_s27 + $0x10] sm:$0xff] %v465_v48   ;;  %v467_v59 = vcombine.low %v296_v43, %v297_v49  ;;  %v299_v60 = vmax.bf16 %v281_v47, %v263_v50  ;;  %v265_v61 = vmax.bf16 %v247_v55, %v229_v52 }
  0x1b   : > { %v231_v63 = vld [vmem:[%s526_s18 + $0x34] sm:$0xf]  ;;  %v248_v0 = vld [vmem:[%s531_s21 + $0x30] sm:$0xf]  ;;  %v232_v9 = vld [vmem:[%s526_s18 + $0x38] sm:$0xf] }
  0x1c   : > { %v300_v1 = vmax.bf16 %v282_v57, %v264_v56  ;;  %v249_v2 = vld [vmem:[%s531_s21 + $0x34] sm:$0xf]  ;;  %v266_v3 = vmax.bf16 %v248_v0, %v230_v62  ;;  %v284_v4 = vld [vmem:[%s536_s24 + $0x30] sm:$0xf]  ;;  %468 = vst [vmem:[%s556_s27 + $0x18] sm:$0xff] %v467_v59   ;;  %v469_v6 = vcombine.low %v298_v54, %v299_v60  ;;  %v301_v7 = vmax.bf16 %v283_v58, %v265_v61 }
  0x1d   : > { %v285_v5 = vld [vmem:[%s536_s24 + $0x34] sm:$0xf]  ;;  %v267_v8 = vmax.bf16 %v249_v2, %v231_v63  ;;  %v233_v10 = vld [vmem:[%s526_s18 + $0x3c] sm:$0xf]  ;;  %v250_v11 = vld [vmem:[%s531_s21 + $0x38] sm:$0xf] }
  0x1e   : > { %v302_v12 = vmax.bf16 %v284_v4, %v266_v3  ;;  %v251_v13 = vld [vmem:[%s531_s21 + $0x3c] sm:$0xf]  ;;  %v268_v14 = vmax.bf16 %v250_v11, %v232_v9  ;;  %v286_v15 = vld [vmem:[%s536_s24 + $0x38] sm:$0xf]  ;;  %470 = vst [vmem:[%s556_s27 + $0x20] sm:$0xff] %v469_v6   ;;  %v471_v17 = vcombine.low %v300_v1, %v301_v7 }
  0x1f   : > { %v287_v16 = vld [vmem:[%s536_s24 + $0x3c] sm:$0xf]  ;;  %v303_v18 = vmax.bf16 %v285_v5, %v267_v8  ;;  %v269_v19 = vmax.bf16 %v251_v13, %v233_v10  ;;  %v234_v20 = vld [vmem:[%s526_s18 + $0x40] sm:$0xf]  ;;  %v235_v21 = vld [vmem:[%s526_s18 + $0x44] sm:$0xf] }
  0x20   : > { %v252_v22 = vld [vmem:[%s531_s21 + $0x40] sm:$0xf]  ;;  %v304_v23 = vmax.bf16 %v286_v15, %v268_v14  ;;  %v253_v24 = vld [vmem:[%s531_s21 + $0x44] sm:$0xf]  ;;  %472 = vst [vmem:[%s556_s27 + $0x28] sm:$0xff] %v471_v17  }
  0x21   : > { %v270_v25 = vmax.bf16 %v252_v22, %v234_v20  ;;  %v288_v26 = vld [vmem:[%s536_s24 + $0x40] sm:$0xf]  ;;  %v289_v27 = vld [vmem:[%s536_s24 + $0x44] sm:$0xf]  ;;  %v473_v28 = vcombine.low %v302_v12, %v303_v18  ;;  %v305_v29 = vmax.bf16 %v287_v16, %v269_v19  ;;  %v271_v30 = vmax.bf16 %v253_v24, %v235_v21 }
  0x23   : > { %v306_v31 = vmax.bf16 %v288_v26, %v270_v25  ;;  %474 = vst [vmem:[%s556_s27 + $0x30] sm:$0xff] %v473_v28   ;;  %v475_v32 = vcombine.low %v304_v23, %v305_v29  ;;  %v307_v33 = vmax.bf16 %v289_v27, %v271_v30 }
  0x25   : > { %476 = vst [vmem:[%s556_s27 + $0x38] sm:$0xff] %v475_v32   ;;  %v477_v34 = vcombine.low %v306_v31, %v307_v33 }
  0x27   : > { %478 = vst [vmem:[%s556_s27 + $0x40] sm:$0xff] %v477_v34  }
  0x28 PF: > { %s13_s12 = sadd.s32 1, %s493_s12  }
  0x29   : > { %p10_p4 = scmp.ge.s32.totalorder %s13_s12, 4  }
  0x2b   :  { %12 = sbr.rel (!%p10_p4) target bundleno = 1 (0x1), region = 68 }

// kernel: byol_forward.20
= control target key start
LH: loop header
LB: loop body
LE: loop exit
PB: predicated region body
PF: predicated region fallthrough
CT: control target
= control target key end

     0   :  { %s1467_s15 = smov 0   ;;  %s1662_s0 = inlined_call_operand.vmem [shape: bf16[512,256], index: 0, kind: input, shape index: {}]   ;;  %s1663_s1 = inlined_call_operand.vmem [shape: bf16[256,128], index: 1, kind: input, shape index: {}]   ;;  %s1664_s2 = inlined_call_operand.vmem [shape: f32[1,128], index: 2, kind: input, shape index: {}]   ;;  %s1665_s3 = inlined_call_operand.vmem [shape: f32[1,128], index: 3, kind: input, shape index: {}]   ;;  %s1666_s4 = inlined_call_operand.vmem [shape: bf16[512,128], index: 4, kind: output, shape index: {}]  }
   0x1 LB: > { %s1012_s16 = sadd.s32 4294967295, %s1440_s15   ;;  %p1016_p0 = scmp.ge.s32.totalorder %s1440_s15, 1  ;;  %s1440_s15 = sphi %s1467_s15, %s14_s15  }
   0x2   : > { %p164_p1 = scmp.lt.s32.totalorder %s1440_s15, 3 }
   0x4   : > { %p165_p2 = pnand %p1016_p0, %p164_p1 }
   0x5   : > { %s1017_s19 = sshll.u32 (!%p165_p2), %s1012_s16, 5 }
   0x6   : > { %168 = sbr.rel (%p165_p2) target bundleno = 310 (0x136), region = 36  ;;  %p192_p3 = scmp.lt.s32.totalorder (!%p165_p2), %s1017_s19, 63 }
   0xb   : > { %v1370_v0 = vld [vmem:[%s1663_s1 + $0x78] sm:$0xff]   ;;  %v1372_v2 = vld [vmem:[%s1663_s1 + $0x70] sm:$0xff]   ;;  %v1374_v4 = vld [vmem:[%s1663_s1 + $0x68] sm:$0xff]   ;;  %s1668_s19 = smov (!%p192_p3, %s1017_s19), 63 }
   0xc   : > { %v1371_v1 = vld [vmem:[%s1663_s1 + $0x38] sm:$0xff]   ;;  %1234 = vmatprep.subr.bf16.mxu0 %v1370_v0  ;;  %1346 = vmatprep.subr.bf16.mxu1 %v1370_v0  ;;  %v1373_v3 = vld [vmem:[%s1663_s1 + $0x30] sm:$0xff]   ;;  %v1375_v5 = vld [vmem:[%s1663_s1 + $0x28] sm:$0xff]   ;;  %s1106_s8 = sshll.u32 %s1668_s19, 3 }
   0xd   : > { %1235 = vmatpush3.bf16.msra.mxu0 %v1371_v1  ;;  %1354 = vmatpush3.bf16.msra.mxu1 %v1371_v1  ;;  %v1376_v6 = vld [vmem:[%s1663_s1 + $0x60] sm:$0xff]   ;;  %v1378_v8 = vld [vmem:[%s1663_s1 + $0x58] sm:$0xff]   ;;  %s1508_s13 = scalar_lea.vmem %s1662_s0, %s1106_s8  ;;  %v1380_v10 = vld [vmem:[%s1663_s1 + $0x50] sm:$0xff]   ;;  %s1021_s8 = sshll.u32 %s1668_s19, 2 }
   0xe   : > { %1236 = vmatprep.subr.bf16.mxu0 %v1372_v2  ;;  %1347 = vmatprep.subr.bf16.mxu1 %v1372_v2  ;;  %v1377_v7 = vld [vmem:[%s1663_s1 + $0x20] sm:$0xff]   ;;  %v1379_v9 = vld [vmem:[%s1663_s1 + $0x18] sm:$0xff]   ;;  %v1381_v13 = vld [vmem:[%s1663_s1 + $0x10] sm:$0xff]   ;;  %s1585_s11 = scalar_lea.vmem %s1666_s4, %s1021_s8 }
   0xf   : > { %v1388_v11 = vld [vmem:[%s1508_s13 + $0x4] ss:$8 sps:$4 sm:$0xff]   ;;  %v1386_v18 = vld [vmem:[%s1508_s13] ss:$8 sps:$4 sm:$0xff]   ;;  %v1392_v20 = vld [vmem:[%s1508_s13 + $0x14] ss:$8 sps:$4 sm:$0xff]  }
  0x10   : > { %v1391_v12 = vld [vmem:[%s1508_s13 + $0x84] ss:$8 sps:$4 sm:$0xff]   ;;  %557 = vmatprep.mubr.bf16.mxu0 %v1388_v11  ;;  %v1389_v19 = vld [vmem:[%s1508_s13 + $0x80] ss:$8 sps:$4 sm:$0xff]   ;;  %v1394_v21 = vld [vmem:[%s1508_s13 + $0x94] ss:$8 sps:$4 sm:$0xff]  }
  0x11   : > { %1237 = vmatpush3.bf16.msra.mxu0 %v1373_v3  ;;  %1355 = vmatpush3.bf16.msra.mxu1 %v1373_v3  ;;  %v1382_v14 = vld [vmem:[%s1663_s1 + $0x48] sm:$0xff]   ;;  %v1384_v16 = vld [vmem:[%s1663_s1 + $0x40] sm:$0xff]   ;;  %v1396_v22 = vld [vmem:[%s1508_s13 + $0x10] ss:$8 sps:$4 sm:$0xff]  }
  0x12   : > { %1238 = vmatprep.subr.bf16.mxu0 %v1374_v4  ;;  %1348 = vmatprep.subr.bf16.mxu1 %v1374_v4  ;;  %v1383_v15 = vld [vmem:[%s1663_s1 + $0x8] sm:$0xff]   ;;  %v1385_v17 = vld [vmem:[%s1663_s1] sm:$0xff]   ;;  %v1397_v23 = vld [vmem:[%s1508_s13 + $0x90] ss:$8 sps:$4 sm:$0xff]  }
  0x13   : > { %621 = vmatprep.mubr.bf16.mxu1 %v1391_v12  ;;  %v1398_v24 = vld [vmem:[%s1508_s13 + $0x24] ss:$8 sps:$4 sm:$0xff]   ;;  %v1402_v26 = vld [vmem:[%s1508_s13 + $0x20] ss:$8 sps:$4 sm:$0xff]   ;;  %v1404_v28 = vld [vmem:[%s1508_s13 + $0x34] ss:$8 sps:$4 sm:$0xff]  }
  0x14   : > { %v1400_v25 = vld [vmem:[%s1508_s13 + $0xa4] ss:$8 sps:$4 sm:$0xff]   ;;  %v1403_v27 = vld [vmem:[%s1508_s13 + $0xa0] ss:$8 sps:$4 sm:$0xff]   ;;  %v1406_v29 = vld [vmem:[%s1508_s13 + $0xb4] ss:$8 sps:$4 sm:$0xff]  }
  0x15   : > { %1239 = vmatpush3.bf16.msra.mxu0 %v1375_v5  ;;  %1356 = vmatpush3.bf16.msra.mxu1 %v1375_v5  ;;  %v1408_v30 = vld [vmem:[%s1508_s13 + $0x30] ss:$8 sps:$4 sm:$0xff]   ;;  %v1410_v32 = vld [vmem:[%s1508_s13 + $0x44] ss:$8 sps:$4 sm:$0xff]   ;;  %v1414_v34 = vld [vmem:[%s1508_s13 + $0x40] ss:$8 sps:$4 sm:$0xff]  }
  0x16   : > { %1240 = vmatprep.subr.bf16.mxu0 %v1376_v6  ;;  %1349 = vmatprep.subr.bf16.mxu1 %v1376_v6  ;;  %v1409_v31 = vld [vmem:[%s1508_s13 + $0xb0] ss:$8 sps:$4 sm:$0xff]   ;;  %v1412_v33 = vld [vmem:[%s1508_s13 + $0xc4] ss:$8 sps:$4 sm:$0xff]   ;;  %v1415_v35 = vld [vmem:[%s1508_s13 + $0xc0] ss:$8 sps:$4 sm:$0xff]  }
  0x17   : > { %v1416_v36 = vld [vmem:[%s1508_s13 + $0x54] ss:$8 sps:$4 sm:$0xff]   ;;  %v1420_v38 = vld [vmem:[%s1508_s13 + $0x50] ss:$8 sps:$4 sm:$0xff]   ;;  %v1422_v40 = vld [vmem:[%s1508_s13 + $0x64] ss:$8 sps:$4 sm:$0xff]  }
  0x18   : > { %v1418_v37 = vld [vmem:[%s1508_s13 + $0xd4] ss:$8 sps:$4 sm:$0xff]   ;;  %v1421_v39 = vld [vmem:[%s1508_s13 + $0xd0] ss:$8 sps:$4 sm:$0xff]   ;;  %v1424_v41 = vld [vmem:[%s1508_s13 + $0xe4] ss:$8 sps:$4 sm:$0xff]  }
  0x19   : > { %1241 = vmatpush3.bf16.msra.mxu0 %v1377_v7  ;;  %1357 = vmatpush3.bf16.msra.mxu1 %v1377_v7  ;;  %v1426_v42 = vld [vmem:[%s1508_s13 + $0x60] ss:$8 sps:$4 sm:$0xff]   ;;  %v1428_v44 = vld [vmem:[%s1508_s13 + $0x74] ss:$8 sps:$4 sm:$0xff]   ;;  %v1432_v46 = vld [vmem:[%s1508_s13 + $0x70] ss:$8 sps:$4 sm:$0xff]  }
  0x1a   : > { %1242 = vmatprep.subr.bf16.mxu0 %v1378_v8  ;;  %1350 = vmatprep.subr.bf16.mxu1 %v1378_v8  ;;  %v1427_v43 = vld [vmem:[%s1508_s13 + $0xe0] ss:$8 sps:$4 sm:$0xff]   ;;  %v1430_v45 = vld [vmem:[%s1508_s13 + $0xf4] ss:$8 sps:$4 sm:$0xff]   ;;  %v1433_v47 = vld [vmem:[%s1508_s13 + $0xf0] ss:$8 sps:$4 sm:$0xff]  }
  0x1b   : > { %v1566_v51 = vld [vmem:[%s1664_s2] ss:$0 sm:$0xff] }
  0x1c   : > { %v1573_v59 = vld [vmem:[%s1665_s3] ss:$0 sm:$0xff] }
  0x1d   : > { %1243 = vmatpush3.bf16.msra.mxu0 %v1379_v9  ;;  %1358 = vmatpush3.bf16.msra.mxu1 %v1379_v9 }
  0x1e   : > { %1244 = vmatprep.subr.bf16.mxu0 %v1380_v10  ;;  %1351 = vmatprep.subr.bf16.mxu1 %v1380_v10 }
  0x21   : > { %1245 = vmatpush3.bf16.msra.mxu0 %v1381_v13  ;;  %1359 = vmatpush3.bf16.msra.mxu1 %v1381_v13 }
  0x22   : > { %1246 = vmatprep.subr.bf16.mxu0 %v1382_v14  ;;  %1352 = vmatprep.subr.bf16.mxu1 %v1382_v14 }
  0x25   : > { %1247 = vmatpush3.bf16.msra.mxu0 %v1383_v15  ;;  %1360 = vmatpush3.bf16.msra.mxu1 %v1383_v15 }
  0x26   : > { %1248 = vmatprep.subr.bf16.mxu0 %v1384_v16  ;;  %1353 = vmatprep.subr.bf16.mxu1 %v1384_v16 }
  0x29   : > { %1249 = vmatpush3.bf16.msra.mxu0 %v1385_v17  ;;  %1361 = vmatpush3.bf16.msra.mxu1 %v1385_v17 }
  0x2c   : > { %558 = vmatmul.mubr.bf16.vlgmr.msra.gmra.mxu0 %v1386_v18  ;;  %622 = vmatmul.mubr.bf16.vlgmr.msra.gmra.mxu1 %v1389_v19 }
  0x2d   : > { %565 = vmatprep.mubr.bf16.mxu0 %v1392_v20  ;;  %629 = vmatprep.mubr.bf16.mxu1 %v1394_v21 }
  0x34   : > { %566 = vmatmul.mubr.bf16.gmra.mxu0 %v1396_v22  ;;  %630 = vmatmul.mubr.bf16.gmra.mxu1 %v1397_v23 }
  0x35   : > { %573 = vmatprep.mubr.bf16.mxu0 %v1398_v24  ;;  %637 = vmatprep.mubr.bf16.mxu1 %v1400_v25 }
  0x3c   : > { %574 = vmatmul.mubr.bf16.gmra.mxu0 %v1402_v26  ;;  %638 = vmatmul.mubr.bf16.gmra.mxu1 %v1403_v27 }
  0x3d   : > { %581 = vmatprep.mubr.bf16.mxu0 %v1404_v28  ;;  %645 = vmatprep.mubr.bf16.mxu1 %v1406_v29 }
  0x44   : > { %582 = vmatmul.mubr.bf16.gmra.mxu0 %v1408_v30  ;;  %646 = vmatmul.mubr.bf16.gmra.mxu1 %v1409_v31 }
  0x45   : > { %589 = vmatprep.mubr.bf16.mxu0 %v1410_v32  ;;  %653 = vmatprep.mubr.bf16.mxu1 %v1412_v33 }
  0x4c   : > { %590 = vmatmul.mubr.bf16.gmra.mxu0 %v1414_v34  ;;  %654 = vmatmul.mubr.bf16.gmra.mxu1 %v1415_v35 }
  0x4d   : > { %597 = vmatprep.mubr.bf16.mxu0 %v1416_v36  ;;  %661 = vmatprep.mubr.bf16.mxu1 %v1418_v37 }
  0x54   : > { %598 = vmatmul.mubr.bf16.gmra.mxu0 %v1420_v38  ;;  %662 = vmatmul.mubr.bf16.gmra.mxu1 %v1421_v39 }
  0x55   : > { %605 = vmatprep.mubr.bf16.mxu0 %v1422_v40  ;;  %669 = vmatprep.mubr.bf16.mxu1 %v1424_v41 }
  0x5c   : > { %606 = vmatmul.mubr.bf16.gmra.mxu0 %v1426_v42  ;;  %670 = vmatmul.mubr.bf16.gmra.mxu1 %v1427_v43 }
  0x5d   : > { %613 = vmatprep.mubr.bf16.mxu0 %v1428_v44  ;;  %677 = vmatprep.mubr.bf16.mxu1 %v1430_v45 }
  0x64   : > { %614 = vmatmul.mubr.bf16.gmra.mxu0 %v1432_v46  ;;  %678 = vmatmul.mubr.bf16.gmra.mxu1 %v1433_v47 }
  0xec   : > { %v1250_v48 = vpop.f32.mrf.mxu0  ;;  %v1298_v49 = vpop.f32.mrf.mxu1 }
  0xee   : > { %v1251_v50 = vpop.f32.mrf.mxu0  ;;  %v1299_v52 = vpop.f32.mrf.mxu1 }
  0xef   : > { %v1252_v53 = vadd.f32 %v1251_v50, %v1250_v48  ;;  %v1300_v54 = vadd.f32 %v1299_v52, %v1298_v49 }
  0xf0   : > { %v1253_v55 = vpop.f32.mrf.mxu0  ;;  %v1301_v56 = vpop.f32.mrf.mxu1 }
  0xf1   : > { %v693_v57 = vmul.f32 %v1252_v53, %v1566_v51  ;;  %v709_v58 = vmul.f32 %v1300_v54, %v1566_v51 }
  0xf2   : > { %v1254_v60 = vpop.f32.mrf.mxu0  ;;  %v1302_v61 = vpop.f32.mrf.mxu1 }
  0xf3   : > { %v1255_v62 = vadd.f32 %v1254_v60, %v1253_v55  ;;  %v1303_v63 = vadd.f32 %v1302_v61, %v1301_v56  ;;  %v732_v2 = vadd.f32 %v1573_v59, %v693_v57  ;;  %v748_v3 = vadd.f32 %v1573_v59, %v709_v58 }
  0xf4   : > { %v1256_v0 = vpop.f32.mrf.mxu0  ;;  %v1304_v1 = vpop.f32.mrf.mxu1 }
  0xf5   : > { %v694_v4 = vmul.f32 %v1255_v62, %v1566_v51  ;;  %v710_v5 = vmul.f32 %v1303_v63, %v1566_v51  ;;  %v764_v14 = vmax.f32 %v732_v2, 0.0  ;;  %v780_v15 = vmax.f32 %v748_v3, 0.0 }
  0xf6   : > { %v1257_v6 = vpop.f32.mrf.mxu0  ;;  %v1305_v7 = vpop.f32.mrf.mxu1 }
  0xf7   : > { %v733_v8 = vadd.f32 %v1573_v59, %v694_v4  ;;  %v749_v9 = vadd.f32 %v1573_v59, %v710_v5  ;;  %v1258_v10 = vadd.f32 %v1257_v6, %v1256_v0  ;;  %v1306_v11 = vadd.f32 %v1305_v7, %v1304_v1 }
  0xf8   : > { %v1259_v12 = vpop.f32.mrf.mxu0  ;;  %v1307_v13 = vpop.f32.mrf.mxu1 }
  0xf9   : > { %v765_v16 = vmax.f32 %v733_v8, 0.0  ;;  %v781_v17 = vmax.f32 %v749_v9, 0.0  ;;  %v695_v18 = vmul.f32 %v1258_v10, %v1566_v51  ;;  %v711_v19 = vmul.f32 %v1306_v11, %v1566_v51 }
  0xfa   : > { %v1260_v20 = vpop.f32.mrf.mxu0  ;;  %v1308_v21 = vpop.f32.mrf.mxu1 }
  0xfb   : > { %v1142_v22 = vpack.c.bf16 %v765_v16, %v764_v14  ;;  %v1182_v23 = vpack.c.bf16 %v781_v17, %v780_v15  ;;  %v1261_v24 = vadd.f32 %v1260_v20, %v1259_v12  ;;  %v1309_v25 = vadd.f32 %v1308_v21, %v1307_v13 }
  0xfc   : > { %v1262_v26 = vpop.f32.mrf.mxu0  ;;  %v1310_v27 = vpop.f32.mrf.mxu1  ;;  %v734_v28 = vadd.f32 %v1573_v59, %v695_v18  ;;  %v750_v29 = vadd.f32 %v1573_v59, %v711_v19 }
  0xfd   : > { %1143 = vst [vmem:[%s1585_s11] sm:$0xff] %v1142_v22   ;;  %1226 = vst [vmem:[%s1585_s11 + $0x40] sm:$0xff] %v1182_v23   ;;  %v696_v30 = vmul.f32 %v1261_v24, %v1566_v51  ;;  %v712_v31 = vmul.f32 %v1309_v25, %v1566_v51 }
  0xfe   : > { %v1263_v32 = vpop.f32.mrf.mxu0  ;;  %v1311_v33 = vpop.f32.mrf.mxu1  ;;  %v766_v42 = vmax.f32 %v734_v28, 0.0  ;;  %v782_v43 = vmax.f32 %v750_v29, 0.0 }
  0xff   : > { %v1264_v34 = vadd.f32 %v1263_v32, %v1262_v26  ;;  %v1312_v35 = vadd.f32 %v1311_v33, %v1310_v27  ;;  %v735_v36 = vadd.f32 %v1573_v59, %v696_v30  ;;  %v751_v37 = vadd.f32 %v1573_v59, %v712_v31 }
 0x100   : > { %v1265_v38 = vpop.f32.mrf.mxu0  ;;  %v1313_v39 = vpop.f32.mrf.mxu1 }
 0x101   : > { %v697_v40 = vmul.f32 %v1264_v34, %v1566_v51  ;;  %v713_v41 = vmul.f32 %v1312_v35, %v1566_v51  ;;  %v767_v44 = vmax.f32 %v735_v36, 0.0  ;;  %v783_v45 = vmax.f32 %v751_v37, 0.0 }
 0x102   : > { %v1266_v46 = vpop.f32.mrf.mxu0  ;;  %v1314_v47 = vpop.f32.mrf.mxu1 }
 0x103   : > { %v1267_v48 = vadd.f32 %v1266_v46, %v1265_v38  ;;  %v1315_v49 = vadd.f32 %v1314_v47, %v1313_v39  ;;  %v1147_v50 = vpack.c.bf16 %v767_v44, %v766_v42  ;;  %v1187_v52 = vpack.c.bf16 %v783_v45, %v782_v43 }
 0x104   : > { %v1268_v53 = vpop.f32.mrf.mxu0  ;;  %v1316_v54 = vpop.f32.mrf.mxu1  ;;  %v736_v55 = vadd.f32 %v1573_v59, %v697_v40  ;;  %v752_v56 = vadd.f32 %v1573_v59, %v713_v41 }
 0x105   : > { %v698_v57 = vmul.f32 %v1267_v48, %v1566_v51  ;;  %v714_v58 = vmul.f32 %v1315_v49, %v1566_v51  ;;  %1219 = vst [vmem:[%s1585_s11 + $0x8] sm:$0xff] %v1147_v50   ;;  %1227 = vst [vmem:[%s1585_s11 + $0x48] sm:$0xff] %v1187_v52  }
 0x106   : > { %v1269_v60 = vpop.f32.mrf.mxu0  ;;  %v1317_v61 = vpop.f32.mrf.mxu1  ;;  %v768_v4 = vmax.f32 %v736_v55, 0.0  ;;  %v784_v5 = vmax.f32 %v752_v56, 0.0 }
 0x107   : > { %v737_v62 = vadd.f32 %v1573_v59, %v698_v57  ;;  %v753_v63 = vadd.f32 %v1573_v59, %v714_v58  ;;  %v1270_v0 = vadd.f32 %v1269_v60, %v1268_v53  ;;  %v1318_v1 = vadd.f32 %v1317_v61, %v1316_v54 }
 0x108   : > { %v1271_v2 = vpop.f32.mrf.mxu0  ;;  %v1319_v3 = vpop.f32.mrf.mxu1 }
 0x109   : > { %v769_v6 = vmax.f32 %v737_v62, 0.0  ;;  %v785_v7 = vmax.f32 %v753_v63, 0.0  ;;  %v699_v8 = vmul.f32 %v1270_v0, %v1566_v51  ;;  %v715_v9 = vmul.f32 %v1318_v1, %v1566_v51 }
 0x10a   : > { %v1272_v10 = vpop.f32.mrf.mxu0  ;;  %v1320_v11 = vpop.f32.mrf.mxu1 }
 0x10b   : > { %v1152_v12 = vpack.c.bf16 %v769_v6, %v768_v4  ;;  %v1192_v13 = vpack.c.bf16 %v785_v7, %v784_v5  ;;  %v1273_v14 = vadd.f32 %v1272_v10, %v1271_v2  ;;  %v1321_v15 = vadd.f32 %v1320_v11, %v1319_v3 }
 0x10c   : > { %v1274_v16 = vpop.f32.mrf.mxu0  ;;  %v1322_v17 = vpop.f32.mrf.mxu1  ;;  %v738_v18 = vadd.f32 %v1573_v59, %v699_v8  ;;  %v754_v19 = vadd.f32 %v1573_v59, %v715_v9 }
 0x10d   : > { %1220 = vst [vmem:[%s1585_s11 + $0x10] sm:$0xff] %v1152_v12   ;;  %1228 = vst [vmem:[%s1585_s11 + $0x50] sm:$0xff] %v1192_v13   ;;  %v700_v20 = vmul.f32 %v1273_v14, %v1566_v51  ;;  %v716_v21 = vmul.f32 %v1321_v15, %v1566_v51 }
 0x10e   : > { %v1275_v22 = vpop.f32.mrf.mxu0  ;;  %v1323_v23 = vpop.f32.mrf.mxu1  ;;  %v770_v32 = vmax.f32 %v738_v18, 0.0  ;;  %v786_v33 = vmax.f32 %v754_v19, 0.0 }
 0x10f   : > { %v1276_v24 = vadd.f32 %v1275_v22, %v1274_v16  ;;  %v1324_v25 = vadd.f32 %v1323_v23, %v1322_v17  ;;  %v739_v26 = vadd.f32 %v1573_v59, %v700_v20  ;;  %v755_v27 = vadd.f32 %v1573_v59, %v716_v21 }
 0x110   : > { %v1277_v28 = vpop.f32.mrf.mxu0  ;;  %v1325_v29 = vpop.f32.mrf.mxu1 }
 0x111   : > { %v701_v30 = vmul.f32 %v1276_v24, %v1566_v51  ;;  %v717_v31 = vmul.f32 %v1324_v25, %v1566_v51  ;;  %v771_v34 = vmax.f32 %v739_v26, 0.0  ;;  %v787_v35 = vmax.f32 %v755_v27, 0.0 }
 0x112   : > { %v1278_v36 = vpop.f32.mrf.mxu0  ;;  %v1326_v37 = vpop.f32.mrf.mxu1 }
 0x113   : > { %v1279_v38 = vadd.f32 %v1278_v36, %v1277_v28  ;;  %v1327_v39 = vadd.f32 %v1326_v37, %v1325_v29  ;;  %v1157_v40 = vpack.c.bf16 %v771_v34, %v770_v32  ;;  %v1197_v41 = vpack.c.bf16 %v787_v35, %v786_v33 }
 0x114   : > { %v1280_v42 = vpop.f32.mrf.mxu0  ;;  %v1328_v43 = vpop.f32.mrf.mxu1  ;;  %v740_v44 = vadd.f32 %v1573_v59, %v701_v30  ;;  %v756_v45 = vadd.f32 %v1573_v59, %v717_v31 }
 0x115   : > { %v702_v46 = vmul.f32 %v1279_v38, %v1566_v51  ;;  %v718_v47 = vmul.f32 %v1327_v39, %v1566_v51  ;;  %1221 = vst [vmem:[%s1585_s11 + $0x18] sm:$0xff] %v1157_v40   ;;  %1229 = vst [vmem:[%s1585_s11 + $0x58] sm:$0xff] %v1197_v41  }
 0x116   : > { %v1281_v48 = vpop.f32.mrf.mxu0  ;;  %v1329_v49 = vpop.f32.mrf.mxu1  ;;  %v772_v57 = vmax.f32 %v740_v44, 0.0  ;;  %v788_v58 = vmax.f32 %v756_v45, 0.0 }
 0x117   : > { %v741_v50 = vadd.f32 %v1573_v59, %v702_v46  ;;  %v757_v52 = vadd.f32 %v1573_v59, %v718_v47  ;;  %v1282_v53 = vadd.f32 %v1281_v48, %v1280_v42  ;;  %v1330_v54 = vadd.f32 %v1329_v49, %v1328_v43 }
 0x118   : > { %v1283_v55 = vpop.f32.mrf.mxu0  ;;  %v1331_v56 = vpop.f32.mrf.mxu1 }
 0x119   : > { %v773_v60 = vmax.f32 %v741_v50, 0.0  ;;  %v789_v61 = vmax.f32 %v757_v52, 0.0  ;;  %v703_v62 = vmul.f32 %v1282_v53, %v1566_v51  ;;  %v719_v63 = vmul.f32 %v1330_v54, %v1566_v51 }
 0x11a   : > { %v1284_v0 = vpop.f32.mrf.mxu0  ;;  %v1332_v1 = vpop.f32.mrf.mxu1 }
 0x11b   : > { %v1162_v2 = vpack.c.bf16 %v773_v60, %v772_v57  ;;  %v1202_v3 = vpack.c.bf16 %v789_v61, %v788_v58  ;;  %v1285_v4 = vadd.f32 %v1284_v0, %v1283_v55  ;;  %v1333_v5 = vadd.f32 %v1332_v1, %v1331_v56 }
 0x11c   : > { %v1286_v6 = vpop.f32.mrf.mxu0  ;;  %v1334_v7 = vpop.f32.mrf.mxu1  ;;  %v742_v8 = vadd.f32 %v1573_v59, %v703_v62  ;;  %v758_v9 = vadd.f32 %v1573_v59, %v719_v63 }
 0x11d   : > { %1222 = vst [vmem:[%s1585_s11 + $0x20] sm:$0xff] %v1162_v2   ;;  %1230 = vst [vmem:[%s1585_s11 + $0x60] sm:$0xff] %v1202_v3   ;;  %v704_v10 = vmul.f32 %v1285_v4, %v1566_v51  ;;  %v720_v11 = vmul.f32 %v1333_v5, %v1566_v51 }
 0x11e   : > { %v1287_v12 = vpop.f32.mrf.mxu0  ;;  %v1335_v13 = vpop.f32.mrf.mxu1  ;;  %v774_v22 = vmax.f32 %v742_v8, 0.0  ;;  %v790_v23 = vmax.f32 %v758_v9, 0.0 }
 0x11f   : > { %v1288_v14 = vadd.f32 %v1287_v12, %v1286_v6  ;;  %v1336_v15 = vadd.f32 %v1335_v13, %v1334_v7  ;;  %v743_v16 = vadd.f32 %v1573_v59, %v704_v10  ;;  %v759_v17 = vadd.f32 %v1573_v59, %v720_v11 }
 0x120   : > { %v1289_v18 = vpop.f32.mrf.mxu0  ;;  %v1337_v19 = vpop.f32.mrf.mxu1 }
 0x121   : > { %v705_v20 = vmul.f32 %v1288_v14, %v1566_v51  ;;  %v721_v21 = vmul.f32 %v1336_v15, %v1566_v51  ;;  %v775_v24 = vmax.f32 %v743_v16, 0.0  ;;  %v791_v25 = vmax.f32 %v759_v17, 0.0 }
 0x122   : > { %v1290_v26 = vpop.f32.mrf.mxu0  ;;  %v1338_v27 = vpop.f32.mrf.mxu1 }
 0x123   : > { %v1291_v28 = vadd.f32 %v1290_v26, %v1289_v18  ;;  %v1339_v29 = vadd.f32 %v1338_v27, %v1337_v19  ;;  %v1167_v30 = vpack.c.bf16 %v775_v24, %v774_v22  ;;  %v1207_v31 = vpack.c.bf16 %v791_v25, %v790_v23 }
 0x124   : > { %v1292_v32 = vpop.f32.mrf.mxu0  ;;  %v1340_v33 = vpop.f32.mrf.mxu1  ;;  %v744_v34 = vadd.f32 %v1573_v59, %v705_v20  ;;  %v760_v35 = vadd.f32 %v1573_v59, %v721_v21 }
 0x125   : > { %v706_v36 = vmul.f32 %v1291_v28, %v1566_v51  ;;  %v722_v37 = vmul.f32 %v1339_v29, %v1566_v51  ;;  %1223 = vst [vmem:[%s1585_s11 + $0x28] sm:$0xff] %v1167_v30   ;;  %1231 = vst [vmem:[%s1585_s11 + $0x68] sm:$0xff] %v1207_v31  }
 0x126   : > { %v1293_v38 = vpop.f32.mrf.mxu0  ;;  %v1341_v39 = vpop.f32.mrf.mxu1  ;;  %v776_v46 = vmax.f32 %v744_v34, 0.0  ;;  %v792_v47 = vmax.f32 %v760_v35, 0.0 }
 0x127   : > { %v745_v40 = vadd.f32 %v1573_v59, %v706_v36  ;;  %v761_v41 = vadd.f32 %v1573_v59, %v722_v37  ;;  %v1294_v42 = vadd.f32 %v1293_v38, %v1292_v32  ;;  %v1342_v43 = vadd.f32 %v1341_v39, %v1340_v33 }
 0x128   : > { %v1295_v44 = vpop.f32.mrf.mxu0  ;;  %v1343_v45 = vpop.f32.mrf.mxu1 }
 0x129   : > { %v777_v48 = vmax.f32 %v745_v40, 0.0  ;;  %v793_v49 = vmax.f32 %v761_v41, 0.0  ;;  %v707_v50 = vmul.f32 %v1294_v42, %v1566_v51  ;;  %v723_v52 = vmul.f32 %v1342_v43, %v1566_v51 }
 0x12a   : > { %v1296_v53 = vpop.f32.mrf.mxu0  ;;  %v1344_v54 = vpop.f32.mrf.mxu1 }
 0x12b   : > { %v1172_v55 = vpack.c.bf16 %v777_v48, %v776_v46  ;;  %v1212_v56 = vpack.c.bf16 %v793_v49, %v792_v47  ;;  %v1297_v57 = vadd.f32 %v1296_v53, %v1295_v44  ;;  %v1345_v58 = vadd.f32 %v1344_v54, %v1343_v45 }
 0x12c   : > { %v746_v60 = vadd.f32 %v1573_v59, %v707_v50  ;;  %v762_v61 = vadd.f32 %v1573_v59, %v723_v52 }
 0x12d   : > { %1224 = vst [vmem:[%s1585_s11 + $0x30] sm:$0xff] %v1172_v55   ;;  %1232 = vst [vmem:[%s1585_s11 + $0x70] sm:$0xff] %v1212_v56   ;;  %v708_v62 = vmul.f32 %v1297_v57, %v1566_v51  ;;  %v724_v63 = vmul.f32 %v1345_v58, %v1566_v51 }
 0x12e   : > { %v778_v2 = vmax.f32 %v746_v60, 0.0  ;;  %v794_v3 = vmax.f32 %v762_v61, 0.0 }
 0x12f   : > { %v747_v0 = vadd.f32 %v1573_v59, %v708_v62  ;;  %v763_v1 = vadd.f32 %v1573_v59, %v724_v63 }
 0x131   : > { %v779_v4 = vmax.f32 %v747_v0, 0.0  ;;  %v795_v5 = vmax.f32 %v763_v1, 0.0 }
 0x133   : > { %v1177_v6 = vpack.c.bf16 %v779_v4, %v778_v2  ;;  %v1217_v7 = vpack.c.bf16 %v795_v5, %v794_v3 }
 0x135   : > { %1225 = vst [vmem:[%s1585_s11 + $0x38] sm:$0xff] %v1177_v6   ;;  %1233 = vst [vmem:[%s1585_s11 + $0x78] sm:$0xff] %v1217_v7  }
 0x136 PF: > { %s14_s15 = sadd.s32 1, %s1440_s15  }
 0x137   : > { %p11_p4 = scmp.ge.s32.totalorder %s14_s15, 4  }
 0x139   :  { %13 = sbr.rel (!%p11_p4) target bundleno = 1 (0x1), region = 66 }

// kernel: byol_forward.23
= control target key start
LH: loop header
LB: loop body
LE: loop exit
PB: predicated region body
PF: predicated region fallthrough
CT: control target
= control target key end

     0   :  { %s2002_s15 = smov 0   ;;  %s2333_s0 = inlined_call_operand.vmem [shape: bf16[128,1152], index: 0, kind: input, shape index: {}]   ;;  %s2334_s1 = inlined_call_operand.vmem [shape: bf16[1152,128], index: 1, kind: input, shape index: {}]   ;;  %s2335_s2 = inlined_call_operand.vmem [shape: f32[1,128], index: 2, kind: input, shape index: {}]   ;;  %s2336_s3 = inlined_call_operand.vmem [shape: f32[1,128], index: 3, kind: input, shape index: {}]   ;;  %s2337_s4 = inlined_call_operand.vmem [shape: bf16[128,128], index: 4, kind: output, shape index: {}]  }
   0x1 LB: > { %s1464_s16 = sadd.s32 4294967295, %s1975_s15   ;;  %p1468_p0 = scmp.ge.s32.totalorder %s1975_s15, 1  ;;  %s1975_s15 = sphi %s2002_s15, %s14_s15  }
   0x2   : > { %p164_p1 = scmp.lt.s32.totalorder %s1975_s15, 3 }
   0x4   : > { %p165_p2 = pnand %p1468_p0, %p164_p1 }
   0x6   : > { %168 = sbr.rel (%p165_p2) target bundleno = 321 (0x141), region = 36 }
   0xb   : > { %v1845_v0 = vld [vmem:[%s2334_s1 + $0x78] sm:$0xff]   ;;  %v1849_v4 = vld [vmem:[%s2334_s1 + $0x70] sm:$0xff]   ;;  %v1853_v8 = vld [vmem:[%s2334_s1 + $0x68] sm:$0xff]   ;;  %s1469_s23 = sshll.u32 %s1464_s16, 3 }
   0xc   : > { %v1846_v1 = vld [vmem:[%s2334_s1 + $0xf8] sm:$0xff]   ;;  %1624 = vmatprep.subr.bf16.mxu0 %v1845_v0  ;;  %v1850_v5 = vld [vmem:[%s2334_s1 + $0xf0] sm:$0xff]   ;;  %v1854_v9 = vld [vmem:[%s2334_s1 + $0xe8] sm:$0xff]   ;;  %p192_p3 = scmp.lt.s32.totalorder %s1469_s23, 15 }
   0xd   : > { %v1847_v2 = vld [vmem:[%s2334_s1 + $0x38] sm:$0xff]   ;;  %1664 = vmatprep.subr.bf16.mxu1 %v1846_v1  ;;  %v1851_v6 = vld [vmem:[%s2334_s1 + $0x30] sm:$0xff]   ;;  %v1855_v10 = vld [vmem:[%s2334_s1 + $0x28] sm:$0xff]  }
   0xe   : > { %v1848_v3 = vld [vmem:[%s2334_s1 + $0xb8] sm:$0xff]   ;;  %1625 = vmatpush3.bf16.msra.mxu0 %v1847_v2  ;;  %v1852_v7 = vld [vmem:[%s2334_s1 + $0xb0] sm:$0xff]   ;;  %v1856_v11 = vld [vmem:[%s2334_s1 + $0xa8] sm:$0xff]   ;;  %s2355_s23 = smov (!%p192_p3, %s1469_s23), 15 }
   0xf   : > { %1665 = vmatpush3.bf16.msra.mxu1 %v1848_v3  ;;  %1626 = vmatprep.subr.bf16.mxu0 %v1849_v4  ;;  %v1857_v12 = vld [vmem:[%s2334_s1 + $0x60] sm:$0xff]   ;;  %v1861_v16 = vld [vmem:[%s2334_s1 + $0x58] sm:$0xff]   ;;  %v1865_v20 = vld [vmem:[%s2334_s1 + $0x50] sm:$0xff]   ;;  %s1836_s21 = smul.u32 36, %s2355_s23  ;;  %s1472_s28 = sshll.u32 %s2355_s23, 2 }
  0x10   : > { %1666 = vmatprep.subr.bf16.mxu1 %v1850_v5  ;;  %v1858_v13 = vld [vmem:[%s2334_s1 + $0xe0] sm:$0xff]   ;;  %v1862_v17 = vld [vmem:[%s2334_s1 + $0xd8] sm:$0xff]   ;;  %v1866_v21 = vld [vmem:[%s2334_s1 + $0xd0] sm:$0xff]   ;;  %s202_s5 = scalar_lea.vmem %s2337_s4, %s1472_s28 }
  0x11   : > { %v1859_v14 = vld [vmem:[%s2334_s1 + $0x20] sm:$0xff]   ;;  %v1863_v18 = vld [vmem:[%s2334_s1 + $0x18] sm:$0xff]   ;;  %v1867_v22 = vld [vmem:[%s2334_s1 + $0x10] sm:$0xff]   ;;  %s2108_s6 = scalar_lea.vmem %s2333_s0, %s1836_s21 }
  0x12   : > { %1627 = vmatpush3.bf16.msra.mxu0 %v1851_v6  ;;  %v1860_v15 = vld [vmem:[%s2334_s1 + $0xa0] sm:$0xff]   ;;  %v1864_v19 = vld [vmem:[%s2334_s1 + $0x98] sm:$0xff]   ;;  %v1868_v23 = vld [vmem:[%s2334_s1 + $0x90] sm:$0xff]  }
  0x13   : > { %1667 = vmatpush3.bf16.msra.mxu1 %v1852_v7  ;;  %1628 = vmatprep.subr.bf16.mxu0 %v1853_v8  ;;  %v1869_v24 = vld [vmem:[%s2334_s1 + $0x48] sm:$0xff]   ;;  %v1873_v28 = vld [vmem:[%s2334_s1 + $0x40] sm:$0xff]   ;;  %v1883_v36 = vld [vmem:[%s2334_s1 + $0x178] sm:$0xff]  }
  0x14   : > { %1668 = vmatprep.subr.bf16.mxu1 %v1854_v9  ;;  %v1870_v25 = vld [vmem:[%s2334_s1 + $0xc8] sm:$0xff]   ;;  %v1874_v29 = vld [vmem:[%s2334_s1 + $0xc0] sm:$0xff]   ;;  %v1884_v37 = vld [vmem:[%s2334_s1 + $0x1f8] sm:$0xff]  }
  0x15   : > { %v1871_v26 = vld [vmem:[%s2334_s1 + $0x8] sm:$0xff]   ;;  %v1875_v30 = vld [vmem:[%s2334_s1] sm:$0xff]   ;;  %v1885_v38 = vld [vmem:[%s2334_s1 + $0x138] sm:$0xff]  }
  0x16   : > { %1629 = vmatpush3.bf16.msra.mxu0 %v1855_v10  ;;  %v1872_v27 = vld [vmem:[%s2334_s1 + $0x88] sm:$0xff]   ;;  %v1876_v31 = vld [vmem:[%s2334_s1 + $0x80] sm:$0xff]   ;;  %v1886_v39 = vld [vmem:[%s2334_s1 + $0x1b8] sm:$0xff]  }
  0x17   : > { %1669 = vmatpush3.bf16.msra.mxu1 %v1856_v11  ;;  %1630 = vmatprep.subr.bf16.mxu0 %v1857_v12  ;;  %v1877_v32 = vld [vmem:[%s2108_s6] ss:$36 sps:$4 sm:$0xff]   ;;  %v1880_v34 = vld [vmem:[%s2108_s6 + $0x8] ss:$36 sps:$4 sm:$0xff]   ;;  %v1887_v40 = vld [vmem:[%s2334_s1 + $0x170] sm:$0xff]  }
  0x18   : > { %1670 = vmatprep.subr.bf16.mxu1 %v1858_v13  ;;  %v1879_v33 = vld [vmem:[%s2108_s6 + $0x4] ss:$36 sps:$4 sm:$0xff]   ;;  %v1882_v35 = vld [vmem:[%s2108_s6 + $0xc] ss:$36 sps:$4 sm:$0xff]   ;;  %v1893_v45 = vld [vmem:[%s2108_s6 + $0x54] ss:$36 sps:$4 sm:$0xff]  }
  0x19   : > { %1037 = vmatprep.mubr.bf16.mxu0 %v1879_v33  ;;  %1102 = vmatprep.mubr.bf16.mxu1 %v1882_v35  ;;  %v1888_v41 = vld [vmem:[%s2334_s1 + $0x1f0] sm:$0xff]   ;;  %v1895_v46 = vld [vmem:[%s2108_s6 + $0x48] ss:$36 sps:$4 sm:$0xff]   ;;  %v1901_v52 = vld [vmem:[%s2334_s1 + $0x160] sm:$0xff]  }
  0x1a   : > { %1631 = vmatpush3.bf16.msra.mxu0 %v1859_v14  ;;  %v1889_v42 = vld [vmem:[%s2334_s1 + $0x130] sm:$0xff]   ;;  %v1897_v48 = vld [vmem:[%s2334_s1 + $0x168] sm:$0xff]   ;;  %v1902_v53 = vld [vmem:[%s2334_s1 + $0x1e0] sm:$0xff]  }
  0x1b   : > { %1671 = vmatpush3.bf16.msra.mxu1 %v1860_v15  ;;  %1632 = vmatprep.subr.bf16.mxu0 %v1861_v16  ;;  %v1890_v43 = vld [vmem:[%s2334_s1 + $0x1b0] sm:$0xff]   ;;  %v1898_v49 = vld [vmem:[%s2334_s1 + $0x1e8] sm:$0xff]   ;;  %v1903_v54 = vld [vmem:[%s2334_s1 + $0x120] sm:$0xff]  }
  0x1c   : > { %1672 = vmatprep.subr.bf16.mxu1 %v1862_v17  ;;  %v1891_v44 = vld [vmem:[%s2108_s6 + $0x4c] ss:$36 sps:$4 sm:$0xff]   ;;  %v1904_v55 = vld [vmem:[%s2334_s1 + $0x1a0] sm:$0xff]   ;;  %v1905_v56 = vld [vmem:[%s2108_s6 + $0x94] ss:$36 sps:$4 sm:$0xff]  }
  0x1d   : > { %v1896_v47 = vld [vmem:[%s2108_s6 + $0x50] ss:$36 sps:$4 sm:$0xff]   ;;  %v1899_v50 = vld [vmem:[%s2334_s1 + $0x128] sm:$0xff]   ;;  %v1907_v57 = vld [vmem:[%s2108_s6 + $0x9c] ss:$36 sps:$4 sm:$0xff]  }
  0x1e   : > { %1633 = vmatpush3.bf16.msra.mxu0 %v1863_v18  ;;  %v1900_v51 = vld [vmem:[%s2334_s1 + $0x1a8] sm:$0xff]   ;;  %v1909_v58 = vld [vmem:[%s2108_s6 + $0x90] ss:$36 sps:$4 sm:$0xff]   ;;  %v1910_v59 = vld [vmem:[%s2108_s6 + $0x98] ss:$36 sps:$4 sm:$0xff]  }
  0x1f   : > { %1673 = vmatpush3.bf16.msra.mxu1 %v1864_v19  ;;  %1634 = vmatprep.subr.bf16.mxu0 %v1865_v20  ;;  %v1911_v60 = vld [vmem:[%s2334_s1 + $0x158] sm:$0xff]   ;;  %v1915_v0 = vld [vmem:[%s2334_s1 + $0x150] sm:$0xff]   ;;  %v1921_v5 = vld [vmem:[%s2108_s6 + $0xe4] ss:$36 sps:$4 sm:$0xff]  }
  0x20   : > { %1674 = vmatprep.subr.bf16.mxu1 %v1866_v21  ;;  %v1912_v61 = vld [vmem:[%s2334_s1 + $0x1d8] sm:$0xff]   ;;  %v1916_v1 = vld [vmem:[%s2334_s1 + $0x1d0] sm:$0xff]   ;;  %v1924_v7 = vld [vmem:[%s2108_s6 + $0xe0] ss:$36 sps:$4 sm:$0xff]  }
  0x21   : > { %v1913_v62 = vld [vmem:[%s2334_s1 + $0x118] sm:$0xff]   ;;  %v1917_v2 = vld [vmem:[%s2334_s1 + $0x110] sm:$0xff]   ;;  %v1925_v8 = vld [vmem:[%s2334_s1 + $0x148] sm:$0xff]  }
  0x22   : > { %1635 = vmatpush3.bf16.msra.mxu0 %v1867_v22  ;;  %v1914_v63 = vld [vmem:[%s2334_s1 + $0x198] sm:$0xff]   ;;  %v1918_v3 = vld [vmem:[%s2334_s1 + $0x190] sm:$0xff]   ;;  %v1926_v9 = vld [vmem:[%s2334_s1 + $0x1c8] sm:$0xff]  }
  0x23   : > { %1675 = vmatpush3.bf16.msra.mxu1 %v1868_v23  ;;  %1636 = vmatprep.subr.bf16.mxu0 %v1869_v24  ;;  %v1919_v4 = vld [vmem:[%s2108_s6 + $0xdc] ss:$36 sps:$4 sm:$0xff]   ;;  %v1927_v10 = vld [vmem:[%s2334_s1 + $0x108] sm:$0xff]   ;;  %v1933_v16 = vld [vmem:[%s2108_s6 + $0x10] ss:$36 sps:$4 sm:$0xff]  }
  0x24   : > { %1676 = vmatprep.subr.bf16.mxu1 %v1870_v25  ;;  %v1923_v6 = vld [vmem:[%s2108_s6 + $0xd8] ss:$36 sps:$4 sm:$0xff]   ;;  %v1928_v11 = vld [vmem:[%s2334_s1 + $0x188] sm:$0xff]   ;;  %v1929_v12 = vld [vmem:[%s2334_s1 + $0x140] sm:$0xff]  }
  0x25   : > { %v1930_v13 = vld [vmem:[%s2334_s1 + $0x1c0] sm:$0xff]   ;;  %v1935_v17 = vld [vmem:[%s2108_s6 + $0x14] ss:$36 sps:$4 sm:$0xff]   ;;  %v1957_v33 = vld [vmem:[%s2108_s6 + $0xec] ss:$36 sps:$4 sm:$0xff]  }
  0x26   : > { %1637 = vmatpush3.bf16.msra.mxu0 %v1871_v26  ;;  %v1931_v14 = vld [vmem:[%s2334_s1 + $0x100] sm:$0xff]   ;;  %v1936_v18 = vld [vmem:[%s2108_s6 + $0x18] ss:$36 sps:$4 sm:$0xff]   ;;  %v1940_v21 = vld [vmem:[%s2334_s1 + $0x230] sm:$0xff]  }
  0x27   : > { %1677 = vmatpush3.bf16.msra.mxu1 %v1872_v27  ;;  %1638 = vmatprep.subr.bf16.mxu0 %v1873_v28  ;;  %v1932_v15 = vld [vmem:[%s2334_s1 + $0x180] sm:$0xff]   ;;  %v1939_v20 = vld [vmem:[%s2334_s1 + $0x238] sm:$0xff]   ;;  %v1947_v26 = vld [vmem:[%s2334_s1 + $0x228] sm:$0xff]  }
  0x28   : > { %1678 = vmatprep.subr.bf16.mxu1 %v1874_v29  ;;  %v1938_v19 = vld [vmem:[%s2108_s6 + $0x1c] ss:$36 sps:$4 sm:$0xff]   ;;  %v1943_v23 = vld [vmem:[%s2108_s6 + $0x64] ss:$36 sps:$4 sm:$0xff]   ;;  %v1951_v28 = vld [vmem:[%s2108_s6 + $0xac] ss:$36 sps:$4 sm:$0xff]  }
  0x29   : > { %v1941_v22 = vld [vmem:[%s2108_s6 + $0x5c] ss:$36 sps:$4 sm:$0xff]   ;;  %v1949_v27 = vld [vmem:[%s2108_s6 + $0xa4] ss:$36 sps:$4 sm:$0xff]   ;;  %v1956_v35 = vld [vmem:[%s2334_s1 + $0x210] sm:$0xff]  }
  0x2a   : > { %1639 = vmatpush3.bf16.msra.mxu0 %v1875_v30  ;;  %v1945_v24 = vld [vmem:[%s2108_s6 + $0x58] ss:$36 sps:$4 sm:$0xff]   ;;  %v1946_v25 = vld [vmem:[%s2108_s6 + $0x60] ss:$36 sps:$4 sm:$0xff]  }
  0x2b   : > { %1679 = vmatpush3.bf16.msra.mxu1 %v1876_v31  ;;  %1704 = vmatprep.subr.bf16.mxu0 %v1883_v36  ;;  %v1948_v29 = vld [vmem:[%s2334_s1 + $0x220] sm:$0xff]   ;;  %v1954_v31 = vld [vmem:[%s2108_s6 + $0xa8] ss:$36 sps:$4 sm:$0xff]  }
  0x2c   : > { %1744 = vmatprep.subr.bf16.mxu1 %v1884_v37  ;;  %v1953_v30 = vld [vmem:[%s2108_s6 + $0xa0] ss:$36 sps:$4 sm:$0xff]   ;;  %v1961_v36 = vld [vmem:[%s2108_s6 + $0xe8] ss:$36 sps:$4 sm:$0xff]  }
  0x2d   : > { %1038 = vmatmul.mubr.bf16.vlgmr.msra.gmra.mxu0 %v1877_v32  ;;  %v1955_v32 = vld [vmem:[%s2334_s1 + $0x218] sm:$0xff]   ;;  %v1963_v37 = vld [vmem:[%s2334_s1 + $0x208] sm:$0xff]  }
  0x2e   : > { %1103 = vmatmul.mubr.bf16.vlgmr.msra.gmra.mxu1 %v1880_v34  ;;  %1705 = vmatpush3.bf16.msra.mxu0 %v1885_v38  ;;  %v1959_v34 = vld [vmem:[%s2108_s6 + $0xf4] ss:$36 sps:$4 sm:$0xff]  }
  0x2f   : > { %1745 = vmatpush3.bf16.msra.mxu1 %v1886_v39  ;;  %1706 = vmatprep.subr.bf16.mxu0 %v1887_v40  ;;  %v1962_v38 = vld [vmem:[%s2108_s6 + $0xf0] ss:$36 sps:$4 sm:$0xff]   ;;  %v1965_v39 = vld [vmem:[%s2108_s6 + $0x20] ss:$36 sps:$4 sm:$0xff]  }
  0x30   : > { %1746 = vmatprep.subr.bf16.mxu1 %v1888_v41  ;;  %1045 = vmatprep.mubr.bf16.mxu0 %v1891_v44  ;;  %v1966_v40 = vld [vmem:[%s2108_s6 + $0xb0] ss:$36 sps:$4 sm:$0xff]   ;;  %v1964_v41 = vld [vmem:[%s2334_s1 + $0x200] sm:$0xff]  }
  0x31   : > { %1110 = vmatprep.mubr.bf16.mxu1 %v1893_v45 }
  0x32   : > { %1707 = vmatpush3.bf16.msra.mxu0 %v1889_v42  ;;  %v1967_v42 = vld [vmem:[%s2108_s6 + $0x68] ss:$36 sps:$4 sm:$0xff]  }
  0x33   : > { %1747 = vmatpush3.bf16.msra.mxu1 %v1890_v43  ;;  %1708 = vmatprep.subr.bf16.mxu0 %v1897_v48  ;;  %v1968_v43 = vld [vmem:[%s2108_s6 + $0xf8] ss:$36 sps:$4 sm:$0xff]  }
  0x34   : > { %1748 = vmatprep.subr.bf16.mxu1 %v1898_v49 }
  0x35   : > { %1046 = vmatmul.mubr.bf16.gmra.mxu0 %v1895_v46 }
  0x36   : > { %1111 = vmatmul.mubr.bf16.gmra.mxu1 %v1896_v47  ;;  %1709 = vmatpush3.bf16.msra.mxu0 %v1899_v50 }
  0x37   : > { %1749 = vmatpush3.bf16.msra.mxu1 %v1900_v51  ;;  %1710 = vmatprep.subr.bf16.mxu0 %v1901_v52 }
  0x38   : > { %1750 = vmatprep.subr.bf16.mxu1 %v1902_v53  ;;  %1053 = vmatprep.mubr.bf16.mxu0 %v1905_v56 }
  0x39   : > { %1118 = vmatprep.mubr.bf16.mxu1 %v1907_v57 }
  0x3a   : > { %1711 = vmatpush3.bf16.msra.mxu0 %v1903_v54 }
  0x3b   : > { %1751 = vmatpush3.bf16.msra.mxu1 %v1904_v55  ;;  %1712 = vmatprep.subr.bf16.mxu0 %v1911_v60 }
  0x3c   : > { %1752 = vmatprep.subr.bf16.mxu1 %v1912_v61 }
  0x3d   : > { %1054 = vmatmul.mubr.bf16.gmra.mxu0 %v1909_v58 }
  0x3e   : > { %1119 = vmatmul.mubr.bf16.gmra.mxu1 %v1910_v59  ;;  %1713 = vmatpush3.bf16.msra.mxu0 %v1913_v62 }
  0x3f   : > { %1753 = vmatpush3.bf16.msra.mxu1 %v1914_v63  ;;  %1714 = vmatprep.subr.bf16.mxu0 %v1915_v0 }
  0x40   : > { %1754 = vmatprep.subr.bf16.mxu1 %v1916_v1  ;;  %1061 = vmatprep.mubr.bf16.mxu0 %v1919_v4 }
  0x41   : > { %1126 = vmatprep.mubr.bf16.mxu1 %v1921_v5 }
  0x42   : > { %1715 = vmatpush3.bf16.msra.mxu0 %v1917_v2 }
  0x43   : > { %1755 = vmatpush3.bf16.msra.mxu1 %v1918_v3  ;;  %1716 = vmatprep.subr.bf16.mxu0 %v1925_v8 }
  0x44   : > { %1756 = vmatprep.subr.bf16.mxu1 %v1926_v9 }
  0x45   : > { %1062 = vmatmul.mubr.bf16.gmra.mxu0 %v1923_v6 }
  0x46   : > { %1127 = vmatmul.mubr.bf16.gmra.mxu1 %v1924_v7  ;;  %1717 = vmatpush3.bf16.msra.mxu0 %v1927_v10 }
  0x47   : > { %1757 = vmatpush3.bf16.msra.mxu1 %v1928_v11  ;;  %1718 = vmatprep.subr.bf16.mxu0 %v1929_v12 }
  0x48   : > { %1758 = vmatprep.subr.bf16.mxu1 %v1930_v13  ;;  %1167 = vmatprep.mubr.bf16.mxu0 %v1935_v17 }
  0x49   : > { %1232 = vmatprep.mubr.bf16.mxu1 %v1938_v19 }
  0x4a   : > { %1719 = vmatpush3.bf16.msra.mxu0 %v1931_v14 }
  0x4b   : > { %1759 = vmatpush3.bf16.msra.mxu1 %v1932_v15  ;;  %1796 = vmatprep.subr.bf16.mxu0 %v1939_v20 }
  0x4c   : > { %1820 = vmatprep.subr.bf16.mxu1 %v1939_v20 }
  0x4d   : > { %1168 = vmatmul.mubr.bf16.vlgmr.msra.gmra.mxu0 %v1933_v16 }
  0x4e   : > { %1233 = vmatmul.mubr.bf16.vlgmr.msra.gmra.mxu1 %v1936_v18  ;;  %1797 = vmatpush3.bf16.msra.mxu0 %v1939_v20 }
  0x4f   : > { %1828 = vmatpush3.bf16.msra.mxu1 %v1939_v20  ;;  %1798 = vmatprep.subr.bf16.mxu0 %v1940_v21 }
  0x50   : > { %1821 = vmatprep.subr.bf16.mxu1 %v1940_v21  ;;  %1175 = vmatprep.mubr.bf16.mxu0 %v1941_v22 }
  0x51   : > { %1240 = vmatprep.mubr.bf16.mxu1 %v1943_v23 }
  0x52   : > { %1799 = vmatpush3.bf16.msra.mxu0 %v1940_v21 }
  0x53   : > { %1829 = vmatpush3.bf16.msra.mxu1 %v1940_v21  ;;  %1800 = vmatprep.subr.bf16.mxu0 %v1947_v26 }
  0x54   : > { %1822 = vmatprep.subr.bf16.mxu1 %v1947_v26 }
  0x55   : > { %1176 = vmatmul.mubr.bf16.gmra.mxu0 %v1945_v24 }
  0x56   : > { %1241 = vmatmul.mubr.bf16.gmra.mxu1 %v1946_v25  ;;  %1183 = vmatprep.mubr.bf16.mxu0 %v1949_v27 }
  0x57   : > { %1801 = vmatpush3.bf16.msra.mxu0 %v1947_v26  ;;  %1248 = vmatprep.mubr.bf16.mxu1 %v1951_v28 }
  0x58   : > { %1830 = vmatpush3.bf16.msra.mxu1 %v1947_v26  ;;  %1802 = vmatprep.subr.bf16.mxu0 %v1948_v29 }
  0x59   : > { %1823 = vmatprep.subr.bf16.mxu1 %v1948_v29 }
  0x5b   : > { %1803 = vmatpush3.bf16.msra.mxu0 %v1948_v29 }
  0x5c   : > { %1831 = vmatpush3.bf16.msra.mxu1 %v1948_v29  ;;  %1804 = vmatprep.subr.bf16.mxu0 %v1955_v32 }
  0x5d   : > { %1184 = vmatmul.mubr.bf16.gmra.mxu0 %v1953_v30  ;;  %1824 = vmatprep.subr.bf16.mxu1 %v1955_v32 }
  0x5e   : > { %1249 = vmatmul.mubr.bf16.gmra.mxu1 %v1954_v31  ;;  %1191 = vmatprep.mubr.bf16.mxu0 %v1957_v33 }
  0x5f   : > { %1805 = vmatpush3.bf16.msra.mxu0 %v1955_v32  ;;  %1256 = vmatprep.mubr.bf16.mxu1 %v1959_v34 }
  0x60   : > { %1832 = vmatpush3.bf16.msra.mxu1 %v1955_v32  ;;  %1806 = vmatprep.subr.bf16.mxu0 %v1956_v35 }
  0x61   : > { %1825 = vmatprep.subr.bf16.mxu1 %v1956_v35 }
  0x63   : > { %1807 = vmatpush3.bf16.msra.mxu0 %v1956_v35 }
  0x64   : > { %1833 = vmatpush3.bf16.msra.mxu1 %v1956_v35  ;;  %1808 = vmatprep.subr.bf16.mxu0 %v1963_v37 }
  0x65   : > { %1192 = vmatmul.mubr.bf16.gmra.mxu0 %v1961_v36  ;;  %1826 = vmatprep.subr.bf16.mxu1 %v1963_v37 }
  0x66   : > { %1257 = vmatmul.mubr.bf16.gmra.mxu1 %v1962_v38  ;;  %1812 = vmatprep.mubr.bf16.mxu0 %v1965_v39 }
  0x67   : > { %1809 = vmatpush3.bf16.msra.mxu0 %v1963_v37  ;;  %1816 = vmatprep.mubr.bf16.mxu1 %v1966_v40 }
  0x68   : > { %1834 = vmatpush3.bf16.msra.mxu1 %v1963_v37  ;;  %1810 = vmatprep.subr.bf16.mxu0 %v1964_v41 }
  0x69   : > { %1827 = vmatprep.subr.bf16.mxu1 %v1964_v41 }
  0x6b   : > { %1811 = vmatpush3.bf16.msra.mxu0 %v1964_v41 }
  0x6c   : > { %1835 = vmatpush3.bf16.msra.mxu1 %v1964_v41 }
  0x6e   : > { %1813 = vmatmul.mubr.bf16.vlgmr.msra.gmra.mxu0 %v1967_v42 }
  0x6f   : > { %1817 = vmatmul.mubr.bf16.vlgmr.msra.gmra.mxu1 %v1968_v43 }
  0xed   : > { %v1640_v44 = vpop.f32.mrf.mxu0 }
  0xee   : > { %v1680_v45 = vpop.f32.mrf.mxu1 }
  0xef   : > { %v1641_v46 = vpop.f32.mrf.mxu0 }
  0xf0   : > { %v1681_v47 = vpop.f32.mrf.mxu1  ;;  %v1642_v33 = vadd.f32 %v1641_v46, %v1640_v44 }
  0xf1   : > { %v2272_v48 = vpop.f32.mrf.mxu0  ;;  %v1682_v34 = vadd.f32 %v1681_v47, %v1680_v45 }
  0xf2   : > { %v2274_v49 = vpop.f32.mrf.mxu1 }
  0xf3   : > { %v2276_v50 = vpop.f32.mrf.mxu0 }
  0xf4   : > { %v2278_v51 = vpop.f32.mrf.mxu1 }
  0xf5   : > { %v1646_v52 = vpop.f32.mrf.mxu0 }
  0xf6   : > { %v1686_v53 = vpop.f32.mrf.mxu1 }
  0xf7   : > { %v1647_v54 = vpop.f32.mrf.mxu0 }
  0xf8   : > { %v1687_v55 = vpop.f32.mrf.mxu1  ;;  %v1648_v37 = vadd.f32 %v1647_v54, %v1646_v52  ;;  %v1685_v54 = vadd.f32 %v2278_v51, %v2274_v49 }
  0xf9   : > { %v1649_v56 = vpop.f32.mrf.mxu0  ;;  %v1688_v38 = vadd.f32 %v1687_v55, %v1686_v53  ;;  %v1645_v53 = vadd.f32 %v2276_v50, %v2272_v48 }
  0xfa   : > { %v1689_v57 = vpop.f32.mrf.mxu1 }
  0xfb   : > { %v1650_v58 = vpop.f32.mrf.mxu0  ;;  %v1113_v46 = vadd.f32 %v1688_v38, %v1648_v37 }
  0xfc   : > { %v1690_v59 = vpop.f32.mrf.mxu1  ;;  %v1651_v41 = vadd.f32 %v1650_v58, %v1649_v56 }
  0xfd   : > { %v1652_v60 = vpop.f32.mrf.mxu0  ;;  %v1691_v42 = vadd.f32 %v1690_v59, %v1689_v57 }
  0xfe   : > { %v1692_v61 = vpop.f32.mrf.mxu1 }
  0xff   : > { %v1653_v62 = vpop.f32.mrf.mxu0  ;;  %v1116_v55 = vadd.f32 %v1691_v42, %v1651_v41 }
 0x100   : > { %v1693_v63 = vpop.f32.mrf.mxu1 }
 0x101   : > { %v2280_v0 = vpop.f32.mrf.mxu0 }
 0x102   : > { %v2282_v1 = vpop.f32.mrf.mxu1 }
 0x103   : > { %v2284_v2 = vpop.f32.mrf.mxu0 }
 0x104   : > { %v2286_v3 = vpop.f32.mrf.mxu1 }
 0x105   : > { %2338 = vst [vmem:[#allocation2_spill] sm:$0xff] %v2286_v3  ;;  %v1658_v4 = vpop.f32.mrf.mxu0 }
 0x106   : > { %v1698_v5 = vpop.f32.mrf.mxu1 }
 0x107   : > { %v1659_v6 = vpop.f32.mrf.mxu0 }
 0x108   : > { %v1699_v7 = vpop.f32.mrf.mxu1  ;;  %v1660_v39 = vadd.f32 %v1659_v6, %v1658_v4 }
 0x109   : > { %v1661_v8 = vpop.f32.mrf.mxu0  ;;  %v1700_v40 = vadd.f32 %v1699_v7, %v1698_v5 }
 0x10a   : > { %v1701_v9 = vpop.f32.mrf.mxu1 }
 0x10b   : > { %v1662_v10 = vpop.f32.mrf.mxu0  ;;  %v1129_v47 = vadd.f32 %v1700_v40, %v1660_v39 }
 0x10c   : > { %v1702_v11 = vpop.f32.mrf.mxu1  ;;  %v2346_v4 = vld [vmem:[#allocation2_spill] sm:$0xff] }
 0x10d   : > { %v1720_v12 = vpop.f32.mrf.mxu0  ;;  %v1703_v3 = vadd.f32 %v1702_v11, %v1701_v9  ;;  %v1697_v5 = vadd.f32 %v2346_v4, %v2282_v1 }
 0x10e   : > { %v2288_v13 = vpop.f32.mrf.mxu1 }
 0x10f   : > { %2339 = vst [vmem:[#allocation3_spill] sm:$0xff] %v2288_v13  ;;  %v1721_v14 = vpop.f32.mrf.mxu0  ;;  %v1663_v13 = vadd.f32 %v1662_v10, %v1661_v8  ;;  %v1108_v10 = vadd.f32 %v1685_v54, %v1645_v53 }
 0x110   : > { %v2290_v15 = vpop.f32.mrf.mxu1 }
 0x111   : > { %2340 = vst [vmem:[#allocation4_spill] sm:$0xff] %v2290_v15  ;;  %v1723_v16 = vpop.f32.mrf.mxu0  ;;  %v1105_v15 = vadd.f32 %v1682_v34, %v1642_v33  ;;  %v1132_v6 = vadd.f32 %v1703_v3, %v1663_v13 }
 0x112   : > { %v2292_v17 = vpop.f32.mrf.mxu1 }
 0x113   : > { %2341 = vst [vmem:[#allocation5_spill] sm:$0xff] %v2292_v17  ;;  %v1724_v18 = vpop.f32.mrf.mxu0  ;;  %v1654_v17 = vadd.f32 %v1653_v62, %v1652_v60 }
 0x114   : > { %v2294_v19 = vpop.f32.mrf.mxu1  ;;  %v1725_v49 = vadd.f32 %v1724_v18, %v1723_v16 }
 0x115   : > { %2342 = vst [vmem:[#allocation6_spill] sm:$0xff] %v2294_v19  ;;  %v1726_v20 = vpop.f32.mrf.mxu0 }
 0x116   : > { %v1766_v21 = vpop.f32.mrf.mxu1  ;;  %v1173_v16 = vadd.f32 %v1725_v49, %v1108_v10 }
 0x117   : > { %v1727_v22 = vpop.f32.mrf.mxu0 }
 0x118   : > { %v1767_v23 = vpop.f32.mrf.mxu1 }
 0x119   : > { %v1729_v24 = vpop.f32.mrf.mxu0  ;;  %v1768_v51 = vadd.f32 %v1767_v23, %v1766_v21 }
 0x11a   : > { %v2296_v25 = vpop.f32.mrf.mxu1 }
 0x11b   : > { %2343 = vst [vmem:[#allocation7_spill] sm:$0xff] %v2296_v25  ;;  %v1730_v26 = vpop.f32.mrf.mxu0  ;;  %v1728_v25 = vadd.f32 %v1727_v22, %v1726_v20  ;;  %v2348_v20 = vld [vmem:[#allocation4_spill] sm:$0xff] }
 0x11c   : > { %v2298_v27 = vpop.f32.mrf.mxu1 }
 0x11d   : > { %2344 = vst [vmem:[#allocation8_spill] sm:$0xff] %v2298_v27  ;;  %v1732_v28 = vpop.f32.mrf.mxu0  ;;  %v1694_v27 = vadd.f32 %v1693_v63, %v1692_v61  ;;  %v1178_v60 = vadd.f32 %v1728_v25, %v1113_v46  ;;  %v1731_v61 = vadd.f32 %v1730_v26, %v1729_v24  ;;  %v1657_v63 = vadd.f32 %v2284_v2, %v2280_v0 }
 0x11e   : > { %v1772_v29 = vpop.f32.mrf.mxu1 }
 0x11f   : > { %v1733_v30 = vpop.f32.mrf.mxu0  ;;  %v1121_v59 = vadd.f32 %v1694_v27, %v1654_v17  ;;  %v1181_v0 = vadd.f32 %v1731_v61, %v1116_v55  ;;  %v1243_v24 = vadd.f32 %v1768_v51, %v1178_v60  ;;  %v1124_v1 = vadd.f32 %v1697_v5, %v1657_v63 }
 0x120   : > { %v1773_v31 = vpop.f32.mrf.mxu1  ;;  %v1734_v56 = vadd.f32 %v1733_v30, %v1732_v28 }
 0x121   : > { %v1735_v32 = vpop.f32.mrf.mxu0  ;;  %v1774_v3 = vadd.f32 %v1773_v31, %v1772_v29  ;;  %v2352_v29 = vld [vmem:[#allocation6_spill] sm:$0xff] }
 0x122   : > { %v2300_v35 = vpop.f32.mrf.mxu1  ;;  %v1186_v11 = vadd.f32 %v1734_v56, %v1121_v59  ;;  %v2349_v18 = vld [vmem:[#allocation7_spill] sm:$0xff] }
 0x123   : > { %2345 = vst [vmem:[#allocation9_spill] sm:$0xff] %v2300_v35  ;;  %v1736_v36 = vpop.f32.mrf.mxu0  ;;  %v1722_v35 = vadd.f32 %v1721_v14, %v1720_v12 }
 0x124   : > { %v2302_v43 = vpop.f32.mrf.mxu1  ;;  %v1737_v12 = vadd.f32 %v1736_v36, %v1735_v32  ;;  %v2350_v21 = vld [vmem:[#allocation8_spill] sm:$0xff]  ;;  %v1251_v34 = vadd.f32 %v1774_v3, %v1186_v11  ;;  %v2351_v36 = vld [vmem:[#allocation5_spill] sm:$0xff] }
 0x125   : > { %v1738_v19 = vpop.f32.mrf.mxu0  ;;  %v1170_v8 = vadd.f32 %v1722_v35, %v1105_v15  ;;  %v1581_v15 = vld [vmem:[%s2335_s2] ss:$0 sm:$0xff]  ;;  %v1771_v23 = vadd.f32 %v2350_v21, %v2349_v18  ;;  %v1765_v31 = vadd.f32 %v2352_v29, %v2351_v36 }
 0x126   : > { %v1778_v44 = vpop.f32.mrf.mxu1  ;;  %v1189_v30 = vadd.f32 %v1737_v12, %v1124_v1 }
 0x127   : > { %v1739_v45 = vpop.f32.mrf.mxu0  ;;  %v1246_v40 = vadd.f32 %v1771_v23, %v1181_v0  ;;  %v1238_v55 = vadd.f32 %v1765_v31, %v1173_v16 }
 0x128   : > { %v1740_v52 = vadd.f32 %v1739_v45, %v1738_v19  ;;  %v1779_v57 = vpop.f32.mrf.mxu1  ;;  %v2347_v19 = vld [vmem:[#allocation3_spill] sm:$0xff] }
 0x129   : > { %v1741_v58 = vpop.f32.mrf.mxu0  ;;  %v1780_v7 = vadd.f32 %v1779_v57, %v1778_v44  ;;  %v1762_v22 = vadd.f32 %v2348_v20, %v2347_v19  ;;  %v1582_v44 = vld [vmem:[%s2336_s3] ss:$0 sm:$0xff] }
 0x12a   : > { %v1194_v62 = vadd.f32 %v1740_v52, %v1129_v47  ;;  %v1781_v48 = vpop.f32.mrf.mxu1  ;;  %v2353_v41 = vld [vmem:[#allocation9_spill] sm:$0xff] }
 0x12b   : > { %v1742_v50 = vpop.f32.mrf.mxu0  ;;  %v1235_v28 = vadd.f32 %v1762_v22, %v1170_v8  ;;  %v1777_v42 = vadd.f32 %v2302_v43, %v2353_v41 }
 0x12c   : > { %v1743_v9 = vadd.f32 %v1742_v50, %v1741_v58  ;;  %v1782_v14 = vpop.f32.mrf.mxu1  ;;  %v1259_v17 = vadd.f32 %v1780_v7, %v1194_v62 }
 0x12d   : > { %v1783_v13 = vadd.f32 %v1782_v14, %v1781_v48  ;;  %v1254_v59 = vadd.f32 %v1777_v42, %v1189_v30 }
 0x12e   : > { %v1197_v2 = vadd.f32 %v1743_v9, %v1132_v6  ;;  %v1814_v25 = vpop.f32.mrf.mxu0 }
 0x12f   : > { %v1308_v26 = vadd.f32 %v1814_v25, %v1243_v24  ;;  %v1818_v27 = vpop.f32.mrf.mxu1 }
 0x130   : > { %v1324_v32 = vadd.f32 %v1818_v27, %v1259_v17  ;;  %v1299_v33 = vpop.f32.mrf.mxu0  ;;  %v1262_v35 = vadd.f32 %v1783_v13, %v1197_v2 }
 0x131   : > { %v1339_v37 = vmul.f32 %v1581_v15, %v1308_v26  ;;  %v1300_v38 = vadd.f32 %v1299_v33, %v1235_v28  ;;  %v1315_v39 = vpop.f32.mrf.mxu1 }
 0x132   : > { %v1343_v45 = vmul.f32 %v1581_v15, %v1324_v32  ;;  %v1316_v46 = vadd.f32 %v1315_v39, %v1251_v34  ;;  %v1815_v47 = vpop.f32.mrf.mxu0 }
 0x133   : > { %v1337_v52 = vmul.f32 %v1581_v15, %v1300_v38  ;;  %v1311_v53 = vadd.f32 %v1815_v47, %v1246_v40  ;;  %v1819_v54 = vpop.f32.mrf.mxu1  ;;  %v1354_v60 = vadd.f32 %v1582_v44, %v1339_v37 }
 0x134   : > { %v1341_v56 = vmul.f32 %v1581_v15, %v1316_v46  ;;  %v1327_v57 = vadd.f32 %v1819_v54, %v1262_v35  ;;  %v1302_v58 = vpop.f32.mrf.mxu0  ;;  %v1358_v63 = vadd.f32 %v1582_v44, %v1343_v45 }
 0x135   : > { %v1340_v61 = vmul.f32 %v1581_v15, %v1311_v53  ;;  %v1303_v62 = vadd.f32 %v1302_v58, %v1238_v55  ;;  %v1318_v43 = vpop.f32.mrf.mxu1  ;;  %v1352_v6 = vadd.f32 %v1582_v44, %v1337_v52  ;;  %v1362_v51 = vmax.f32 %v1354_v60, 0.0 }
 0x136   : > { %v1344_v4 = vmul.f32 %v1581_v15, %v1327_v57  ;;  %v1319_v5 = vadd.f32 %v1318_v43, %v1254_v59  ;;  %v1356_v50 = vadd.f32 %v1582_v44, %v1341_v56  ;;  %v1366_v11 = vmax.f32 %v1358_v63, 0.0 }
 0x137   : > { %v1355_v7 = vadd.f32 %v1582_v44, %v1340_v61  ;;  %v1338_v48 = vmul.f32 %v1581_v15, %v1303_v62  ;;  %v1360_v17 = vmax.f32 %v1352_v6, 0.0 }
 0x138   : > { %v1359_v8 = vadd.f32 %v1582_v44, %v1344_v4  ;;  %v1342_v49 = vmul.f32 %v1581_v15, %v1319_v5  ;;  %v1364_v22 = vmax.f32 %v1356_v50, 0.0 }
 0x139   : > { %v1363_v9 = vmax.f32 %v1355_v7, 0.0  ;;  %v1353_v10 = vadd.f32 %v1582_v44, %v1338_v48 }
 0x13a   : > { %v1367_v12 = vmax.f32 %v1359_v8, 0.0  ;;  %v1357_v14 = vadd.f32 %v1582_v44, %v1342_v49 }
 0x13b   : > { %v1609_v19 = vpack.c.bf16 %v1363_v9, %v1362_v51  ;;  %v1361_v20 = vmax.f32 %v1353_v10, 0.0 }
 0x13c   : > { %v1619_v0 = vpack.c.bf16 %v1367_v12, %v1366_v11  ;;  %v1365_v2 = vmax.f32 %v1357_v14, 0.0 }
 0x13d   : > { %1621 = vst [vmem:[%s202_s5 + $0x8] sm:$0xff] %v1609_v19   ;;  %v1604_v24 = vpack.c.bf16 %v1361_v20, %v1360_v17 }
 0x13e   : > { %1623 = vst [vmem:[%s202_s5 + $0x18] sm:$0xff] %v1619_v0   ;;  %v1614_v1 = vpack.c.bf16 %v1365_v2, %v1364_v22 }
 0x13f   : > { %1605 = vst [vmem:[%s202_s5] sm:$0xff] %v1604_v24  }
 0x140   : > { %1622 = vst [vmem:[%s202_s5 + $0x10] sm:$0xff] %v1614_v1  }
 0x141 PF: > { %s14_s15 = sadd.s32 1, %s1975_s15  }
 0x142   : > { %p11_p4 = scmp.ge.s32.totalorder %s14_s15, 4  }
 0x144   :  { %13 = sbr.rel (!%p11_p4) target bundleno = 1 (0x1), region = 66 }

// kernel: byol_forward.24
= control target key start
LH: loop header
LB: loop body
LE: loop exit
PB: predicated region body
PF: predicated region fallthrough
CT: control target
= control target key end

     0   :  { %s2113_s18 = smov 0   ;;  %s2479_s0 = inlined_call_operand.vmem [shape: bf16[128,1152], index: 0, kind: input, shape index: {}]   ;;  %s2480_s1 = inlined_call_operand.vmem [shape: bf16[1152,128], index: 1, kind: input, shape index: {}]   ;;  %s2481_s2 = inlined_call_operand.vmem [shape: f32[1,128], index: 2, kind: input, shape index: {}]   ;;  %s2482_s3 = inlined_call_operand.vmem [shape: f32[1,128], index: 3, kind: input, shape index: {}]   ;;  %s2483_s4 = inlined_call_operand.vmem [shape: bf16[128,128], index: 4, kind: input, shape index: {}]   ;;  %s2484_s5 = inlined_call_operand.vmem [shape: bf16[128,128], index: 5, kind: output, shape index: {}]  }
   0x1 LB: > { %s1549_s19 = sadd.s32 4294967295, %s2081_s18   ;;  %p1553_p0 = scmp.ge.s32.totalorder %s2081_s18, 1  ;;  %s2081_s18 = sphi %s2113_s18, %s15_s18  }
   0x2   : > { %p200_p1 = scmp.lt.s32.totalorder %s2081_s18, 3 }
   0x4   : > { %p201_p2 = pnand %p1553_p0, %p200_p1 }
   0x6   : > { %204 = sbr.rel (%p201_p2) target bundleno = 323 (0x143), region = 40 }
   0xb   : > { %v1951_v0 = vld [vmem:[%s2480_s1 + $0x78] sm:$0xff]   ;;  %v1955_v4 = vld [vmem:[%s2480_s1 + $0x70] sm:$0xff]   ;;  %v1959_v8 = vld [vmem:[%s2480_s1 + $0x68] sm:$0xff]   ;;  %s1554_s27 = sshll.u32 %s1549_s19, 3 }
   0xc   : > { %v1952_v1 = vld [vmem:[%s2480_s1 + $0xf8] sm:$0xff]   ;;  %1730 = vmatprep.subr.bf16.mxu0 %v1951_v0  ;;  %v1956_v5 = vld [vmem:[%s2480_s1 + $0xf0] sm:$0xff]   ;;  %v1960_v9 = vld [vmem:[%s2480_s1 + $0xe8] sm:$0xff]   ;;  %p235_p3 = scmp.lt.s32.totalorder %s1554_s27, 15 }
   0xd   : > { %v1953_v2 = vld [vmem:[%s2480_s1 + $0x38] sm:$0xff]   ;;  %1770 = vmatprep.subr.bf16.mxu1 %v1952_v1  ;;  %v1957_v6 = vld [vmem:[%s2480_s1 + $0x30] sm:$0xff]   ;;  %v1961_v10 = vld [vmem:[%s2480_s1 + $0x28] sm:$0xff]  }
   0xe   : > { %v1954_v3 = vld [vmem:[%s2480_s1 + $0xb8] sm:$0xff]   ;;  %1731 = vmatpush3.bf16.msra.mxu0 %v1953_v2  ;;  %v1958_v7 = vld [vmem:[%s2480_s1 + $0xb0] sm:$0xff]   ;;  %v1962_v11 = vld [vmem:[%s2480_s1 + $0xa8] sm:$0xff]   ;;  %s2500_s27 = smov (!%p235_p3, %s1554_s27), 15 }
   0xf   : > { %1771 = vmatpush3.bf16.msra.mxu1 %v1954_v3  ;;  %1732 = vmatprep.subr.bf16.mxu0 %v1955_v4  ;;  %v1963_v12 = vld [vmem:[%s2480_s1 + $0x60] sm:$0xff]   ;;  %v1967_v16 = vld [vmem:[%s2480_s1 + $0x58] sm:$0xff]   ;;  %v1971_v20 = vld [vmem:[%s2480_s1 + $0x50] sm:$0xff]   ;;  %s1942_s26 = smul.u32 36, %s2500_s27 }
  0x10   : > { %1772 = vmatprep.subr.bf16.mxu1 %v1956_v5  ;;  %v1964_v13 = vld [vmem:[%s2480_s1 + $0xe0] sm:$0xff]   ;;  %v1968_v17 = vld [vmem:[%s2480_s1 + $0xd8] sm:$0xff]   ;;  %v1972_v21 = vld [vmem:[%s2480_s1 + $0xd0] sm:$0xff]  }
  0x11   : > { %v1965_v14 = vld [vmem:[%s2480_s1 + $0x20] sm:$0xff]   ;;  %v1969_v18 = vld [vmem:[%s2480_s1 + $0x18] sm:$0xff]   ;;  %v1973_v22 = vld [vmem:[%s2480_s1 + $0x10] sm:$0xff]   ;;  %s2219_s12 = scalar_lea.vmem %s2479_s0, %s1942_s26 }
  0x12   : > { %1733 = vmatpush3.bf16.msra.mxu0 %v1957_v6  ;;  %v1966_v15 = vld [vmem:[%s2480_s1 + $0xa0] sm:$0xff]   ;;  %v1970_v19 = vld [vmem:[%s2480_s1 + $0x98] sm:$0xff]   ;;  %v1974_v23 = vld [vmem:[%s2480_s1 + $0x90] sm:$0xff]  }
  0x13   : > { %1773 = vmatpush3.bf16.msra.mxu1 %v1958_v7  ;;  %1734 = vmatprep.subr.bf16.mxu0 %v1959_v8  ;;  %v1975_v24 = vld [vmem:[%s2480_s1 + $0x48] sm:$0xff]   ;;  %v1979_v28 = vld [vmem:[%s2480_s1 + $0x40] sm:$0xff]   ;;  %v1989_v36 = vld [vmem:[%s2480_s1 + $0x178] sm:$0xff]  }
  0x14   : > { %1774 = vmatprep.subr.bf16.mxu1 %v1960_v9  ;;  %v1976_v25 = vld [vmem:[%s2480_s1 + $0xc8] sm:$0xff]   ;;  %v1980_v29 = vld [vmem:[%s2480_s1 + $0xc0] sm:$0xff]   ;;  %v1990_v37 = vld [vmem:[%s2480_s1 + $0x1f8] sm:$0xff]  }
  0x15   : > { %v1977_v26 = vld [vmem:[%s2480_s1 + $0x8] sm:$0xff]   ;;  %v1981_v30 = vld [vmem:[%s2480_s1] sm:$0xff]   ;;  %v1991_v38 = vld [vmem:[%s2480_s1 + $0x138] sm:$0xff]  }
  0x16   : > { %1735 = vmatpush3.bf16.msra.mxu0 %v1961_v10  ;;  %v1978_v27 = vld [vmem:[%s2480_s1 + $0x88] sm:$0xff]   ;;  %v1982_v31 = vld [vmem:[%s2480_s1 + $0x80] sm:$0xff]   ;;  %v1992_v39 = vld [vmem:[%s2480_s1 + $0x1b8] sm:$0xff]  }
  0x17   : > { %1775 = vmatpush3.bf16.msra.mxu1 %v1962_v11  ;;  %1736 = vmatprep.subr.bf16.mxu0 %v1963_v12  ;;  %v1983_v32 = vld [vmem:[%s2219_s12] ss:$36 sps:$4 sm:$0xff]   ;;  %v1986_v34 = vld [vmem:[%s2219_s12 + $0x8] ss:$36 sps:$4 sm:$0xff]   ;;  %v1993_v40 = vld [vmem:[%s2480_s1 + $0x170] sm:$0xff]  }
  0x18   : > { %1776 = vmatprep.subr.bf16.mxu1 %v1964_v13  ;;  %v1985_v33 = vld [vmem:[%s2219_s12 + $0x4] ss:$36 sps:$4 sm:$0xff]   ;;  %v1988_v35 = vld [vmem:[%s2219_s12 + $0xc] ss:$36 sps:$4 sm:$0xff]   ;;  %v1999_v45 = vld [vmem:[%s2219_s12 + $0x54] ss:$36 sps:$4 sm:$0xff]  }
  0x19   : > { %1086 = vmatprep.mubr.bf16.mxu0 %v1985_v33  ;;  %1151 = vmatprep.mubr.bf16.mxu1 %v1988_v35  ;;  %v1994_v41 = vld [vmem:[%s2480_s1 + $0x1f0] sm:$0xff]   ;;  %v2001_v46 = vld [vmem:[%s2219_s12 + $0x48] ss:$36 sps:$4 sm:$0xff]   ;;  %v2007_v52 = vld [vmem:[%s2480_s1 + $0x160] sm:$0xff]  }
  0x1a   : > { %1737 = vmatpush3.bf16.msra.mxu0 %v1965_v14  ;;  %v1995_v42 = vld [vmem:[%s2480_s1 + $0x130] sm:$0xff]   ;;  %v2003_v48 = vld [vmem:[%s2480_s1 + $0x168] sm:$0xff]   ;;  %v2008_v53 = vld [vmem:[%s2480_s1 + $0x1e0] sm:$0xff]  }
  0x1b   : > { %1777 = vmatpush3.bf16.msra.mxu1 %v1966_v15  ;;  %1738 = vmatprep.subr.bf16.mxu0 %v1967_v16  ;;  %v1996_v43 = vld [vmem:[%s2480_s1 + $0x1b0] sm:$0xff]   ;;  %v2004_v49 = vld [vmem:[%s2480_s1 + $0x1e8] sm:$0xff]   ;;  %v2009_v54 = vld [vmem:[%s2480_s1 + $0x120] sm:$0xff]  }
  0x1c   : > { %1778 = vmatprep.subr.bf16.mxu1 %v1968_v17  ;;  %v1997_v44 = vld [vmem:[%s2219_s12 + $0x4c] ss:$36 sps:$4 sm:$0xff]   ;;  %v2010_v55 = vld [vmem:[%s2480_s1 + $0x1a0] sm:$0xff]   ;;  %v2011_v56 = vld [vmem:[%s2219_s12 + $0x94] ss:$36 sps:$4 sm:$0xff]  }
  0x1d   : > { %v2002_v47 = vld [vmem:[%s2219_s12 + $0x50] ss:$36 sps:$4 sm:$0xff]   ;;  %v2005_v50 = vld [vmem:[%s2480_s1 + $0x128] sm:$0xff]   ;;  %v2013_v57 = vld [vmem:[%s2219_s12 + $0x9c] ss:$36 sps:$4 sm:$0xff]  }
  0x1e   : > { %1739 = vmatpush3.bf16.msra.mxu0 %v1969_v18  ;;  %v2006_v51 = vld [vmem:[%s2480_s1 + $0x1a8] sm:$0xff]   ;;  %v2015_v58 = vld [vmem:[%s2219_s12 + $0x90] ss:$36 sps:$4 sm:$0xff]   ;;  %v2016_v59 = vld [vmem:[%s2219_s12 + $0x98] ss:$36 sps:$4 sm:$0xff]  }
  0x1f   : > { %1779 = vmatpush3.bf16.msra.mxu1 %v1970_v19  ;;  %1740 = vmatprep.subr.bf16.mxu0 %v1971_v20  ;;  %v2017_v60 = vld [vmem:[%s2480_s1 + $0x158] sm:$0xff]   ;;  %v2021_v0 = vld [vmem:[%s2480_s1 + $0x150] sm:$0xff]   ;;  %v2027_v5 = vld [vmem:[%s2219_s12 + $0xe4] ss:$36 sps:$4 sm:$0xff]  }
  0x20   : > { %1780 = vmatprep.subr.bf16.mxu1 %v1972_v21  ;;  %v2018_v61 = vld [vmem:[%s2480_s1 + $0x1d8] sm:$0xff]   ;;  %v2022_v1 = vld [vmem:[%s2480_s1 + $0x1d0] sm:$0xff]   ;;  %v2030_v7 = vld [vmem:[%s2219_s12 + $0xe0] ss:$36 sps:$4 sm:$0xff]  }
  0x21   : > { %v2019_v62 = vld [vmem:[%s2480_s1 + $0x118] sm:$0xff]   ;;  %v2023_v2 = vld [vmem:[%s2480_s1 + $0x110] sm:$0xff]   ;;  %v2031_v8 = vld [vmem:[%s2480_s1 + $0x148] sm:$0xff]  }
  0x22   : > { %1741 = vmatpush3.bf16.msra.mxu0 %v1973_v22  ;;  %v2020_v63 = vld [vmem:[%s2480_s1 + $0x198] sm:$0xff]   ;;  %v2024_v3 = vld [vmem:[%s2480_s1 + $0x190] sm:$0xff]   ;;  %v2032_v9 = vld [vmem:[%s2480_s1 + $0x1c8] sm:$0xff]  }
  0x23   : > { %1781 = vmatpush3.bf16.msra.mxu1 %v1974_v23  ;;  %1742 = vmatprep.subr.bf16.mxu0 %v1975_v24  ;;  %v2025_v4 = vld [vmem:[%s2219_s12 + $0xdc] ss:$36 sps:$4 sm:$0xff]   ;;  %v2033_v10 = vld [vmem:[%s2480_s1 + $0x108] sm:$0xff]   ;;  %v2039_v16 = vld [vmem:[%s2219_s12 + $0x10] ss:$36 sps:$4 sm:$0xff]  }
  0x24   : > { %1782 = vmatprep.subr.bf16.mxu1 %v1976_v25  ;;  %v2029_v6 = vld [vmem:[%s2219_s12 + $0xd8] ss:$36 sps:$4 sm:$0xff]   ;;  %v2034_v11 = vld [vmem:[%s2480_s1 + $0x188] sm:$0xff]   ;;  %v2035_v12 = vld [vmem:[%s2480_s1 + $0x140] sm:$0xff]  }
  0x25   : > { %v2036_v13 = vld [vmem:[%s2480_s1 + $0x1c0] sm:$0xff]   ;;  %v2041_v17 = vld [vmem:[%s2219_s12 + $0x14] ss:$36 sps:$4 sm:$0xff]   ;;  %v2063_v33 = vld [vmem:[%s2219_s12 + $0xec] ss:$36 sps:$4 sm:$0xff]  }
  0x26   : > { %1743 = vmatpush3.bf16.msra.mxu0 %v1977_v26  ;;  %v2037_v14 = vld [vmem:[%s2480_s1 + $0x100] sm:$0xff]   ;;  %v2042_v18 = vld [vmem:[%s2219_s12 + $0x18] ss:$36 sps:$4 sm:$0xff]   ;;  %v2046_v21 = vld [vmem:[%s2480_s1 + $0x230] sm:$0xff]  }
  0x27   : > { %1783 = vmatpush3.bf16.msra.mxu1 %v1978_v27  ;;  %1744 = vmatprep.subr.bf16.mxu0 %v1979_v28  ;;  %v2038_v15 = vld [vmem:[%s2480_s1 + $0x180] sm:$0xff]   ;;  %v2045_v20 = vld [vmem:[%s2480_s1 + $0x238] sm:$0xff]   ;;  %v2053_v26 = vld [vmem:[%s2480_s1 + $0x228] sm:$0xff]  }
  0x28   : > { %1784 = vmatprep.subr.bf16.mxu1 %v1980_v29  ;;  %v2044_v19 = vld [vmem:[%s2219_s12 + $0x1c] ss:$36 sps:$4 sm:$0xff]   ;;  %v2049_v23 = vld [vmem:[%s2219_s12 + $0x64] ss:$36 sps:$4 sm:$0xff]   ;;  %v2057_v28 = vld [vmem:[%s2219_s12 + $0xac] ss:$36 sps:$4 sm:$0xff]  }
  0x29   : > { %v2047_v22 = vld [vmem:[%s2219_s12 + $0x5c] ss:$36 sps:$4 sm:$0xff]   ;;  %v2055_v27 = vld [vmem:[%s2219_s12 + $0xa4] ss:$36 sps:$4 sm:$0xff]   ;;  %v2062_v35 = vld [vmem:[%s2480_s1 + $0x210] sm:$0xff]  }
  0x2a   : > { %1745 = vmatpush3.bf16.msra.mxu0 %v1981_v30  ;;  %v2051_v24 = vld [vmem:[%s2219_s12 + $0x58] ss:$36 sps:$4 sm:$0xff]   ;;  %v2052_v25 = vld [vmem:[%s2219_s12 + $0x60] ss:$36 sps:$4 sm:$0xff]  }
  0x2b   : > { %1785 = vmatpush3.bf16.msra.mxu1 %v1982_v31  ;;  %1810 = vmatprep.subr.bf16.mxu0 %v1989_v36  ;;  %v2054_v29 = vld [vmem:[%s2480_s1 + $0x220] sm:$0xff]   ;;  %v2060_v31 = vld [vmem:[%s2219_s12 + $0xa8] ss:$36 sps:$4 sm:$0xff]  }
  0x2c   : > { %1850 = vmatprep.subr.bf16.mxu1 %v1990_v37  ;;  %v2059_v30 = vld [vmem:[%s2219_s12 + $0xa0] ss:$36 sps:$4 sm:$0xff]   ;;  %v2067_v36 = vld [vmem:[%s2219_s12 + $0xe8] ss:$36 sps:$4 sm:$0xff]  }
  0x2d   : > { %1087 = vmatmul.mubr.bf16.vlgmr.msra.gmra.mxu0 %v1983_v32  ;;  %v2061_v32 = vld [vmem:[%s2480_s1 + $0x218] sm:$0xff]   ;;  %v2069_v37 = vld [vmem:[%s2480_s1 + $0x208] sm:$0xff]  }
  0x2e   : > { %1152 = vmatmul.mubr.bf16.vlgmr.msra.gmra.mxu1 %v1986_v34  ;;  %1811 = vmatpush3.bf16.msra.mxu0 %v1991_v38  ;;  %v2065_v34 = vld [vmem:[%s2219_s12 + $0xf4] ss:$36 sps:$4 sm:$0xff]  }
  0x2f   : > { %1851 = vmatpush3.bf16.msra.mxu1 %v1992_v39  ;;  %1812 = vmatprep.subr.bf16.mxu0 %v1993_v40  ;;  %v2068_v38 = vld [vmem:[%s2219_s12 + $0xf0] ss:$36 sps:$4 sm:$0xff]   ;;  %v2071_v39 = vld [vmem:[%s2219_s12 + $0x20] ss:$36 sps:$4 sm:$0xff]  }
  0x30   : > { %1852 = vmatprep.subr.bf16.mxu1 %v1994_v41  ;;  %1094 = vmatprep.mubr.bf16.mxu0 %v1997_v44  ;;  %v2072_v40 = vld [vmem:[%s2219_s12 + $0xb0] ss:$36 sps:$4 sm:$0xff]   ;;  %v2070_v41 = vld [vmem:[%s2480_s1 + $0x200] sm:$0xff]  }
  0x31   : > { %1159 = vmatprep.mubr.bf16.mxu1 %v1999_v45 }
  0x32   : > { %1813 = vmatpush3.bf16.msra.mxu0 %v1995_v42  ;;  %v2073_v42 = vld [vmem:[%s2219_s12 + $0x68] ss:$36 sps:$4 sm:$0xff]  }
  0x33   : > { %1853 = vmatpush3.bf16.msra.mxu1 %v1996_v43  ;;  %1814 = vmatprep.subr.bf16.mxu0 %v2003_v48  ;;  %v2074_v43 = vld [vmem:[%s2219_s12 + $0xf8] ss:$36 sps:$4 sm:$0xff]   ;;  %s1557_s12 = sshll.u32 %s2500_s27, 2 }
  0x34   : > { %1854 = vmatprep.subr.bf16.mxu1 %v2004_v49  ;;  %s2421_s19 = scalar_lea.vmem %s2483_s4, %s1557_s12  ;;  %s251_s20 = scalar_lea.vmem %s2484_s5, %s1557_s12 }
  0x35   : > { %1095 = vmatmul.mubr.bf16.gmra.mxu0 %v2001_v46 }
  0x36   : > { %1160 = vmatmul.mubr.bf16.gmra.mxu1 %v2002_v47  ;;  %1815 = vmatpush3.bf16.msra.mxu0 %v2005_v50 }
  0x37   : > { %1855 = vmatpush3.bf16.msra.mxu1 %v2006_v51  ;;  %1816 = vmatprep.subr.bf16.mxu0 %v2007_v52 }
  0x38   : > { %1856 = vmatprep.subr.bf16.mxu1 %v2008_v53  ;;  %1102 = vmatprep.mubr.bf16.mxu0 %v2011_v56 }
  0x39   : > { %1167 = vmatprep.mubr.bf16.mxu1 %v2013_v57 }
  0x3a   : > { %1817 = vmatpush3.bf16.msra.mxu0 %v2009_v54 }
  0x3b   : > { %1857 = vmatpush3.bf16.msra.mxu1 %v2010_v55  ;;  %1818 = vmatprep.subr.bf16.mxu0 %v2017_v60 }
  0x3c   : > { %1858 = vmatprep.subr.bf16.mxu1 %v2018_v61 }
  0x3d   : > { %1103 = vmatmul.mubr.bf16.gmra.mxu0 %v2015_v58 }
  0x3e   : > { %1168 = vmatmul.mubr.bf16.gmra.mxu1 %v2016_v59  ;;  %1819 = vmatpush3.bf16.msra.mxu0 %v2019_v62 }
  0x3f   : > { %1859 = vmatpush3.bf16.msra.mxu1 %v2020_v63  ;;  %1820 = vmatprep.subr.bf16.mxu0 %v2021_v0 }
  0x40   : > { %1860 = vmatprep.subr.bf16.mxu1 %v2022_v1  ;;  %1110 = vmatprep.mubr.bf16.mxu0 %v2025_v4 }
  0x41   : > { %1175 = vmatprep.mubr.bf16.mxu1 %v2027_v5 }
  0x42   : > { %1821 = vmatpush3.bf16.msra.mxu0 %v2023_v2 }
  0x43   : > { %1861 = vmatpush3.bf16.msra.mxu1 %v2024_v3  ;;  %1822 = vmatprep.subr.bf16.mxu0 %v2031_v8 }
  0x44   : > { %1862 = vmatprep.subr.bf16.mxu1 %v2032_v9 }
  0x45   : > { %1111 = vmatmul.mubr.bf16.gmra.mxu0 %v2029_v6 }
  0x46   : > { %1176 = vmatmul.mubr.bf16.gmra.mxu1 %v2030_v7  ;;  %1823 = vmatpush3.bf16.msra.mxu0 %v2033_v10 }
  0x47   : > { %1863 = vmatpush3.bf16.msra.mxu1 %v2034_v11  ;;  %1824 = vmatprep.subr.bf16.mxu0 %v2035_v12 }
  0x48   : > { %1864 = vmatprep.subr.bf16.mxu1 %v2036_v13  ;;  %1216 = vmatprep.mubr.bf16.mxu0 %v2041_v17 }
  0x49   : > { %1281 = vmatprep.mubr.bf16.mxu1 %v2044_v19 }
  0x4a   : > { %1825 = vmatpush3.bf16.msra.mxu0 %v2037_v14 }
  0x4b   : > { %1865 = vmatpush3.bf16.msra.mxu1 %v2038_v15  ;;  %1902 = vmatprep.subr.bf16.mxu0 %v2045_v20 }
  0x4c   : > { %1926 = vmatprep.subr.bf16.mxu1 %v2045_v20 }
  0x4d   : > { %1217 = vmatmul.mubr.bf16.vlgmr.msra.gmra.mxu0 %v2039_v16 }
  0x4e   : > { %1282 = vmatmul.mubr.bf16.vlgmr.msra.gmra.mxu1 %v2042_v18  ;;  %1903 = vmatpush3.bf16.msra.mxu0 %v2045_v20 }
  0x4f   : > { %1934 = vmatpush3.bf16.msra.mxu1 %v2045_v20  ;;  %1904 = vmatprep.subr.bf16.mxu0 %v2046_v21 }
  0x50   : > { %1927 = vmatprep.subr.bf16.mxu1 %v2046_v21  ;;  %1224 = vmatprep.mubr.bf16.mxu0 %v2047_v22 }
  0x51   : > { %1289 = vmatprep.mubr.bf16.mxu1 %v2049_v23 }
  0x52   : > { %1905 = vmatpush3.bf16.msra.mxu0 %v2046_v21 }
  0x53   : > { %1935 = vmatpush3.bf16.msra.mxu1 %v2046_v21  ;;  %1906 = vmatprep.subr.bf16.mxu0 %v2053_v26 }
  0x54   : > { %1928 = vmatprep.subr.bf16.mxu1 %v2053_v26 }
  0x55   : > { %1225 = vmatmul.mubr.bf16.gmra.mxu0 %v2051_v24 }
  0x56   : > { %1290 = vmatmul.mubr.bf16.gmra.mxu1 %v2052_v25  ;;  %1232 = vmatprep.mubr.bf16.mxu0 %v2055_v27 }
  0x57   : > { %1907 = vmatpush3.bf16.msra.mxu0 %v2053_v26  ;;  %1297 = vmatprep.mubr.bf16.mxu1 %v2057_v28 }
  0x58   : > { %1936 = vmatpush3.bf16.msra.mxu1 %v2053_v26  ;;  %1908 = vmatprep.subr.bf16.mxu0 %v2054_v29 }
  0x59   : > { %1929 = vmatprep.subr.bf16.mxu1 %v2054_v29 }
  0x5b   : > { %1909 = vmatpush3.bf16.msra.mxu0 %v2054_v29 }
  0x5c   : > { %1937 = vmatpush3.bf16.msra.mxu1 %v2054_v29  ;;  %1910 = vmatprep.subr.bf16.mxu0 %v2061_v32 }
  0x5d   : > { %1233 = vmatmul.mubr.bf16.gmra.mxu0 %v2059_v30  ;;  %1930 = vmatprep.subr.bf16.mxu1 %v2061_v32 }
  0x5e   : > { %1298 = vmatmul.mubr.bf16.gmra.mxu1 %v2060_v31  ;;  %1240 = vmatprep.mubr.bf16.mxu0 %v2063_v33 }
  0x5f   : > { %1911 = vmatpush3.bf16.msra.mxu0 %v2061_v32  ;;  %1305 = vmatprep.mubr.bf16.mxu1 %v2065_v34 }
  0x60   : > { %1938 = vmatpush3.bf16.msra.mxu1 %v2061_v32  ;;  %1912 = vmatprep.subr.bf16.mxu0 %v2062_v35 }
  0x61   : > { %1931 = vmatprep.subr.bf16.mxu1 %v2062_v35 }
  0x63   : > { %1913 = vmatpush3.bf16.msra.mxu0 %v2062_v35 }
  0x64   : > { %1939 = vmatpush3.bf16.msra.mxu1 %v2062_v35  ;;  %1914 = vmatprep.subr.bf16.mxu0 %v2069_v37 }
  0x65   : > { %1241 = vmatmul.mubr.bf16.gmra.mxu0 %v2067_v36  ;;  %1932 = vmatprep.subr.bf16.mxu1 %v2069_v37 }
  0x66   : > { %1306 = vmatmul.mubr.bf16.gmra.mxu1 %v2068_v38  ;;  %1918 = vmatprep.mubr.bf16.mxu0 %v2071_v39 }
  0x67   : > { %1915 = vmatpush3.bf16.msra.mxu0 %v2069_v37  ;;  %1922 = vmatprep.mubr.bf16.mxu1 %v2072_v40 }
  0x68   : > { %1940 = vmatpush3.bf16.msra.mxu1 %v2069_v37  ;;  %1916 = vmatprep.subr.bf16.mxu0 %v2070_v41  ;;  %v2426_v37 = vld [vmem:[%s2421_s19 + $0x8] sm:$0xff]  }
  0x69   : > { %1933 = vmatprep.subr.bf16.mxu1 %v2070_v41 }
  0x6b   : > { %1917 = vmatpush3.bf16.msra.mxu0 %v2070_v41 }
  0x6c   : > { %1941 = vmatpush3.bf16.msra.mxu1 %v2070_v41 }
  0x6e   : > { %1919 = vmatmul.mubr.bf16.vlgmr.msra.gmra.mxu0 %v2073_v42  ;;  %v2429_v42 = vld [vmem:[%s2421_s19 + $0x18] sm:$0xff]  }
  0x6f   : > { %1923 = vmatmul.mubr.bf16.vlgmr.msra.gmra.mxu1 %v2074_v43 }
  0xed   : > { %v1746_v44 = vpop.f32.mrf.mxu0 }
  0xee   : > { %v1786_v45 = vpop.f32.mrf.mxu1 }
  0xef   : > { %v1747_v46 = vpop.f32.mrf.mxu0 }
  0xf0   : > { %v1787_v47 = vpop.f32.mrf.mxu1  ;;  %v1748_v33 = vadd.f32 %v1747_v46, %v1746_v44 }
  0xf1   : > { %v2383_v48 = vpop.f32.mrf.mxu0  ;;  %v1788_v34 = vadd.f32 %v1787_v47, %v1786_v45  ;;  %v1694_v45 = vunpack.c.l.bf16 %v2426_v37 }
  0xf2   : > { %v2385_v49 = vpop.f32.mrf.mxu1 }
  0xf3   : > { %v2387_v50 = vpop.f32.mrf.mxu0  ;;  %v1154_v46 = vadd.f32 %v1788_v34, %v1748_v33 }
  0xf4   : > { %v2389_v51 = vpop.f32.mrf.mxu1 }
  0xf5   : > { %v1752_v52 = vpop.f32.mrf.mxu0 }
  0xf6   : > { %v1792_v53 = vpop.f32.mrf.mxu1 }
  0xf7   : > { %v1753_v54 = vpop.f32.mrf.mxu0 }
  0xf8   : > { %v1793_v55 = vpop.f32.mrf.mxu1  ;;  %v1754_v38 = vadd.f32 %v1753_v54, %v1752_v52 }
  0xf9   : > { %v1755_v56 = vpop.f32.mrf.mxu0  ;;  %v1794_v39 = vadd.f32 %v1793_v55, %v1792_v53  ;;  %v1702_v53 = vunpack.c.l.bf16 %v2429_v42 }
  0xfa   : > { %v1795_v57 = vpop.f32.mrf.mxu1 }
  0xfb   : > { %v1756_v58 = vpop.f32.mrf.mxu0  ;;  %v1162_v54 = vadd.f32 %v1794_v39, %v1754_v38  ;;  %v1725_v38 = vld [vmem:[%s2421_s19 + $0x10] sm:$0xff]  }
  0xfc   : > { %v1796_v59 = vpop.f32.mrf.mxu1  ;;  %v1757_v43 = vadd.f32 %v1756_v58, %v1755_v56  ;;  %v1791_v58 = vadd.f32 %v2389_v51, %v2385_v49 }
  0xfd   : > { %v1758_v60 = vpop.f32.mrf.mxu0 }
  0xfe   : > { %v1798_v61 = vpop.f32.mrf.mxu1 }
  0xff   : > { %v1759_v62 = vpop.f32.mrf.mxu0 }
 0x100   : > { %v1799_v63 = vpop.f32.mrf.mxu1 }
 0x101   : > { %v2391_v0 = vpop.f32.mrf.mxu0 }
 0x102   : > { %v2393_v1 = vpop.f32.mrf.mxu1 }
 0x103   : > { %v2395_v2 = vpop.f32.mrf.mxu0 }
 0x104   : > { %v2397_v3 = vpop.f32.mrf.mxu1 }
 0x105   : > { %v1764_v4 = vpop.f32.mrf.mxu0 }
 0x106   : > { %v1804_v5 = vpop.f32.mrf.mxu1 }
 0x107   : > { %v1765_v6 = vpop.f32.mrf.mxu0 }
 0x108   : > { %v1805_v7 = vpop.f32.mrf.mxu1  ;;  %v1766_v40 = vadd.f32 %v1765_v6, %v1764_v4 }
 0x109   : > { %v1767_v8 = vpop.f32.mrf.mxu0  ;;  %v1806_v41 = vadd.f32 %v1805_v7, %v1804_v5 }
 0x10a   : > { %v1807_v9 = vpop.f32.mrf.mxu1 }
 0x10b   : > { %v1768_v10 = vpop.f32.mrf.mxu0  ;;  %v1178_v55 = vadd.f32 %v1806_v41, %v1766_v40 }
 0x10c   : > { %v1808_v11 = vpop.f32.mrf.mxu1  ;;  %v1769_v47 = vadd.f32 %v1768_v10, %v1767_v8  ;;  %v1763_v8 = vadd.f32 %v2395_v2, %v2391_v0 }
 0x10d   : > { %v1826_v12 = vpop.f32.mrf.mxu0 }
 0x10e   : > { %v2399_v13 = vpop.f32.mrf.mxu1 }
 0x10f   : > { %v1827_v14 = vpop.f32.mrf.mxu0 }
 0x110   : > { %v2401_v15 = vpop.f32.mrf.mxu1  ;;  %v1828_v4 = vadd.f32 %v1827_v14, %v1826_v12 }
 0x111   : > { %2485 = vst [vmem:[#allocation2_spill] sm:$0xff] %v2401_v15  ;;  %v2403_v16 = vpop.f32.mrf.mxu0 }
 0x112   : > { %v2405_v17 = vpop.f32.mrf.mxu1  ;;  %v1219_v49 = vadd.f32 %v1828_v4, %v1154_v46 }
 0x113   : > { %2486 = vst [vmem:[#allocation3_spill] sm:$0xff] %v2405_v17  ;;  %v1830_v18 = vpop.f32.mrf.mxu0 }
 0x114   : > { %v2407_v19 = vpop.f32.mrf.mxu1  ;;  %v1831_v51 = vadd.f32 %v1830_v18, %v2403_v16 }
 0x115   : > { %2487 = vst [vmem:[#allocation4_spill] sm:$0xff] %v2407_v19  ;;  %v1832_v20 = vpop.f32.mrf.mxu0  ;;  %v1797_v19 = vadd.f32 %v1796_v59, %v1795_v57  ;;  %v1751_v57 = vadd.f32 %v2387_v50, %v2383_v48 }
 0x116   : > { %v1872_v21 = vpop.f32.mrf.mxu1 }
 0x117   : > { %v1833_v22 = vpop.f32.mrf.mxu0  ;;  %v1165_v59 = vadd.f32 %v1797_v19, %v1757_v43  ;;  %v2445_v19 = vld [vmem:[%s2421_s19] sm:$0xff]  }
 0x118   : > { %v1873_v23 = vpop.f32.mrf.mxu1  ;;  %v1834_v44 = vadd.f32 %v1833_v22, %v1832_v20  ;;  %v1157_v20 = vadd.f32 %v1791_v58, %v1751_v57  ;;  %v2492_v0 = vld [vmem:[#allocation2_spill] sm:$0xff] }
 0x119   : > { %v1835_v24 = vpop.f32.mrf.mxu0  ;;  %v1874_v12 = vadd.f32 %v1873_v23, %v1872_v21  ;;  %v1668_v21 = vld [vmem:[%s2481_s2] ss:$0 sm:$0xff]  ;;  %v1690_v23 = vunpack.c.l.bf16 %v2445_v19 }
 0x11a   : > { %v2409_v25 = vpop.f32.mrf.mxu1  ;;  %v1227_v5 = vadd.f32 %v1834_v44, %v1162_v54  ;;  %v2496_v46 = vld [vmem:[#allocation3_spill] sm:$0xff] }
 0x11b   : > { %2488 = vst [vmem:[#allocation5_spill] sm:$0xff] %v2409_v25  ;;  %v1836_v26 = vpop.f32.mrf.mxu0  ;;  %v1760_v25 = vadd.f32 %v1759_v62, %v1758_v60 }
 0x11c   : > { %v2411_v27 = vpop.f32.mrf.mxu1  ;;  %v1837_v6 = vadd.f32 %v1836_v26, %v1835_v24 }
 0x11d   : > { %2489 = vst [vmem:[#allocation6_spill] sm:$0xff] %v2411_v27  ;;  %v1838_v28 = vpop.f32.mrf.mxu0 }
 0x11e   : > { %v2414_v29 = vpop.f32.mrf.mxu1  ;;  %v1230_v2 = vadd.f32 %v1837_v6, %v1165_v59 }
 0x11f   : > { %2490 = vst [vmem:[#allocation7_spill] sm:$0xff] %v2414_v29  ;;  %v1839_v30 = vpop.f32.mrf.mxu0  ;;  %v1800_v29 = vadd.f32 %v1799_v63, %v1798_v61 }
 0x120   : > { %v1879_v31 = vpop.f32.mrf.mxu1  ;;  %v1840_v60 = vadd.f32 %v1839_v30, %v1838_v28  ;;  %v1222_v30 = vadd.f32 %v1831_v51, %v1157_v20 }
 0x121   : > { %v1841_v32 = vpop.f32.mrf.mxu0  ;;  %v1170_v63 = vadd.f32 %v1800_v29, %v1760_v25 }
 0x122   : > { %v2423_v35 = vpop.f32.mrf.mxu1 }
 0x123   : > { %2491 = vst [vmem:[#allocation8_spill] sm:$0xff] %v2423_v35  ;;  %v1842_v36 = vpop.f32.mrf.mxu0  ;;  %v1809_v35 = vadd.f32 %v1808_v11, %v1807_v9  ;;  %v1803_v9 = vadd.f32 %v2397_v3, %v2393_v1  ;;  %v1235_v22 = vadd.f32 %v1840_v60, %v1170_v63  ;;  %v1868_v1 = vadd.f32 %v2492_v0, %v2399_v13 }
 0x124   : > { %v2431_v17 = vpop.f32.mrf.mxu1  ;;  %v1843_v24 = vadd.f32 %v1842_v36, %v1841_v32  ;;  %v2494_v32 = vld [vmem:[#allocation5_spill] sm:$0xff]  ;;  %v2495_v33 = vld [vmem:[#allocation6_spill] sm:$0xff] }
 0x125   : > { %v1844_v27 = vpop.f32.mrf.mxu0  ;;  %v1181_v10 = vadd.f32 %v1809_v35, %v1769_v47  ;;  %v1877_v34 = vadd.f32 %v2495_v33, %v2494_v32  ;;  %v1284_v36 = vadd.f32 %v1868_v1, %v1219_v49  ;;  %v2497_v47 = vld [vmem:[#allocation4_spill] sm:$0xff] }
 0x126   : > { %v1884_v15 = vpop.f32.mrf.mxu1  ;;  %v2493_v28 = vld [vmem:[#allocation7_spill] sm:$0xff] }
 0x127   : > { %v1845_v52 = vpop.f32.mrf.mxu0  ;;  %v1880_v29 = vadd.f32 %v1879_v31, %v2493_v28  ;;  %v1669_v31 = vld [vmem:[%s2482_s3] ss:$0 sm:$0xff]  ;;  %v1699_v28 = vunpack.c.h.bf16 %v1725_v38 }
 0x128   : > { %v1846_v56 = vadd.f32 %v1845_v52, %v1844_v27  ;;  %v1885_v61 = vpop.f32.mrf.mxu1  ;;  %v1173_v27 = vadd.f32 %v1803_v9, %v1763_v8  ;;  %v1871_v52 = vadd.f32 %v2497_v47, %v2496_v46 }
 0x129   : > { %v1847_v62 = vpop.f32.mrf.mxu0  ;;  %v1886_v48 = vadd.f32 %v1885_v61, %v1884_v15  ;;  %v1292_v15 = vadd.f32 %v1874_v12, %v1227_v5  ;;  %v1300_v43 = vadd.f32 %v1880_v29, %v1235_v22  ;;  %v1698_v61 = vunpack.c.l.bf16 %v1725_v38 }
 0x12a   : > { %v1243_v7 = vadd.f32 %v1846_v56, %v1178_v55  ;;  %v1887_v50 = vpop.f32.mrf.mxu1  ;;  %v1238_v39 = vadd.f32 %v1843_v24, %v1173_v27  ;;  %v1295_v56 = vadd.f32 %v1877_v34, %v1230_v2  ;;  %v2498_v57 = vld [vmem:[#allocation8_spill] sm:$0xff]  ;;  %v1287_v8 = vadd.f32 %v1871_v52, %v1222_v30 }
 0x12b   : > { %v1848_v11 = vpop.f32.mrf.mxu0  ;;  %v1883_v58 = vadd.f32 %v2431_v17, %v2498_v57  ;;  %v1695_v12 = vunpack.c.h.bf16 %v2426_v37  ;;  %v1703_v24 = vunpack.c.h.bf16 %v2429_v42  ;;  %v1691_v2 = vunpack.c.h.bf16 %v2445_v19 }
 0x12c   : > { %v1849_v14 = vadd.f32 %v1848_v11, %v1847_v62  ;;  %v1888_v25 = vpop.f32.mrf.mxu1  ;;  %v1308_v26 = vadd.f32 %v1886_v48, %v1243_v7 }
 0x12d   : > { %v1889_v16 = vadd.f32 %v1888_v25, %v1887_v50  ;;  %v1303_v11 = vadd.f32 %v1883_v58, %v1238_v39 }
 0x12e   : > { %v1246_v3 = vadd.f32 %v1849_v14, %v1181_v10  ;;  %v1920_v18 = vpop.f32.mrf.mxu0 }
 0x12f   : > { %v1357_v35 = vadd.f32 %v1920_v18, %v1292_v15  ;;  %v1924_v13 = vpop.f32.mrf.mxu1 }
 0x130   : > { %v1373_v40 = vadd.f32 %v1924_v13, %v1308_v26  ;;  %v1348_v41 = vpop.f32.mrf.mxu0  ;;  %v1311_v44 = vadd.f32 %v1889_v16, %v1246_v3 }
 0x131   : > { %v1388_v54 = vmul.f32 %v1668_v21, %v1357_v35  ;;  %v1349_v55 = vadd.f32 %v1348_v41, %v1284_v36  ;;  %v1364_v4 = vpop.f32.mrf.mxu1 }
 0x132   : > { %v1392_v59 = vmul.f32 %v1668_v21, %v1373_v40  ;;  %v1365_v60 = vadd.f32 %v1364_v4, %v1300_v43  ;;  %v1921_v62 = vpop.f32.mrf.mxu0 }
 0x133   : > { %v1403_v63 = vadd.f32 %v1669_v31, %v1388_v54  ;;  %v1386_v5 = vmul.f32 %v1668_v21, %v1349_v55  ;;  %v1360_v6 = vadd.f32 %v1921_v62, %v1295_v56  ;;  %v1925_v7 = vpop.f32.mrf.mxu1 }
 0x134   : > { %v1407_v9 = vadd.f32 %v1669_v31, %v1392_v59  ;;  %v1390_v10 = vmul.f32 %v1668_v21, %v1365_v60  ;;  %v1376_v48 = vadd.f32 %v1925_v7, %v1311_v44  ;;  %v1351_v50 = vpop.f32.mrf.mxu0 }
 0x135   : > { %v1401_v49 = vadd.f32 %v1669_v31, %v1386_v5  ;;  %v1389_v51 = vmul.f32 %v1668_v21, %v1360_v6  ;;  %v1352_v14 = vadd.f32 %v1351_v50, %v1287_v8  ;;  %v1367_v17 = vpop.f32.mrf.mxu1  ;;  %v1427_v26 = vadd.f32 %v1694_v45, %v1403_v63 }
 0x136   : > { %v1405_v20 = vadd.f32 %v1669_v31, %v1390_v10  ;;  %v1393_v22 = vmul.f32 %v1668_v21, %v1376_v48  ;;  %v1368_v25 = vadd.f32 %v1367_v17, %v1303_v11  ;;  %v1431_v3 = vadd.f32 %v1702_v53, %v1407_v9 }
 0x137   : > { %v1404_v0 = vadd.f32 %v1669_v31, %v1389_v51  ;;  %v1387_v1 = vmul.f32 %v1668_v21, %v1352_v14  ;;  %v1425_v29 = vadd.f32 %v1690_v23, %v1401_v49  ;;  %v1435_v34 = vmax.f32 %v1427_v26, 0.0 }
 0x138   : > { %v1408_v15 = vadd.f32 %v1669_v31, %v1393_v22  ;;  %v1391_v27 = vmul.f32 %v1668_v21, %v1368_v25  ;;  %v1429_v30 = vadd.f32 %v1698_v61, %v1405_v20  ;;  %v1439_v35 = vmax.f32 %v1431_v3, 0.0 }
 0x139   : > { %v1428_v16 = vadd.f32 %v1695_v12, %v1404_v0  ;;  %v1402_v18 = vadd.f32 %v1669_v31, %v1387_v1  ;;  %v1433_v19 = vmax.f32 %v1425_v29, 0.0 }
 0x13a   : > { %v1432_v32 = vadd.f32 %v1703_v24, %v1408_v15  ;;  %v1406_v33 = vadd.f32 %v1669_v31, %v1391_v27  ;;  %v1437_v23 = vmax.f32 %v1429_v30, 0.0 }
 0x13b   : > { %v1436_v37 = vmax.f32 %v1428_v16, 0.0  ;;  %v1426_v45 = vadd.f32 %v1691_v2, %v1402_v18 }
 0x13c   : > { %v1440_v42 = vmax.f32 %v1432_v32, 0.0  ;;  %v1430_v53 = vadd.f32 %v1699_v28, %v1406_v33 }
 0x13d   : > { %v1712_v21 = vpack.c.bf16 %v1436_v37, %v1435_v34  ;;  %v1434_v13 = vmax.f32 %v1426_v45, 0.0 }
 0x13e   : > { %v1722_v36 = vpack.c.bf16 %v1440_v42, %v1439_v35  ;;  %v1438_v38 = vmax.f32 %v1430_v53, 0.0 }
 0x13f   : > { %1727 = vst [vmem:[%s251_s20 + $0x8] sm:$0xff] %v1712_v21   ;;  %v1707_v39 = vpack.c.bf16 %v1434_v13, %v1433_v19 }
 0x140   : > { %1729 = vst [vmem:[%s251_s20 + $0x18] sm:$0xff] %v1722_v36   ;;  %v1717_v31 = vpack.c.bf16 %v1438_v38, %v1437_v23 }
 0x141   : > { %1708 = vst [vmem:[%s251_s20] sm:$0xff] %v1707_v39  }
 0x142   : > { %1728 = vst [vmem:[%s251_s20 + $0x10] sm:$0xff] %v1717_v31  }
 0x143 PF: > { %s15_s18 = sadd.s32 1, %s2081_s18  }
 0x144   : > { %p12_p4 = scmp.ge.s32.totalorder %s15_s18, 4  }
 0x146   :  { %14 = sbr.rel (!%p12_p4) target bundleno = 1 (0x1), region = 73 }

// kernel: byol_forward.28
= control target key start
LH: loop header
LB: loop body
LE: loop exit
PB: predicated region body
PF: predicated region fallthrough
CT: control target
= control target key end

     0   :  { %s1557_s18 = smov 0   ;;  %s1816_s0 = inlined_call_operand.vmem [shape: bf16[32,1152], index: 0, kind: input, shape index: {}]   ;;  %s1817_s1 = inlined_call_operand.vmem [shape: bf16[1152,128], index: 1, kind: input, shape index: {}]   ;;  %s1818_s2 = inlined_call_operand.vmem [shape: f32[1,128], index: 2, kind: input, shape index: {}]   ;;  %s1819_s3 = inlined_call_operand.vmem [shape: f32[1,128], index: 3, kind: input, shape index: {}]   ;;  %s1820_s4 = inlined_call_operand.vmem [shape: bf16[32,128], index: 4, kind: input, shape index: {}]   ;;  %s1821_s5 = inlined_call_operand.vmem [shape: bf16[32,128], index: 5, kind: output, shape index: {}]  }
   0x1 LB: > { %s1195_s19 = sadd.s32 4294967295, %s1523_s18   ;;  %p1199_p0 = scmp.ge.s32.totalorder %s1523_s18, 1  ;;  %s1523_s18 = sphi %s1557_s18, %s15_s18  }
   0x2   : > { %p200_p1 = scmp.lt.s32.totalorder %s1523_s18, 3 }
   0x4   : > { %p201_p2 = pnand %p1199_p0, %p200_p1 }
   0x5   : > { %s1200_s27 = sshll.u32 (!%p201_p2), %s1195_s19, 1 }
   0x6   : > { %204 = sbr.rel (%p201_p2) target bundleno = 319 (0x13f), region = 40  ;;  %p235_p3 = scmp.lt.s32.totalorder (!%p201_p2), %s1200_s27, 3 }
   0xb   : > { %v1432_v0 = vld [vmem:[%s1817_s1 + $0x78] sm:$0xff]   ;;  %v1436_v4 = vld [vmem:[%s1817_s1 + $0x70] sm:$0xff]   ;;  %v1440_v8 = vld [vmem:[%s1817_s1 + $0x68] sm:$0xff]   ;;  %s1823_s27 = smov (!%p235_p3, %s1200_s27), 3  ;;  %vm1526_vm0 = vmmov 0  }
   0xc   : > { %v1433_v1 = vld [vmem:[%s1817_s1 + $0xf8] sm:$0xff]   ;;  %1304 = vmatprep.subr.bf16.mxu0 %v1432_v0  ;;  %v1437_v5 = vld [vmem:[%s1817_s1 + $0xf0] sm:$0xff]   ;;  %v1441_v9 = vld [vmem:[%s1817_s1 + $0xe8] sm:$0xff]   ;;  %s1421_s26 = smul.u32 36, %s1823_s27 }
   0xd   : > { %v1434_v2 = vld [vmem:[%s1817_s1 + $0x38] sm:$0xff]   ;;  %1326 = vmatprep.subr.bf16.mxu1 %v1433_v1  ;;  %v1438_v6 = vld [vmem:[%s1817_s1 + $0x30] sm:$0xff]   ;;  %v1442_v10 = vld [vmem:[%s1817_s1 + $0x28] sm:$0xff]  }
   0xe   : > { %v1435_v3 = vld [vmem:[%s1817_s1 + $0xb8] sm:$0xff]   ;;  %1305 = vmatpush3.bf16.msra.mxu0 %v1434_v2  ;;  %v1439_v7 = vld [vmem:[%s1817_s1 + $0xb0] sm:$0xff]   ;;  %v1443_v11 = vld [vmem:[%s1817_s1 + $0xa8] sm:$0xff]   ;;  %s1663_s12 = scalar_lea.vmem %s1816_s0, %s1421_s26 }
   0xf   : > { %1327 = vmatpush3.bf16.msra.mxu1 %v1435_v3  ;;  %1306 = vmatprep.subr.bf16.mxu0 %v1436_v4  ;;  %v1444_v12 = vld [vmem:[%s1817_s1 + $0x60] sm:$0xff]   ;;  %v1448_v16 = vld [vmem:[%s1817_s1 + $0x58] sm:$0xff]   ;;  %v1452_v20 = vld [vmem:[%s1817_s1 + $0x50] sm:$0xff]  }
  0x10   : > { %1328 = vmatprep.subr.bf16.mxu1 %v1437_v5  ;;  %v1445_v13 = vld [vmem:[%s1817_s1 + $0xe0] sm:$0xff]   ;;  %v1449_v17 = vld [vmem:[%s1817_s1 + $0xd8] sm:$0xff]   ;;  %v1453_v21 = vld [vmem:[%s1817_s1 + $0xd0] sm:$0xff]  }
  0x11   : > { %v1446_v14 = vld [vmem:[%s1817_s1 + $0x20] sm:$0xff]   ;;  %v1450_v18 = vld [vmem:[%s1817_s1 + $0x18] sm:$0xff]   ;;  %v1454_v22 = vld [vmem:[%s1817_s1 + $0x10] sm:$0xff]  }
  0x12   : > { %1307 = vmatpush3.bf16.msra.mxu0 %v1438_v6  ;;  %v1447_v15 = vld [vmem:[%s1817_s1 + $0xa0] sm:$0xff]   ;;  %v1451_v19 = vld [vmem:[%s1817_s1 + $0x98] sm:$0xff]   ;;  %v1455_v23 = vld [vmem:[%s1817_s1 + $0x90] sm:$0xff]   ;;  %v1525_v6 = vmov 0.0  }
  0x13   : > { %1329 = vmatpush3.bf16.msra.mxu1 %v1439_v7  ;;  %1308 = vmatprep.subr.bf16.mxu0 %v1440_v8  ;;  %v1456_v24 = vld [vmem:[%s1817_s1 + $0x48] sm:$0xff]   ;;  %v1460_v28 = vld [vmem:[%s1817_s1 + $0x40] sm:$0xff]   ;;  %v1470_v36 = vld [vmem:[%s1817_s1 + $0x178] sm:$0xff]  }
  0x14   : > { %1330 = vmatprep.subr.bf16.mxu1 %v1441_v9  ;;  %v1457_v25 = vld [vmem:[%s1817_s1 + $0xc8] sm:$0xff]   ;;  %v1461_v29 = vld [vmem:[%s1817_s1 + $0xc0] sm:$0xff]   ;;  %v1471_v37 = vld [vmem:[%s1817_s1 + $0x138] sm:$0xff]  }
  0x15   : > { %v1458_v26 = vld [vmem:[%s1817_s1 + $0x8] sm:$0xff]   ;;  %v1462_v30 = vld [vmem:[%s1817_s1] sm:$0xff]   ;;  %v1472_v38 = vld [vmem:[%s1817_s1 + $0x1f8] sm:$0xff]  }
  0x16   : > { %1309 = vmatpush3.bf16.msra.mxu0 %v1442_v10  ;;  %v1459_v27 = vld [vmem:[%s1817_s1 + $0x88] sm:$0xff]   ;;  %v1463_v31 = vld [vmem:[%s1817_s1 + $0x80] sm:$0xff]   ;;  %v1473_v39 = vld [vmem:[%s1817_s1 + $0x1b8] sm:$0xff]  }
  0x17   : > { %1331 = vmatpush3.bf16.msra.mxu1 %v1443_v11  ;;  %1310 = vmatprep.subr.bf16.mxu0 %v1444_v12  ;;  %v1464_v32 = vld [vmem:[%s1663_s12] ss:$36 sps:$4 sm:$0xff]   ;;  %v1467_v34 = vld [vmem:[%s1663_s12 + $0x8] ss:$36 sps:$4 sm:$0xff]   ;;  %v1474_v40 = vld [vmem:[%s1817_s1 + $0x170] sm:$0xff]  }
  0x18   : > { %1332 = vmatprep.subr.bf16.mxu1 %v1445_v13  ;;  %v1466_v33 = vld [vmem:[%s1663_s12 + $0x4] ss:$36 sps:$4 sm:$0xff]   ;;  %v1469_v35 = vld [vmem:[%s1663_s12 + $0xc] ss:$36 sps:$4 sm:$0xff]   ;;  %v1486_v52 = vld [vmem:[%s1817_s1 + $0x158] sm:$0xff]  }
  0x19   : > { %918 = vmatprep.mubr.bf16.mxu0 %v1466_v33  ;;  %959 = vmatprep.mubr.bf16.mxu1 %v1469_v35  ;;  %v1475_v41 = vld [vmem:[%s1817_s1 + $0x130] sm:$0xff]   ;;  %v1478_v44 = vld [vmem:[%s1817_s1 + $0x168] sm:$0xff]   ;;  %v1482_v48 = vld [vmem:[%s1817_s1 + $0x160] sm:$0xff]  }
  0x1a   : > { %1311 = vmatpush3.bf16.msra.mxu0 %v1446_v14  ;;  %v1476_v42 = vld [vmem:[%s1817_s1 + $0x1f0] sm:$0xff]   ;;  %v1479_v45 = vld [vmem:[%s1817_s1 + $0x128] sm:$0xff]   ;;  %v1483_v49 = vld [vmem:[%s1817_s1 + $0x120] sm:$0xff]  }
  0x1b   : > { %1333 = vmatpush3.bf16.msra.mxu1 %v1447_v15  ;;  %1312 = vmatprep.subr.bf16.mxu0 %v1448_v16  ;;  %v1477_v43 = vld [vmem:[%s1817_s1 + $0x1b0] sm:$0xff]   ;;  %v1480_v46 = vld [vmem:[%s1817_s1 + $0x1e8] sm:$0xff]   ;;  %v1484_v50 = vld [vmem:[%s1817_s1 + $0x1e0] sm:$0xff]  }
  0x1c   : > { %1334 = vmatprep.subr.bf16.mxu1 %v1449_v17  ;;  %v1481_v47 = vld [vmem:[%s1817_s1 + $0x1a8] sm:$0xff]   ;;  %v1485_v51 = vld [vmem:[%s1817_s1 + $0x1a0] sm:$0xff]   ;;  %v1487_v53 = vld [vmem:[%s1817_s1 + $0x118] sm:$0xff]  }
  0x1d   : > { %v1488_v54 = vld [vmem:[%s1817_s1 + $0x1d8] sm:$0xff]   ;;  %v1490_v56 = vld [vmem:[%s1817_s1 + $0x150] sm:$0xff]   ;;  %v1494_v60 = vld [vmem:[%s1817_s1 + $0x148] sm:$0xff]  }
  0x1e   : > { %1313 = vmatpush3.bf16.msra.mxu0 %v1450_v18  ;;  %v1489_v55 = vld [vmem:[%s1817_s1 + $0x198] sm:$0xff]   ;;  %v1491_v57 = vld [vmem:[%s1817_s1 + $0x110] sm:$0xff]   ;;  %v1495_v61 = vld [vmem:[%s1817_s1 + $0x108] sm:$0xff]  }
  0x1f   : > { %1335 = vmatpush3.bf16.msra.mxu1 %v1451_v19  ;;  %1314 = vmatprep.subr.bf16.mxu0 %v1452_v20  ;;  %v1492_v58 = vld [vmem:[%s1817_s1 + $0x1d0] sm:$0xff]   ;;  %v1496_v62 = vld [vmem:[%s1817_s1 + $0x1c8] sm:$0xff]   ;;  %v1498_v0 = vld [vmem:[%s1817_s1 + $0x140] sm:$0xff]  }
  0x20   : > { %1336 = vmatprep.subr.bf16.mxu1 %v1453_v21  ;;  %v1493_v59 = vld [vmem:[%s1817_s1 + $0x190] sm:$0xff]   ;;  %v1497_v63 = vld [vmem:[%s1817_s1 + $0x188] sm:$0xff]   ;;  %v1499_v1 = vld [vmem:[%s1817_s1 + $0x100] sm:$0xff]  }
  0x21   : > { %v1500_v2 = vld [vmem:[%s1817_s1 + $0x1c0] sm:$0xff]   ;;  %v1501_v3 = vld [vmem:[%s1663_s12 + $0x10] ss:$36 sps:$4 sm:$0xff]   ;;  %v1505_v7 = vld [vmem:[%s1663_s12 + $0x18] ss:$36 sps:$4 sm:$0xff]  }
  0x22   : > { %1315 = vmatpush3.bf16.msra.mxu0 %v1454_v22  ;;  %v1503_v4 = vld [vmem:[%s1663_s12 + $0x14] ss:$36 sps:$4 sm:$0xff]   ;;  %v1504_v5 = vld [vmem:[%s1817_s1 + $0x180] sm:$0xff]   ;;  %v1510_v11 = vld [vmem:[%s1817_s1 + $0x228] sm:$0xff]  }
  0x23   : > { %1337 = vmatpush3.bf16.msra.mxu1 %v1455_v23  ;;  %1316 = vmatprep.subr.bf16.mxu0 %v1456_v24  ;;  %v1507_v8 = vld [vmem:[%s1663_s12 + $0x1c] ss:$36 sps:$4 sm:$0xff]   ;;  %v1509_v10 = vld [vmem:[%s1817_s1 + $0x230] sm:$0xff]   ;;  %v1514_v15 = vld [vmem:[%s1817_s1 + $0x208] sm:$0xff]  }
  0x24   : > { %1338 = vmatprep.subr.bf16.mxu1 %v1457_v25  ;;  %v1508_v9 = vld [vmem:[%s1817_s1 + $0x238] sm:$0xff]   ;;  %v1511_v12 = vld [vmem:[%s1817_s1 + $0x220] sm:$0xff]   ;;  %v1513_v14 = vld [vmem:[%s1817_s1 + $0x210] sm:$0xff]  }
  0x25   : > { %v1512_v13 = vld [vmem:[%s1817_s1 + $0x218] sm:$0xff]   ;;  %v1515_v16 = vld [vmem:[%s1817_s1 + $0x200] sm:$0xff]  }
  0x26   : > { %1317 = vmatpush3.bf16.msra.mxu0 %v1458_v26  ;;  %v1516_v17 = vld [vmem:[%s1663_s12 + $0x20] ss:$36 sps:$4 sm:$0xff]   ;;  %s1203_s12 = sshll.u32 %s1823_s27, 2 }
  0x27   : > { %1339 = vmatpush3.bf16.msra.mxu1 %v1459_v27  ;;  %1318 = vmatprep.subr.bf16.mxu0 %v1460_v28  ;;  %s245_s19 = scalar_lea.vmem %s1820_s4, %s1203_s12  ;;  %s251_s17 = scalar_lea.vmem %s1821_s5, %s1203_s12 }
  0x28   : > { %1340 = vmatprep.subr.bf16.mxu1 %v1461_v29 }
  0x2a   : > { %1319 = vmatpush3.bf16.msra.mxu0 %v1462_v30 }
  0x2b   : > { %1341 = vmatpush3.bf16.msra.mxu1 %v1463_v31  ;;  %1348 = vmatprep.subr.bf16.mxu0 %v1470_v36 }
  0x2c   : > { %1370 = vmatprep.subr.bf16.mxu1 %v1472_v38 }
  0x2d   : > { %919 = vmatmul.mubr.bf16.vlgmr.msra.gmra.mxu0 %v1464_v32 }
  0x2e   : > { %960 = vmatmul.mubr.bf16.vlgmr.msra.gmra.mxu1 %v1467_v34  ;;  %1349 = vmatpush3.bf16.msra.mxu0 %v1471_v37 }
  0x2f   : > { %1371 = vmatpush3.bf16.msra.mxu1 %v1473_v39  ;;  %1350 = vmatprep.subr.bf16.mxu0 %v1474_v40 }
  0x30   : > { %1372 = vmatprep.subr.bf16.mxu1 %v1476_v42  ;;  %1000 = vmatprep.mubr.bf16.mxu0 %v1503_v4 }
  0x31   : > { %1041 = vmatprep.mubr.bf16.mxu1 %v1507_v8 }
  0x32   : > { %1351 = vmatpush3.bf16.msra.mxu0 %v1475_v41 }
  0x33   : > { %1373 = vmatpush3.bf16.msra.mxu1 %v1477_v43  ;;  %1352 = vmatprep.subr.bf16.mxu0 %v1478_v44 }
  0x34   : > { %1374 = vmatprep.subr.bf16.mxu1 %v1480_v46 }
  0x36   : > { %1353 = vmatpush3.bf16.msra.mxu0 %v1479_v45 }
  0x37   : > { %1375 = vmatpush3.bf16.msra.mxu1 %v1481_v47  ;;  %1354 = vmatprep.subr.bf16.mxu0 %v1482_v48  ;;  %v1287_v48 = vld [vmem:[%s1818_s2] ss:$0 sm:$0xff] }
  0x38   : > { %1376 = vmatprep.subr.bf16.mxu1 %v1484_v50  ;;  %v1288_v50 = vld [vmem:[%s1819_s3] ss:$0 sm:$0xff] }
  0x3a   : > { %1355 = vmatpush3.bf16.msra.mxu0 %v1483_v49 }
  0x3b   : > { %1377 = vmatpush3.bf16.msra.mxu1 %v1485_v51  ;;  %1356 = vmatprep.subr.bf16.mxu0 %v1486_v52  ;;  %v1296_v51 = vld [vmem:[%s245_s19] sm:$0xff]  }
  0x3c   : > { %1378 = vmatprep.subr.bf16.mxu1 %v1488_v54 }
  0x3e   : > { %1357 = vmatpush3.bf16.msra.mxu0 %v1487_v53 }
  0x3f   : > { %1379 = vmatpush3.bf16.msra.mxu1 %v1489_v55  ;;  %1358 = vmatprep.subr.bf16.mxu0 %v1490_v56 }
  0x40   : > { %1380 = vmatprep.subr.bf16.mxu1 %v1492_v58 }
  0x42   : > { %1359 = vmatpush3.bf16.msra.mxu0 %v1491_v57  ;;  %v1297_v57 = vunpack.c.l.bf16 %v1296_v51 }
  0x43   : > { %1381 = vmatpush3.bf16.msra.mxu1 %v1493_v59  ;;  %1360 = vmatprep.subr.bf16.mxu0 %v1494_v60 }
  0x44   : > { %1382 = vmatprep.subr.bf16.mxu1 %v1496_v62 }
  0x46   : > { %1361 = vmatpush3.bf16.msra.mxu0 %v1495_v61  ;;  %v1298_v61 = vunpack.c.h.bf16 %v1296_v51 }
  0x47   : > { %1383 = vmatpush3.bf16.msra.mxu1 %v1497_v63  ;;  %1362 = vmatprep.subr.bf16.mxu0 %v1498_v0 }
  0x48   : > { %1384 = vmatprep.subr.bf16.mxu1 %v1500_v2 }
  0x4a   : > { %1363 = vmatpush3.bf16.msra.mxu0 %v1499_v1 }
  0x4b   : > { %1401 = vmatprep.subr.bf16.mxu0 %v1525_v6  ;;  %1385 = vmatpush3.bf16.msra.mxu1 %v1504_v5 }
  0x4d   : > { %1001 = vmatmul.mubr.bf16.vlgmr.msra.gmra.mxu0 %v1501_v3 }
  0x4e   : > { %1417 = vmatprep.mubr.msk.bf16.mxu0 %vm1526_vm0, %v1525_v6  ;;  %1402 = vmatpush3.bf16.msra.mxu0 %v1508_v9 }
  0x4f   : > { %1042 = vmatmul.mubr.bf16.vlgmr.msra.gmra.mxu1 %v1505_v7  ;;  %1403 = vmatprep.subr.bf16.mxu0 %v1525_v6 }
  0x52   : > { %1404 = vmatpush3.bf16.msra.mxu0 %v1509_v10 }
  0x53   : > { %1405 = vmatprep.subr.bf16.mxu0 %v1525_v6 }
  0x56   : > { %1406 = vmatpush3.bf16.msra.mxu0 %v1510_v11 }
  0x57   : > { %1407 = vmatprep.subr.bf16.mxu0 %v1525_v6 }
  0x5a   : > { %1408 = vmatpush3.bf16.msra.mxu0 %v1511_v12 }
  0x5b   : > { %1409 = vmatprep.subr.bf16.mxu0 %v1525_v6 }
  0x5e   : > { %1410 = vmatpush3.bf16.msra.mxu0 %v1512_v13 }
  0x5f   : > { %1411 = vmatprep.subr.bf16.mxu0 %v1525_v6 }
  0x62   : > { %1412 = vmatpush3.bf16.msra.mxu0 %v1513_v14 }
  0x63   : > { %1413 = vmatprep.subr.bf16.mxu0 %v1525_v6 }
  0x66   : > { %1414 = vmatpush3.bf16.msra.mxu0 %v1514_v15 }
  0x67   : > { %1415 = vmatprep.subr.bf16.mxu0 %v1525_v6 }
  0x6a   : > { %1416 = vmatpush3.bf16.msra.mxu0 %v1515_v16 }
  0x6d   : > { %1418 = vmatmul.mubr.bf16.vlgmr.msra.gmra.mxu0 %v1516_v17 }
  0xed   : > { %v1320_v18 = vpop.f32.mrf.mxu0 }
  0xee   : > { %v1342_v19 = vpop.f32.mrf.mxu1 }
  0xef   : > { %v1321_v20 = vpop.f32.mrf.mxu0 }
  0xf0   : > { %v1343_v21 = vpop.f32.mrf.mxu1  ;;  %v1322_v31 = vadd.f32 %v1321_v20, %v1320_v18 }
  0xf1   : > { %v1323_v22 = vpop.f32.mrf.mxu0  ;;  %v1344_v32 = vadd.f32 %v1343_v21, %v1342_v19 }
  0xf2   : > { %v1345_v23 = vpop.f32.mrf.mxu1 }
  0xf3   : > { %v1324_v24 = vpop.f32.mrf.mxu0  ;;  %v962_v36 = vadd.f32 %v1344_v32, %v1322_v31 }
  0xf4   : > { %v1346_v26 = vpop.f32.mrf.mxu1  ;;  %v1325_v37 = vadd.f32 %v1324_v24, %v1323_v22 }
  0xf5   : > { %v1347_v38 = vadd.f32 %v1346_v26, %v1345_v23 }
  0xf7   : > { %v965_v43 = vadd.f32 %v1347_v38, %v1325_v37 }
 0x10d   : > { %v1364_v25 = vpop.f32.mrf.mxu0 }
 0x10f   : > { %v1365_v27 = vpop.f32.mrf.mxu0  ;;  %v1386_v28 = vpop.f32.mrf.mxu1 }
 0x110   : > { %v1366_v33 = vadd.f32 %v1365_v27, %v1364_v25 }
 0x111   : > { %v1367_v29 = vpop.f32.mrf.mxu0  ;;  %v1387_v30 = vpop.f32.mrf.mxu1 }
 0x112   : > { %v1003_v39 = vadd.f32 %v1366_v33, %v962_v36  ;;  %v1388_v40 = vadd.f32 %v1387_v30, %v1386_v28 }
 0x113   : > { %v1368_v34 = vpop.f32.mrf.mxu0  ;;  %v1389_v35 = vpop.f32.mrf.mxu1 }
 0x114   : > { %v1369_v41 = vadd.f32 %v1368_v34, %v1367_v29  ;;  %v1044_v46 = vadd.f32 %v1388_v40, %v1003_v39 }
 0x115   : > { %v1390_v42 = vpop.f32.mrf.mxu1 }
 0x116   : > { %v1006_v44 = vadd.f32 %v1369_v41, %v965_v43  ;;  %v1391_v45 = vadd.f32 %v1390_v42, %v1389_v35 }
 0x118   : > { %v1047_v54 = vadd.f32 %v1391_v45, %v1006_v44 }
 0x12d   : > { %v1084_v47 = vpop.f32.mrf.mxu0 }
 0x12e   : > { %v1085_v49 = vadd.f32 %v1084_v47, %v1044_v46 }
 0x12f   : > { %v1419_v52 = vpop.f32.mrf.mxu0 }
 0x130   : > { %v1098_v53 = vmul.f32 %v1287_v48, %v1085_v49 }
 0x131   : > { %v1087_v55 = vpop.f32.mrf.mxu0 }
 0x132   : > { %v1107_v56 = vadd.f32 %v1288_v50, %v1098_v53  ;;  %v1088_v58 = vadd.f32 %v1087_v55, %v1047_v54 }
 0x133   : > { %v1420_v59 = vpop.f32.mrf.mxu0 }
 0x134   : > { %v1099_v60 = vmul.f32 %v1287_v48, %v1088_v58  ;;  %v1113_v62 = vadd.f32 %v1297_v57, %v1107_v56 }
 0x136   : > { %v1108_v63 = vadd.f32 %v1288_v50, %v1099_v60  ;;  %v1115_v1 = vmax.f32 %v1113_v62, 0.0 }
 0x138   : > { %v1114_v0 = vadd.f32 %v1298_v61, %v1108_v63 }
 0x13a   : > { %v1116_v2 = vmax.f32 %v1114_v0, 0.0 }
 0x13c   : > { %v1302_v3 = vpack.c.bf16 %v1116_v2, %v1115_v1 }
 0x13e   : > { %1303 = vst [vmem:[%s251_s17] sm:$0xff] %v1302_v3  }
 0x13f PF: > { %s15_s18 = sadd.s32 1, %s1523_s18  }
 0x140   : > { %p12_p4 = scmp.ge.s32.totalorder %s15_s18, 4  }
 0x142   :  { %14 = sbr.rel (!%p12_p4) target bundleno = 1 (0x1), region = 73 }

// kernel: byol_forward.27
= control target key start
LH: loop header
LB: loop body
LE: loop exit
PB: predicated region body
PF: predicated region fallthrough
CT: control target
= control target key end

     0   :  { %s1846_s27 = smov 0   ;;  %s2135_s0 = inlined_call_operand.vmem [shape: bf16[32,1152], index: 0, kind: input, shape index: {}]   ;;  %s2136_s1 = inlined_call_operand.vmem [shape: bf16[1152,128], index: 1, kind: input, shape index: {}]   ;;  %s2137_s2 = inlined_call_operand.vmem [shape: f32[1,128], index: 2, kind: input, shape index: {}]   ;;  %s2138_s3 = inlined_call_operand.vmem [shape: f32[1,128], index: 3, kind: input, shape index: {}]   ;;  %s2139_s4 = inlined_call_operand.vmem [shape: bf16[128,128], index: 4, kind: input, shape index: {}]   ;;  %s2140_s5 = inlined_call_operand.vmem [shape: f32[1,128], index: 5, kind: input, shape index: {}]   ;;  %s2141_s6 = inlined_call_operand.vmem [shape: f32[1,128], index: 6, kind: input, shape index: {}]   ;;  %s2142_s7 = inlined_call_operand.vmem [shape: bf16[32,128], index: 7, kind: output, shape index: {0}]   ;;  %s2143_s8 = inlined_call_operand.vmem [shape: bf16[32,128], index: 8, kind: output, shape index: {1}]  }
   0x1 LB: > { %s1417_s28 = sadd.s32 4294967295, %s1797_s27   ;;  %p1421_p0 = scmp.ge.s32.totalorder %s1797_s27, 1  ;;  %s1797_s27 = sphi %s1846_s27, %s19_s27  }
   0x2   : > { %p267_p1 = scmp.lt.s32.totalorder %s1797_s27, 3 }
   0x4   : > { %p268_p2 = pnand %p1421_p0, %p267_p1 }
   0x5   : > { %s1422_s17 = sshll.u32 (!%p268_p2), %s1417_s28, 1 }
   0x6   : > { %271 = sbr.rel (%p268_p2) target bundleno = 318 (0x13e), region = 48  ;;  %p308_p3 = scmp.lt.s32.totalorder (!%p268_p2), %s1422_s17, 3 }
   0xb   : > { %v1698_v0 = vld [vmem:[%s2136_s1 + $0x78] sm:$0xff]   ;;  %v1702_v4 = vld [vmem:[%s2136_s1 + $0x70] sm:$0xff]   ;;  %v1706_v8 = vld [vmem:[%s2136_s1 + $0x68] sm:$0xff]   ;;  %s2145_s17 = smov (!%p308_p3, %s1422_s17), 3  ;;  %vm1800_vm0 = vmmov 0  }
   0xc   : > { %v1699_v1 = vld [vmem:[%s2136_s1 + $0xf8] sm:$0xff]   ;;  %1541 = vmatprep.subr.bf16.mxu0 %v1698_v0  ;;  %v1703_v5 = vld [vmem:[%s2136_s1 + $0xf0] sm:$0xff]   ;;  %v1707_v9 = vld [vmem:[%s2136_s1 + $0xe8] sm:$0xff]   ;;  %s1687_s20 = smul.u32 36, %s2145_s17  ;;  %s1425_s24 = sshll.u32 %s2145_s17, 2 }
   0xd   : > { %v1700_v2 = vld [vmem:[%s2136_s1 + $0x38] sm:$0xff]   ;;  %1563 = vmatprep.subr.bf16.mxu1 %v1699_v1  ;;  %v1704_v6 = vld [vmem:[%s2136_s1 + $0x30] sm:$0xff]   ;;  %v1708_v10 = vld [vmem:[%s2136_s1 + $0x28] sm:$0xff]   ;;  %s324_s26 = scalar_lea.vmem %s2143_s8, %s1425_s24  ;;  %s318_s9 = scalar_lea.vmem %s2142_s7, %s1425_s24 }
   0xe   : > { %v1701_v3 = vld [vmem:[%s2136_s1 + $0xb8] sm:$0xff]   ;;  %1542 = vmatpush3.bf16.msra.mxu0 %v1700_v2  ;;  %v1705_v7 = vld [vmem:[%s2136_s1 + $0xb0] sm:$0xff]   ;;  %v1709_v11 = vld [vmem:[%s2136_s1 + $0xa8] sm:$0xff]   ;;  %s1952_s10 = scalar_lea.vmem %s2135_s0, %s1687_s20 }
   0xf   : > { %1564 = vmatpush3.bf16.msra.mxu1 %v1701_v3  ;;  %1543 = vmatprep.subr.bf16.mxu0 %v1702_v4  ;;  %v1710_v12 = vld [vmem:[%s2136_s1 + $0x60] sm:$0xff]   ;;  %v1714_v16 = vld [vmem:[%s2136_s1 + $0x58] sm:$0xff]   ;;  %v1718_v20 = vld [vmem:[%s2136_s1 + $0x50] sm:$0xff]  }
  0x10   : > { %1565 = vmatprep.subr.bf16.mxu1 %v1703_v5  ;;  %v1711_v13 = vld [vmem:[%s2136_s1 + $0xe0] sm:$0xff]   ;;  %v1715_v17 = vld [vmem:[%s2136_s1 + $0xd8] sm:$0xff]   ;;  %v1719_v21 = vld [vmem:[%s2136_s1 + $0xd0] sm:$0xff]  }
  0x11   : > { %v1712_v14 = vld [vmem:[%s2136_s1 + $0x20] sm:$0xff]   ;;  %v1716_v18 = vld [vmem:[%s2136_s1 + $0x18] sm:$0xff]   ;;  %v1720_v22 = vld [vmem:[%s2136_s1 + $0x10] sm:$0xff]  }
  0x12   : > { %1544 = vmatpush3.bf16.msra.mxu0 %v1704_v6  ;;  %v1713_v15 = vld [vmem:[%s2136_s1 + $0xa0] sm:$0xff]   ;;  %v1717_v19 = vld [vmem:[%s2136_s1 + $0x98] sm:$0xff]   ;;  %v1721_v23 = vld [vmem:[%s2136_s1 + $0x90] sm:$0xff]  }
  0x13   : > { %1566 = vmatpush3.bf16.msra.mxu1 %v1705_v7  ;;  %1545 = vmatprep.subr.bf16.mxu0 %v1706_v8  ;;  %v1722_v24 = vld [vmem:[%s2136_s1 + $0x48] sm:$0xff]   ;;  %v1726_v28 = vld [vmem:[%s2136_s1 + $0x40] sm:$0xff]   ;;  %v1736_v36 = vld [vmem:[%s2136_s1 + $0x178] sm:$0xff]   ;;  %v1799_v7 = vmov 0.0  }
  0x14   : > { %1567 = vmatprep.subr.bf16.mxu1 %v1707_v9  ;;  %v1723_v25 = vld [vmem:[%s2136_s1 + $0xc8] sm:$0xff]   ;;  %v1727_v29 = vld [vmem:[%s2136_s1 + $0xc0] sm:$0xff]   ;;  %v1737_v37 = vld [vmem:[%s2136_s1 + $0x1f8] sm:$0xff]  }
  0x15   : > { %v1724_v26 = vld [vmem:[%s2136_s1 + $0x8] sm:$0xff]   ;;  %v1728_v30 = vld [vmem:[%s2136_s1] sm:$0xff]   ;;  %v1738_v38 = vld [vmem:[%s2136_s1 + $0x138] sm:$0xff]  }
  0x16   : > { %1546 = vmatpush3.bf16.msra.mxu0 %v1708_v10  ;;  %v1725_v27 = vld [vmem:[%s2136_s1 + $0x88] sm:$0xff]   ;;  %v1729_v31 = vld [vmem:[%s2136_s1 + $0x80] sm:$0xff]   ;;  %v1739_v39 = vld [vmem:[%s2136_s1 + $0x1b8] sm:$0xff]  }
  0x17   : > { %1568 = vmatpush3.bf16.msra.mxu1 %v1709_v11  ;;  %1547 = vmatprep.subr.bf16.mxu0 %v1710_v12  ;;  %v1730_v32 = vld [vmem:[%s1952_s10] ss:$36 sps:$4 sm:$0xff]   ;;  %v1733_v34 = vld [vmem:[%s1952_s10 + $0x8] ss:$36 sps:$4 sm:$0xff]   ;;  %v1740_v40 = vld [vmem:[%s2136_s1 + $0x170] sm:$0xff]  }
  0x18   : > { %1569 = vmatprep.subr.bf16.mxu1 %v1711_v13  ;;  %v1732_v33 = vld [vmem:[%s1952_s10 + $0x4] ss:$36 sps:$4 sm:$0xff]   ;;  %v1735_v35 = vld [vmem:[%s1952_s10 + $0xc] ss:$36 sps:$4 sm:$0xff]   ;;  %v1752_v52 = vld [vmem:[%s2136_s1 + $0x158] sm:$0xff]  }
  0x19   : > { %991 = vmatprep.mubr.bf16.mxu0 %v1732_v33  ;;  %1032 = vmatprep.mubr.bf16.mxu1 %v1735_v35  ;;  %v1741_v41 = vld [vmem:[%s2136_s1 + $0x1f0] sm:$0xff]   ;;  %v1744_v44 = vld [vmem:[%s2136_s1 + $0x168] sm:$0xff]   ;;  %v1748_v48 = vld [vmem:[%s2136_s1 + $0x160] sm:$0xff]  }
  0x1a   : > { %1548 = vmatpush3.bf16.msra.mxu0 %v1712_v14  ;;  %v1742_v42 = vld [vmem:[%s2136_s1 + $0x130] sm:$0xff]   ;;  %v1745_v45 = vld [vmem:[%s2136_s1 + $0x1e8] sm:$0xff]   ;;  %v1749_v49 = vld [vmem:[%s2136_s1 + $0x1e0] sm:$0xff]  }
  0x1b   : > { %1570 = vmatpush3.bf16.msra.mxu1 %v1713_v15  ;;  %1549 = vmatprep.subr.bf16.mxu0 %v1714_v16  ;;  %v1743_v43 = vld [vmem:[%s2136_s1 + $0x1b0] sm:$0xff]   ;;  %v1746_v46 = vld [vmem:[%s2136_s1 + $0x128] sm:$0xff]   ;;  %v1750_v50 = vld [vmem:[%s2136_s1 + $0x120] sm:$0xff]  }
  0x1c   : > { %1571 = vmatprep.subr.bf16.mxu1 %v1715_v17  ;;  %v1747_v47 = vld [vmem:[%s2136_s1 + $0x1a8] sm:$0xff]   ;;  %v1751_v51 = vld [vmem:[%s2136_s1 + $0x1a0] sm:$0xff]   ;;  %v1753_v53 = vld [vmem:[%s2136_s1 + $0x1d8] sm:$0xff]  }
  0x1d   : > { %v1754_v54 = vld [vmem:[%s2136_s1 + $0x118] sm:$0xff]   ;;  %v1756_v56 = vld [vmem:[%s2136_s1 + $0x150] sm:$0xff]   ;;  %v1760_v60 = vld [vmem:[%s2136_s1 + $0x148] sm:$0xff]  }
  0x1e   : > { %1550 = vmatpush3.bf16.msra.mxu0 %v1716_v18  ;;  %v1755_v55 = vld [vmem:[%s2136_s1 + $0x198] sm:$0xff]   ;;  %v1757_v57 = vld [vmem:[%s2136_s1 + $0x1d0] sm:$0xff]   ;;  %v1761_v61 = vld [vmem:[%s2136_s1 + $0x1c8] sm:$0xff]  }
  0x1f   : > { %1572 = vmatpush3.bf16.msra.mxu1 %v1717_v19  ;;  %1551 = vmatprep.subr.bf16.mxu0 %v1718_v20  ;;  %v1758_v58 = vld [vmem:[%s2136_s1 + $0x110] sm:$0xff]   ;;  %v1762_v62 = vld [vmem:[%s2136_s1 + $0x108] sm:$0xff]   ;;  %v1764_v0 = vld [vmem:[%s2136_s1 + $0x140] sm:$0xff]  }
  0x20   : > { %1573 = vmatprep.subr.bf16.mxu1 %v1719_v21  ;;  %v1759_v59 = vld [vmem:[%s2136_s1 + $0x190] sm:$0xff]   ;;  %v1763_v63 = vld [vmem:[%s2136_s1 + $0x188] sm:$0xff]   ;;  %v1765_v1 = vld [vmem:[%s2136_s1 + $0x1c0] sm:$0xff]  }
  0x21   : > { %v1766_v2 = vld [vmem:[%s2136_s1 + $0x100] sm:$0xff]   ;;  %v1768_v4 = vld [vmem:[%s1952_s10 + $0x10] ss:$36 sps:$4 sm:$0xff]   ;;  %v1771_v6 = vld [vmem:[%s1952_s10 + $0x18] ss:$36 sps:$4 sm:$0xff]  }
  0x22   : > { %1552 = vmatpush3.bf16.msra.mxu0 %v1720_v22  ;;  %v1767_v3 = vld [vmem:[%s2136_s1 + $0x180] sm:$0xff]   ;;  %v1770_v5 = vld [vmem:[%s1952_s10 + $0x14] ss:$36 sps:$4 sm:$0xff]   ;;  %v1778_v13 = vld [vmem:[%s2136_s1 + $0x228] sm:$0xff]  }
  0x23   : > { %1574 = vmatpush3.bf16.msra.mxu1 %v1721_v23  ;;  %1553 = vmatprep.subr.bf16.mxu0 %v1722_v24  ;;  %v1773_v8 = vld [vmem:[%s1952_s10 + $0x1c] ss:$36 sps:$4 sm:$0xff]   ;;  %v1776_v11 = vld [vmem:[%s2136_s1 + $0x230] sm:$0xff]   ;;  %v1779_v14 = vld [vmem:[%s2139_s4 + $0x28] sm:$0xff]  }
  0x24   : > { %1575 = vmatprep.subr.bf16.mxu1 %v1723_v25  ;;  %v1774_v9 = vld [vmem:[%s2136_s1 + $0x238] sm:$0xff]   ;;  %v1777_v12 = vld [vmem:[%s2139_s4 + $0x30] sm:$0xff]   ;;  %v1780_v15 = vld [vmem:[%s2136_s1 + $0x220] sm:$0xff]  }
  0x25   : > { %v1775_v10 = vld [vmem:[%s2139_s4 + $0x38] sm:$0xff]   ;;  %v1781_v16 = vld [vmem:[%s2139_s4 + $0x20] sm:$0xff]   ;;  %v1784_v19 = vld [vmem:[%s2136_s1 + $0x210] sm:$0xff]  }
  0x26   : > { %1554 = vmatpush3.bf16.msra.mxu0 %v1724_v26  ;;  %v1782_v17 = vld [vmem:[%s2136_s1 + $0x218] sm:$0xff]   ;;  %v1785_v20 = vld [vmem:[%s2139_s4 + $0x10] sm:$0xff]   ;;  %v1786_v21 = vld [vmem:[%s2136_s1 + $0x208] sm:$0xff]  }
  0x27   : > { %1576 = vmatpush3.bf16.msra.mxu1 %v1725_v27  ;;  %1555 = vmatprep.subr.bf16.mxu0 %v1726_v28  ;;  %v1783_v18 = vld [vmem:[%s2139_s4 + $0x18] sm:$0xff]   ;;  %v1787_v22 = vld [vmem:[%s2139_s4 + $0x8] sm:$0xff]   ;;  %v1788_v23 = vld [vmem:[%s2136_s1 + $0x200] sm:$0xff]  }
  0x28   : > { %1577 = vmatprep.subr.bf16.mxu1 %v1727_v29  ;;  %v1789_v24 = vld [vmem:[%s2139_s4] sm:$0xff]  }
  0x29   : > { %v1790_v25 = vld [vmem:[%s1952_s10 + $0x20] ss:$36 sps:$4 sm:$0xff]  }
  0x2a   : > { %1556 = vmatpush3.bf16.msra.mxu0 %v1728_v30 }
  0x2b   : > { %1578 = vmatpush3.bf16.msra.mxu1 %v1729_v31  ;;  %1585 = vmatprep.subr.bf16.mxu0 %v1736_v36 }
  0x2c   : > { %1607 = vmatprep.subr.bf16.mxu1 %v1737_v37 }
  0x2d   : > { %992 = vmatmul.mubr.bf16.vlgmr.msra.gmra.mxu0 %v1730_v32 }
  0x2e   : > { %1033 = vmatmul.mubr.bf16.vlgmr.msra.gmra.mxu1 %v1733_v34  ;;  %1586 = vmatpush3.bf16.msra.mxu0 %v1738_v38 }
  0x2f   : > { %1608 = vmatpush3.bf16.msra.mxu1 %v1739_v39  ;;  %1587 = vmatprep.subr.bf16.mxu0 %v1740_v40 }
  0x30   : > { %1609 = vmatprep.subr.bf16.mxu1 %v1741_v41  ;;  %1073 = vmatprep.mubr.bf16.mxu0 %v1770_v5 }
  0x31   : > { %1114 = vmatprep.mubr.bf16.mxu1 %v1773_v8 }
  0x32   : > { %1588 = vmatpush3.bf16.msra.mxu0 %v1742_v42 }
  0x33   : > { %1610 = vmatpush3.bf16.msra.mxu1 %v1743_v43  ;;  %1589 = vmatprep.subr.bf16.mxu0 %v1744_v44 }
  0x34   : > { %1611 = vmatprep.subr.bf16.mxu1 %v1745_v45 }
  0x36   : > { %1590 = vmatpush3.bf16.msra.mxu0 %v1746_v46 }
  0x37   : > { %1612 = vmatpush3.bf16.msra.mxu1 %v1747_v47  ;;  %1591 = vmatprep.subr.bf16.mxu0 %v1748_v48 }
  0x38   : > { %1613 = vmatprep.subr.bf16.mxu1 %v1749_v49 }
  0x3a   : > { %1592 = vmatpush3.bf16.msra.mxu0 %v1750_v50 }
  0x3b   : > { %1614 = vmatpush3.bf16.msra.mxu1 %v1751_v51  ;;  %1593 = vmatprep.subr.bf16.mxu0 %v1752_v52 }
  0x3c   : > { %1615 = vmatprep.subr.bf16.mxu1 %v1753_v53 }
  0x3e   : > { %1594 = vmatpush3.bf16.msra.mxu0 %v1754_v54  ;;  %v1521_v54 = vld [vmem:[%s2140_s5] ss:$0 sm:$0xff] }
  0x3f   : > { %1616 = vmatpush3.bf16.msra.mxu1 %v1755_v55  ;;  %1595 = vmatprep.subr.bf16.mxu0 %v1756_v56  ;;  %v1509_v56 = vld [vmem:[%s2137_s2] ss:$0 sm:$0xff] }
  0x40   : > { %1617 = vmatprep.subr.bf16.mxu1 %v1757_v57 }
  0x42   : > { %1596 = vmatpush3.bf16.msra.mxu0 %v1758_v58 }
  0x43   : > { %1618 = vmatpush3.bf16.msra.mxu1 %v1759_v59  ;;  %1597 = vmatprep.subr.bf16.mxu0 %v1760_v60 }
  0x44   : > { %1619 = vmatprep.subr.bf16.mxu1 %v1761_v61 }
  0x46   : > { %1598 = vmatpush3.bf16.msra.mxu0 %v1762_v62 }
  0x47   : > { %1620 = vmatpush3.bf16.msra.mxu1 %v1763_v63  ;;  %1599 = vmatprep.subr.bf16.mxu0 %v1764_v0  ;;  %v1522_v63 = vld [vmem:[%s2141_s6] ss:$0 sm:$0xff] }
  0x48   : > { %1621 = vmatprep.subr.bf16.mxu1 %v1765_v1 }
  0x4a   : > { %1600 = vmatpush3.bf16.msra.mxu0 %v1766_v2  ;;  %v1510_v2 = vld [vmem:[%s2138_s3] ss:$0 sm:$0xff] }
  0x4b   : > { %1622 = vmatpush3.bf16.msra.mxu1 %v1767_v3  ;;  %1647 = vmatprep.subr.bf16.mxu0 %v1799_v7 }
  0x4c   : > { %1667 = vmatprep.subr.bf16.mxu1 %v1799_v7 }
  0x4d   : > { %1074 = vmatmul.mubr.bf16.vlgmr.msra.gmra.mxu0 %v1768_v4 }
  0x4e   : > { %1663 = vmatprep.mubr.msk.bf16.mxu0 %vm1800_vm0, %v1799_v7  ;;  %1115 = vmatmul.mubr.bf16.vlgmr.msra.gmra.mxu1 %v1771_v6 }
  0x4f   : > { %1648 = vmatpush3.bf16.msra.mxu0 %v1774_v9  ;;  %1668 = vmatpush3.bf16.msra.mxu1 %v1775_v10 }
  0x50   : > { %1649 = vmatprep.subr.bf16.mxu0 %v1799_v7  ;;  %1669 = vmatprep.subr.bf16.mxu1 %v1799_v7 }
  0x51   : > { %1683 = vmatprep.mubr.msk.bf16.mxu1 %vm1800_vm0, %v1799_v7 }
  0x53   : > { %1650 = vmatpush3.bf16.msra.mxu0 %v1776_v11  ;;  %1670 = vmatpush3.bf16.msra.mxu1 %v1777_v12 }
  0x54   : > { %1651 = vmatprep.subr.bf16.mxu0 %v1799_v7  ;;  %1671 = vmatprep.subr.bf16.mxu1 %v1799_v7 }
  0x57   : > { %1652 = vmatpush3.bf16.msra.mxu0 %v1778_v13  ;;  %1672 = vmatpush3.bf16.msra.mxu1 %v1779_v14 }
  0x58   : > { %1653 = vmatprep.subr.bf16.mxu0 %v1799_v7  ;;  %1673 = vmatprep.subr.bf16.mxu1 %v1799_v7 }
  0x5b   : > { %1654 = vmatpush3.bf16.msra.mxu0 %v1780_v15  ;;  %1674 = vmatpush3.bf16.msra.mxu1 %v1781_v16 }
  0x5c   : > { %1655 = vmatprep.subr.bf16.mxu0 %v1799_v7  ;;  %1675 = vmatprep.subr.bf16.mxu1 %v1799_v7 }
  0x5f   : > { %1656 = vmatpush3.bf16.msra.mxu0 %v1782_v17  ;;  %1676 = vmatpush3.bf16.msra.mxu1 %v1783_v18 }
  0x60   : > { %1657 = vmatprep.subr.bf16.mxu0 %v1799_v7  ;;  %1677 = vmatprep.subr.bf16.mxu1 %v1799_v7 }
  0x63   : > { %1658 = vmatpush3.bf16.msra.mxu0 %v1784_v19  ;;  %1678 = vmatpush3.bf16.msra.mxu1 %v1785_v20 }
  0x64   : > { %1659 = vmatprep.subr.bf16.mxu0 %v1799_v7  ;;  %1679 = vmatprep.subr.bf16.mxu1 %v1799_v7 }
  0x67   : > { %1660 = vmatpush3.bf16.msra.mxu0 %v1786_v21  ;;  %1680 = vmatpush3.bf16.msra.mxu1 %v1787_v22 }
  0x68   : > { %1661 = vmatprep.subr.bf16.mxu0 %v1799_v7  ;;  %1681 = vmatprep.subr.bf16.mxu1 %v1799_v7 }
  0x6b   : > { %1662 = vmatpush3.bf16.msra.mxu0 %v1788_v23  ;;  %1682 = vmatpush3.bf16.msra.mxu1 %v1789_v24 }
  0x6e   : > { %1664 = vmatmul.mubr.bf16.vlgmr.msra.gmra.mxu0 %v1790_v25  ;;  %1684 = vmatmul.mubr.bf16.vlgmr.msra.gmra.mxu1 %v1768_v4 }
  0xed   : > { %v1557_v26 = vpop.f32.mrf.mxu0 }
  0xee   : > { %v1579_v28 = vpop.f32.mrf.mxu1 }
  0xef   : > { %v1558_v27 = vpop.f32.mrf.mxu0 }
  0xf0   : > { %v1580_v30 = vpop.f32.mrf.mxu1  ;;  %v1559_v38 = vadd.f32 %v1558_v27, %v1557_v26 }
  0xf1   : > { %v1560_v29 = vpop.f32.mrf.mxu0  ;;  %v1581_v39 = vadd.f32 %v1580_v30, %v1579_v28 }
  0xf2   : > { %v1582_v32 = vpop.f32.mrf.mxu1 }
  0xf3   : > { %v1561_v31 = vpop.f32.mrf.mxu0  ;;  %v1035_v43 = vadd.f32 %v1581_v39, %v1559_v38 }
  0xf4   : > { %v1583_v34 = vpop.f32.mrf.mxu1  ;;  %v1562_v44 = vadd.f32 %v1561_v31, %v1560_v29 }
  0xf5   : > { %v1584_v45 = vadd.f32 %v1583_v34, %v1582_v32 }
  0xf7   : > { %v1038_v50 = vadd.f32 %v1584_v45, %v1562_v44 }
 0x10d   : > { %v1601_v33 = vpop.f32.mrf.mxu0 }
 0x10e   : > { %v1623_v36 = vpop.f32.mrf.mxu1 }
 0x10f   : > { %v1602_v35 = vpop.f32.mrf.mxu0 }
 0x110   : > { %v1624_v40 = vpop.f32.mrf.mxu1  ;;  %v1603_v41 = vadd.f32 %v1602_v35, %v1601_v33 }
 0x111   : > { %v1604_v37 = vpop.f32.mrf.mxu0  ;;  %v1625_v48 = vadd.f32 %v1624_v40, %v1623_v36 }
 0x112   : > { %v1626_v46 = vpop.f32.mrf.mxu1  ;;  %v1076_v47 = vadd.f32 %v1603_v41, %v1035_v43 }
 0x113   : > { %v1605_v42 = vpop.f32.mrf.mxu0 }
 0x114   : > { %v1606_v49 = vadd.f32 %v1605_v42, %v1604_v37  ;;  %v1627_v51 = vpop.f32.mrf.mxu1  ;;  %v1117_v53 = vadd.f32 %v1625_v48, %v1076_v47 }
 0x115   : > { %v1628_v57 = vadd.f32 %v1627_v51, %v1626_v46 }
 0x116   : > { %v1079_v52 = vadd.f32 %v1606_v49, %v1038_v50 }
 0x118   : > { %v1120_v1 = vadd.f32 %v1628_v57, %v1079_v52 }
 0x12e   : > { %v1157_v55 = vpop.f32.mrf.mxu0  ;;  %v1292_v59 = vpop.f32.mrf.mxu1 }
 0x12f   : > { %v1158_v58 = vadd.f32 %v1157_v55, %v1117_v53  ;;  %v1306_v60 = vmul.f32 %v1521_v54, %v1292_v59 }
 0x130   : > { %v1665_v61 = vpop.f32.mrf.mxu0  ;;  %v1685_v0 = vpop.f32.mrf.mxu1 }
 0x131   : > { %v1171_v62 = vmul.f32 %v1509_v56, %v1158_v58  ;;  %v1315_v6 = vadd.f32 %v1522_v63, %v1306_v60 }
 0x132   : > { %v1160_v3 = vpop.f32.mrf.mxu0  ;;  %v1295_v5 = vpop.f32.mrf.mxu1 }
 0x133   : > { %v1161_v4 = vadd.f32 %v1160_v3, %v1120_v1  ;;  %v1307_v7 = vmul.f32 %v1521_v54, %v1295_v5  ;;  %v1180_v9 = vadd.f32 %v1510_v2, %v1171_v62 }
 0x134   : > { %v1666_v8 = vpop.f32.mrf.mxu0  ;;  %v1686_v11 = vpop.f32.mrf.mxu1 }
 0x135   : > { %v1172_v10 = vmul.f32 %v1509_v56, %v1161_v4  ;;  %v1316_v12 = vadd.f32 %v1522_v63, %v1307_v7  ;;  %v1182_v15 = vmax.f32 %v1180_v9, 0.0 }
 0x137   : > { %v1181_v13 = vadd.f32 %v1510_v2, %v1172_v10  ;;  %v1539_v14 = vpack.c.bf16 %v1316_v12, %v1315_v6 }
 0x139   : > { %v1183_v16 = vmax.f32 %v1181_v13, 0.0  ;;  %1540 = vst [vmem:[%s324_s26] sm:$0xff] %v1539_v14  }
 0x13b   : > { %v1534_v17 = vpack.c.bf16 %v1183_v16, %v1182_v15 }
 0x13d   : > { %1535 = vst [vmem:[%s318_s9] sm:$0xff] %v1534_v17  }
 0x13e PF: > { %s19_s27 = sadd.s32 1, %s1797_s27  }
 0x13f   : > { %p16_p4 = scmp.ge.s32.totalorder %s19_s27, 4  }
 0x141   :  { %18 = sbr.rel (!%p16_p4) target bundleno = 1 (0x1), region = 90 }

// kernel: byol_forward.29
= control target key start
LH: loop header
LB: loop body
LE: loop exit
PB: predicated region body
PF: predicated region fallthrough
CT: control target
= control target key end

     0   :  { %s1479_s15 = smov 0   ;;  %s1735_s0 = inlined_call_operand.vmem [shape: bf16[32,1152], index: 0, kind: input, shape index: {}]   ;;  %s1736_s1 = inlined_call_operand.vmem [shape: bf16[1152,128], index: 1, kind: input, shape index: {}]   ;;  %s1737_s2 = inlined_call_operand.vmem [shape: f32[1,128], index: 2, kind: input, shape index: {}]   ;;  %s1738_s3 = inlined_call_operand.vmem [shape: f32[1,128], index: 3, kind: input, shape index: {}]   ;;  %s1739_s4 = inlined_call_operand.vmem [shape: bf16[32,128], index: 4, kind: output, shape index: {}]  }
   0x1 LB: > { %s1128_s16 = sadd.s32 4294967295, %s1450_s15   ;;  %p1132_p0 = scmp.ge.s32.totalorder %s1450_s15, 1  ;;  %s1450_s15 = sphi %s1479_s15, %s14_s15  }
   0x2   : > { %p164_p1 = scmp.lt.s32.totalorder %s1450_s15, 3 }
   0x4   : > { %p165_p2 = pnand %p1132_p0, %p164_p1 }
   0x5   : > { %s1133_s23 = sshll.u32 (!%p165_p2), %s1128_s16, 1 }
   0x6   : > { %168 = sbr.rel (%p165_p2) target bundleno = 317 (0x13d), region = 36  ;;  %p192_p3 = scmp.lt.s32.totalorder (!%p165_p2), %s1133_s23, 3 }
   0xb   : > { %v1359_v0 = vld [vmem:[%s1736_s1 + $0x78] sm:$0xff]   ;;  %v1363_v4 = vld [vmem:[%s1736_s1 + $0x70] sm:$0xff]   ;;  %v1367_v8 = vld [vmem:[%s1736_s1 + $0x68] sm:$0xff]   ;;  %s1741_s23 = smov (!%p192_p3, %s1133_s23), 3  ;;  %vm1453_vm0 = vmmov 0  }
   0xc   : > { %v1360_v1 = vld [vmem:[%s1736_s1 + $0xf8] sm:$0xff]   ;;  %1231 = vmatprep.subr.bf16.mxu0 %v1359_v0  ;;  %v1364_v5 = vld [vmem:[%s1736_s1 + $0xf0] sm:$0xff]   ;;  %v1368_v9 = vld [vmem:[%s1736_s1 + $0xe8] sm:$0xff]   ;;  %s1348_s21 = smul.u32 36, %s1741_s23  ;;  %s1136_s28 = sshll.u32 %s1741_s23, 2 }
   0xd   : > { %v1361_v2 = vld [vmem:[%s1736_s1 + $0x38] sm:$0xff]   ;;  %1253 = vmatprep.subr.bf16.mxu1 %v1360_v1  ;;  %v1365_v6 = vld [vmem:[%s1736_s1 + $0x30] sm:$0xff]   ;;  %v1369_v10 = vld [vmem:[%s1736_s1 + $0x28] sm:$0xff]   ;;  %s202_s5 = scalar_lea.vmem %s1739_s4, %s1136_s28 }
   0xe   : > { %v1362_v3 = vld [vmem:[%s1736_s1 + $0xb8] sm:$0xff]   ;;  %1232 = vmatpush3.bf16.msra.mxu0 %v1361_v2  ;;  %v1366_v7 = vld [vmem:[%s1736_s1 + $0xb0] sm:$0xff]   ;;  %v1370_v11 = vld [vmem:[%s1736_s1 + $0xa8] sm:$0xff]   ;;  %s1585_s6 = scalar_lea.vmem %s1735_s0, %s1348_s21 }
   0xf   : > { %1254 = vmatpush3.bf16.msra.mxu1 %v1362_v3  ;;  %1233 = vmatprep.subr.bf16.mxu0 %v1363_v4  ;;  %v1371_v12 = vld [vmem:[%s1736_s1 + $0x60] sm:$0xff]   ;;  %v1375_v16 = vld [vmem:[%s1736_s1 + $0x58] sm:$0xff]   ;;  %v1379_v20 = vld [vmem:[%s1736_s1 + $0x50] sm:$0xff]  }
  0x10   : > { %1255 = vmatprep.subr.bf16.mxu1 %v1364_v5  ;;  %v1372_v13 = vld [vmem:[%s1736_s1 + $0xe0] sm:$0xff]   ;;  %v1376_v17 = vld [vmem:[%s1736_s1 + $0xd8] sm:$0xff]   ;;  %v1380_v21 = vld [vmem:[%s1736_s1 + $0xd0] sm:$0xff]  }
  0x11   : > { %v1373_v14 = vld [vmem:[%s1736_s1 + $0x20] sm:$0xff]   ;;  %v1377_v18 = vld [vmem:[%s1736_s1 + $0x18] sm:$0xff]   ;;  %v1381_v22 = vld [vmem:[%s1736_s1 + $0x10] sm:$0xff]  }
  0x12   : > { %1234 = vmatpush3.bf16.msra.mxu0 %v1365_v6  ;;  %v1374_v15 = vld [vmem:[%s1736_s1 + $0xa0] sm:$0xff]   ;;  %v1378_v19 = vld [vmem:[%s1736_s1 + $0x98] sm:$0xff]   ;;  %v1382_v23 = vld [vmem:[%s1736_s1 + $0x90] sm:$0xff]   ;;  %v1452_v6 = vmov 0.0  }
  0x13   : > { %1256 = vmatpush3.bf16.msra.mxu1 %v1366_v7  ;;  %1235 = vmatprep.subr.bf16.mxu0 %v1367_v8  ;;  %v1383_v24 = vld [vmem:[%s1736_s1 + $0x48] sm:$0xff]   ;;  %v1387_v28 = vld [vmem:[%s1736_s1 + $0x40] sm:$0xff]   ;;  %v1397_v36 = vld [vmem:[%s1736_s1 + $0x178] sm:$0xff]  }
  0x14   : > { %1257 = vmatprep.subr.bf16.mxu1 %v1368_v9  ;;  %v1384_v25 = vld [vmem:[%s1736_s1 + $0xc8] sm:$0xff]   ;;  %v1388_v29 = vld [vmem:[%s1736_s1 + $0xc0] sm:$0xff]   ;;  %v1398_v37 = vld [vmem:[%s1736_s1 + $0x138] sm:$0xff]  }
  0x15   : > { %v1385_v26 = vld [vmem:[%s1736_s1 + $0x8] sm:$0xff]   ;;  %v1389_v30 = vld [vmem:[%s1736_s1] sm:$0xff]   ;;  %v1399_v38 = vld [vmem:[%s1736_s1 + $0x1f8] sm:$0xff]  }
  0x16   : > { %1236 = vmatpush3.bf16.msra.mxu0 %v1369_v10  ;;  %v1386_v27 = vld [vmem:[%s1736_s1 + $0x88] sm:$0xff]   ;;  %v1390_v31 = vld [vmem:[%s1736_s1 + $0x80] sm:$0xff]   ;;  %v1400_v39 = vld [vmem:[%s1736_s1 + $0x1b8] sm:$0xff]  }
  0x17   : > { %1258 = vmatpush3.bf16.msra.mxu1 %v1370_v11  ;;  %1237 = vmatprep.subr.bf16.mxu0 %v1371_v12  ;;  %v1391_v32 = vld [vmem:[%s1585_s6] ss:$36 sps:$4 sm:$0xff]   ;;  %v1394_v34 = vld [vmem:[%s1585_s6 + $0x8] ss:$36 sps:$4 sm:$0xff]   ;;  %v1401_v40 = vld [vmem:[%s1736_s1 + $0x170] sm:$0xff]  }
  0x18   : > { %1259 = vmatprep.subr.bf16.mxu1 %v1372_v13  ;;  %v1393_v33 = vld [vmem:[%s1585_s6 + $0x4] ss:$36 sps:$4 sm:$0xff]   ;;  %v1396_v35 = vld [vmem:[%s1585_s6 + $0xc] ss:$36 sps:$4 sm:$0xff]   ;;  %v1413_v52 = vld [vmem:[%s1736_s1 + $0x158] sm:$0xff]  }
  0x19   : > { %869 = vmatprep.mubr.bf16.mxu0 %v1393_v33  ;;  %910 = vmatprep.mubr.bf16.mxu1 %v1396_v35  ;;  %v1402_v41 = vld [vmem:[%s1736_s1 + $0x130] sm:$0xff]   ;;  %v1405_v44 = vld [vmem:[%s1736_s1 + $0x168] sm:$0xff]   ;;  %v1409_v48 = vld [vmem:[%s1736_s1 + $0x160] sm:$0xff]  }
  0x1a   : > { %1238 = vmatpush3.bf16.msra.mxu0 %v1373_v14  ;;  %v1403_v42 = vld [vmem:[%s1736_s1 + $0x1f0] sm:$0xff]   ;;  %v1406_v45 = vld [vmem:[%s1736_s1 + $0x128] sm:$0xff]   ;;  %v1410_v49 = vld [vmem:[%s1736_s1 + $0x120] sm:$0xff]  }
  0x1b   : > { %1260 = vmatpush3.bf16.msra.mxu1 %v1374_v15  ;;  %1239 = vmatprep.subr.bf16.mxu0 %v1375_v16  ;;  %v1404_v43 = vld [vmem:[%s1736_s1 + $0x1b0] sm:$0xff]   ;;  %v1407_v46 = vld [vmem:[%s1736_s1 + $0x1e8] sm:$0xff]   ;;  %v1411_v50 = vld [vmem:[%s1736_s1 + $0x1e0] sm:$0xff]  }
  0x1c   : > { %1261 = vmatprep.subr.bf16.mxu1 %v1376_v17  ;;  %v1408_v47 = vld [vmem:[%s1736_s1 + $0x1a8] sm:$0xff]   ;;  %v1412_v51 = vld [vmem:[%s1736_s1 + $0x1a0] sm:$0xff]   ;;  %v1414_v53 = vld [vmem:[%s1736_s1 + $0x118] sm:$0xff]  }
  0x1d   : > { %v1415_v54 = vld [vmem:[%s1736_s1 + $0x1d8] sm:$0xff]   ;;  %v1417_v56 = vld [vmem:[%s1736_s1 + $0x150] sm:$0xff]   ;;  %v1421_v60 = vld [vmem:[%s1736_s1 + $0x148] sm:$0xff]  }
  0x1e   : > { %1240 = vmatpush3.bf16.msra.mxu0 %v1377_v18  ;;  %v1416_v55 = vld [vmem:[%s1736_s1 + $0x198] sm:$0xff]   ;;  %v1418_v57 = vld [vmem:[%s1736_s1 + $0x110] sm:$0xff]   ;;  %v1422_v61 = vld [vmem:[%s1736_s1 + $0x108] sm:$0xff]  }
  0x1f   : > { %1262 = vmatpush3.bf16.msra.mxu1 %v1378_v19  ;;  %1241 = vmatprep.subr.bf16.mxu0 %v1379_v20  ;;  %v1419_v58 = vld [vmem:[%s1736_s1 + $0x1d0] sm:$0xff]   ;;  %v1423_v62 = vld [vmem:[%s1736_s1 + $0x1c8] sm:$0xff]   ;;  %v1425_v0 = vld [vmem:[%s1736_s1 + $0x140] sm:$0xff]  }
  0x20   : > { %1263 = vmatprep.subr.bf16.mxu1 %v1380_v21  ;;  %v1420_v59 = vld [vmem:[%s1736_s1 + $0x190] sm:$0xff]   ;;  %v1424_v63 = vld [vmem:[%s1736_s1 + $0x188] sm:$0xff]   ;;  %v1426_v1 = vld [vmem:[%s1736_s1 + $0x100] sm:$0xff]  }
  0x21   : > { %v1427_v2 = vld [vmem:[%s1736_s1 + $0x1c0] sm:$0xff]   ;;  %v1428_v3 = vld [vmem:[%s1585_s6 + $0x10] ss:$36 sps:$4 sm:$0xff]   ;;  %v1432_v7 = vld [vmem:[%s1585_s6 + $0x18] ss:$36 sps:$4 sm:$0xff]  }
  0x22   : > { %1242 = vmatpush3.bf16.msra.mxu0 %v1381_v22  ;;  %v1430_v4 = vld [vmem:[%s1585_s6 + $0x14] ss:$36 sps:$4 sm:$0xff]   ;;  %v1431_v5 = vld [vmem:[%s1736_s1 + $0x180] sm:$0xff]   ;;  %v1437_v11 = vld [vmem:[%s1736_s1 + $0x228] sm:$0xff]  }
  0x23   : > { %1264 = vmatpush3.bf16.msra.mxu1 %v1382_v23  ;;  %1243 = vmatprep.subr.bf16.mxu0 %v1383_v24  ;;  %v1434_v8 = vld [vmem:[%s1585_s6 + $0x1c] ss:$36 sps:$4 sm:$0xff]   ;;  %v1436_v10 = vld [vmem:[%s1736_s1 + $0x230] sm:$0xff]   ;;  %v1441_v15 = vld [vmem:[%s1736_s1 + $0x208] sm:$0xff]  }
  0x24   : > { %1265 = vmatprep.subr.bf16.mxu1 %v1384_v25  ;;  %v1435_v9 = vld [vmem:[%s1736_s1 + $0x238] sm:$0xff]   ;;  %v1438_v12 = vld [vmem:[%s1736_s1 + $0x220] sm:$0xff]   ;;  %v1440_v14 = vld [vmem:[%s1736_s1 + $0x210] sm:$0xff]  }
  0x25   : > { %v1439_v13 = vld [vmem:[%s1736_s1 + $0x218] sm:$0xff]   ;;  %v1442_v16 = vld [vmem:[%s1736_s1 + $0x200] sm:$0xff]  }
  0x26   : > { %1244 = vmatpush3.bf16.msra.mxu0 %v1385_v26  ;;  %v1443_v17 = vld [vmem:[%s1585_s6 + $0x20] ss:$36 sps:$4 sm:$0xff]  }
  0x27   : > { %1266 = vmatpush3.bf16.msra.mxu1 %v1386_v27  ;;  %1245 = vmatprep.subr.bf16.mxu0 %v1387_v28 }
  0x28   : > { %1267 = vmatprep.subr.bf16.mxu1 %v1388_v29 }
  0x2a   : > { %1246 = vmatpush3.bf16.msra.mxu0 %v1389_v30 }
  0x2b   : > { %1268 = vmatpush3.bf16.msra.mxu1 %v1390_v31  ;;  %1275 = vmatprep.subr.bf16.mxu0 %v1397_v36 }
  0x2c   : > { %1297 = vmatprep.subr.bf16.mxu1 %v1399_v38 }
  0x2d   : > { %870 = vmatmul.mubr.bf16.vlgmr.msra.gmra.mxu0 %v1391_v32 }
  0x2e   : > { %911 = vmatmul.mubr.bf16.vlgmr.msra.gmra.mxu1 %v1394_v34  ;;  %1276 = vmatpush3.bf16.msra.mxu0 %v1398_v37 }
  0x2f   : > { %1298 = vmatpush3.bf16.msra.mxu1 %v1400_v39  ;;  %1277 = vmatprep.subr.bf16.mxu0 %v1401_v40 }
  0x30   : > { %1299 = vmatprep.subr.bf16.mxu1 %v1403_v42  ;;  %951 = vmatprep.mubr.bf16.mxu0 %v1430_v4 }
  0x31   : > { %992 = vmatprep.mubr.bf16.mxu1 %v1434_v8 }
  0x32   : > { %1278 = vmatpush3.bf16.msra.mxu0 %v1402_v41 }
  0x33   : > { %1300 = vmatpush3.bf16.msra.mxu1 %v1404_v43  ;;  %1279 = vmatprep.subr.bf16.mxu0 %v1405_v44 }
  0x34   : > { %1301 = vmatprep.subr.bf16.mxu1 %v1407_v46 }
  0x36   : > { %1280 = vmatpush3.bf16.msra.mxu0 %v1406_v45 }
  0x37   : > { %1302 = vmatpush3.bf16.msra.mxu1 %v1408_v47  ;;  %1281 = vmatprep.subr.bf16.mxu0 %v1409_v48  ;;  %v1218_v48 = vld [vmem:[%s1737_s2] ss:$0 sm:$0xff] }
  0x38   : > { %1303 = vmatprep.subr.bf16.mxu1 %v1411_v50 }
  0x3a   : > { %1282 = vmatpush3.bf16.msra.mxu0 %v1410_v49 }
  0x3b   : > { %1304 = vmatpush3.bf16.msra.mxu1 %v1412_v51  ;;  %1283 = vmatprep.subr.bf16.mxu0 %v1413_v52 }
  0x3c   : > { %1305 = vmatprep.subr.bf16.mxu1 %v1415_v54 }
  0x3e   : > { %1284 = vmatpush3.bf16.msra.mxu0 %v1414_v53  ;;  %v1219_v53 = vld [vmem:[%s1738_s3] ss:$0 sm:$0xff] }
  0x3f   : > { %1306 = vmatpush3.bf16.msra.mxu1 %v1416_v55  ;;  %1285 = vmatprep.subr.bf16.mxu0 %v1417_v56 }
  0x40   : > { %1307 = vmatprep.subr.bf16.mxu1 %v1419_v58 }
  0x42   : > { %1286 = vmatpush3.bf16.msra.mxu0 %v1418_v57 }
  0x43   : > { %1308 = vmatpush3.bf16.msra.mxu1 %v1420_v59  ;;  %1287 = vmatprep.subr.bf16.mxu0 %v1421_v60 }
  0x44   : > { %1309 = vmatprep.subr.bf16.mxu1 %v1423_v62 }
  0x46   : > { %1288 = vmatpush3.bf16.msra.mxu0 %v1422_v61 }
  0x47   : > { %1310 = vmatpush3.bf16.msra.mxu1 %v1424_v63  ;;  %1289 = vmatprep.subr.bf16.mxu0 %v1425_v0 }
  0x48   : > { %1311 = vmatprep.subr.bf16.mxu1 %v1427_v2 }
  0x4a   : > { %1290 = vmatpush3.bf16.msra.mxu0 %v1426_v1 }
  0x4b   : > { %1328 = vmatprep.subr.bf16.mxu0 %v1452_v6  ;;  %1312 = vmatpush3.bf16.msra.mxu1 %v1431_v5 }
  0x4d   : > { %952 = vmatmul.mubr.bf16.vlgmr.msra.gmra.mxu0 %v1428_v3 }
  0x4e   : > { %1344 = vmatprep.mubr.msk.bf16.mxu0 %vm1453_vm0, %v1452_v6  ;;  %1329 = vmatpush3.bf16.msra.mxu0 %v1435_v9 }
  0x4f   : > { %993 = vmatmul.mubr.bf16.vlgmr.msra.gmra.mxu1 %v1432_v7  ;;  %1330 = vmatprep.subr.bf16.mxu0 %v1452_v6 }
  0x52   : > { %1331 = vmatpush3.bf16.msra.mxu0 %v1436_v10 }
  0x53   : > { %1332 = vmatprep.subr.bf16.mxu0 %v1452_v6 }
  0x56   : > { %1333 = vmatpush3.bf16.msra.mxu0 %v1437_v11 }
  0x57   : > { %1334 = vmatprep.subr.bf16.mxu0 %v1452_v6 }
  0x5a   : > { %1335 = vmatpush3.bf16.msra.mxu0 %v1438_v12 }
  0x5b   : > { %1336 = vmatprep.subr.bf16.mxu0 %v1452_v6 }
  0x5e   : > { %1337 = vmatpush3.bf16.msra.mxu0 %v1439_v13 }
  0x5f   : > { %1338 = vmatprep.subr.bf16.mxu0 %v1452_v6 }
  0x62   : > { %1339 = vmatpush3.bf16.msra.mxu0 %v1440_v14 }
  0x63   : > { %1340 = vmatprep.subr.bf16.mxu0 %v1452_v6 }
  0x66   : > { %1341 = vmatpush3.bf16.msra.mxu0 %v1441_v15 }
  0x67   : > { %1342 = vmatprep.subr.bf16.mxu0 %v1452_v6 }
  0x6a   : > { %1343 = vmatpush3.bf16.msra.mxu0 %v1442_v16 }
  0x6d   : > { %1345 = vmatmul.mubr.bf16.vlgmr.msra.gmra.mxu0 %v1443_v17 }
  0xed   : > { %v1247_v18 = vpop.f32.mrf.mxu0 }
  0xee   : > { %v1269_v19 = vpop.f32.mrf.mxu1 }
  0xef   : > { %v1248_v20 = vpop.f32.mrf.mxu0 }
  0xf0   : > { %v1270_v21 = vpop.f32.mrf.mxu1  ;;  %v1249_v31 = vadd.f32 %v1248_v20, %v1247_v18 }
  0xf1   : > { %v1250_v22 = vpop.f32.mrf.mxu0  ;;  %v1271_v32 = vadd.f32 %v1270_v21, %v1269_v19 }
  0xf2   : > { %v1272_v23 = vpop.f32.mrf.mxu1 }
  0xf3   : > { %v1251_v24 = vpop.f32.mrf.mxu0  ;;  %v913_v36 = vadd.f32 %v1271_v32, %v1249_v31 }
  0xf4   : > { %v1273_v26 = vpop.f32.mrf.mxu1  ;;  %v1252_v37 = vadd.f32 %v1251_v24, %v1250_v22 }
  0xf5   : > { %v1274_v38 = vadd.f32 %v1273_v26, %v1272_v23 }
  0xf7   : > { %v916_v43 = vadd.f32 %v1274_v38, %v1252_v37 }
 0x10d   : > { %v1291_v25 = vpop.f32.mrf.mxu0 }
 0x10f   : > { %v1292_v27 = vpop.f32.mrf.mxu0  ;;  %v1313_v28 = vpop.f32.mrf.mxu1 }
 0x110   : > { %v1293_v33 = vadd.f32 %v1292_v27, %v1291_v25 }
 0x111   : > { %v1294_v29 = vpop.f32.mrf.mxu0  ;;  %v1314_v30 = vpop.f32.mrf.mxu1 }
 0x112   : > { %v954_v39 = vadd.f32 %v1293_v33, %v913_v36  ;;  %v1315_v40 = vadd.f32 %v1314_v30, %v1313_v28 }
 0x113   : > { %v1295_v34 = vpop.f32.mrf.mxu0  ;;  %v1316_v35 = vpop.f32.mrf.mxu1 }
 0x114   : > { %v1296_v41 = vadd.f32 %v1295_v34, %v1294_v29  ;;  %v995_v46 = vadd.f32 %v1315_v40, %v954_v39 }
 0x115   : > { %v1317_v42 = vpop.f32.mrf.mxu1 }
 0x116   : > { %v957_v44 = vadd.f32 %v1296_v41, %v916_v43  ;;  %v1318_v45 = vadd.f32 %v1317_v42, %v1316_v35 }
 0x118   : > { %v998_v52 = vadd.f32 %v1318_v45, %v957_v44 }
 0x12d   : > { %v1035_v47 = vpop.f32.mrf.mxu0 }
 0x12e   : > { %v1036_v49 = vadd.f32 %v1035_v47, %v995_v46 }
 0x12f   : > { %v1346_v50 = vpop.f32.mrf.mxu0 }
 0x130   : > { %v1049_v51 = vmul.f32 %v1218_v48, %v1036_v49 }
 0x131   : > { %v1038_v54 = vpop.f32.mrf.mxu0 }
 0x132   : > { %v1039_v55 = vadd.f32 %v1038_v54, %v998_v52  ;;  %v1058_v57 = vadd.f32 %v1219_v53, %v1049_v51 }
 0x133   : > { %v1347_v56 = vpop.f32.mrf.mxu0 }
 0x134   : > { %v1050_v58 = vmul.f32 %v1218_v48, %v1039_v55  ;;  %v1060_v60 = vmax.f32 %v1058_v57, 0.0 }
 0x136   : > { %v1059_v59 = vadd.f32 %v1219_v53, %v1050_v58 }
 0x138   : > { %v1061_v61 = vmax.f32 %v1059_v59, 0.0 }
 0x13a   : > { %v1229_v62 = vpack.c.bf16 %v1061_v61, %v1060_v60 }
 0x13c   : > { %1230 = vst [vmem:[%s202_s5] sm:$0xff] %v1229_v62  }
 0x13d PF: > { %s14_s15 = sadd.s32 1, %s1450_s15  }
 0x13e   : > { %p11_p4 = scmp.ge.s32.totalorder %s14_s15, 4  }
 0x140   :  { %13 = sbr.rel (!%p11_p4) target bundleno = 1 (0x1), region = 66 }

// kernel: byol_forward.31
= control target key start
LH: loop header
LB: loop body
LE: loop exit
PB: predicated region body
PF: predicated region fallthrough
CT: control target
= control target key end

     0   :  { %vm1322_vm0 = vmmov 0   ;;  %s1648_s1 = inlined_call_operand.vmem [shape: bf16[1152,128], index: 1, kind: input, shape index: {}]   ;;  %s1649_s0 = inlined_call_operand.vmem [shape: bf16[8,1152], index: 0, kind: input, shape index: {}]   ;;  %s1650_s4 = inlined_call_operand.vmem [shape: bf16[128,128], index: 4, kind: input, shape index: {}]   ;;  %s1651_s5 = inlined_call_operand.vmem [shape: f32[1,128], index: 5, kind: input, shape index: {}]   ;;  %s1652_s2 = inlined_call_operand.vmem [shape: f32[1,128], index: 2, kind: input, shape index: {}]   ;;  %s1653_s6 = inlined_call_operand.vmem [shape: f32[1,128], index: 6, kind: input, shape index: {}]   ;;  %s1654_s3 = inlined_call_operand.vmem [shape: f32[1,128], index: 3, kind: input, shape index: {}]   ;;  %s1655_s8 = inlined_call_operand.vmem [shape: bf16[8,128], index: 8, kind: output, shape index: {1}]   ;;  %s1656_s7 = inlined_call_operand.vmem [shape: bf16[8,128], index: 7, kind: output, shape index: {0}]  }
   0x1   :  { %v1232_v0 = vld [vmem:[%s1648_s1 + $0x78] sm:$0xff]   ;;  %v1236_v4 = vld [vmem:[%s1648_s1 + $0x70] sm:$0xff]   ;;  %v1240_v8 = vld [vmem:[%s1648_s1 + $0x68] sm:$0xff]  }
   0x2   :  { %v1233_v1 = vld [vmem:[%s1648_s1 + $0xf8] sm:$0xff]   ;;  %1084 = vmatprep.subr.bf16.mxu0 %v1232_v0  ;;  %v1237_v5 = vld [vmem:[%s1648_s1 + $0xf0] sm:$0xff]   ;;  %v1241_v9 = vld [vmem:[%s1648_s1 + $0xe8] sm:$0xff]  }
   0x3   :  { %v1234_v2 = vld [vmem:[%s1648_s1 + $0x38] sm:$0xff]   ;;  %1106 = vmatprep.subr.bf16.mxu1 %v1233_v1  ;;  %v1238_v6 = vld [vmem:[%s1648_s1 + $0x30] sm:$0xff]   ;;  %v1242_v10 = vld [vmem:[%s1648_s1 + $0x28] sm:$0xff]  }
   0x4   :  { %v1235_v3 = vld [vmem:[%s1648_s1 + $0xb8] sm:$0xff]   ;;  %1085 = vmatpush3.bf16.msra.mxu0 %v1234_v2  ;;  %v1239_v7 = vld [vmem:[%s1648_s1 + $0xb0] sm:$0xff]   ;;  %v1243_v11 = vld [vmem:[%s1648_s1 + $0xa8] sm:$0xff]  }
   0x5   :  { %1107 = vmatpush3.bf16.msra.mxu1 %v1235_v3  ;;  %1086 = vmatprep.subr.bf16.mxu0 %v1236_v4  ;;  %v1244_v12 = vld [vmem:[%s1648_s1 + $0x60] sm:$0xff]   ;;  %v1248_v16 = vld [vmem:[%s1648_s1 + $0x58] sm:$0xff]   ;;  %v1252_v20 = vld [vmem:[%s1648_s1 + $0x50] sm:$0xff]  }
   0x6   :  { %1108 = vmatprep.subr.bf16.mxu1 %v1237_v5  ;;  %v1245_v13 = vld [vmem:[%s1648_s1 + $0xe0] sm:$0xff]   ;;  %v1249_v17 = vld [vmem:[%s1648_s1 + $0xd8] sm:$0xff]   ;;  %v1253_v21 = vld [vmem:[%s1648_s1 + $0xd0] sm:$0xff]  }
   0x7   :  { %v1246_v14 = vld [vmem:[%s1648_s1 + $0x20] sm:$0xff]   ;;  %v1250_v18 = vld [vmem:[%s1648_s1 + $0x18] sm:$0xff]   ;;  %v1254_v22 = vld [vmem:[%s1648_s1 + $0x10] sm:$0xff]  }
   0x8   :  { %1087 = vmatpush3.bf16.msra.mxu0 %v1238_v6  ;;  %v1247_v15 = vld [vmem:[%s1648_s1 + $0xa0] sm:$0xff]   ;;  %v1251_v19 = vld [vmem:[%s1648_s1 + $0x98] sm:$0xff]   ;;  %v1255_v23 = vld [vmem:[%s1648_s1 + $0x90] sm:$0xff]  }
   0x9   :  { %1109 = vmatpush3.bf16.msra.mxu1 %v1239_v7  ;;  %1088 = vmatprep.subr.bf16.mxu0 %v1240_v8  ;;  %v1256_v24 = vld [vmem:[%s1648_s1 + $0x48] sm:$0xff]   ;;  %v1260_v28 = vld [vmem:[%s1648_s1 + $0x40] sm:$0xff]   ;;  %v1268_v38 = vld [vmem:[%s1648_s1 + $0x178] sm:$0xff]  }
   0xa   :  { %1110 = vmatprep.subr.bf16.mxu1 %v1241_v9  ;;  %v1257_v25 = vld [vmem:[%s1648_s1 + $0xc8] sm:$0xff]   ;;  %v1261_v29 = vld [vmem:[%s1648_s1 + $0xc0] sm:$0xff]   ;;  %v1269_v39 = vld [vmem:[%s1648_s1 + $0x1f8] sm:$0xff]  }
   0xb   :  { %v1258_v26 = vld [vmem:[%s1648_s1 + $0x8] sm:$0xff]   ;;  %v1262_v30 = vld [vmem:[%s1648_s1] sm:$0xff]   ;;  %v1270_v40 = vld [vmem:[%s1648_s1 + $0x138] sm:$0xff]  }
   0xc   :  { %1089 = vmatpush3.bf16.msra.mxu0 %v1242_v10  ;;  %v1259_v27 = vld [vmem:[%s1648_s1 + $0x88] sm:$0xff]   ;;  %v1263_v31 = vld [vmem:[%s1648_s1 + $0x80] sm:$0xff]   ;;  %v1271_v41 = vld [vmem:[%s1648_s1 + $0x1b8] sm:$0xff]  }
   0xd   :  { %1111 = vmatpush3.bf16.msra.mxu1 %v1243_v11  ;;  %1090 = vmatprep.subr.bf16.mxu0 %v1244_v12  ;;  %v29_v32 = vld [vmem:[%s1649_s0] sm:$0xff]  ;;  %v30_v33 = vld [vmem:[%s1649_s0 + $0x8] sm:$0xff]  ;;  %v1272_v42 = vld [vmem:[%s1648_s1 + $0x170] sm:$0xff]  }
   0xe   :  { %1112 = vmatprep.subr.bf16.mxu1 %v1245_v13  ;;  %v991_v34 = vcombine.low %v29_v32, %v29_v32  ;;  %v992_v35 = vcombine.high %v29_v32, %v29_v32  ;;  %v993_v36 = vcombine.low %v30_v33, %v30_v33  ;;  %v994_v37 = vcombine.high %v30_v33, %v30_v33  ;;  %v1273_v43 = vld [vmem:[%s1648_s1 + $0x1f0] sm:$0xff]   ;;  %v1276_v46 = vld [vmem:[%s1648_s1 + $0x168] sm:$0xff]   ;;  %v1280_v50 = vld [vmem:[%s1648_s1 + $0x160] sm:$0xff]  }
   0xf   :  { %v1274_v44 = vld [vmem:[%s1648_s1 + $0x130] sm:$0xff]   ;;  %v1277_v47 = vld [vmem:[%s1648_s1 + $0x1e8] sm:$0xff]   ;;  %v1281_v51 = vld [vmem:[%s1648_s1 + $0x1e0] sm:$0xff]   ;;  %v1321_v13 = vmov 0.0  }
  0x10   :  { %1091 = vmatpush3.bf16.msra.mxu0 %v1246_v14  ;;  %674 = vmatprep.mubr.bf16.mxu0 %v992_v35  ;;  %v1275_v45 = vld [vmem:[%s1648_s1 + $0x1b0] sm:$0xff]   ;;  %v1278_v48 = vld [vmem:[%s1648_s1 + $0x128] sm:$0xff]   ;;  %v1282_v52 = vld [vmem:[%s1648_s1 + $0x120] sm:$0xff]  }
  0x11   :  { %1113 = vmatpush3.bf16.msra.mxu1 %v1247_v15  ;;  %1092 = vmatprep.subr.bf16.mxu0 %v1248_v16  ;;  %v1279_v49 = vld [vmem:[%s1648_s1 + $0x1a8] sm:$0xff]   ;;  %v1283_v53 = vld [vmem:[%s1648_s1 + $0x1a0] sm:$0xff]   ;;  %v1284_v54 = vld [vmem:[%s1648_s1 + $0x158] sm:$0xff]  }
  0x12   :  { %1114 = vmatprep.subr.bf16.mxu1 %v1249_v17  ;;  %714 = vmatprep.mubr.bf16.mxu1 %v994_v37  ;;  %v1285_v55 = vld [vmem:[%s1648_s1 + $0x1d8] sm:$0xff]   ;;  %v1288_v58 = vld [vmem:[%s1648_s1 + $0x150] sm:$0xff]   ;;  %v1292_v62 = vld [vmem:[%s1648_s1 + $0x148] sm:$0xff]  }
  0x13   :  { %v1286_v56 = vld [vmem:[%s1648_s1 + $0x118] sm:$0xff]   ;;  %v1289_v59 = vld [vmem:[%s1648_s1 + $0x1d0] sm:$0xff]   ;;  %v1293_v63 = vld [vmem:[%s1648_s1 + $0x1c8] sm:$0xff]  }
  0x14   :  { %1093 = vmatpush3.bf16.msra.mxu0 %v1250_v18  ;;  %v1287_v57 = vld [vmem:[%s1648_s1 + $0x198] sm:$0xff]   ;;  %v1290_v60 = vld [vmem:[%s1648_s1 + $0x110] sm:$0xff]   ;;  %v1294_v0 = vld [vmem:[%s1648_s1 + $0x108] sm:$0xff]  }
  0x15   :  { %1115 = vmatpush3.bf16.msra.mxu1 %v1251_v19  ;;  %1094 = vmatprep.subr.bf16.mxu0 %v1252_v20  ;;  %v1291_v61 = vld [vmem:[%s1648_s1 + $0x190] sm:$0xff]   ;;  %v1295_v1 = vld [vmem:[%s1648_s1 + $0x188] sm:$0xff]   ;;  %v1296_v2 = vld [vmem:[%s1648_s1 + $0x140] sm:$0xff]  }
  0x16   :  { %1116 = vmatprep.subr.bf16.mxu1 %v1253_v21  ;;  %v1297_v3 = vld [vmem:[%s1648_s1 + $0x1c0] sm:$0xff]   ;;  %v1569_v6 = vld [vmem:[%s1649_s0 + $0x10] sm:$0xff]  ;;  %v32_v8 = vld [vmem:[%s1649_s0 + $0x18] sm:$0xff] }
  0x17   :  { %v1298_v4 = vld [vmem:[%s1648_s1 + $0x100] sm:$0xff]   ;;  %v996_v7 = vcombine.high %v1569_v6, %v1569_v6  ;;  %v995_v9 = vcombine.low %v1569_v6, %v1569_v6  ;;  %v997_v10 = vcombine.low %v32_v8, %v32_v8  ;;  %v998_v11 = vcombine.high %v32_v8, %v32_v8  ;;  %v1304_v12 = vld [vmem:[%s1648_s1 + $0x238] sm:$0xff]   ;;  %v1306_v15 = vld [vmem:[%s1648_s1 + $0x230] sm:$0xff]  }
  0x18   :  { %1095 = vmatpush3.bf16.msra.mxu0 %v1254_v22  ;;  %v1299_v5 = vld [vmem:[%s1648_s1 + $0x180] sm:$0xff]   ;;  %v1305_v14 = vld [vmem:[%s1650_s4 + $0x38] sm:$0xff]   ;;  %v1307_v16 = vld [vmem:[%s1650_s4 + $0x30] sm:$0xff]  }
  0x19   :  { %1117 = vmatpush3.bf16.msra.mxu1 %v1255_v23  ;;  %1096 = vmatprep.subr.bf16.mxu0 %v1256_v24  ;;  %v1308_v17 = vld [vmem:[%s1648_s1 + $0x228] sm:$0xff]   ;;  %v1310_v19 = vld [vmem:[%s1648_s1 + $0x220] sm:$0xff]   ;;  %v1312_v21 = vld [vmem:[%s1648_s1 + $0x218] sm:$0xff]  }
  0x1a   :  { %1118 = vmatprep.subr.bf16.mxu1 %v1257_v25  ;;  %v1309_v18 = vld [vmem:[%s1650_s4 + $0x28] sm:$0xff]   ;;  %v1311_v20 = vld [vmem:[%s1650_s4 + $0x20] sm:$0xff]   ;;  %v1313_v22 = vld [vmem:[%s1650_s4 + $0x18] sm:$0xff]  }
  0x1b   :  { %v1314_v23 = vld [vmem:[%s1648_s1 + $0x210] sm:$0xff]   ;;  %v1316_v25 = vld [vmem:[%s1648_s1 + $0x208] sm:$0xff]  }
  0x1c   :  { %1097 = vmatpush3.bf16.msra.mxu0 %v1258_v26  ;;  %v1315_v24 = vld [vmem:[%s1650_s4 + $0x10] sm:$0xff]   ;;  %v1317_v26 = vld [vmem:[%s1650_s4 + $0x8] sm:$0xff]  }
  0x1d   :  { %1119 = vmatpush3.bf16.msra.mxu1 %v1259_v27  ;;  %1098 = vmatprep.subr.bf16.mxu0 %v1260_v28  ;;  %v1318_v27 = vld [vmem:[%s1648_s1 + $0x200] sm:$0xff]  }
  0x1e   :  { %1120 = vmatprep.subr.bf16.mxu1 %v1261_v29  ;;  %v1319_v28 = vld [vmem:[%s1650_s4] sm:$0xff]  }
  0x1f   :  { %v1320_v29 = vld [vmem:[%s1649_s0 + $0x20] ss:$0 sps:$4 sm:$0xff]  }
  0x20   :  { %1099 = vmatpush3.bf16.msra.mxu0 %v1262_v30 }
  0x21   :  { %1121 = vmatpush3.bf16.msra.mxu1 %v1263_v31  ;;  %1128 = vmatprep.subr.bf16.mxu0 %v1268_v38 }
  0x22   :  { %1150 = vmatprep.subr.bf16.mxu1 %v1269_v39 }
  0x23   :  { %675 = vmatmul.mubr.bf16.vlgmr.msra.gmra.mxu0 %v991_v34 }
  0x24   :  { %715 = vmatmul.mubr.bf16.vlgmr.msra.gmra.mxu1 %v993_v36  ;;  %1129 = vmatpush3.bf16.msra.mxu0 %v1270_v40 }
  0x25   :  { %1151 = vmatpush3.bf16.msra.mxu1 %v1271_v41  ;;  %1130 = vmatprep.subr.bf16.mxu0 %v1272_v42 }
  0x26   :  { %1152 = vmatprep.subr.bf16.mxu1 %v1273_v43  ;;  %754 = vmatprep.mubr.bf16.mxu0 %v996_v7 }
  0x27   :  { %794 = vmatprep.mubr.bf16.mxu1 %v998_v11 }
  0x28   :  { %1131 = vmatpush3.bf16.msra.mxu0 %v1274_v44 }
  0x29   :  { %1153 = vmatpush3.bf16.msra.mxu1 %v1275_v45  ;;  %1132 = vmatprep.subr.bf16.mxu0 %v1276_v46 }
  0x2a   :  { %1154 = vmatprep.subr.bf16.mxu1 %v1277_v47 }
  0x2c   :  { %1133 = vmatpush3.bf16.msra.mxu0 %v1278_v48 }
  0x2d   :  { %1155 = vmatpush3.bf16.msra.mxu1 %v1279_v49  ;;  %1134 = vmatprep.subr.bf16.mxu0 %v1280_v50 }
  0x2e   :  { %1156 = vmatprep.subr.bf16.mxu1 %v1281_v51 }
  0x30   :  { %1135 = vmatpush3.bf16.msra.mxu0 %v1282_v52  ;;  %v1082_v52 = vld [vmem:[%s1651_s5] ss:$0 sm:$0xff] }
  0x31   :  { %1157 = vmatpush3.bf16.msra.mxu1 %v1283_v53  ;;  %1136 = vmatprep.subr.bf16.mxu0 %v1284_v54 }
  0x32   :  { %1158 = vmatprep.subr.bf16.mxu1 %v1285_v55  ;;  %v1072_v55 = vld [vmem:[%s1652_s2] ss:$0 sm:$0xff] }
  0x34   :  { %1137 = vmatpush3.bf16.msra.mxu0 %v1286_v56 }
  0x35   :  { %1159 = vmatpush3.bf16.msra.mxu1 %v1287_v57  ;;  %1138 = vmatprep.subr.bf16.mxu0 %v1288_v58  ;;  %v1083_v57 = vld [vmem:[%s1653_s6] ss:$0 sm:$0xff] }
  0x36   :  { %1160 = vmatprep.subr.bf16.mxu1 %v1289_v59 }
  0x38   :  { %1139 = vmatpush3.bf16.msra.mxu0 %v1290_v60  ;;  %v1073_v60 = vld [vmem:[%s1654_s3] ss:$0 sm:$0xff] }
  0x39   :  { %1161 = vmatpush3.bf16.msra.mxu1 %v1291_v61  ;;  %1140 = vmatprep.subr.bf16.mxu0 %v1292_v62 }
  0x3a   :  { %1162 = vmatprep.subr.bf16.mxu1 %v1293_v63 }
  0x3c   :  { %1141 = vmatpush3.bf16.msra.mxu0 %v1294_v0 }
  0x3d   :  { %1163 = vmatpush3.bf16.msra.mxu1 %v1295_v1  ;;  %1142 = vmatprep.subr.bf16.mxu0 %v1296_v2 }
  0x3e   :  { %1164 = vmatprep.subr.bf16.mxu1 %v1297_v3 }
  0x40   :  { %1143 = vmatpush3.bf16.msra.mxu0 %v1298_v4 }
  0x41   :  { %1165 = vmatpush3.bf16.msra.mxu1 %v1299_v5  ;;  %1190 = vmatprep.subr.bf16.mxu0 %v1321_v13 }
  0x42   :  { %1210 = vmatprep.subr.bf16.mxu1 %v1321_v13 }
  0x43   :  { %755 = vmatmul.mubr.bf16.vlgmr.msra.gmra.mxu0 %v995_v9 }
  0x44   :  { %795 = vmatmul.mubr.bf16.vlgmr.msra.gmra.mxu1 %v997_v10  ;;  %1191 = vmatpush3.bf16.msra.mxu0 %v1304_v12 }
  0x45   :  { %1211 = vmatpush3.bf16.msra.mxu1 %v1305_v14  ;;  %1192 = vmatprep.subr.bf16.mxu0 %v1321_v13 }
  0x46   :  { %1212 = vmatprep.subr.bf16.mxu1 %v1321_v13  ;;  %1206 = vmatprep.mubr.msk.bf16.mxu0 %vm1322_vm0, %v1321_v13 }
  0x47   :  { %1226 = vmatprep.mubr.msk.bf16.mxu1 %vm1322_vm0, %v1321_v13 }
  0x48   :  { %1193 = vmatpush3.bf16.msra.mxu0 %v1306_v15 }
  0x49   :  { %1213 = vmatpush3.bf16.msra.mxu1 %v1307_v16  ;;  %1194 = vmatprep.subr.bf16.mxu0 %v1321_v13 }
  0x4a   :  { %1214 = vmatprep.subr.bf16.mxu1 %v1321_v13 }
  0x4c   :  { %1195 = vmatpush3.bf16.msra.mxu0 %v1308_v17 }
  0x4d   :  { %1215 = vmatpush3.bf16.msra.mxu1 %v1309_v18  ;;  %1196 = vmatprep.subr.bf16.mxu0 %v1321_v13 }
  0x4e   :  { %1216 = vmatprep.subr.bf16.mxu1 %v1321_v13 }
  0x50   :  { %1197 = vmatpush3.bf16.msra.mxu0 %v1310_v19 }
  0x51   :  { %1217 = vmatpush3.bf16.msra.mxu1 %v1311_v20  ;;  %1198 = vmatprep.subr.bf16.mxu0 %v1321_v13 }
  0x52   :  { %1218 = vmatprep.subr.bf16.mxu1 %v1321_v13 }
  0x54   :  { %1199 = vmatpush3.bf16.msra.mxu0 %v1312_v21 }
  0x55   :  { %1219 = vmatpush3.bf16.msra.mxu1 %v1313_v22  ;;  %1200 = vmatprep.subr.bf16.mxu0 %v1321_v13 }
  0x56   :  { %1220 = vmatprep.subr.bf16.mxu1 %v1321_v13 }
  0x58   :  { %1201 = vmatpush3.bf16.msra.mxu0 %v1314_v23 }
  0x59   :  { %1221 = vmatpush3.bf16.msra.mxu1 %v1315_v24  ;;  %1202 = vmatprep.subr.bf16.mxu0 %v1321_v13 }
  0x5a   :  { %1222 = vmatprep.subr.bf16.mxu1 %v1321_v13 }
  0x5c   :  { %1203 = vmatpush3.bf16.msra.mxu0 %v1316_v25 }
  0x5d   :  { %1223 = vmatpush3.bf16.msra.mxu1 %v1317_v26  ;;  %1204 = vmatprep.subr.bf16.mxu0 %v1321_v13 }
  0x5e   :  { %1224 = vmatprep.subr.bf16.mxu1 %v1321_v13 }
  0x60   :  { %1205 = vmatpush3.bf16.msra.mxu0 %v1318_v27 }
  0x61   :  { %1225 = vmatpush3.bf16.msra.mxu1 %v1319_v28 }
  0x63   :  { %1207 = vmatmul.mubr.bf16.vlgmr.msra.gmra.mxu0 %v1320_v29 }
  0x64   :  { %1227 = vmatmul.mubr.bf16.vlgmr.msra.gmra.mxu1 %v1569_v6 }
  0xe3   :  { %v1100_v30 = vpop.f32.mrf.mxu0 }
  0xe4   :  { %v1122_v31 = vpop.f32.mrf.mxu1 }
  0xe5   :  { %v1101_v32 = vpop.f32.mrf.mxu0 }
  0xe6   :  { %v1123_v33 = vpop.f32.mrf.mxu1  ;;  %v1102_v46 = vadd.f32 %v1101_v32, %v1100_v30 }
  0xe7   :  { %v1103_v34 = vpop.f32.mrf.mxu0  ;;  %v1124_v47 = vadd.f32 %v1123_v33, %v1122_v31 }
  0xe8   :  { %v1125_v35 = vpop.f32.mrf.mxu1 }
  0xe9   :  { %v1104_v36 = vpop.f32.mrf.mxu0  ;;  %v717_v49 = vadd.f32 %v1124_v47, %v1102_v46 }
  0xea   :  { %v1126_v37 = vpop.f32.mrf.mxu1 }
 0x103   :  { %v1144_v38 = vpop.f32.mrf.mxu0 }
 0x104   :  { %v1166_v39 = vpop.f32.mrf.mxu1 }
 0x105   :  { %v1145_v40 = vpop.f32.mrf.mxu0 }
 0x106   :  { %v1167_v41 = vpop.f32.mrf.mxu1  ;;  %v1146_v48 = vadd.f32 %v1145_v40, %v1144_v38 }
 0x107   :  { %v1147_v42 = vpop.f32.mrf.mxu0  ;;  %v1168_v51 = vadd.f32 %v1167_v41, %v1166_v39 }
 0x108   :  { %v1169_v43 = vpop.f32.mrf.mxu1  ;;  %v757_v50 = vadd.f32 %v1146_v48, %v717_v49 }
 0x109   :  { %v1148_v44 = vpop.f32.mrf.mxu0 }
 0x10a   :  { %v1170_v45 = vpop.f32.mrf.mxu1  ;;  %v797_v53 = vadd.f32 %v1168_v51, %v757_v50 }
 0x123   :  { %v836_v54 = vpop.f32.mrf.mxu0 }
 0x124   :  { %v959_v56 = vpop.f32.mrf.mxu1  ;;  %v837_v58 = vadd.f32 %v836_v54, %v797_v53 }
 0x125   :  { %v972_v59 = vmul.f32 %v1082_v52, %v959_v56  ;;  %v1208_v61 = vpop.f32.mrf.mxu0 }
 0x126   :  { %v1228_v62 = vpop.f32.mrf.mxu1  ;;  %v849_v63 = vmul.f32 %v1072_v55, %v837_v58 }
 0x127   :  { %v980_v0 = vadd.f32 %v1083_v57, %v972_v59  ;;  %v839_v1 = vpop.f32.mrf.mxu0 }
 0x128   :  { %v962_v2 = vpop.f32.mrf.mxu1  ;;  %v857_v3 = vadd.f32 %v1073_v60, %v849_v63 }
 0x129   :  { %v981_v4 = vpack.c.bf16 %v980_v0, %v980_v0  ;;  %v1209_v5 = vpop.f32.mrf.mxu0 }
 0x12a   :  { %v1229_v6 = vpop.f32.mrf.mxu1  ;;  %v858_v7 = vmax.f32 %v857_v3, 0.0 }
 0x12b   :  { %982 = vst [vmem:[%s1655_s8] sm:$0xf] %v981_v4 }
 0x12c   :  { %v859_v8 = vpack.c.bf16 %v858_v7, %v858_v7 }
 0x12e   :  { %860 = vst [vmem:[%s1656_s7] sm:$0xf] %v859_v8 }

// kernel: byol_forward.33
= control target key start
LH: loop header
LB: loop body
LE: loop exit
PB: predicated region body
PF: predicated region fallthrough
CT: control target
= control target key end

     0   :  { %vm1138_vm0 = vmmov 0   ;;  %s1404_s1 = inlined_call_operand.vmem [shape: bf16[1152,128], index: 1, kind: input, shape index: {}]   ;;  %s1405_s0 = inlined_call_operand.vmem [shape: bf16[8,1152], index: 0, kind: input, shape index: {}]   ;;  %s1406_s2 = inlined_call_operand.vmem [shape: f32[1,128], index: 2, kind: input, shape index: {}]   ;;  %s1407_s3 = inlined_call_operand.vmem [shape: f32[1,128], index: 3, kind: input, shape index: {}]   ;;  %s1408_s4 = inlined_call_operand.vmem [shape: bf16[8,128], index: 4, kind: output, shape index: {}]  }
   0x1   :  { %v1056_v0 = vld [vmem:[%s1404_s1 + $0x78] sm:$0xff]   ;;  %v1060_v4 = vld [vmem:[%s1404_s1 + $0x70] sm:$0xff]   ;;  %v1064_v8 = vld [vmem:[%s1404_s1 + $0x68] sm:$0xff]  }
   0x2   :  { %v1057_v1 = vld [vmem:[%s1404_s1 + $0xf8] sm:$0xff]   ;;  %937 = vmatprep.subr.bf16.mxu0 %v1056_v0  ;;  %v1061_v5 = vld [vmem:[%s1404_s1 + $0xf0] sm:$0xff]   ;;  %v1065_v9 = vld [vmem:[%s1404_s1 + $0xe8] sm:$0xff]  }
   0x3   :  { %v1058_v2 = vld [vmem:[%s1404_s1 + $0x38] sm:$0xff]   ;;  %959 = vmatprep.subr.bf16.mxu1 %v1057_v1  ;;  %v1062_v6 = vld [vmem:[%s1404_s1 + $0x30] sm:$0xff]   ;;  %v1066_v10 = vld [vmem:[%s1404_s1 + $0x28] sm:$0xff]  }
   0x4   :  { %v1059_v3 = vld [vmem:[%s1404_s1 + $0xb8] sm:$0xff]   ;;  %938 = vmatpush3.bf16.msra.mxu0 %v1058_v2  ;;  %v1063_v7 = vld [vmem:[%s1404_s1 + $0xb0] sm:$0xff]   ;;  %v1067_v11 = vld [vmem:[%s1404_s1 + $0xa8] sm:$0xff]  }
   0x5   :  { %960 = vmatpush3.bf16.msra.mxu1 %v1059_v3  ;;  %939 = vmatprep.subr.bf16.mxu0 %v1060_v4  ;;  %v1068_v12 = vld [vmem:[%s1404_s1 + $0x60] sm:$0xff]   ;;  %v1072_v16 = vld [vmem:[%s1404_s1 + $0x58] sm:$0xff]   ;;  %v1076_v20 = vld [vmem:[%s1404_s1 + $0x50] sm:$0xff]  }
   0x6   :  { %961 = vmatprep.subr.bf16.mxu1 %v1061_v5  ;;  %v1069_v13 = vld [vmem:[%s1404_s1 + $0xe0] sm:$0xff]   ;;  %v1073_v17 = vld [vmem:[%s1404_s1 + $0xd8] sm:$0xff]   ;;  %v1077_v21 = vld [vmem:[%s1404_s1 + $0xd0] sm:$0xff]  }
   0x7   :  { %v1070_v14 = vld [vmem:[%s1404_s1 + $0x20] sm:$0xff]   ;;  %v1074_v18 = vld [vmem:[%s1404_s1 + $0x18] sm:$0xff]   ;;  %v1078_v22 = vld [vmem:[%s1404_s1 + $0x10] sm:$0xff]  }
   0x8   :  { %940 = vmatpush3.bf16.msra.mxu0 %v1062_v6  ;;  %v1071_v15 = vld [vmem:[%s1404_s1 + $0xa0] sm:$0xff]   ;;  %v1075_v19 = vld [vmem:[%s1404_s1 + $0x98] sm:$0xff]   ;;  %v1079_v23 = vld [vmem:[%s1404_s1 + $0x90] sm:$0xff]  }
   0x9   :  { %962 = vmatpush3.bf16.msra.mxu1 %v1063_v7  ;;  %941 = vmatprep.subr.bf16.mxu0 %v1064_v8  ;;  %v1080_v24 = vld [vmem:[%s1404_s1 + $0x48] sm:$0xff]   ;;  %v1084_v28 = vld [vmem:[%s1404_s1 + $0x40] sm:$0xff]   ;;  %v1092_v38 = vld [vmem:[%s1404_s1 + $0x178] sm:$0xff]  }
   0xa   :  { %963 = vmatprep.subr.bf16.mxu1 %v1065_v9  ;;  %v1081_v25 = vld [vmem:[%s1404_s1 + $0xc8] sm:$0xff]   ;;  %v1085_v29 = vld [vmem:[%s1404_s1 + $0xc0] sm:$0xff]   ;;  %v1093_v39 = vld [vmem:[%s1404_s1 + $0x138] sm:$0xff]  }
   0xb   :  { %v1082_v26 = vld [vmem:[%s1404_s1 + $0x8] sm:$0xff]   ;;  %v1086_v30 = vld [vmem:[%s1404_s1] sm:$0xff]   ;;  %v1094_v40 = vld [vmem:[%s1404_s1 + $0x1f8] sm:$0xff]  }
   0xc   :  { %942 = vmatpush3.bf16.msra.mxu0 %v1066_v10  ;;  %v1083_v27 = vld [vmem:[%s1404_s1 + $0x88] sm:$0xff]   ;;  %v1087_v31 = vld [vmem:[%s1404_s1 + $0x80] sm:$0xff]   ;;  %v1095_v41 = vld [vmem:[%s1404_s1 + $0x1b8] sm:$0xff]  }
   0xd   :  { %964 = vmatpush3.bf16.msra.mxu1 %v1067_v11  ;;  %943 = vmatprep.subr.bf16.mxu0 %v1068_v12  ;;  %v18_v32 = vld [vmem:[%s1405_s0] sm:$0xff]  ;;  %v19_v33 = vld [vmem:[%s1405_s0 + $0x8] sm:$0xff]  ;;  %v1096_v42 = vld [vmem:[%s1404_s1 + $0x170] sm:$0xff]  }
   0xe   :  { %965 = vmatprep.subr.bf16.mxu1 %v1069_v13  ;;  %v854_v34 = vcombine.low %v18_v32, %v18_v32  ;;  %v855_v35 = vcombine.high %v18_v32, %v18_v32  ;;  %v856_v36 = vcombine.low %v19_v33, %v19_v33  ;;  %v857_v37 = vcombine.high %v19_v33, %v19_v33  ;;  %v1097_v43 = vld [vmem:[%s1404_s1 + $0x130] sm:$0xff]   ;;  %v1100_v46 = vld [vmem:[%s1404_s1 + $0x168] sm:$0xff]   ;;  %v1104_v50 = vld [vmem:[%s1404_s1 + $0x160] sm:$0xff]  }
   0xf   :  { %v1098_v44 = vld [vmem:[%s1404_s1 + $0x1f0] sm:$0xff]   ;;  %v1101_v47 = vld [vmem:[%s1404_s1 + $0x128] sm:$0xff]   ;;  %v1105_v51 = vld [vmem:[%s1404_s1 + $0x120] sm:$0xff]   ;;  %v1137_v13 = vmov 0.0  }
  0x10   :  { %944 = vmatpush3.bf16.msra.mxu0 %v1070_v14  ;;  %663 = vmatprep.mubr.bf16.mxu0 %v855_v35  ;;  %v1099_v45 = vld [vmem:[%s1404_s1 + $0x1b0] sm:$0xff]   ;;  %v1102_v48 = vld [vmem:[%s1404_s1 + $0x1e8] sm:$0xff]   ;;  %v1106_v52 = vld [vmem:[%s1404_s1 + $0x1e0] sm:$0xff]  }
  0x11   :  { %966 = vmatpush3.bf16.msra.mxu1 %v1071_v15  ;;  %945 = vmatprep.subr.bf16.mxu0 %v1072_v16  ;;  %v1103_v49 = vld [vmem:[%s1404_s1 + $0x1a8] sm:$0xff]   ;;  %v1107_v53 = vld [vmem:[%s1404_s1 + $0x1a0] sm:$0xff]   ;;  %v1108_v54 = vld [vmem:[%s1404_s1 + $0x158] sm:$0xff]  }
  0x12   :  { %967 = vmatprep.subr.bf16.mxu1 %v1073_v17  ;;  %703 = vmatprep.mubr.bf16.mxu1 %v857_v37  ;;  %v1109_v55 = vld [vmem:[%s1404_s1 + $0x118] sm:$0xff]   ;;  %v1112_v58 = vld [vmem:[%s1404_s1 + $0x150] sm:$0xff]   ;;  %v1116_v62 = vld [vmem:[%s1404_s1 + $0x148] sm:$0xff]  }
  0x13   :  { %v1110_v56 = vld [vmem:[%s1404_s1 + $0x1d8] sm:$0xff]   ;;  %v1113_v59 = vld [vmem:[%s1404_s1 + $0x110] sm:$0xff]   ;;  %v1117_v63 = vld [vmem:[%s1404_s1 + $0x108] sm:$0xff]  }
  0x14   :  { %946 = vmatpush3.bf16.msra.mxu0 %v1074_v18  ;;  %v1111_v57 = vld [vmem:[%s1404_s1 + $0x198] sm:$0xff]   ;;  %v1114_v60 = vld [vmem:[%s1404_s1 + $0x1d0] sm:$0xff]   ;;  %v1118_v0 = vld [vmem:[%s1404_s1 + $0x1c8] sm:$0xff]  }
  0x15   :  { %968 = vmatpush3.bf16.msra.mxu1 %v1075_v19  ;;  %947 = vmatprep.subr.bf16.mxu0 %v1076_v20  ;;  %v1115_v61 = vld [vmem:[%s1404_s1 + $0x190] sm:$0xff]   ;;  %v1119_v1 = vld [vmem:[%s1404_s1 + $0x188] sm:$0xff]   ;;  %v1120_v2 = vld [vmem:[%s1404_s1 + $0x140] sm:$0xff]  }
  0x16   :  { %969 = vmatprep.subr.bf16.mxu1 %v1077_v21  ;;  %v1121_v3 = vld [vmem:[%s1404_s1 + $0x100] sm:$0xff]   ;;  %v20_v5 = vld [vmem:[%s1405_s0 + $0x10] sm:$0xff]  ;;  %v21_v9 = vld [vmem:[%s1405_s0 + $0x18] sm:$0xff] }
  0x17   :  { %v1122_v4 = vld [vmem:[%s1404_s1 + $0x1c0] sm:$0xff]   ;;  %v859_v6 = vcombine.high %v20_v5, %v20_v5  ;;  %v858_v8 = vcombine.low %v20_v5, %v20_v5  ;;  %v860_v10 = vcombine.low %v21_v9, %v21_v9  ;;  %v861_v11 = vcombine.high %v21_v9, %v21_v9  ;;  %v1128_v12 = vld [vmem:[%s1404_s1 + $0x238] sm:$0xff]   ;;  %v1129_v14 = vld [vmem:[%s1404_s1 + $0x230] sm:$0xff]  }
  0x18   :  { %948 = vmatpush3.bf16.msra.mxu0 %v1078_v22  ;;  %v1125_v7 = vld [vmem:[%s1404_s1 + $0x180] sm:$0xff]   ;;  %v1130_v15 = vld [vmem:[%s1404_s1 + $0x228] sm:$0xff]   ;;  %v1132_v17 = vld [vmem:[%s1404_s1 + $0x218] sm:$0xff]  }
  0x19   :  { %970 = vmatpush3.bf16.msra.mxu1 %v1079_v23  ;;  %949 = vmatprep.subr.bf16.mxu0 %v1080_v24  ;;  %v1131_v16 = vld [vmem:[%s1404_s1 + $0x220] sm:$0xff]   ;;  %v1133_v18 = vld [vmem:[%s1404_s1 + $0x210] sm:$0xff]   ;;  %v1134_v19 = vld [vmem:[%s1404_s1 + $0x208] sm:$0xff]  }
  0x1a   :  { %971 = vmatprep.subr.bf16.mxu1 %v1081_v25  ;;  %v1135_v20 = vld [vmem:[%s1404_s1 + $0x200] sm:$0xff]  }
  0x1b   :  { %v1136_v21 = vld [vmem:[%s1405_s0 + $0x20] ss:$0 sps:$4 sm:$0xff]  }
  0x1c   :  { %950 = vmatpush3.bf16.msra.mxu0 %v1082_v26 }
  0x1d   :  { %972 = vmatpush3.bf16.msra.mxu1 %v1083_v27  ;;  %951 = vmatprep.subr.bf16.mxu0 %v1084_v28 }
  0x1e   :  { %973 = vmatprep.subr.bf16.mxu1 %v1085_v29 }
  0x20   :  { %952 = vmatpush3.bf16.msra.mxu0 %v1086_v30 }
  0x21   :  { %974 = vmatpush3.bf16.msra.mxu1 %v1087_v31  ;;  %981 = vmatprep.subr.bf16.mxu0 %v1092_v38 }
  0x22   :  { %1003 = vmatprep.subr.bf16.mxu1 %v1094_v40 }
  0x23   :  { %664 = vmatmul.mubr.bf16.vlgmr.msra.gmra.mxu0 %v854_v34 }
  0x24   :  { %704 = vmatmul.mubr.bf16.vlgmr.msra.gmra.mxu1 %v856_v36  ;;  %982 = vmatpush3.bf16.msra.mxu0 %v1093_v39 }
  0x25   :  { %1004 = vmatpush3.bf16.msra.mxu1 %v1095_v41  ;;  %983 = vmatprep.subr.bf16.mxu0 %v1096_v42 }
  0x26   :  { %1005 = vmatprep.subr.bf16.mxu1 %v1098_v44  ;;  %743 = vmatprep.mubr.bf16.mxu0 %v859_v6 }
  0x27   :  { %783 = vmatprep.mubr.bf16.mxu1 %v861_v11 }
  0x28   :  { %984 = vmatpush3.bf16.msra.mxu0 %v1097_v43 }
  0x29   :  { %1006 = vmatpush3.bf16.msra.mxu1 %v1099_v45  ;;  %985 = vmatprep.subr.bf16.mxu0 %v1100_v46  ;;  %v935_v46 = vld [vmem:[%s1406_s2] ss:$0 sm:$0xff] }
  0x2a   :  { %1007 = vmatprep.subr.bf16.mxu1 %v1102_v48  ;;  %v936_v48 = vld [vmem:[%s1407_s3] ss:$0 sm:$0xff] }
  0x2c   :  { %986 = vmatpush3.bf16.msra.mxu0 %v1101_v47 }
  0x2d   :  { %1008 = vmatpush3.bf16.msra.mxu1 %v1103_v49  ;;  %987 = vmatprep.subr.bf16.mxu0 %v1104_v50 }
  0x2e   :  { %1009 = vmatprep.subr.bf16.mxu1 %v1106_v52 }
  0x30   :  { %988 = vmatpush3.bf16.msra.mxu0 %v1105_v51 }
  0x31   :  { %1010 = vmatpush3.bf16.msra.mxu1 %v1107_v53  ;;  %989 = vmatprep.subr.bf16.mxu0 %v1108_v54 }
  0x32   :  { %1011 = vmatprep.subr.bf16.mxu1 %v1110_v56 }
  0x34   :  { %990 = vmatpush3.bf16.msra.mxu0 %v1109_v55 }
  0x35   :  { %1012 = vmatpush3.bf16.msra.mxu1 %v1111_v57  ;;  %991 = vmatprep.subr.bf16.mxu0 %v1112_v58 }
  0x36   :  { %1013 = vmatprep.subr.bf16.mxu1 %v1114_v60 }
  0x38   :  { %992 = vmatpush3.bf16.msra.mxu0 %v1113_v59 }
  0x39   :  { %1014 = vmatpush3.bf16.msra.mxu1 %v1115_v61  ;;  %993 = vmatprep.subr.bf16.mxu0 %v1116_v62 }
  0x3a   :  { %1015 = vmatprep.subr.bf16.mxu1 %v1118_v0 }
  0x3c   :  { %994 = vmatpush3.bf16.msra.mxu0 %v1117_v63 }
  0x3d   :  { %1016 = vmatpush3.bf16.msra.mxu1 %v1119_v1  ;;  %995 = vmatprep.subr.bf16.mxu0 %v1120_v2 }
  0x3e   :  { %1017 = vmatprep.subr.bf16.mxu1 %v1122_v4 }
  0x40   :  { %996 = vmatpush3.bf16.msra.mxu0 %v1121_v3 }
  0x41   :  { %1018 = vmatpush3.bf16.msra.mxu1 %v1125_v7  ;;  %1034 = vmatprep.subr.bf16.mxu0 %v1137_v13 }
  0x43   :  { %744 = vmatmul.mubr.bf16.vlgmr.msra.gmra.mxu0 %v858_v8 }
  0x44   :  { %1035 = vmatpush3.bf16.msra.mxu0 %v1128_v12  ;;  %784 = vmatmul.mubr.bf16.vlgmr.msra.gmra.mxu1 %v860_v10 }
  0x45   :  { %1036 = vmatprep.subr.bf16.mxu0 %v1137_v13  ;;  %1050 = vmatprep.mubr.msk.bf16.mxu0 %vm1138_vm0, %v1137_v13 }
  0x48   :  { %1037 = vmatpush3.bf16.msra.mxu0 %v1129_v14 }
  0x49   :  { %1038 = vmatprep.subr.bf16.mxu0 %v1137_v13 }
  0x4c   :  { %1039 = vmatpush3.bf16.msra.mxu0 %v1130_v15 }
  0x4d   :  { %1040 = vmatprep.subr.bf16.mxu0 %v1137_v13 }
  0x50   :  { %1041 = vmatpush3.bf16.msra.mxu0 %v1131_v16 }
  0x51   :  { %1042 = vmatprep.subr.bf16.mxu0 %v1137_v13 }
  0x54   :  { %1043 = vmatpush3.bf16.msra.mxu0 %v1132_v17 }
  0x55   :  { %1044 = vmatprep.subr.bf16.mxu0 %v1137_v13 }
  0x58   :  { %1045 = vmatpush3.bf16.msra.mxu0 %v1133_v18 }
  0x59   :  { %1046 = vmatprep.subr.bf16.mxu0 %v1137_v13 }
  0x5c   :  { %1047 = vmatpush3.bf16.msra.mxu0 %v1134_v19 }
  0x5d   :  { %1048 = vmatprep.subr.bf16.mxu0 %v1137_v13 }
  0x60   :  { %1049 = vmatpush3.bf16.msra.mxu0 %v1135_v20 }
  0x63   :  { %1051 = vmatmul.mubr.bf16.vlgmr.msra.gmra.mxu0 %v1136_v21 }
  0xe3   :  { %v953_v22 = vpop.f32.mrf.mxu0 }
  0xe4   :  { %v975_v23 = vpop.f32.mrf.mxu1 }
  0xe5   :  { %v954_v24 = vpop.f32.mrf.mxu0 }
  0xe6   :  { %v976_v25 = vpop.f32.mrf.mxu1  ;;  %v955_v38 = vadd.f32 %v954_v24, %v953_v22 }
  0xe7   :  { %v956_v26 = vpop.f32.mrf.mxu0  ;;  %v977_v39 = vadd.f32 %v976_v25, %v975_v23 }
  0xe8   :  { %v978_v27 = vpop.f32.mrf.mxu1 }
  0xe9   :  { %v957_v28 = vpop.f32.mrf.mxu0  ;;  %v706_v41 = vadd.f32 %v977_v39, %v955_v38 }
  0xea   :  { %v979_v29 = vpop.f32.mrf.mxu1 }
 0x103   :  { %v997_v30 = vpop.f32.mrf.mxu0 }
 0x104   :  { %v1019_v31 = vpop.f32.mrf.mxu1 }
 0x105   :  { %v998_v32 = vpop.f32.mrf.mxu0 }
 0x106   :  { %v1020_v33 = vpop.f32.mrf.mxu1  ;;  %v999_v40 = vadd.f32 %v998_v32, %v997_v30 }
 0x107   :  { %v1000_v34 = vpop.f32.mrf.mxu0  ;;  %v1021_v43 = vadd.f32 %v1020_v33, %v1019_v31 }
 0x108   :  { %v1022_v35 = vpop.f32.mrf.mxu1  ;;  %v746_v42 = vadd.f32 %v999_v40, %v706_v41 }
 0x109   :  { %v1001_v36 = vpop.f32.mrf.mxu0 }
 0x10a   :  { %v1023_v37 = vpop.f32.mrf.mxu1  ;;  %v786_v44 = vadd.f32 %v1021_v43, %v746_v42 }
 0x123   :  { %v825_v45 = vpop.f32.mrf.mxu0 }
 0x124   :  { %v826_v47 = vadd.f32 %v825_v45, %v786_v44 }
 0x125   :  { %v1052_v49 = vpop.f32.mrf.mxu0 }
 0x126   :  { %v838_v50 = vmul.f32 %v935_v46, %v826_v47 }
 0x127   :  { %v828_v51 = vpop.f32.mrf.mxu0 }
 0x128   :  { %v846_v52 = vadd.f32 %v936_v48, %v838_v50 }
 0x129   :  { %v1053_v53 = vpop.f32.mrf.mxu0 }
 0x12a   :  { %v847_v54 = vmax.f32 %v846_v52, 0.0 }
 0x12c   :  { %v848_v55 = vpack.c.bf16 %v847_v54, %v847_v54 }
 0x12e   :  { %849 = vst [vmem:[%s1408_s4] sm:$0xf] %v848_v55 }

// kernel: byol_forward.32
= control target key start
LH: loop header
LB: loop body
LE: loop exit
PB: predicated region body
PF: predicated region fallthrough
CT: control target
= control target key end

     0   :  { %vm1144_vm0 = vmmov 0   ;;  %s1418_s1 = inlined_call_operand.vmem [shape: bf16[1152,128], index: 1, kind: input, shape index: {}]   ;;  %s1419_s0 = inlined_call_operand.vmem [shape: bf16[8,1152], index: 0, kind: input, shape index: {}]   ;;  %s1420_s2 = inlined_call_operand.vmem [shape: f32[1,128], index: 2, kind: input, shape index: {}]   ;;  %s1421_s4 = inlined_call_operand.vmem [shape: bf16[8,128], index: 4, kind: input, shape index: {}]   ;;  %s1422_s3 = inlined_call_operand.vmem [shape: f32[1,128], index: 3, kind: input, shape index: {}]   ;;  %s1423_s5 = inlined_call_operand.vmem [shape: bf16[8,128], index: 5, kind: output, shape index: {}]  }
   0x1   :  { %v1062_v0 = vld [vmem:[%s1418_s1 + $0x78] sm:$0xff]   ;;  %v1066_v4 = vld [vmem:[%s1418_s1 + $0x70] sm:$0xff]   ;;  %v1070_v8 = vld [vmem:[%s1418_s1 + $0x68] sm:$0xff]  }
   0x2   :  { %v1063_v1 = vld [vmem:[%s1418_s1 + $0xf8] sm:$0xff]   ;;  %943 = vmatprep.subr.bf16.mxu0 %v1062_v0  ;;  %v1067_v5 = vld [vmem:[%s1418_s1 + $0xf0] sm:$0xff]   ;;  %v1071_v9 = vld [vmem:[%s1418_s1 + $0xe8] sm:$0xff]  }
   0x3   :  { %v1064_v2 = vld [vmem:[%s1418_s1 + $0x38] sm:$0xff]   ;;  %965 = vmatprep.subr.bf16.mxu1 %v1063_v1  ;;  %v1068_v6 = vld [vmem:[%s1418_s1 + $0x30] sm:$0xff]   ;;  %v1072_v10 = vld [vmem:[%s1418_s1 + $0x28] sm:$0xff]  }
   0x4   :  { %v1065_v3 = vld [vmem:[%s1418_s1 + $0xb8] sm:$0xff]   ;;  %944 = vmatpush3.bf16.msra.mxu0 %v1064_v2  ;;  %v1069_v7 = vld [vmem:[%s1418_s1 + $0xb0] sm:$0xff]   ;;  %v1073_v11 = vld [vmem:[%s1418_s1 + $0xa8] sm:$0xff]  }
   0x5   :  { %966 = vmatpush3.bf16.msra.mxu1 %v1065_v3  ;;  %945 = vmatprep.subr.bf16.mxu0 %v1066_v4  ;;  %v1074_v12 = vld [vmem:[%s1418_s1 + $0x60] sm:$0xff]   ;;  %v1078_v16 = vld [vmem:[%s1418_s1 + $0x58] sm:$0xff]   ;;  %v1082_v20 = vld [vmem:[%s1418_s1 + $0x50] sm:$0xff]  }
   0x6   :  { %967 = vmatprep.subr.bf16.mxu1 %v1067_v5  ;;  %v1075_v13 = vld [vmem:[%s1418_s1 + $0xe0] sm:$0xff]   ;;  %v1079_v17 = vld [vmem:[%s1418_s1 + $0xd8] sm:$0xff]   ;;  %v1083_v21 = vld [vmem:[%s1418_s1 + $0xd0] sm:$0xff]  }
   0x7   :  { %v1076_v14 = vld [vmem:[%s1418_s1 + $0x20] sm:$0xff]   ;;  %v1080_v18 = vld [vmem:[%s1418_s1 + $0x18] sm:$0xff]   ;;  %v1084_v22 = vld [vmem:[%s1418_s1 + $0x10] sm:$0xff]  }
   0x8   :  { %946 = vmatpush3.bf16.msra.mxu0 %v1068_v6  ;;  %v1077_v15 = vld [vmem:[%s1418_s1 + $0xa0] sm:$0xff]   ;;  %v1081_v19 = vld [vmem:[%s1418_s1 + $0x98] sm:$0xff]   ;;  %v1085_v23 = vld [vmem:[%s1418_s1 + $0x90] sm:$0xff]  }
   0x9   :  { %968 = vmatpush3.bf16.msra.mxu1 %v1069_v7  ;;  %947 = vmatprep.subr.bf16.mxu0 %v1070_v8  ;;  %v1086_v24 = vld [vmem:[%s1418_s1 + $0x48] sm:$0xff]   ;;  %v1090_v28 = vld [vmem:[%s1418_s1 + $0x40] sm:$0xff]   ;;  %v1098_v38 = vld [vmem:[%s1418_s1 + $0x178] sm:$0xff]  }
   0xa   :  { %969 = vmatprep.subr.bf16.mxu1 %v1071_v9  ;;  %v1087_v25 = vld [vmem:[%s1418_s1 + $0xc8] sm:$0xff]   ;;  %v1091_v29 = vld [vmem:[%s1418_s1 + $0xc0] sm:$0xff]   ;;  %v1099_v39 = vld [vmem:[%s1418_s1 + $0x138] sm:$0xff]  }
   0xb   :  { %v1088_v26 = vld [vmem:[%s1418_s1 + $0x8] sm:$0xff]   ;;  %v1092_v30 = vld [vmem:[%s1418_s1] sm:$0xff]   ;;  %v1100_v40 = vld [vmem:[%s1418_s1 + $0x1f8] sm:$0xff]  }
   0xc   :  { %948 = vmatpush3.bf16.msra.mxu0 %v1072_v10  ;;  %v1089_v27 = vld [vmem:[%s1418_s1 + $0x88] sm:$0xff]   ;;  %v1093_v31 = vld [vmem:[%s1418_s1 + $0x80] sm:$0xff]   ;;  %v1101_v41 = vld [vmem:[%s1418_s1 + $0x1b8] sm:$0xff]  }
   0xd   :  { %970 = vmatpush3.bf16.msra.mxu1 %v1073_v11  ;;  %949 = vmatprep.subr.bf16.mxu0 %v1074_v12  ;;  %v21_v32 = vld [vmem:[%s1419_s0] sm:$0xff]  ;;  %v22_v33 = vld [vmem:[%s1419_s0 + $0x8] sm:$0xff]  ;;  %v1102_v42 = vld [vmem:[%s1418_s1 + $0x170] sm:$0xff]  }
   0xe   :  { %971 = vmatprep.subr.bf16.mxu1 %v1075_v13  ;;  %v860_v34 = vcombine.low %v21_v32, %v21_v32  ;;  %v861_v35 = vcombine.high %v21_v32, %v21_v32  ;;  %v862_v36 = vcombine.low %v22_v33, %v22_v33  ;;  %v863_v37 = vcombine.high %v22_v33, %v22_v33  ;;  %v1103_v43 = vld [vmem:[%s1418_s1 + $0x130] sm:$0xff]   ;;  %v1106_v46 = vld [vmem:[%s1418_s1 + $0x168] sm:$0xff]   ;;  %v1110_v50 = vld [vmem:[%s1418_s1 + $0x160] sm:$0xff]  }
   0xf   :  { %v1104_v44 = vld [vmem:[%s1418_s1 + $0x1f0] sm:$0xff]   ;;  %v1107_v47 = vld [vmem:[%s1418_s1 + $0x128] sm:$0xff]   ;;  %v1111_v51 = vld [vmem:[%s1418_s1 + $0x120] sm:$0xff]   ;;  %v1143_v13 = vmov 0.0  }
  0x10   :  { %950 = vmatpush3.bf16.msra.mxu0 %v1076_v14  ;;  %666 = vmatprep.mubr.bf16.mxu0 %v861_v35  ;;  %v1105_v45 = vld [vmem:[%s1418_s1 + $0x1b0] sm:$0xff]   ;;  %v1108_v48 = vld [vmem:[%s1418_s1 + $0x1e8] sm:$0xff]   ;;  %v1112_v52 = vld [vmem:[%s1418_s1 + $0x1e0] sm:$0xff]  }
  0x11   :  { %972 = vmatpush3.bf16.msra.mxu1 %v1077_v15  ;;  %951 = vmatprep.subr.bf16.mxu0 %v1078_v16  ;;  %v1109_v49 = vld [vmem:[%s1418_s1 + $0x1a8] sm:$0xff]   ;;  %v1113_v53 = vld [vmem:[%s1418_s1 + $0x1a0] sm:$0xff]   ;;  %v1114_v54 = vld [vmem:[%s1418_s1 + $0x158] sm:$0xff]  }
  0x12   :  { %973 = vmatprep.subr.bf16.mxu1 %v1079_v17  ;;  %706 = vmatprep.mubr.bf16.mxu1 %v863_v37  ;;  %v1115_v55 = vld [vmem:[%s1418_s1 + $0x118] sm:$0xff]   ;;  %v1118_v58 = vld [vmem:[%s1418_s1 + $0x150] sm:$0xff]   ;;  %v1122_v62 = vld [vmem:[%s1418_s1 + $0x148] sm:$0xff]  }
  0x13   :  { %v1116_v56 = vld [vmem:[%s1418_s1 + $0x1d8] sm:$0xff]   ;;  %v1119_v59 = vld [vmem:[%s1418_s1 + $0x110] sm:$0xff]   ;;  %v1123_v63 = vld [vmem:[%s1418_s1 + $0x108] sm:$0xff]  }
  0x14   :  { %952 = vmatpush3.bf16.msra.mxu0 %v1080_v18  ;;  %v1117_v57 = vld [vmem:[%s1418_s1 + $0x198] sm:$0xff]   ;;  %v1120_v60 = vld [vmem:[%s1418_s1 + $0x1d0] sm:$0xff]   ;;  %v1124_v0 = vld [vmem:[%s1418_s1 + $0x1c8] sm:$0xff]  }
  0x15   :  { %974 = vmatpush3.bf16.msra.mxu1 %v1081_v19  ;;  %953 = vmatprep.subr.bf16.mxu0 %v1082_v20  ;;  %v1121_v61 = vld [vmem:[%s1418_s1 + $0x190] sm:$0xff]   ;;  %v1125_v1 = vld [vmem:[%s1418_s1 + $0x188] sm:$0xff]   ;;  %v1126_v2 = vld [vmem:[%s1418_s1 + $0x140] sm:$0xff]  }
  0x16   :  { %975 = vmatprep.subr.bf16.mxu1 %v1083_v21  ;;  %v1127_v3 = vld [vmem:[%s1418_s1 + $0x100] sm:$0xff]   ;;  %v23_v5 = vld [vmem:[%s1419_s0 + $0x10] sm:$0xff]  ;;  %v24_v9 = vld [vmem:[%s1419_s0 + $0x18] sm:$0xff] }
  0x17   :  { %v1128_v4 = vld [vmem:[%s1418_s1 + $0x1c0] sm:$0xff]   ;;  %v865_v6 = vcombine.high %v23_v5, %v23_v5  ;;  %v864_v8 = vcombine.low %v23_v5, %v23_v5  ;;  %v866_v10 = vcombine.low %v24_v9, %v24_v9  ;;  %v867_v11 = vcombine.high %v24_v9, %v24_v9  ;;  %v1134_v12 = vld [vmem:[%s1418_s1 + $0x238] sm:$0xff]   ;;  %v1135_v14 = vld [vmem:[%s1418_s1 + $0x230] sm:$0xff]  }
  0x18   :  { %954 = vmatpush3.bf16.msra.mxu0 %v1084_v22  ;;  %v1131_v7 = vld [vmem:[%s1418_s1 + $0x180] sm:$0xff]   ;;  %v1136_v15 = vld [vmem:[%s1418_s1 + $0x228] sm:$0xff]   ;;  %v1138_v17 = vld [vmem:[%s1418_s1 + $0x218] sm:$0xff]  }
  0x19   :  { %976 = vmatpush3.bf16.msra.mxu1 %v1085_v23  ;;  %955 = vmatprep.subr.bf16.mxu0 %v1086_v24  ;;  %v1137_v16 = vld [vmem:[%s1418_s1 + $0x220] sm:$0xff]   ;;  %v1139_v18 = vld [vmem:[%s1418_s1 + $0x210] sm:$0xff]   ;;  %v1140_v19 = vld [vmem:[%s1418_s1 + $0x208] sm:$0xff]  }
  0x1a   :  { %977 = vmatprep.subr.bf16.mxu1 %v1087_v25  ;;  %v1141_v20 = vld [vmem:[%s1418_s1 + $0x200] sm:$0xff]  }
  0x1b   :  { %v1142_v21 = vld [vmem:[%s1419_s0 + $0x20] ss:$0 sps:$4 sm:$0xff]  }
  0x1c   :  { %956 = vmatpush3.bf16.msra.mxu0 %v1088_v26 }
  0x1d   :  { %978 = vmatpush3.bf16.msra.mxu1 %v1089_v27  ;;  %957 = vmatprep.subr.bf16.mxu0 %v1090_v28 }
  0x1e   :  { %979 = vmatprep.subr.bf16.mxu1 %v1091_v29 }
  0x20   :  { %958 = vmatpush3.bf16.msra.mxu0 %v1092_v30 }
  0x21   :  { %980 = vmatpush3.bf16.msra.mxu1 %v1093_v31  ;;  %987 = vmatprep.subr.bf16.mxu0 %v1098_v38 }
  0x22   :  { %1009 = vmatprep.subr.bf16.mxu1 %v1100_v40 }
  0x23   :  { %667 = vmatmul.mubr.bf16.vlgmr.msra.gmra.mxu0 %v860_v34 }
  0x24   :  { %707 = vmatmul.mubr.bf16.vlgmr.msra.gmra.mxu1 %v862_v36  ;;  %988 = vmatpush3.bf16.msra.mxu0 %v1099_v39 }
  0x25   :  { %1010 = vmatpush3.bf16.msra.mxu1 %v1101_v41  ;;  %989 = vmatprep.subr.bf16.mxu0 %v1102_v42 }
  0x26   :  { %1011 = vmatprep.subr.bf16.mxu1 %v1104_v44  ;;  %746 = vmatprep.mubr.bf16.mxu0 %v865_v6 }
  0x27   :  { %786 = vmatprep.mubr.bf16.mxu1 %v867_v11 }
  0x28   :  { %990 = vmatpush3.bf16.msra.mxu0 %v1103_v43 }
  0x29   :  { %1012 = vmatpush3.bf16.msra.mxu1 %v1105_v45  ;;  %991 = vmatprep.subr.bf16.mxu0 %v1106_v46  ;;  %v941_v46 = vld [vmem:[%s1420_s2] ss:$0 sm:$0xff] }
  0x2a   :  { %1013 = vmatprep.subr.bf16.mxu1 %v1108_v48 }
  0x2c   :  { %992 = vmatpush3.bf16.msra.mxu0 %v1107_v47  ;;  %v850_v47 = vld [vmem:[%s1421_s4] sm:$0xf] }
  0x2d   :  { %1014 = vmatpush3.bf16.msra.mxu1 %v1109_v49  ;;  %993 = vmatprep.subr.bf16.mxu0 %v1110_v50  ;;  %v942_v49 = vld [vmem:[%s1422_s3] ss:$0 sm:$0xff] }
  0x2e   :  { %1015 = vmatprep.subr.bf16.mxu1 %v1112_v52  ;;  %v851_v52 = vunpack.c.l.bf16 %v850_v47 }
  0x30   :  { %994 = vmatpush3.bf16.msra.mxu0 %v1111_v51 }
  0x31   :  { %1016 = vmatpush3.bf16.msra.mxu1 %v1113_v53  ;;  %995 = vmatprep.subr.bf16.mxu0 %v1114_v54 }
  0x32   :  { %1017 = vmatprep.subr.bf16.mxu1 %v1116_v56 }
  0x34   :  { %996 = vmatpush3.bf16.msra.mxu0 %v1115_v55 }
  0x35   :  { %1018 = vmatpush3.bf16.msra.mxu1 %v1117_v57  ;;  %997 = vmatprep.subr.bf16.mxu0 %v1118_v58 }
  0x36   :  { %1019 = vmatprep.subr.bf16.mxu1 %v1120_v60 }
  0x38   :  { %998 = vmatpush3.bf16.msra.mxu0 %v1119_v59 }
  0x39   :  { %1020 = vmatpush3.bf16.msra.mxu1 %v1121_v61  ;;  %999 = vmatprep.subr.bf16.mxu0 %v1122_v62 }
  0x3a   :  { %1021 = vmatprep.subr.bf16.mxu1 %v1124_v0 }
  0x3c   :  { %1000 = vmatpush3.bf16.msra.mxu0 %v1123_v63 }
  0x3d   :  { %1022 = vmatpush3.bf16.msra.mxu1 %v1125_v1  ;;  %1001 = vmatprep.subr.bf16.mxu0 %v1126_v2 }
  0x3e   :  { %1023 = vmatprep.subr.bf16.mxu1 %v1128_v4 }
  0x40   :  { %1002 = vmatpush3.bf16.msra.mxu0 %v1127_v3 }
  0x41   :  { %1024 = vmatpush3.bf16.msra.mxu1 %v1131_v7  ;;  %1040 = vmatprep.subr.bf16.mxu0 %v1143_v13 }
  0x43   :  { %747 = vmatmul.mubr.bf16.vlgmr.msra.gmra.mxu0 %v864_v8 }
  0x44   :  { %1041 = vmatpush3.bf16.msra.mxu0 %v1134_v12  ;;  %787 = vmatmul.mubr.bf16.vlgmr.msra.gmra.mxu1 %v866_v10 }
  0x45   :  { %1042 = vmatprep.subr.bf16.mxu0 %v1143_v13  ;;  %1056 = vmatprep.mubr.msk.bf16.mxu0 %vm1144_vm0, %v1143_v13 }
  0x48   :  { %1043 = vmatpush3.bf16.msra.mxu0 %v1135_v14 }
  0x49   :  { %1044 = vmatprep.subr.bf16.mxu0 %v1143_v13 }
  0x4c   :  { %1045 = vmatpush3.bf16.msra.mxu0 %v1136_v15 }
  0x4d   :  { %1046 = vmatprep.subr.bf16.mxu0 %v1143_v13 }
  0x50   :  { %1047 = vmatpush3.bf16.msra.mxu0 %v1137_v16 }
  0x51   :  { %1048 = vmatprep.subr.bf16.mxu0 %v1143_v13 }
  0x54   :  { %1049 = vmatpush3.bf16.msra.mxu0 %v1138_v17 }
  0x55   :  { %1050 = vmatprep.subr.bf16.mxu0 %v1143_v13 }
  0x58   :  { %1051 = vmatpush3.bf16.msra.mxu0 %v1139_v18 }
  0x59   :  { %1052 = vmatprep.subr.bf16.mxu0 %v1143_v13 }
  0x5c   :  { %1053 = vmatpush3.bf16.msra.mxu0 %v1140_v19 }
  0x5d   :  { %1054 = vmatprep.subr.bf16.mxu0 %v1143_v13 }
  0x60   :  { %1055 = vmatpush3.bf16.msra.mxu0 %v1141_v20 }
  0x63   :  { %1057 = vmatmul.mubr.bf16.vlgmr.msra.gmra.mxu0 %v1142_v21 }
  0xe3   :  { %v959_v22 = vpop.f32.mrf.mxu0 }
  0xe4   :  { %v981_v23 = vpop.f32.mrf.mxu1 }
  0xe5   :  { %v960_v24 = vpop.f32.mrf.mxu0 }
  0xe6   :  { %v982_v25 = vpop.f32.mrf.mxu1  ;;  %v961_v38 = vadd.f32 %v960_v24, %v959_v22 }
  0xe7   :  { %v962_v26 = vpop.f32.mrf.mxu0  ;;  %v983_v39 = vadd.f32 %v982_v25, %v981_v23 }
  0xe8   :  { %v984_v27 = vpop.f32.mrf.mxu1 }
  0xe9   :  { %v963_v28 = vpop.f32.mrf.mxu0  ;;  %v709_v41 = vadd.f32 %v983_v39, %v961_v38 }
  0xea   :  { %v985_v29 = vpop.f32.mrf.mxu1 }
 0x103   :  { %v1003_v30 = vpop.f32.mrf.mxu0 }
 0x104   :  { %v1025_v31 = vpop.f32.mrf.mxu1 }
 0x105   :  { %v1004_v32 = vpop.f32.mrf.mxu0 }
 0x106   :  { %v1026_v33 = vpop.f32.mrf.mxu1  ;;  %v1005_v40 = vadd.f32 %v1004_v32, %v1003_v30 }
 0x107   :  { %v1006_v34 = vpop.f32.mrf.mxu0  ;;  %v1027_v43 = vadd.f32 %v1026_v33, %v1025_v31 }
 0x108   :  { %v1028_v35 = vpop.f32.mrf.mxu1  ;;  %v749_v42 = vadd.f32 %v1005_v40, %v709_v41 }
 0x109   :  { %v1007_v36 = vpop.f32.mrf.mxu0 }
 0x10a   :  { %v1029_v37 = vpop.f32.mrf.mxu1  ;;  %v789_v44 = vadd.f32 %v1027_v43, %v749_v42 }
 0x123   :  { %v828_v45 = vpop.f32.mrf.mxu0 }
 0x124   :  { %v829_v48 = vadd.f32 %v828_v45, %v789_v44 }
 0x125   :  { %v1058_v50 = vpop.f32.mrf.mxu0 }
 0x126   :  { %v841_v51 = vmul.f32 %v941_v46, %v829_v48 }
 0x127   :  { %v831_v53 = vpop.f32.mrf.mxu0 }
 0x128   :  { %v849_v54 = vadd.f32 %v942_v49, %v841_v51 }
 0x129   :  { %v1059_v55 = vpop.f32.mrf.mxu0 }
 0x12a   :  { %v852_v56 = vadd.f32 %v851_v52, %v849_v54 }
 0x12c   :  { %v853_v57 = vmax.f32 %v852_v56, 0.0 }
 0x12e   :  { %v854_v58 = vpack.c.bf16 %v853_v57, %v853_v57 }
 0x130   :  { %855 = vst [vmem:[%s1423_s5] sm:$0xf] %v854_v58 }

// kernel: byol_forward.35
= control target key start
LH: loop header
LB: loop body
LE: loop exit
PB: predicated region body
PF: predicated region fallthrough
CT: control target
= control target key end

     0   :  { %vm1390_vm0 = vmmov 0   ;;  %s1725_s1 = inlined_call_operand.vmem [shape: bf16[1152,128], index: 1, kind: input, shape index: {}]   ;;  %s1726_s0 = inlined_call_operand.vmem [shape: bf16[16,1152], index: 0, kind: input, shape index: {}]   ;;  %s1727_s4 = inlined_call_operand.vmem [shape: bf16[128,128], index: 4, kind: input, shape index: {}]   ;;  %s1728_s5 = inlined_call_operand.vmem [shape: f32[1,128], index: 5, kind: input, shape index: {}]   ;;  %s1729_s2 = inlined_call_operand.vmem [shape: f32[1,128], index: 2, kind: input, shape index: {}]   ;;  %s1730_s6 = inlined_call_operand.vmem [shape: f32[1,128], index: 6, kind: input, shape index: {}]   ;;  %s1731_s3 = inlined_call_operand.vmem [shape: f32[1,128], index: 3, kind: input, shape index: {}]   ;;  %s1732_s8 = inlined_call_operand.vmem [shape: bf16[16,128], index: 8, kind: output, shape index: {1}]   ;;  %s1733_s7 = inlined_call_operand.vmem [shape: bf16[16,128], index: 7, kind: output, shape index: {0}]  }
   0x1   :  { %v1296_v0 = vld [vmem:[%s1725_s1 + $0x78] sm:$0xff]   ;;  %v1300_v4 = vld [vmem:[%s1725_s1 + $0x70] sm:$0xff]   ;;  %v1304_v8 = vld [vmem:[%s1725_s1 + $0x68] sm:$0xff]  }
   0x2   :  { %v1297_v1 = vld [vmem:[%s1725_s1 + $0xf8] sm:$0xff]   ;;  %1148 = vmatprep.subr.bf16.mxu0 %v1296_v0  ;;  %v1301_v5 = vld [vmem:[%s1725_s1 + $0xf0] sm:$0xff]   ;;  %v1305_v9 = vld [vmem:[%s1725_s1 + $0xe8] sm:$0xff]  }
   0x3   :  { %v1298_v2 = vld [vmem:[%s1725_s1 + $0x38] sm:$0xff]   ;;  %1170 = vmatprep.subr.bf16.mxu1 %v1297_v1  ;;  %v1302_v6 = vld [vmem:[%s1725_s1 + $0x30] sm:$0xff]   ;;  %v1306_v10 = vld [vmem:[%s1725_s1 + $0x28] sm:$0xff]  }
   0x4   :  { %v1299_v3 = vld [vmem:[%s1725_s1 + $0xb8] sm:$0xff]   ;;  %1149 = vmatpush3.bf16.msra.mxu0 %v1298_v2  ;;  %v1303_v7 = vld [vmem:[%s1725_s1 + $0xb0] sm:$0xff]   ;;  %v1307_v11 = vld [vmem:[%s1725_s1 + $0xa8] sm:$0xff]  }
   0x5   :  { %1171 = vmatpush3.bf16.msra.mxu1 %v1299_v3  ;;  %1150 = vmatprep.subr.bf16.mxu0 %v1300_v4  ;;  %v1308_v12 = vld [vmem:[%s1725_s1 + $0x60] sm:$0xff]   ;;  %v1312_v16 = vld [vmem:[%s1725_s1 + $0x58] sm:$0xff]   ;;  %v1316_v20 = vld [vmem:[%s1725_s1 + $0x50] sm:$0xff]  }
   0x6   :  { %1172 = vmatprep.subr.bf16.mxu1 %v1301_v5  ;;  %v1309_v13 = vld [vmem:[%s1725_s1 + $0xe0] sm:$0xff]   ;;  %v1313_v17 = vld [vmem:[%s1725_s1 + $0xd8] sm:$0xff]   ;;  %v1317_v21 = vld [vmem:[%s1725_s1 + $0xd0] sm:$0xff]  }
   0x7   :  { %v1310_v14 = vld [vmem:[%s1725_s1 + $0x20] sm:$0xff]   ;;  %v1314_v18 = vld [vmem:[%s1725_s1 + $0x18] sm:$0xff]   ;;  %v1318_v22 = vld [vmem:[%s1725_s1 + $0x10] sm:$0xff]  }
   0x8   :  { %1151 = vmatpush3.bf16.msra.mxu0 %v1302_v6  ;;  %v1311_v15 = vld [vmem:[%s1725_s1 + $0xa0] sm:$0xff]   ;;  %v1315_v19 = vld [vmem:[%s1725_s1 + $0x98] sm:$0xff]   ;;  %v1319_v23 = vld [vmem:[%s1725_s1 + $0x90] sm:$0xff]  }
   0x9   :  { %1173 = vmatpush3.bf16.msra.mxu1 %v1303_v7  ;;  %1152 = vmatprep.subr.bf16.mxu0 %v1304_v8  ;;  %v1320_v24 = vld [vmem:[%s1725_s1 + $0x48] sm:$0xff]   ;;  %v1324_v28 = vld [vmem:[%s1725_s1 + $0x40] sm:$0xff]   ;;  %v1334_v36 = vld [vmem:[%s1725_s1 + $0x178] sm:$0xff]   ;;  %v1389_v7 = vmov 0.0  }
   0xa   :  { %1174 = vmatprep.subr.bf16.mxu1 %v1305_v9  ;;  %v1321_v25 = vld [vmem:[%s1725_s1 + $0xc8] sm:$0xff]   ;;  %v1325_v29 = vld [vmem:[%s1725_s1 + $0xc0] sm:$0xff]   ;;  %v1335_v37 = vld [vmem:[%s1725_s1 + $0x1f8] sm:$0xff]  }
   0xb   :  { %v1322_v26 = vld [vmem:[%s1725_s1 + $0x8] sm:$0xff]   ;;  %v1326_v30 = vld [vmem:[%s1725_s1] sm:$0xff]   ;;  %v1336_v38 = vld [vmem:[%s1725_s1 + $0x138] sm:$0xff]  }
   0xc   :  { %1153 = vmatpush3.bf16.msra.mxu0 %v1306_v10  ;;  %v1323_v27 = vld [vmem:[%s1725_s1 + $0x88] sm:$0xff]   ;;  %v1327_v31 = vld [vmem:[%s1725_s1 + $0x80] sm:$0xff]   ;;  %v1337_v39 = vld [vmem:[%s1725_s1 + $0x1b8] sm:$0xff]  }
   0xd   :  { %1175 = vmatpush3.bf16.msra.mxu1 %v1307_v11  ;;  %1154 = vmatprep.subr.bf16.mxu0 %v1308_v12  ;;  %v1328_v32 = vld [vmem:[%s1726_s0] ss:$36 sps:$4 sm:$0xff]   ;;  %v1331_v34 = vld [vmem:[%s1726_s0 + $0x8] ss:$36 sps:$4 sm:$0xff]   ;;  %v1338_v40 = vld [vmem:[%s1725_s1 + $0x170] sm:$0xff]  }
   0xe   :  { %1176 = vmatprep.subr.bf16.mxu1 %v1309_v13  ;;  %v1330_v33 = vld [vmem:[%s1726_s0 + $0x4] ss:$36 sps:$4 sm:$0xff]   ;;  %v1333_v35 = vld [vmem:[%s1726_s0 + $0xc] ss:$36 sps:$4 sm:$0xff]   ;;  %v1350_v52 = vld [vmem:[%s1725_s1 + $0x158] sm:$0xff]  }
   0xf   :  { %693 = vmatprep.mubr.bf16.mxu0 %v1330_v33  ;;  %734 = vmatprep.mubr.bf16.mxu1 %v1333_v35  ;;  %v1339_v41 = vld [vmem:[%s1725_s1 + $0x1f0] sm:$0xff]   ;;  %v1342_v44 = vld [vmem:[%s1725_s1 + $0x168] sm:$0xff]   ;;  %v1346_v48 = vld [vmem:[%s1725_s1 + $0x160] sm:$0xff]  }
  0x10   :  { %1155 = vmatpush3.bf16.msra.mxu0 %v1310_v14  ;;  %v1340_v42 = vld [vmem:[%s1725_s1 + $0x130] sm:$0xff]   ;;  %v1343_v45 = vld [vmem:[%s1725_s1 + $0x1e8] sm:$0xff]   ;;  %v1347_v49 = vld [vmem:[%s1725_s1 + $0x1e0] sm:$0xff]  }
  0x11   :  { %1177 = vmatpush3.bf16.msra.mxu1 %v1311_v15  ;;  %1156 = vmatprep.subr.bf16.mxu0 %v1312_v16  ;;  %v1341_v43 = vld [vmem:[%s1725_s1 + $0x1b0] sm:$0xff]   ;;  %v1344_v46 = vld [vmem:[%s1725_s1 + $0x128] sm:$0xff]   ;;  %v1348_v50 = vld [vmem:[%s1725_s1 + $0x120] sm:$0xff]  }
  0x12   :  { %1178 = vmatprep.subr.bf16.mxu1 %v1313_v17  ;;  %v1345_v47 = vld [vmem:[%s1725_s1 + $0x1a8] sm:$0xff]   ;;  %v1349_v51 = vld [vmem:[%s1725_s1 + $0x1a0] sm:$0xff]   ;;  %v1351_v53 = vld [vmem:[%s1725_s1 + $0x1d8] sm:$0xff]  }
  0x13   :  { %v1352_v54 = vld [vmem:[%s1725_s1 + $0x118] sm:$0xff]   ;;  %v1354_v56 = vld [vmem:[%s1725_s1 + $0x150] sm:$0xff]   ;;  %v1358_v60 = vld [vmem:[%s1725_s1 + $0x148] sm:$0xff]  }
  0x14   :  { %1157 = vmatpush3.bf16.msra.mxu0 %v1314_v18  ;;  %v1353_v55 = vld [vmem:[%s1725_s1 + $0x198] sm:$0xff]   ;;  %v1355_v57 = vld [vmem:[%s1725_s1 + $0x1d0] sm:$0xff]   ;;  %v1359_v61 = vld [vmem:[%s1725_s1 + $0x1c8] sm:$0xff]  }
  0x15   :  { %1179 = vmatpush3.bf16.msra.mxu1 %v1315_v19  ;;  %1158 = vmatprep.subr.bf16.mxu0 %v1316_v20  ;;  %v1356_v58 = vld [vmem:[%s1725_s1 + $0x110] sm:$0xff]   ;;  %v1360_v62 = vld [vmem:[%s1725_s1 + $0x108] sm:$0xff]   ;;  %v1362_v0 = vld [vmem:[%s1725_s1 + $0x140] sm:$0xff]  }
  0x16   :  { %1180 = vmatprep.subr.bf16.mxu1 %v1317_v21  ;;  %v1357_v59 = vld [vmem:[%s1725_s1 + $0x190] sm:$0xff]   ;;  %v1361_v63 = vld [vmem:[%s1725_s1 + $0x188] sm:$0xff]   ;;  %v1363_v1 = vld [vmem:[%s1725_s1 + $0x1c0] sm:$0xff]  }
  0x17   :  { %v1364_v2 = vld [vmem:[%s1725_s1 + $0x100] sm:$0xff]   ;;  %v1643_v4 = vld [vmem:[%s1726_s0 + $0x10] ss:$36 sps:$4 sm:$0xff]   ;;  %v1369_v6 = vld [vmem:[%s1726_s0 + $0x18] ss:$36 sps:$4 sm:$0xff]  }
  0x18   :  { %1159 = vmatpush3.bf16.msra.mxu0 %v1318_v22  ;;  %v1365_v3 = vld [vmem:[%s1725_s1 + $0x180] sm:$0xff]   ;;  %v1368_v5 = vld [vmem:[%s1726_s0 + $0x14] ss:$36 sps:$4 sm:$0xff]   ;;  %v1376_v13 = vld [vmem:[%s1725_s1 + $0x228] sm:$0xff]  }
  0x19   :  { %1181 = vmatpush3.bf16.msra.mxu1 %v1319_v23  ;;  %1160 = vmatprep.subr.bf16.mxu0 %v1320_v24  ;;  %v1371_v8 = vld [vmem:[%s1726_s0 + $0x1c] ss:$36 sps:$4 sm:$0xff]   ;;  %v1374_v11 = vld [vmem:[%s1725_s1 + $0x230] sm:$0xff]   ;;  %v1377_v14 = vld [vmem:[%s1727_s4 + $0x28] sm:$0xff]  }
  0x1a   :  { %1182 = vmatprep.subr.bf16.mxu1 %v1321_v25  ;;  %v1372_v9 = vld [vmem:[%s1725_s1 + $0x238] sm:$0xff]   ;;  %v1375_v12 = vld [vmem:[%s1727_s4 + $0x30] sm:$0xff]   ;;  %v1378_v15 = vld [vmem:[%s1725_s1 + $0x220] sm:$0xff]  }
  0x1b   :  { %v1373_v10 = vld [vmem:[%s1727_s4 + $0x38] sm:$0xff]   ;;  %v1379_v16 = vld [vmem:[%s1727_s4 + $0x20] sm:$0xff]   ;;  %v1382_v19 = vld [vmem:[%s1725_s1 + $0x210] sm:$0xff]  }
  0x1c   :  { %1161 = vmatpush3.bf16.msra.mxu0 %v1322_v26  ;;  %v1380_v17 = vld [vmem:[%s1725_s1 + $0x218] sm:$0xff]   ;;  %v1383_v20 = vld [vmem:[%s1727_s4 + $0x10] sm:$0xff]   ;;  %v1384_v21 = vld [vmem:[%s1725_s1 + $0x208] sm:$0xff]  }
  0x1d   :  { %1183 = vmatpush3.bf16.msra.mxu1 %v1323_v27  ;;  %1162 = vmatprep.subr.bf16.mxu0 %v1324_v28  ;;  %v1381_v18 = vld [vmem:[%s1727_s4 + $0x18] sm:$0xff]   ;;  %v1385_v22 = vld [vmem:[%s1727_s4 + $0x8] sm:$0xff]   ;;  %v1386_v23 = vld [vmem:[%s1725_s1 + $0x200] sm:$0xff]  }
  0x1e   :  { %1184 = vmatprep.subr.bf16.mxu1 %v1325_v29  ;;  %v1387_v24 = vld [vmem:[%s1727_s4] sm:$0xff]  }
  0x1f   :  { %v1388_v25 = vld [vmem:[%s1726_s0 + $0x20] ss:$36 sps:$4 sm:$0xff]  }
  0x20   :  { %1163 = vmatpush3.bf16.msra.mxu0 %v1326_v30 }
  0x21   :  { %1185 = vmatpush3.bf16.msra.mxu1 %v1327_v31  ;;  %1192 = vmatprep.subr.bf16.mxu0 %v1334_v36 }
  0x22   :  { %1214 = vmatprep.subr.bf16.mxu1 %v1335_v37 }
  0x23   :  { %694 = vmatmul.mubr.bf16.vlgmr.msra.gmra.mxu0 %v1328_v32 }
  0x24   :  { %735 = vmatmul.mubr.bf16.vlgmr.msra.gmra.mxu1 %v1331_v34  ;;  %1193 = vmatpush3.bf16.msra.mxu0 %v1336_v38 }
  0x25   :  { %1215 = vmatpush3.bf16.msra.mxu1 %v1337_v39  ;;  %1194 = vmatprep.subr.bf16.mxu0 %v1338_v40 }
  0x26   :  { %1216 = vmatprep.subr.bf16.mxu1 %v1339_v41  ;;  %775 = vmatprep.mubr.bf16.mxu0 %v1368_v5 }
  0x27   :  { %816 = vmatprep.mubr.bf16.mxu1 %v1371_v8 }
  0x28   :  { %1195 = vmatpush3.bf16.msra.mxu0 %v1340_v42 }
  0x29   :  { %1217 = vmatpush3.bf16.msra.mxu1 %v1341_v43  ;;  %1196 = vmatprep.subr.bf16.mxu0 %v1342_v44 }
  0x2a   :  { %1218 = vmatprep.subr.bf16.mxu1 %v1343_v45 }
  0x2c   :  { %1197 = vmatpush3.bf16.msra.mxu0 %v1344_v46 }
  0x2d   :  { %1219 = vmatpush3.bf16.msra.mxu1 %v1345_v47  ;;  %1198 = vmatprep.subr.bf16.mxu0 %v1346_v48 }
  0x2e   :  { %1220 = vmatprep.subr.bf16.mxu1 %v1347_v49 }
  0x30   :  { %1199 = vmatpush3.bf16.msra.mxu0 %v1348_v50 }
  0x31   :  { %1221 = vmatpush3.bf16.msra.mxu1 %v1349_v51  ;;  %1200 = vmatprep.subr.bf16.mxu0 %v1350_v52 }
  0x32   :  { %1222 = vmatprep.subr.bf16.mxu1 %v1351_v53 }
  0x34   :  { %1201 = vmatpush3.bf16.msra.mxu0 %v1352_v54  ;;  %v1130_v54 = vld [vmem:[%s1728_s5] ss:$0 sm:$0xff] }
  0x35   :  { %1223 = vmatpush3.bf16.msra.mxu1 %v1353_v55  ;;  %1202 = vmatprep.subr.bf16.mxu0 %v1354_v56  ;;  %v1118_v56 = vld [vmem:[%s1729_s2] ss:$0 sm:$0xff] }
  0x36   :  { %1224 = vmatprep.subr.bf16.mxu1 %v1355_v57 }
  0x38   :  { %1203 = vmatpush3.bf16.msra.mxu0 %v1356_v58 }
  0x39   :  { %1225 = vmatpush3.bf16.msra.mxu1 %v1357_v59  ;;  %1204 = vmatprep.subr.bf16.mxu0 %v1358_v60 }
  0x3a   :  { %1226 = vmatprep.subr.bf16.mxu1 %v1359_v61 }
  0x3c   :  { %1205 = vmatpush3.bf16.msra.mxu0 %v1360_v62 }
  0x3d   :  { %1227 = vmatpush3.bf16.msra.mxu1 %v1361_v63  ;;  %1206 = vmatprep.subr.bf16.mxu0 %v1362_v0  ;;  %v1131_v63 = vld [vmem:[%s1730_s6] ss:$0 sm:$0xff] }
  0x3e   :  { %1228 = vmatprep.subr.bf16.mxu1 %v1363_v1 }
  0x40   :  { %1207 = vmatpush3.bf16.msra.mxu0 %v1364_v2  ;;  %v1119_v2 = vld [vmem:[%s1731_s3] ss:$0 sm:$0xff] }
  0x41   :  { %1229 = vmatpush3.bf16.msra.mxu1 %v1365_v3  ;;  %1254 = vmatprep.subr.bf16.mxu0 %v1389_v7 }
  0x42   :  { %1274 = vmatprep.subr.bf16.mxu1 %v1389_v7 }
  0x43   :  { %776 = vmatmul.mubr.bf16.vlgmr.msra.gmra.mxu0 %v1643_v4 }
  0x44   :  { %1270 = vmatprep.mubr.msk.bf16.mxu0 %vm1390_vm0, %v1389_v7  ;;  %817 = vmatmul.mubr.bf16.vlgmr.msra.gmra.mxu1 %v1369_v6 }
  0x45   :  { %1255 = vmatpush3.bf16.msra.mxu0 %v1372_v9  ;;  %1275 = vmatpush3.bf16.msra.mxu1 %v1373_v10 }
  0x46   :  { %1256 = vmatprep.subr.bf16.mxu0 %v1389_v7  ;;  %1276 = vmatprep.subr.bf16.mxu1 %v1389_v7 }
  0x47   :  { %1290 = vmatprep.mubr.msk.bf16.mxu1 %vm1390_vm0, %v1389_v7 }
  0x49   :  { %1257 = vmatpush3.bf16.msra.mxu0 %v1374_v11  ;;  %1277 = vmatpush3.bf16.msra.mxu1 %v1375_v12 }
  0x4a   :  { %1258 = vmatprep.subr.bf16.mxu0 %v1389_v7  ;;  %1278 = vmatprep.subr.bf16.mxu1 %v1389_v7 }
  0x4d   :  { %1259 = vmatpush3.bf16.msra.mxu0 %v1376_v13  ;;  %1279 = vmatpush3.bf16.msra.mxu1 %v1377_v14 }
  0x4e   :  { %1260 = vmatprep.subr.bf16.mxu0 %v1389_v7  ;;  %1280 = vmatprep.subr.bf16.mxu1 %v1389_v7 }
  0x51   :  { %1261 = vmatpush3.bf16.msra.mxu0 %v1378_v15  ;;  %1281 = vmatpush3.bf16.msra.mxu1 %v1379_v16 }
  0x52   :  { %1262 = vmatprep.subr.bf16.mxu0 %v1389_v7  ;;  %1282 = vmatprep.subr.bf16.mxu1 %v1389_v7 }
  0x55   :  { %1263 = vmatpush3.bf16.msra.mxu0 %v1380_v17  ;;  %1283 = vmatpush3.bf16.msra.mxu1 %v1381_v18 }
  0x56   :  { %1264 = vmatprep.subr.bf16.mxu0 %v1389_v7  ;;  %1284 = vmatprep.subr.bf16.mxu1 %v1389_v7 }
  0x59   :  { %1265 = vmatpush3.bf16.msra.mxu0 %v1382_v19  ;;  %1285 = vmatpush3.bf16.msra.mxu1 %v1383_v20 }
  0x5a   :  { %1266 = vmatprep.subr.bf16.mxu0 %v1389_v7  ;;  %1286 = vmatprep.subr.bf16.mxu1 %v1389_v7 }
  0x5d   :  { %1267 = vmatpush3.bf16.msra.mxu0 %v1384_v21  ;;  %1287 = vmatpush3.bf16.msra.mxu1 %v1385_v22 }
  0x5e   :  { %1268 = vmatprep.subr.bf16.mxu0 %v1389_v7  ;;  %1288 = vmatprep.subr.bf16.mxu1 %v1389_v7 }
  0x61   :  { %1269 = vmatpush3.bf16.msra.mxu0 %v1386_v23  ;;  %1289 = vmatpush3.bf16.msra.mxu1 %v1387_v24 }
  0x64   :  { %1271 = vmatmul.mubr.bf16.vlgmr.msra.gmra.mxu0 %v1388_v25  ;;  %1291 = vmatmul.mubr.bf16.vlgmr.msra.gmra.mxu1 %v1643_v4 }
  0xe3   :  { %v1164_v26 = vpop.f32.mrf.mxu0 }
  0xe4   :  { %v1186_v28 = vpop.f32.mrf.mxu1 }
  0xe5   :  { %v1165_v27 = vpop.f32.mrf.mxu0 }
  0xe6   :  { %v1187_v30 = vpop.f32.mrf.mxu1  ;;  %v1166_v38 = vadd.f32 %v1165_v27, %v1164_v26 }
  0xe7   :  { %v1167_v29 = vpop.f32.mrf.mxu0  ;;  %v1188_v39 = vadd.f32 %v1187_v30, %v1186_v28 }
  0xe8   :  { %v1189_v32 = vpop.f32.mrf.mxu1 }
  0xe9   :  { %v1168_v31 = vpop.f32.mrf.mxu0  ;;  %v737_v43 = vadd.f32 %v1188_v39, %v1166_v38 }
  0xea   :  { %v1190_v34 = vpop.f32.mrf.mxu1  ;;  %v1169_v44 = vadd.f32 %v1168_v31, %v1167_v29 }
  0xeb   :  { %v1191_v45 = vadd.f32 %v1190_v34, %v1189_v32 }
  0xed   :  { %v740_v50 = vadd.f32 %v1191_v45, %v1169_v44 }
 0x103   :  { %v1208_v33 = vpop.f32.mrf.mxu0 }
 0x104   :  { %v1230_v36 = vpop.f32.mrf.mxu1 }
 0x105   :  { %v1209_v35 = vpop.f32.mrf.mxu0 }
 0x106   :  { %v1231_v40 = vpop.f32.mrf.mxu1  ;;  %v1210_v41 = vadd.f32 %v1209_v35, %v1208_v33 }
 0x107   :  { %v1211_v37 = vpop.f32.mrf.mxu0  ;;  %v1232_v48 = vadd.f32 %v1231_v40, %v1230_v36 }
 0x108   :  { %v1233_v46 = vpop.f32.mrf.mxu1  ;;  %v778_v47 = vadd.f32 %v1210_v41, %v737_v43 }
 0x109   :  { %v1212_v42 = vpop.f32.mrf.mxu0 }
 0x10a   :  { %v1213_v49 = vadd.f32 %v1212_v42, %v1211_v37  ;;  %v1234_v51 = vpop.f32.mrf.mxu1  ;;  %v819_v53 = vadd.f32 %v1232_v48, %v778_v47 }
 0x10b   :  { %v1235_v57 = vadd.f32 %v1234_v51, %v1233_v46 }
 0x10c   :  { %v781_v52 = vadd.f32 %v1213_v49, %v740_v50 }
 0x10e   :  { %v822_v1 = vadd.f32 %v1235_v57, %v781_v52 }
 0x124   :  { %v859_v55 = vpop.f32.mrf.mxu0  ;;  %v994_v59 = vpop.f32.mrf.mxu1 }
 0x125   :  { %v860_v58 = vadd.f32 %v859_v55, %v819_v53  ;;  %v1008_v60 = vmul.f32 %v1130_v54, %v994_v59 }
 0x126   :  { %v1272_v61 = vpop.f32.mrf.mxu0  ;;  %v1292_v0 = vpop.f32.mrf.mxu1 }
 0x127   :  { %v873_v62 = vmul.f32 %v1118_v56, %v860_v58  ;;  %v1017_v6 = vadd.f32 %v1131_v63, %v1008_v60 }
 0x128   :  { %v862_v3 = vpop.f32.mrf.mxu0  ;;  %v997_v5 = vpop.f32.mrf.mxu1 }
 0x129   :  { %v863_v4 = vadd.f32 %v862_v3, %v822_v1  ;;  %v1009_v7 = vmul.f32 %v1130_v54, %v997_v5  ;;  %v882_v9 = vadd.f32 %v1119_v2, %v873_v62 }
 0x12a   :  { %v1273_v8 = vpop.f32.mrf.mxu0  ;;  %v1293_v11 = vpop.f32.mrf.mxu1 }
 0x12b   :  { %v874_v10 = vmul.f32 %v1118_v56, %v863_v4  ;;  %v1018_v12 = vadd.f32 %v1131_v63, %v1009_v7  ;;  %v884_v15 = vmax.f32 %v882_v9, 0.0 }
 0x12d   :  { %v883_v13 = vadd.f32 %v1119_v2, %v874_v10  ;;  %v1146_v14 = vpack.c.bf16 %v1018_v12, %v1017_v6 }
 0x12f   :  { %v885_v16 = vmax.f32 %v883_v13, 0.0  ;;  %1147 = vst [vmem:[%s1732_s8] sm:$0xff] %v1146_v14  }
 0x131   :  { %v1141_v17 = vpack.c.bf16 %v885_v16, %v884_v15 }
 0x133   :  { %1142 = vst [vmem:[%s1733_s7] sm:$0xff] %v1141_v17  }

// kernel: byol_forward.37
= control target key start
LH: loop header
LB: loop body
LE: loop exit
PB: predicated region body
PF: predicated region fallthrough
CT: control target
= control target key end

     0   :  { %vm1186_vm0 = vmmov 0   ;;  %s1464_s1 = inlined_call_operand.vmem [shape: bf16[1152,128], index: 1, kind: input, shape index: {}]   ;;  %s1465_s0 = inlined_call_operand.vmem [shape: bf16[16,1152], index: 0, kind: input, shape index: {}]   ;;  %s1466_s2 = inlined_call_operand.vmem [shape: f32[1,128], index: 2, kind: input, shape index: {}]   ;;  %s1467_s3 = inlined_call_operand.vmem [shape: f32[1,128], index: 3, kind: input, shape index: {}]   ;;  %s1468_s4 = inlined_call_operand.vmem [shape: bf16[16,128], index: 4, kind: output, shape index: {}]  }
   0x1   :  { %v1100_v0 = vld [vmem:[%s1464_s1 + $0x78] sm:$0xff]   ;;  %v1104_v4 = vld [vmem:[%s1464_s1 + $0x70] sm:$0xff]   ;;  %v1108_v8 = vld [vmem:[%s1464_s1 + $0x68] sm:$0xff]  }
   0x2   :  { %v1101_v1 = vld [vmem:[%s1464_s1 + $0xf8] sm:$0xff]   ;;  %981 = vmatprep.subr.bf16.mxu0 %v1100_v0  ;;  %v1105_v5 = vld [vmem:[%s1464_s1 + $0xf0] sm:$0xff]   ;;  %v1109_v9 = vld [vmem:[%s1464_s1 + $0xe8] sm:$0xff]  }
   0x3   :  { %v1102_v2 = vld [vmem:[%s1464_s1 + $0x38] sm:$0xff]   ;;  %1003 = vmatprep.subr.bf16.mxu1 %v1101_v1  ;;  %v1106_v6 = vld [vmem:[%s1464_s1 + $0x30] sm:$0xff]   ;;  %v1110_v10 = vld [vmem:[%s1464_s1 + $0x28] sm:$0xff]  }
   0x4   :  { %v1103_v3 = vld [vmem:[%s1464_s1 + $0xb8] sm:$0xff]   ;;  %982 = vmatpush3.bf16.msra.mxu0 %v1102_v2  ;;  %v1107_v7 = vld [vmem:[%s1464_s1 + $0xb0] sm:$0xff]   ;;  %v1111_v11 = vld [vmem:[%s1464_s1 + $0xa8] sm:$0xff]  }
   0x5   :  { %1004 = vmatpush3.bf16.msra.mxu1 %v1103_v3  ;;  %983 = vmatprep.subr.bf16.mxu0 %v1104_v4  ;;  %v1112_v12 = vld [vmem:[%s1464_s1 + $0x60] sm:$0xff]   ;;  %v1116_v16 = vld [vmem:[%s1464_s1 + $0x58] sm:$0xff]   ;;  %v1120_v20 = vld [vmem:[%s1464_s1 + $0x50] sm:$0xff]  }
   0x6   :  { %1005 = vmatprep.subr.bf16.mxu1 %v1105_v5  ;;  %v1113_v13 = vld [vmem:[%s1464_s1 + $0xe0] sm:$0xff]   ;;  %v1117_v17 = vld [vmem:[%s1464_s1 + $0xd8] sm:$0xff]   ;;  %v1121_v21 = vld [vmem:[%s1464_s1 + $0xd0] sm:$0xff]  }
   0x7   :  { %v1114_v14 = vld [vmem:[%s1464_s1 + $0x20] sm:$0xff]   ;;  %v1118_v18 = vld [vmem:[%s1464_s1 + $0x18] sm:$0xff]   ;;  %v1122_v22 = vld [vmem:[%s1464_s1 + $0x10] sm:$0xff]  }
   0x8   :  { %984 = vmatpush3.bf16.msra.mxu0 %v1106_v6  ;;  %v1115_v15 = vld [vmem:[%s1464_s1 + $0xa0] sm:$0xff]   ;;  %v1119_v19 = vld [vmem:[%s1464_s1 + $0x98] sm:$0xff]   ;;  %v1123_v23 = vld [vmem:[%s1464_s1 + $0x90] sm:$0xff]   ;;  %v1185_v6 = vmov 0.0  }
   0x9   :  { %1006 = vmatpush3.bf16.msra.mxu1 %v1107_v7  ;;  %985 = vmatprep.subr.bf16.mxu0 %v1108_v8  ;;  %v1124_v24 = vld [vmem:[%s1464_s1 + $0x48] sm:$0xff]   ;;  %v1128_v28 = vld [vmem:[%s1464_s1 + $0x40] sm:$0xff]   ;;  %v1138_v36 = vld [vmem:[%s1464_s1 + $0x178] sm:$0xff]  }
   0xa   :  { %1007 = vmatprep.subr.bf16.mxu1 %v1109_v9  ;;  %v1125_v25 = vld [vmem:[%s1464_s1 + $0xc8] sm:$0xff]   ;;  %v1129_v29 = vld [vmem:[%s1464_s1 + $0xc0] sm:$0xff]   ;;  %v1139_v37 = vld [vmem:[%s1464_s1 + $0x138] sm:$0xff]  }
   0xb   :  { %v1126_v26 = vld [vmem:[%s1464_s1 + $0x8] sm:$0xff]   ;;  %v1130_v30 = vld [vmem:[%s1464_s1] sm:$0xff]   ;;  %v1140_v38 = vld [vmem:[%s1464_s1 + $0x1f8] sm:$0xff]  }
   0xc   :  { %986 = vmatpush3.bf16.msra.mxu0 %v1110_v10  ;;  %v1127_v27 = vld [vmem:[%s1464_s1 + $0x88] sm:$0xff]   ;;  %v1131_v31 = vld [vmem:[%s1464_s1 + $0x80] sm:$0xff]   ;;  %v1141_v39 = vld [vmem:[%s1464_s1 + $0x1b8] sm:$0xff]  }
   0xd   :  { %1008 = vmatpush3.bf16.msra.mxu1 %v1111_v11  ;;  %987 = vmatprep.subr.bf16.mxu0 %v1112_v12  ;;  %v1132_v32 = vld [vmem:[%s1465_s0] ss:$36 sps:$4 sm:$0xff]   ;;  %v1135_v34 = vld [vmem:[%s1465_s0 + $0x8] ss:$36 sps:$4 sm:$0xff]   ;;  %v1142_v40 = vld [vmem:[%s1464_s1 + $0x170] sm:$0xff]  }
   0xe   :  { %1009 = vmatprep.subr.bf16.mxu1 %v1113_v13  ;;  %v1134_v33 = vld [vmem:[%s1465_s0 + $0x4] ss:$36 sps:$4 sm:$0xff]   ;;  %v1137_v35 = vld [vmem:[%s1465_s0 + $0xc] ss:$36 sps:$4 sm:$0xff]   ;;  %v1154_v52 = vld [vmem:[%s1464_s1 + $0x158] sm:$0xff]  }
   0xf   :  { %682 = vmatprep.mubr.bf16.mxu0 %v1134_v33  ;;  %723 = vmatprep.mubr.bf16.mxu1 %v1137_v35  ;;  %v1143_v41 = vld [vmem:[%s1464_s1 + $0x130] sm:$0xff]   ;;  %v1146_v44 = vld [vmem:[%s1464_s1 + $0x168] sm:$0xff]   ;;  %v1150_v48 = vld [vmem:[%s1464_s1 + $0x160] sm:$0xff]  }
  0x10   :  { %988 = vmatpush3.bf16.msra.mxu0 %v1114_v14  ;;  %v1144_v42 = vld [vmem:[%s1464_s1 + $0x1f0] sm:$0xff]   ;;  %v1147_v45 = vld [vmem:[%s1464_s1 + $0x128] sm:$0xff]   ;;  %v1151_v49 = vld [vmem:[%s1464_s1 + $0x120] sm:$0xff]  }
  0x11   :  { %1010 = vmatpush3.bf16.msra.mxu1 %v1115_v15  ;;  %989 = vmatprep.subr.bf16.mxu0 %v1116_v16  ;;  %v1145_v43 = vld [vmem:[%s1464_s1 + $0x1b0] sm:$0xff]   ;;  %v1148_v46 = vld [vmem:[%s1464_s1 + $0x1e8] sm:$0xff]   ;;  %v1152_v50 = vld [vmem:[%s1464_s1 + $0x1e0] sm:$0xff]  }
  0x12   :  { %1011 = vmatprep.subr.bf16.mxu1 %v1117_v17  ;;  %v1149_v47 = vld [vmem:[%s1464_s1 + $0x1a8] sm:$0xff]   ;;  %v1153_v51 = vld [vmem:[%s1464_s1 + $0x1a0] sm:$0xff]   ;;  %v1155_v53 = vld [vmem:[%s1464_s1 + $0x118] sm:$0xff]  }
  0x13   :  { %v1156_v54 = vld [vmem:[%s1464_s1 + $0x1d8] sm:$0xff]   ;;  %v1158_v56 = vld [vmem:[%s1464_s1 + $0x150] sm:$0xff]   ;;  %v1162_v60 = vld [vmem:[%s1464_s1 + $0x148] sm:$0xff]  }
  0x14   :  { %990 = vmatpush3.bf16.msra.mxu0 %v1118_v18  ;;  %v1157_v55 = vld [vmem:[%s1464_s1 + $0x198] sm:$0xff]   ;;  %v1159_v57 = vld [vmem:[%s1464_s1 + $0x110] sm:$0xff]   ;;  %v1163_v61 = vld [vmem:[%s1464_s1 + $0x108] sm:$0xff]  }
  0x15   :  { %1012 = vmatpush3.bf16.msra.mxu1 %v1119_v19  ;;  %991 = vmatprep.subr.bf16.mxu0 %v1120_v20  ;;  %v1160_v58 = vld [vmem:[%s1464_s1 + $0x1d0] sm:$0xff]   ;;  %v1164_v62 = vld [vmem:[%s1464_s1 + $0x1c8] sm:$0xff]   ;;  %v1166_v0 = vld [vmem:[%s1464_s1 + $0x140] sm:$0xff]  }
  0x16   :  { %1013 = vmatprep.subr.bf16.mxu1 %v1121_v21  ;;  %v1161_v59 = vld [vmem:[%s1464_s1 + $0x190] sm:$0xff]   ;;  %v1165_v63 = vld [vmem:[%s1464_s1 + $0x188] sm:$0xff]   ;;  %v1167_v1 = vld [vmem:[%s1464_s1 + $0x100] sm:$0xff]  }
  0x17   :  { %v1168_v2 = vld [vmem:[%s1464_s1 + $0x1c0] sm:$0xff]   ;;  %v1169_v3 = vld [vmem:[%s1465_s0 + $0x10] ss:$36 sps:$4 sm:$0xff]   ;;  %v1173_v7 = vld [vmem:[%s1465_s0 + $0x18] ss:$36 sps:$4 sm:$0xff]  }
  0x18   :  { %992 = vmatpush3.bf16.msra.mxu0 %v1122_v22  ;;  %v1171_v4 = vld [vmem:[%s1465_s0 + $0x14] ss:$36 sps:$4 sm:$0xff]   ;;  %v1172_v5 = vld [vmem:[%s1464_s1 + $0x180] sm:$0xff]   ;;  %v1178_v11 = vld [vmem:[%s1464_s1 + $0x228] sm:$0xff]  }
  0x19   :  { %1014 = vmatpush3.bf16.msra.mxu1 %v1123_v23  ;;  %993 = vmatprep.subr.bf16.mxu0 %v1124_v24  ;;  %v1175_v8 = vld [vmem:[%s1465_s0 + $0x1c] ss:$36 sps:$4 sm:$0xff]   ;;  %v1177_v10 = vld [vmem:[%s1464_s1 + $0x230] sm:$0xff]   ;;  %v1182_v15 = vld [vmem:[%s1464_s1 + $0x208] sm:$0xff]  }
  0x1a   :  { %1015 = vmatprep.subr.bf16.mxu1 %v1125_v25  ;;  %v1176_v9 = vld [vmem:[%s1464_s1 + $0x238] sm:$0xff]   ;;  %v1179_v12 = vld [vmem:[%s1464_s1 + $0x220] sm:$0xff]   ;;  %v1181_v14 = vld [vmem:[%s1464_s1 + $0x210] sm:$0xff]  }
  0x1b   :  { %v1180_v13 = vld [vmem:[%s1464_s1 + $0x218] sm:$0xff]   ;;  %v1183_v16 = vld [vmem:[%s1464_s1 + $0x200] sm:$0xff]  }
  0x1c   :  { %994 = vmatpush3.bf16.msra.mxu0 %v1126_v26  ;;  %v1184_v17 = vld [vmem:[%s1465_s0 + $0x20] ss:$36 sps:$4 sm:$0xff]  }
  0x1d   :  { %1016 = vmatpush3.bf16.msra.mxu1 %v1127_v27  ;;  %995 = vmatprep.subr.bf16.mxu0 %v1128_v28 }
  0x1e   :  { %1017 = vmatprep.subr.bf16.mxu1 %v1129_v29 }
  0x20   :  { %996 = vmatpush3.bf16.msra.mxu0 %v1130_v30 }
  0x21   :  { %1018 = vmatpush3.bf16.msra.mxu1 %v1131_v31  ;;  %1025 = vmatprep.subr.bf16.mxu0 %v1138_v36 }
  0x22   :  { %1047 = vmatprep.subr.bf16.mxu1 %v1140_v38 }
  0x23   :  { %683 = vmatmul.mubr.bf16.vlgmr.msra.gmra.mxu0 %v1132_v32 }
  0x24   :  { %724 = vmatmul.mubr.bf16.vlgmr.msra.gmra.mxu1 %v1135_v34  ;;  %1026 = vmatpush3.bf16.msra.mxu0 %v1139_v37 }
  0x25   :  { %1048 = vmatpush3.bf16.msra.mxu1 %v1141_v39  ;;  %1027 = vmatprep.subr.bf16.mxu0 %v1142_v40 }
  0x26   :  { %1049 = vmatprep.subr.bf16.mxu1 %v1144_v42  ;;  %764 = vmatprep.mubr.bf16.mxu0 %v1171_v4 }
  0x27   :  { %805 = vmatprep.mubr.bf16.mxu1 %v1175_v8 }
  0x28   :  { %1028 = vmatpush3.bf16.msra.mxu0 %v1143_v41 }
  0x29   :  { %1050 = vmatpush3.bf16.msra.mxu1 %v1145_v43  ;;  %1029 = vmatprep.subr.bf16.mxu0 %v1146_v44 }
  0x2a   :  { %1051 = vmatprep.subr.bf16.mxu1 %v1148_v46 }
  0x2c   :  { %1030 = vmatpush3.bf16.msra.mxu0 %v1147_v45 }
  0x2d   :  { %1052 = vmatpush3.bf16.msra.mxu1 %v1149_v47  ;;  %1031 = vmatprep.subr.bf16.mxu0 %v1150_v48  ;;  %v970_v48 = vld [vmem:[%s1466_s2] ss:$0 sm:$0xff] }
  0x2e   :  { %1053 = vmatprep.subr.bf16.mxu1 %v1152_v50 }
  0x30   :  { %1032 = vmatpush3.bf16.msra.mxu0 %v1151_v49 }
  0x31   :  { %1054 = vmatpush3.bf16.msra.mxu1 %v1153_v51  ;;  %1033 = vmatprep.subr.bf16.mxu0 %v1154_v52 }
  0x32   :  { %1055 = vmatprep.subr.bf16.mxu1 %v1156_v54 }
  0x34   :  { %1034 = vmatpush3.bf16.msra.mxu0 %v1155_v53  ;;  %v971_v53 = vld [vmem:[%s1467_s3] ss:$0 sm:$0xff] }
  0x35   :  { %1056 = vmatpush3.bf16.msra.mxu1 %v1157_v55  ;;  %1035 = vmatprep.subr.bf16.mxu0 %v1158_v56 }
  0x36   :  { %1057 = vmatprep.subr.bf16.mxu1 %v1160_v58 }
  0x38   :  { %1036 = vmatpush3.bf16.msra.mxu0 %v1159_v57 }
  0x39   :  { %1058 = vmatpush3.bf16.msra.mxu1 %v1161_v59  ;;  %1037 = vmatprep.subr.bf16.mxu0 %v1162_v60 }
  0x3a   :  { %1059 = vmatprep.subr.bf16.mxu1 %v1164_v62 }
  0x3c   :  { %1038 = vmatpush3.bf16.msra.mxu0 %v1163_v61 }
  0x3d   :  { %1060 = vmatpush3.bf16.msra.mxu1 %v1165_v63  ;;  %1039 = vmatprep.subr.bf16.mxu0 %v1166_v0 }
  0x3e   :  { %1061 = vmatprep.subr.bf16.mxu1 %v1168_v2 }
  0x40   :  { %1040 = vmatpush3.bf16.msra.mxu0 %v1167_v1 }
  0x41   :  { %1078 = vmatprep.subr.bf16.mxu0 %v1185_v6  ;;  %1062 = vmatpush3.bf16.msra.mxu1 %v1172_v5 }
  0x43   :  { %765 = vmatmul.mubr.bf16.vlgmr.msra.gmra.mxu0 %v1169_v3 }
  0x44   :  { %1094 = vmatprep.mubr.msk.bf16.mxu0 %vm1186_vm0, %v1185_v6  ;;  %1079 = vmatpush3.bf16.msra.mxu0 %v1176_v9 }
  0x45   :  { %806 = vmatmul.mubr.bf16.vlgmr.msra.gmra.mxu1 %v1173_v7  ;;  %1080 = vmatprep.subr.bf16.mxu0 %v1185_v6 }
  0x48   :  { %1081 = vmatpush3.bf16.msra.mxu0 %v1177_v10 }
  0x49   :  { %1082 = vmatprep.subr.bf16.mxu0 %v1185_v6 }
  0x4c   :  { %1083 = vmatpush3.bf16.msra.mxu0 %v1178_v11 }
  0x4d   :  { %1084 = vmatprep.subr.bf16.mxu0 %v1185_v6 }
  0x50   :  { %1085 = vmatpush3.bf16.msra.mxu0 %v1179_v12 }
  0x51   :  { %1086 = vmatprep.subr.bf16.mxu0 %v1185_v6 }
  0x54   :  { %1087 = vmatpush3.bf16.msra.mxu0 %v1180_v13 }
  0x55   :  { %1088 = vmatprep.subr.bf16.mxu0 %v1185_v6 }
  0x58   :  { %1089 = vmatpush3.bf16.msra.mxu0 %v1181_v14 }
  0x59   :  { %1090 = vmatprep.subr.bf16.mxu0 %v1185_v6 }
  0x5c   :  { %1091 = vmatpush3.bf16.msra.mxu0 %v1182_v15 }
  0x5d   :  { %1092 = vmatprep.subr.bf16.mxu0 %v1185_v6 }
  0x60   :  { %1093 = vmatpush3.bf16.msra.mxu0 %v1183_v16 }
  0x63   :  { %1095 = vmatmul.mubr.bf16.vlgmr.msra.gmra.mxu0 %v1184_v17 }
  0xe3   :  { %v997_v18 = vpop.f32.mrf.mxu0 }
  0xe4   :  { %v1019_v19 = vpop.f32.mrf.mxu1 }
  0xe5   :  { %v998_v20 = vpop.f32.mrf.mxu0 }
  0xe6   :  { %v1020_v21 = vpop.f32.mrf.mxu1  ;;  %v999_v31 = vadd.f32 %v998_v20, %v997_v18 }
  0xe7   :  { %v1000_v22 = vpop.f32.mrf.mxu0  ;;  %v1021_v32 = vadd.f32 %v1020_v21, %v1019_v19 }
  0xe8   :  { %v1022_v23 = vpop.f32.mrf.mxu1 }
  0xe9   :  { %v1001_v24 = vpop.f32.mrf.mxu0  ;;  %v726_v36 = vadd.f32 %v1021_v32, %v999_v31 }
  0xea   :  { %v1023_v26 = vpop.f32.mrf.mxu1  ;;  %v1002_v37 = vadd.f32 %v1001_v24, %v1000_v22 }
  0xeb   :  { %v1024_v38 = vadd.f32 %v1023_v26, %v1022_v23 }
  0xed   :  { %v729_v43 = vadd.f32 %v1024_v38, %v1002_v37 }
 0x103   :  { %v1041_v25 = vpop.f32.mrf.mxu0 }
 0x105   :  { %v1042_v27 = vpop.f32.mrf.mxu0  ;;  %v1063_v28 = vpop.f32.mrf.mxu1 }
 0x106   :  { %v1043_v33 = vadd.f32 %v1042_v27, %v1041_v25 }
 0x107   :  { %v1044_v29 = vpop.f32.mrf.mxu0  ;;  %v1064_v30 = vpop.f32.mrf.mxu1 }
 0x108   :  { %v767_v39 = vadd.f32 %v1043_v33, %v726_v36  ;;  %v1065_v40 = vadd.f32 %v1064_v30, %v1063_v28 }
 0x109   :  { %v1045_v34 = vpop.f32.mrf.mxu0  ;;  %v1066_v35 = vpop.f32.mrf.mxu1 }
 0x10a   :  { %v1046_v41 = vadd.f32 %v1045_v34, %v1044_v29  ;;  %v808_v46 = vadd.f32 %v1065_v40, %v767_v39 }
 0x10b   :  { %v1067_v42 = vpop.f32.mrf.mxu1 }
 0x10c   :  { %v770_v44 = vadd.f32 %v1046_v41, %v729_v43  ;;  %v1068_v45 = vadd.f32 %v1067_v42, %v1066_v35 }
 0x10e   :  { %v811_v52 = vadd.f32 %v1068_v45, %v770_v44 }
 0x123   :  { %v848_v47 = vpop.f32.mrf.mxu0 }
 0x124   :  { %v849_v49 = vadd.f32 %v848_v47, %v808_v46 }
 0x125   :  { %v1096_v50 = vpop.f32.mrf.mxu0 }
 0x126   :  { %v862_v51 = vmul.f32 %v970_v48, %v849_v49 }
 0x127   :  { %v851_v54 = vpop.f32.mrf.mxu0 }
 0x128   :  { %v852_v55 = vadd.f32 %v851_v54, %v811_v52  ;;  %v871_v57 = vadd.f32 %v971_v53, %v862_v51 }
 0x129   :  { %v1097_v56 = vpop.f32.mrf.mxu0 }
 0x12a   :  { %v863_v58 = vmul.f32 %v970_v48, %v852_v55  ;;  %v873_v60 = vmax.f32 %v871_v57, 0.0 }
 0x12c   :  { %v872_v59 = vadd.f32 %v971_v53, %v863_v58 }
 0x12e   :  { %v874_v61 = vmax.f32 %v872_v59, 0.0 }
 0x130   :  { %v979_v62 = vpack.c.bf16 %v874_v61, %v873_v60 }
 0x132   :  { %980 = vst [vmem:[%s1468_s4] sm:$0xff] %v979_v62  }

// kernel: byol_forward.36
= control target key start
LH: loop header
LB: loop body
LE: loop exit
PB: predicated region body
PF: predicated region fallthrough
CT: control target
= control target key end

     0   :  { %vm1199_vm0 = vmmov 0   ;;  %s1485_s1 = inlined_call_operand.vmem [shape: bf16[1152,128], index: 1, kind: input, shape index: {}]   ;;  %s1486_s0 = inlined_call_operand.vmem [shape: bf16[16,1152], index: 0, kind: input, shape index: {}]   ;;  %s1487_s2 = inlined_call_operand.vmem [shape: f32[1,128], index: 2, kind: input, shape index: {}]   ;;  %s1488_s3 = inlined_call_operand.vmem [shape: f32[1,128], index: 3, kind: input, shape index: {}]   ;;  %s1489_s4 = inlined_call_operand.vmem [shape: bf16[16,128], index: 4, kind: input, shape index: {}]   ;;  %s1490_s5 = inlined_call_operand.vmem [shape: bf16[16,128], index: 5, kind: output, shape index: {}]  }
   0x1   :  { %v1113_v0 = vld [vmem:[%s1485_s1 + $0x78] sm:$0xff]   ;;  %v1117_v4 = vld [vmem:[%s1485_s1 + $0x70] sm:$0xff]   ;;  %v1121_v8 = vld [vmem:[%s1485_s1 + $0x68] sm:$0xff]  }
   0x2   :  { %v1114_v1 = vld [vmem:[%s1485_s1 + $0xf8] sm:$0xff]   ;;  %994 = vmatprep.subr.bf16.mxu0 %v1113_v0  ;;  %v1118_v5 = vld [vmem:[%s1485_s1 + $0xf0] sm:$0xff]   ;;  %v1122_v9 = vld [vmem:[%s1485_s1 + $0xe8] sm:$0xff]  }
   0x3   :  { %v1115_v2 = vld [vmem:[%s1485_s1 + $0x38] sm:$0xff]   ;;  %1016 = vmatprep.subr.bf16.mxu1 %v1114_v1  ;;  %v1119_v6 = vld [vmem:[%s1485_s1 + $0x30] sm:$0xff]   ;;  %v1123_v10 = vld [vmem:[%s1485_s1 + $0x28] sm:$0xff]  }
   0x4   :  { %v1116_v3 = vld [vmem:[%s1485_s1 + $0xb8] sm:$0xff]   ;;  %995 = vmatpush3.bf16.msra.mxu0 %v1115_v2  ;;  %v1120_v7 = vld [vmem:[%s1485_s1 + $0xb0] sm:$0xff]   ;;  %v1124_v11 = vld [vmem:[%s1485_s1 + $0xa8] sm:$0xff]  }
   0x5   :  { %1017 = vmatpush3.bf16.msra.mxu1 %v1116_v3  ;;  %996 = vmatprep.subr.bf16.mxu0 %v1117_v4  ;;  %v1125_v12 = vld [vmem:[%s1485_s1 + $0x60] sm:$0xff]   ;;  %v1129_v16 = vld [vmem:[%s1485_s1 + $0x58] sm:$0xff]   ;;  %v1133_v20 = vld [vmem:[%s1485_s1 + $0x50] sm:$0xff]  }
   0x6   :  { %1018 = vmatprep.subr.bf16.mxu1 %v1118_v5  ;;  %v1126_v13 = vld [vmem:[%s1485_s1 + $0xe0] sm:$0xff]   ;;  %v1130_v17 = vld [vmem:[%s1485_s1 + $0xd8] sm:$0xff]   ;;  %v1134_v21 = vld [vmem:[%s1485_s1 + $0xd0] sm:$0xff]  }
   0x7   :  { %v1127_v14 = vld [vmem:[%s1485_s1 + $0x20] sm:$0xff]   ;;  %v1131_v18 = vld [vmem:[%s1485_s1 + $0x18] sm:$0xff]   ;;  %v1135_v22 = vld [vmem:[%s1485_s1 + $0x10] sm:$0xff]  }
   0x8   :  { %997 = vmatpush3.bf16.msra.mxu0 %v1119_v6  ;;  %v1128_v15 = vld [vmem:[%s1485_s1 + $0xa0] sm:$0xff]   ;;  %v1132_v19 = vld [vmem:[%s1485_s1 + $0x98] sm:$0xff]   ;;  %v1136_v23 = vld [vmem:[%s1485_s1 + $0x90] sm:$0xff]   ;;  %v1198_v6 = vmov 0.0  }
   0x9   :  { %1019 = vmatpush3.bf16.msra.mxu1 %v1120_v7  ;;  %998 = vmatprep.subr.bf16.mxu0 %v1121_v8  ;;  %v1137_v24 = vld [vmem:[%s1485_s1 + $0x48] sm:$0xff]   ;;  %v1141_v28 = vld [vmem:[%s1485_s1 + $0x40] sm:$0xff]   ;;  %v1151_v36 = vld [vmem:[%s1485_s1 + $0x178] sm:$0xff]  }
   0xa   :  { %1020 = vmatprep.subr.bf16.mxu1 %v1122_v9  ;;  %v1138_v25 = vld [vmem:[%s1485_s1 + $0xc8] sm:$0xff]   ;;  %v1142_v29 = vld [vmem:[%s1485_s1 + $0xc0] sm:$0xff]   ;;  %v1152_v37 = vld [vmem:[%s1485_s1 + $0x138] sm:$0xff]  }
   0xb   :  { %v1139_v26 = vld [vmem:[%s1485_s1 + $0x8] sm:$0xff]   ;;  %v1143_v30 = vld [vmem:[%s1485_s1] sm:$0xff]   ;;  %v1153_v38 = vld [vmem:[%s1485_s1 + $0x1f8] sm:$0xff]  }
   0xc   :  { %999 = vmatpush3.bf16.msra.mxu0 %v1123_v10  ;;  %v1140_v27 = vld [vmem:[%s1485_s1 + $0x88] sm:$0xff]   ;;  %v1144_v31 = vld [vmem:[%s1485_s1 + $0x80] sm:$0xff]   ;;  %v1154_v39 = vld [vmem:[%s1485_s1 + $0x1b8] sm:$0xff]  }
   0xd   :  { %1021 = vmatpush3.bf16.msra.mxu1 %v1124_v11  ;;  %1000 = vmatprep.subr.bf16.mxu0 %v1125_v12  ;;  %v1145_v32 = vld [vmem:[%s1486_s0] ss:$36 sps:$4 sm:$0xff]   ;;  %v1148_v34 = vld [vmem:[%s1486_s0 + $0x8] ss:$36 sps:$4 sm:$0xff]   ;;  %v1155_v40 = vld [vmem:[%s1485_s1 + $0x170] sm:$0xff]  }
   0xe   :  { %1022 = vmatprep.subr.bf16.mxu1 %v1126_v13  ;;  %v1147_v33 = vld [vmem:[%s1486_s0 + $0x4] ss:$36 sps:$4 sm:$0xff]   ;;  %v1150_v35 = vld [vmem:[%s1486_s0 + $0xc] ss:$36 sps:$4 sm:$0xff]   ;;  %v1167_v52 = vld [vmem:[%s1485_s1 + $0x158] sm:$0xff]  }
   0xf   :  { %685 = vmatprep.mubr.bf16.mxu0 %v1147_v33  ;;  %726 = vmatprep.mubr.bf16.mxu1 %v1150_v35  ;;  %v1156_v41 = vld [vmem:[%s1485_s1 + $0x130] sm:$0xff]   ;;  %v1159_v44 = vld [vmem:[%s1485_s1 + $0x168] sm:$0xff]   ;;  %v1163_v48 = vld [vmem:[%s1485_s1 + $0x160] sm:$0xff]  }
  0x10   :  { %1001 = vmatpush3.bf16.msra.mxu0 %v1127_v14  ;;  %v1157_v42 = vld [vmem:[%s1485_s1 + $0x1f0] sm:$0xff]   ;;  %v1160_v45 = vld [vmem:[%s1485_s1 + $0x128] sm:$0xff]   ;;  %v1164_v49 = vld [vmem:[%s1485_s1 + $0x120] sm:$0xff]  }
  0x11   :  { %1023 = vmatpush3.bf16.msra.mxu1 %v1128_v15  ;;  %1002 = vmatprep.subr.bf16.mxu0 %v1129_v16  ;;  %v1158_v43 = vld [vmem:[%s1485_s1 + $0x1b0] sm:$0xff]   ;;  %v1161_v46 = vld [vmem:[%s1485_s1 + $0x1e8] sm:$0xff]   ;;  %v1165_v50 = vld [vmem:[%s1485_s1 + $0x1e0] sm:$0xff]  }
  0x12   :  { %1024 = vmatprep.subr.bf16.mxu1 %v1130_v17  ;;  %v1162_v47 = vld [vmem:[%s1485_s1 + $0x1a8] sm:$0xff]   ;;  %v1166_v51 = vld [vmem:[%s1485_s1 + $0x1a0] sm:$0xff]   ;;  %v1168_v53 = vld [vmem:[%s1485_s1 + $0x118] sm:$0xff]  }
  0x13   :  { %v1169_v54 = vld [vmem:[%s1485_s1 + $0x1d8] sm:$0xff]   ;;  %v1171_v56 = vld [vmem:[%s1485_s1 + $0x150] sm:$0xff]   ;;  %v1175_v60 = vld [vmem:[%s1485_s1 + $0x148] sm:$0xff]  }
  0x14   :  { %1003 = vmatpush3.bf16.msra.mxu0 %v1131_v18  ;;  %v1170_v55 = vld [vmem:[%s1485_s1 + $0x198] sm:$0xff]   ;;  %v1172_v57 = vld [vmem:[%s1485_s1 + $0x110] sm:$0xff]   ;;  %v1176_v61 = vld [vmem:[%s1485_s1 + $0x108] sm:$0xff]  }
  0x15   :  { %1025 = vmatpush3.bf16.msra.mxu1 %v1132_v19  ;;  %1004 = vmatprep.subr.bf16.mxu0 %v1133_v20  ;;  %v1173_v58 = vld [vmem:[%s1485_s1 + $0x1d0] sm:$0xff]   ;;  %v1177_v62 = vld [vmem:[%s1485_s1 + $0x1c8] sm:$0xff]   ;;  %v1179_v0 = vld [vmem:[%s1485_s1 + $0x140] sm:$0xff]  }
  0x16   :  { %1026 = vmatprep.subr.bf16.mxu1 %v1134_v21  ;;  %v1174_v59 = vld [vmem:[%s1485_s1 + $0x190] sm:$0xff]   ;;  %v1178_v63 = vld [vmem:[%s1485_s1 + $0x188] sm:$0xff]   ;;  %v1180_v1 = vld [vmem:[%s1485_s1 + $0x100] sm:$0xff]  }
  0x17   :  { %v1181_v2 = vld [vmem:[%s1485_s1 + $0x1c0] sm:$0xff]   ;;  %v1182_v3 = vld [vmem:[%s1486_s0 + $0x10] ss:$36 sps:$4 sm:$0xff]   ;;  %v1186_v7 = vld [vmem:[%s1486_s0 + $0x18] ss:$36 sps:$4 sm:$0xff]  }
  0x18   :  { %1005 = vmatpush3.bf16.msra.mxu0 %v1135_v22  ;;  %v1184_v4 = vld [vmem:[%s1486_s0 + $0x14] ss:$36 sps:$4 sm:$0xff]   ;;  %v1185_v5 = vld [vmem:[%s1485_s1 + $0x180] sm:$0xff]   ;;  %v1191_v11 = vld [vmem:[%s1485_s1 + $0x228] sm:$0xff]  }
  0x19   :  { %1027 = vmatpush3.bf16.msra.mxu1 %v1136_v23  ;;  %1006 = vmatprep.subr.bf16.mxu0 %v1137_v24  ;;  %v1188_v8 = vld [vmem:[%s1486_s0 + $0x1c] ss:$36 sps:$4 sm:$0xff]   ;;  %v1190_v10 = vld [vmem:[%s1485_s1 + $0x230] sm:$0xff]   ;;  %v1195_v15 = vld [vmem:[%s1485_s1 + $0x208] sm:$0xff]  }
  0x1a   :  { %1028 = vmatprep.subr.bf16.mxu1 %v1138_v25  ;;  %v1189_v9 = vld [vmem:[%s1485_s1 + $0x238] sm:$0xff]   ;;  %v1192_v12 = vld [vmem:[%s1485_s1 + $0x220] sm:$0xff]   ;;  %v1194_v14 = vld [vmem:[%s1485_s1 + $0x210] sm:$0xff]  }
  0x1b   :  { %v1193_v13 = vld [vmem:[%s1485_s1 + $0x218] sm:$0xff]   ;;  %v1196_v16 = vld [vmem:[%s1485_s1 + $0x200] sm:$0xff]  }
  0x1c   :  { %1007 = vmatpush3.bf16.msra.mxu0 %v1139_v26  ;;  %v1197_v17 = vld [vmem:[%s1486_s0 + $0x20] ss:$36 sps:$4 sm:$0xff]  }
  0x1d   :  { %1029 = vmatpush3.bf16.msra.mxu1 %v1140_v27  ;;  %1008 = vmatprep.subr.bf16.mxu0 %v1141_v28 }
  0x1e   :  { %1030 = vmatprep.subr.bf16.mxu1 %v1142_v29 }
  0x20   :  { %1009 = vmatpush3.bf16.msra.mxu0 %v1143_v30 }
  0x21   :  { %1031 = vmatpush3.bf16.msra.mxu1 %v1144_v31  ;;  %1038 = vmatprep.subr.bf16.mxu0 %v1151_v36 }
  0x22   :  { %1060 = vmatprep.subr.bf16.mxu1 %v1153_v38 }
  0x23   :  { %686 = vmatmul.mubr.bf16.vlgmr.msra.gmra.mxu0 %v1145_v32 }
  0x24   :  { %727 = vmatmul.mubr.bf16.vlgmr.msra.gmra.mxu1 %v1148_v34  ;;  %1039 = vmatpush3.bf16.msra.mxu0 %v1152_v37 }
  0x25   :  { %1061 = vmatpush3.bf16.msra.mxu1 %v1154_v39  ;;  %1040 = vmatprep.subr.bf16.mxu0 %v1155_v40 }
  0x26   :  { %1062 = vmatprep.subr.bf16.mxu1 %v1157_v42  ;;  %767 = vmatprep.mubr.bf16.mxu0 %v1184_v4 }
  0x27   :  { %808 = vmatprep.mubr.bf16.mxu1 %v1188_v8 }
  0x28   :  { %1041 = vmatpush3.bf16.msra.mxu0 %v1156_v41 }
  0x29   :  { %1063 = vmatpush3.bf16.msra.mxu1 %v1158_v43  ;;  %1042 = vmatprep.subr.bf16.mxu0 %v1159_v44 }
  0x2a   :  { %1064 = vmatprep.subr.bf16.mxu1 %v1161_v46 }
  0x2c   :  { %1043 = vmatpush3.bf16.msra.mxu0 %v1160_v45 }
  0x2d   :  { %1065 = vmatpush3.bf16.msra.mxu1 %v1162_v47  ;;  %1044 = vmatprep.subr.bf16.mxu0 %v1163_v48  ;;  %v979_v48 = vld [vmem:[%s1487_s2] ss:$0 sm:$0xff] }
  0x2e   :  { %1066 = vmatprep.subr.bf16.mxu1 %v1165_v50  ;;  %v980_v50 = vld [vmem:[%s1488_s3] ss:$0 sm:$0xff] }
  0x30   :  { %1045 = vmatpush3.bf16.msra.mxu0 %v1164_v49 }
  0x31   :  { %1067 = vmatpush3.bf16.msra.mxu1 %v1166_v51  ;;  %1046 = vmatprep.subr.bf16.mxu0 %v1167_v52  ;;  %v986_v51 = vld [vmem:[%s1489_s4] sm:$0xff]  }
  0x32   :  { %1068 = vmatprep.subr.bf16.mxu1 %v1169_v54 }
  0x34   :  { %1047 = vmatpush3.bf16.msra.mxu0 %v1168_v53 }
  0x35   :  { %1069 = vmatpush3.bf16.msra.mxu1 %v1170_v55  ;;  %1048 = vmatprep.subr.bf16.mxu0 %v1171_v56 }
  0x36   :  { %1070 = vmatprep.subr.bf16.mxu1 %v1173_v58 }
  0x38   :  { %1049 = vmatpush3.bf16.msra.mxu0 %v1172_v57  ;;  %v987_v57 = vunpack.c.l.bf16 %v986_v51 }
  0x39   :  { %1071 = vmatpush3.bf16.msra.mxu1 %v1174_v59  ;;  %1050 = vmatprep.subr.bf16.mxu0 %v1175_v60 }
  0x3a   :  { %1072 = vmatprep.subr.bf16.mxu1 %v1177_v62 }
  0x3c   :  { %1051 = vmatpush3.bf16.msra.mxu0 %v1176_v61  ;;  %v988_v61 = vunpack.c.h.bf16 %v986_v51 }
  0x3d   :  { %1073 = vmatpush3.bf16.msra.mxu1 %v1178_v63  ;;  %1052 = vmatprep.subr.bf16.mxu0 %v1179_v0 }
  0x3e   :  { %1074 = vmatprep.subr.bf16.mxu1 %v1181_v2 }
  0x40   :  { %1053 = vmatpush3.bf16.msra.mxu0 %v1180_v1 }
  0x41   :  { %1091 = vmatprep.subr.bf16.mxu0 %v1198_v6  ;;  %1075 = vmatpush3.bf16.msra.mxu1 %v1185_v5 }
  0x43   :  { %768 = vmatmul.mubr.bf16.vlgmr.msra.gmra.mxu0 %v1182_v3 }
  0x44   :  { %1107 = vmatprep.mubr.msk.bf16.mxu0 %vm1199_vm0, %v1198_v6  ;;  %1092 = vmatpush3.bf16.msra.mxu0 %v1189_v9 }
  0x45   :  { %809 = vmatmul.mubr.bf16.vlgmr.msra.gmra.mxu1 %v1186_v7  ;;  %1093 = vmatprep.subr.bf16.mxu0 %v1198_v6 }
  0x48   :  { %1094 = vmatpush3.bf16.msra.mxu0 %v1190_v10 }
  0x49   :  { %1095 = vmatprep.subr.bf16.mxu0 %v1198_v6 }
  0x4c   :  { %1096 = vmatpush3.bf16.msra.mxu0 %v1191_v11 }
  0x4d   :  { %1097 = vmatprep.subr.bf16.mxu0 %v1198_v6 }
  0x50   :  { %1098 = vmatpush3.bf16.msra.mxu0 %v1192_v12 }
  0x51   :  { %1099 = vmatprep.subr.bf16.mxu0 %v1198_v6 }
  0x54   :  { %1100 = vmatpush3.bf16.msra.mxu0 %v1193_v13 }
  0x55   :  { %1101 = vmatprep.subr.bf16.mxu0 %v1198_v6 }
  0x58   :  { %1102 = vmatpush3.bf16.msra.mxu0 %v1194_v14 }
  0x59   :  { %1103 = vmatprep.subr.bf16.mxu0 %v1198_v6 }
  0x5c   :  { %1104 = vmatpush3.bf16.msra.mxu0 %v1195_v15 }
  0x5d   :  { %1105 = vmatprep.subr.bf16.mxu0 %v1198_v6 }
  0x60   :  { %1106 = vmatpush3.bf16.msra.mxu0 %v1196_v16 }
  0x63   :  { %1108 = vmatmul.mubr.bf16.vlgmr.msra.gmra.mxu0 %v1197_v17 }
  0xe3   :  { %v1010_v18 = vpop.f32.mrf.mxu0 }
  0xe4   :  { %v1032_v19 = vpop.f32.mrf.mxu1 }
  0xe5   :  { %v1011_v20 = vpop.f32.mrf.mxu0 }
  0xe6   :  { %v1033_v21 = vpop.f32.mrf.mxu1  ;;  %v1012_v31 = vadd.f32 %v1011_v20, %v1010_v18 }
  0xe7   :  { %v1013_v22 = vpop.f32.mrf.mxu0  ;;  %v1034_v32 = vadd.f32 %v1033_v21, %v1032_v19 }
  0xe8   :  { %v1035_v23 = vpop.f32.mrf.mxu1 }
  0xe9   :  { %v1014_v24 = vpop.f32.mrf.mxu0  ;;  %v729_v36 = vadd.f32 %v1034_v32, %v1012_v31 }
  0xea   :  { %v1036_v26 = vpop.f32.mrf.mxu1  ;;  %v1015_v37 = vadd.f32 %v1014_v24, %v1013_v22 }
  0xeb   :  { %v1037_v38 = vadd.f32 %v1036_v26, %v1035_v23 }
  0xed   :  { %v732_v43 = vadd.f32 %v1037_v38, %v1015_v37 }
 0x103   :  { %v1054_v25 = vpop.f32.mrf.mxu0 }
 0x105   :  { %v1055_v27 = vpop.f32.mrf.mxu0  ;;  %v1076_v28 = vpop.f32.mrf.mxu1 }
 0x106   :  { %v1056_v33 = vadd.f32 %v1055_v27, %v1054_v25 }
 0x107   :  { %v1057_v29 = vpop.f32.mrf.mxu0  ;;  %v1077_v30 = vpop.f32.mrf.mxu1 }
 0x108   :  { %v770_v39 = vadd.f32 %v1056_v33, %v729_v36  ;;  %v1078_v40 = vadd.f32 %v1077_v30, %v1076_v28 }
 0x109   :  { %v1058_v34 = vpop.f32.mrf.mxu0  ;;  %v1079_v35 = vpop.f32.mrf.mxu1 }
 0x10a   :  { %v1059_v41 = vadd.f32 %v1058_v34, %v1057_v29  ;;  %v811_v46 = vadd.f32 %v1078_v40, %v770_v39 }
 0x10b   :  { %v1080_v42 = vpop.f32.mrf.mxu1 }
 0x10c   :  { %v773_v44 = vadd.f32 %v1059_v41, %v732_v43  ;;  %v1081_v45 = vadd.f32 %v1080_v42, %v1079_v35 }
 0x10e   :  { %v814_v54 = vadd.f32 %v1081_v45, %v773_v44 }
 0x123   :  { %v851_v47 = vpop.f32.mrf.mxu0 }
 0x124   :  { %v852_v49 = vadd.f32 %v851_v47, %v811_v46 }
 0x125   :  { %v1109_v52 = vpop.f32.mrf.mxu0 }
 0x126   :  { %v865_v53 = vmul.f32 %v979_v48, %v852_v49 }
 0x127   :  { %v854_v55 = vpop.f32.mrf.mxu0 }
 0x128   :  { %v874_v56 = vadd.f32 %v980_v50, %v865_v53  ;;  %v855_v58 = vadd.f32 %v854_v55, %v814_v54 }
 0x129   :  { %v1110_v59 = vpop.f32.mrf.mxu0 }
 0x12a   :  { %v866_v60 = vmul.f32 %v979_v48, %v855_v58  ;;  %v880_v62 = vadd.f32 %v987_v57, %v874_v56 }
 0x12c   :  { %v875_v63 = vadd.f32 %v980_v50, %v866_v60  ;;  %v882_v1 = vmax.f32 %v880_v62, 0.0 }
 0x12e   :  { %v881_v0 = vadd.f32 %v988_v61, %v875_v63 }
 0x130   :  { %v883_v2 = vmax.f32 %v881_v0, 0.0 }
 0x132   :  { %v992_v3 = vpack.c.bf16 %v883_v2, %v882_v1 }
 0x134   :  { %993 = vst [vmem:[%s1490_s5] sm:$0xff] %v992_v3  }

// kernel: byol_forward.39
= control target key start
LH: loop header
LB: loop body
LE: loop exit
PB: predicated region body
PF: predicated region fallthrough
CT: control target
= control target key end

     0   :  { %v480_v0 = vmov 0.0   ;;  %vm481_vm0 = vmmov 0   ;;  %vm128_vm1 = vcmask 1041409   ;;  %vm130_vm2 = vcmask 1042434   ;;  %s609_s1 = inlined_call_operand.vmem [shape: bf16[128,128], index: 1, kind: input, shape index: {}]   ;;  %s610_s0 = inlined_call_operand.vmem [shape: bf16[8,8,128], index: 0, kind: input, shape index: {}]   ;;  %s611_s4 = inlined_call_operand.vmem [shape: bf16[128,128], index: 4, kind: input, shape index: {}]   ;;  %s612_s2 = inlined_call_operand.vmem [shape: f32[1,128], index: 2, kind: input, shape index: {}]   ;;  %s613_s3 = inlined_call_operand.vmem [shape: f32[1,128], index: 3, kind: input, shape index: {}]   ;;  %s614_s5 = inlined_call_operand.vmem [shape: f32[1,128], index: 5, kind: input, shape index: {}]   ;;  %s615_s6 = inlined_call_operand.vmem [shape: f32[8,128], index: 6, kind: output, shape index: {}]  }
   0x1   :  { %422 = vmatprep.subr.bf16.mxu0 %v480_v0  ;;  %v464_v1 = vld [vmem:[%s609_s1 + $0x38] sm:$0xff]   ;;  %438 = vmatprep.mubr.msk.bf16.mxu0 %vm481_vm0, %v480_v0  ;;  %v465_v2 = vld [vmem:[%s609_s1 + $0x30] sm:$0xff]   ;;  %v466_v3 = vld [vmem:[%s609_s1 + $0x28] sm:$0xff]   ;;  %vm132_vm3 = vcmask 1043459   ;;  %vm134_vm4 = vcmask 1044484   ;;  %vm136_vm5 = vcmask 1045509  }
   0x2   :  { %442 = vmatprep.subr.bf16.mxu1 %v480_v0  ;;  %458 = vmatprep.mubr.msk.bf16.mxu1 %vm481_vm0, %v480_v0  ;;  %v467_v4 = vld [vmem:[%s609_s1 + $0x20] sm:$0xff]   ;;  %v401_v6 = vld [vmem:[%s610_s0 + $0x8] sm:$0xff]   ;;  %v402_v7 = vld [vmem:[%s610_s0 + $0x10] sm:$0xff]   ;;  %vm138_vm6 = vcmask 1046534   ;;  %vm140_vm7 = vcmask 1047559  }
   0x3   :  { %423 = vmatpush3.bf16.msra.mxu0 %v464_v1  ;;  %v386_v5 = vld [vmem:[%s610_s0] sm:$0xff]   ;;  %v391_v10 = vunpack.c.l.bf16 %v401_v6  ;;  %v392_v11 = vunpack.c.h.bf16 %v401_v6  ;;  %v403_v12 = vld [vmem:[%s610_s0 + $0x18] sm:$0xff]   ;;  %v395_v13 = vunpack.c.l.bf16 %v402_v7  ;;  %v396_v14 = vunpack.c.h.bf16 %v402_v7  ;;  %v473_v22 = vld [vmem:[%s611_s4 + $0x30] sm:$0xff]  }
   0x4   :  { %424 = vmatprep.subr.bf16.mxu0 %v480_v0  ;;  %v387_v8 = vunpack.c.l.bf16 %v386_v5  ;;  %v388_v9 = vunpack.c.h.bf16 %v386_v5  ;;  %v399_v15 = vunpack.c.l.bf16 %v403_v12  ;;  %v400_v16 = vunpack.c.h.bf16 %v403_v12  ;;  %v472_v17 = vld [vmem:[%s611_s4 + $0x38] sm:$0xff]   ;;  %v474_v40 = vld [vmem:[%s611_s4 + $0x28] sm:$0xff]   ;;  %v469_v49 = vld [vmem:[%s609_s1 + $0x10] sm:$0xff]  }
   0x5   :  { %v52_v20 = vrot.slane %v391_v10, 4  ;;  %v58_v21 = vrot.slane %v392_v11, 4  ;;  %v64_v23 = vrot.slane %v395_v13, 4  ;;  %v70_v24 = vrot.slane %v396_v14, 4  ;;  %443 = vmatpush3.bf16.msra.mxu1 %v472_v17  ;;  %v468_v31 = vld [vmem:[%s609_s1 + $0x18] sm:$0xff]   ;;  %v475_v62 = vld [vmem:[%s611_s4 + $0x20] sm:$0xff]  }
   0x6   :  { %v40_v18 = vrot.slane %v387_v8, 4  ;;  %v46_v19 = vrot.slane %v388_v9, 4  ;;  %v76_v25 = vrot.slane %v399_v15, 4  ;;  %v82_v26 = vrot.slane %v400_v16, 4  ;;  %444 = vmatprep.subr.bf16.mxu1 %v480_v0  ;;  %v476_v17 = vld [vmem:[%s611_s4 + $0x18] sm:$0xff]  }
   0x7   :  { %425 = vmatpush3.bf16.msra.mxu0 %v465_v2  ;;  %v53_v29 = vadd.f32 %v391_v10, %v52_v20  ;;  %v59_v30 = vadd.f32 %v392_v11, %v58_v21  ;;  %v65_v32 = vadd.f32 %v395_v13, %v64_v23  ;;  %v71_v33 = vadd.f32 %v396_v14, %v70_v24 }
   0x8   :  { %426 = vmatprep.subr.bf16.mxu0 %v480_v0  ;;  %v41_v27 = vadd.f32 %v387_v8, %v40_v18  ;;  %v47_v28 = vadd.f32 %v388_v9, %v46_v19  ;;  %v77_v34 = vadd.f32 %v399_v15, %v76_v25  ;;  %v83_v35 = vadd.f32 %v400_v16, %v82_v26 }
   0x9   :  { %v54_v38 = vrot.slane %v53_v29, 2  ;;  %v60_v39 = vrot.slane %v59_v30, 2  ;;  %v66_v41 = vrot.slane %v65_v32, 2  ;;  %v72_v42 = vrot.slane %v71_v33, 2  ;;  %445 = vmatpush3.bf16.msra.mxu1 %v473_v22  ;;  %v471_v22 = vld [vmem:[%s609_s1] sm:$0xff]  }
   0xa   :  { %v42_v36 = vrot.slane %v41_v27, 2  ;;  %v48_v37 = vrot.slane %v47_v28, 2  ;;  %v78_v43 = vrot.slane %v77_v34, 2  ;;  %v84_v44 = vrot.slane %v83_v35, 2  ;;  %446 = vmatprep.subr.bf16.mxu1 %v480_v0 }
   0xb   :  { %427 = vmatpush3.bf16.msra.mxu0 %v466_v3  ;;  %v55_v47 = vadd.f32 %v54_v38, %v53_v29  ;;  %v61_v48 = vadd.f32 %v60_v39, %v59_v30  ;;  %v67_v50 = vadd.f32 %v66_v41, %v65_v32  ;;  %v73_v51 = vadd.f32 %v72_v42, %v71_v33  ;;  %v374_v38 = vld [vmem:[%s612_s2] ss:$0 sm:$0xff] }
   0xc   :  { %428 = vmatprep.subr.bf16.mxu0 %v480_v0  ;;  %v43_v45 = vadd.f32 %v42_v36, %v41_v27  ;;  %v49_v46 = vadd.f32 %v48_v37, %v47_v28  ;;  %v79_v52 = vadd.f32 %v78_v43, %v77_v34  ;;  %v85_v53 = vadd.f32 %v84_v44, %v83_v35  ;;  %v477_v28 = vld [vmem:[%s611_s4 + $0x10] sm:$0xff]   ;;  %v478_v36 = vld [vmem:[%s611_s4 + $0x8] sm:$0xff]   ;;  %v479_v37 = vld [vmem:[%s611_s4] sm:$0xff]  }
   0xd   :  { %v56_v56 = vrot.slane %v55_v47, 1  ;;  %v62_v57 = vrot.slane %v61_v48, 1  ;;  %v68_v58 = vrot.slane %v67_v50, 1  ;;  %v74_v59 = vrot.slane %v73_v51, 1  ;;  %447 = vmatpush3.bf16.msra.mxu1 %v474_v40  ;;  %v375_v40 = vld [vmem:[%s613_s3] ss:$0 sm:$0xff] }
   0xe   :  { %v44_v54 = vrot.slane %v43_v45, 1  ;;  %v50_v55 = vrot.slane %v49_v46, 1  ;;  %v80_v60 = vrot.slane %v79_v52, 1  ;;  %v86_v61 = vrot.slane %v85_v53, 1  ;;  %448 = vmatprep.subr.bf16.mxu1 %v480_v0 }
   0xf   :  { %429 = vmatpush3.bf16.msra.mxu0 %v467_v4  ;;  %v57_v2 = vadd.f32 %v56_v56, %v55_v47  ;;  %v63_v3 = vadd.f32 %v62_v57, %v61_v48  ;;  %v470_v4 = vld [vmem:[%s609_s1 + $0x8] sm:$0xff]   ;;  %v69_v5 = vadd.f32 %v68_v58, %v67_v50  ;;  %v75_v6 = vadd.f32 %v74_v59, %v73_v51  ;;  %v376_v47 = vld [vmem:[%s614_s5] ss:$0 sm:$0xff] }
  0x10   :  { %430 = vmatprep.subr.bf16.mxu0 %v480_v0  ;;  %v45_v63 = vadd.f32 %v44_v54, %v43_v45  ;;  %v51_v1 = vadd.f32 %v50_v55, %v49_v46  ;;  %v81_v7 = vadd.f32 %v80_v60, %v79_v52  ;;  %v87_v8 = vadd.f32 %v86_v61, %v85_v53 }
  0x11   :  { %v90_v11 = vpack.c.bf16 %v57_v2, %v57_v2  ;;  %v91_v12 = vpack.c.bf16 %v63_v3, %v63_v3  ;;  %v92_v13 = vpack.c.bf16 %v69_v5, %v69_v5  ;;  %v93_v14 = vpack.c.bf16 %v75_v6, %v75_v6  ;;  %449 = vmatpush3.bf16.msra.mxu1 %v475_v62 }
  0x12   :  { %v88_v9 = vpack.c.bf16 %v45_v63, %v45_v63  ;;  %v89_v10 = vpack.c.bf16 %v51_v1, %v51_v1  ;;  %v94_v15 = vpack.c.bf16 %v81_v7, %v81_v7  ;;  %v95_v16 = vpack.c.bf16 %v87_v8, %v87_v8  ;;  %450 = vmatprep.subr.bf16.mxu1 %v480_v0 }
  0x13   :  { %431 = vmatpush3.bf16.msra.mxu0 %v468_v31  ;;  %v122_v20 = vunpack.c.l.b16 %v90_v11  ;;  %v123_v21 = vunpack.c.l.b16 %v91_v12  ;;  %v124_v23 = vunpack.c.l.b16 %v92_v13  ;;  %v125_v24 = vunpack.c.l.b16 %v93_v14 }
  0x14   :  { %432 = vmatprep.subr.bf16.mxu0 %v480_v0  ;;  %v120_v18 = vunpack.c.l.b16 %v88_v9  ;;  %v121_v19 = vunpack.c.l.b16 %v89_v10  ;;  %v126_v26 = vunpack.c.l.b16 %v94_v15  ;;  %v127_v29 = vunpack.c.l.b16 %v95_v16 }
  0x15   :  { %451 = vmatpush3.bf16.msra.mxu1 %v476_v17 }
  0x16   :  { %v129_v25 = vsel %vm128_vm1, %v121_v19, %v120_v18  ;;  %452 = vmatprep.subr.bf16.mxu1 %v480_v0 }
  0x17   :  { %433 = vmatpush3.bf16.msra.mxu0 %v469_v49  ;;  %v131_v27 = vsel %vm130_vm2, %v122_v20, %v129_v25 }
  0x18   :  { %434 = vmatprep.subr.bf16.mxu0 %v480_v0  ;;  %v133_v30 = vsel %vm132_vm3, %v123_v21, %v131_v27 }
  0x19   :  { %v135_v31 = vsel %vm134_vm4, %v124_v23, %v133_v30  ;;  %453 = vmatpush3.bf16.msra.mxu1 %v477_v28 }
  0x1a   :  { %v137_v32 = vsel %vm136_vm5, %v125_v24, %v135_v31  ;;  %454 = vmatprep.subr.bf16.mxu1 %v480_v0 }
  0x1b   :  { %435 = vmatpush3.bf16.msra.mxu0 %v470_v4  ;;  %v139_v33 = vsel %vm138_vm6, %v126_v26, %v137_v32 }
  0x1c   :  { %436 = vmatprep.subr.bf16.mxu0 %v480_v0  ;;  %v141_v34 = vsel %vm140_vm7, %v127_v29, %v139_v33 }
  0x1d   :  { %v142_v35 = vpack.c.b16 %v141_v34, %v141_v34  ;;  %455 = vmatpush3.bf16.msra.mxu1 %v478_v36 }
  0x1e   :  { %456 = vmatprep.subr.bf16.mxu1 %v480_v0 }
  0x1f   :  { %437 = vmatpush3.bf16.msra.mxu0 %v471_v22 }
  0x21   :  { %457 = vmatpush3.bf16.msra.mxu1 %v479_v37 }
  0x22   :  { %439 = vmatmul.mubr.bf16.vlgmr.msra.gmra.mxu0 %v142_v35 }
  0xe2   :  { %v226_v39 = vpop.f32.mrf.mxu0 }
  0xe3   :  { %v239_v41 = vmul.f32 %v374_v38, %v226_v39 }
  0xe4   :  { %v440_v42 = vpop.f32.mrf.mxu0 }
  0xe5   :  { %v247_v43 = vadd.f32 %v375_v40, %v239_v41 }
  0xe6   :  { %v229_v44 = vpop.f32.mrf.mxu0 }
  0xe7   :  { %v248_v45 = vmax.f32 %v247_v43, 0.0 }
  0xe8   :  { %v441_v0 = vpop.f32.mrf.mxu0 }
  0xe9   :  { %v249_v46 = vpack.c.bf16 %v248_v45, %v248_v45 }
  0xeb   :  { %459 = vmatmul.mubr.bf16.vlgmr.msra.gmra.mxu1 %v249_v46 }
 0x1ab   :  { %v355_v48 = vpop.f32.mrf.mxu1 }
 0x1ac   :  { %v356_v49 = vadd.f32 %v376_v47, %v355_v48 }
 0x1ad   :  { %v460_v50 = vpop.f32.mrf.mxu1 }
 0x1ae   :  { %361 = vst [vmem:[%s615_s6] sm:$0xff] %v356_v49 }
 0x1af   :  { %v358_v51 = vpop.f32.mrf.mxu1 }
 0x1b1   :  { %v461_v52 = vpop.f32.mrf.mxu1 }

</bundles_post_ra>
